<compile_context>
chip_gen: v5e
topology: v5e:2x2
jax: 0.10.0
libtpu: 0.0.40
codegen_flags: <defaults>
</compile_context>

<pallas_src>
import functools

import jax
import jax.numpy as jnp
from jax.experimental import pallas as pl
from jax.experimental.pallas import tpu as pltpu


DEFAULT_LAYER_DIM = 96   # TODO(synk): true torch DEFAULT_* not visible in snippet
DEFAULT_LAYERS = 2
DEFAULT_HEADS = 6


def _ffn_hidden_dim(dim: int, multiple_of: int) -> int:
    h = int(2 * (4 * dim) / 3)
    return multiple_of * ((h + multiple_of - 1) // multiple_of)


# ---------------------------------------------------------------------------
# Fused forward kernel: one grid step pushes a TB-row batch tile through the
# entire network. All weights + activations are VMEM-resident.
# ---------------------------------------------------------------------------
def _wakeword_kernel(x_ref, wi_ref, bi_ref, lg_ref, lb_ref,
                     an_ref, wqkv_ref, wo_ref,
                     fn_ref, w1_ref, w3_ref, w2_ref,
                     mwb_ref, mbb_ref, fw_ref, fb_ref,
                     o_ref, *, num_heads: int, eps: float):
    TB, S, E = x_ref.shape
    D = wi_ref.shape[1]
    L = wqkv_ref.shape[0]
    H = num_heads
    hd = D // H
    N = TB * S
    f32 = jnp.float32

    x = x_ref[...].reshape(N, E).astype(f32)            # tokens: (N, E)

    # dropout -> identity (inference);  linear_in -> LayerNorm -> SiLU
    t = jnp.dot(x, wi_ref[...], preferred_element_type=f32) + bi_ref[...]
    mu = jnp.mean(t, axis=-1, keepdims=True)
    c = t - mu
    var = jnp.mean(c * c, axis=-1, keepdims=True)
    t = c * jax.lax.rsqrt(var + eps) * lg_ref[...] + lb_ref[...]
    t = t * jax.nn.sigmoid(t)                           # SiLU, (N, D)

    sm_scale = float(hd) ** -0.5

    def rmsnorm(u, w):                                  # u: (N, D), w: (1, D)
        ms = jnp.mean(u * u, axis=-1, keepdims=True)
        return u * jax.lax.rsqrt(ms + eps) * w

    for l in range(L):                                  # static unroll (L small)
        # ---- multi-head self-attention (pre-norm, residual) ----
        xn = rmsnorm(t, an_ref[l])
        # fused QKV: one (N, D) x (D, 3D) MXU matmul
        qkv = jnp.dot(xn, wqkv_ref[l], preferred_element_type=f32)   # (N, 3D)
        heads = []
        for h in range(H):                              # static unroll (H small)
            qh = qkv[:, h * hd:(h + 1) * hd].reshape(TB, S, hd)
            kh = qkv[:, D + h * hd:D + (h + 1) * hd].reshape(TB, S, hd)
            vh = qkv[:, 2 * D + h * hd:2 * D + (h + 1) * hd].reshape(TB, S, hd)
            s = jnp.einsum('bqd,bkd->bqk', qh, kh,
                           preferred_element_type=f32) * sm_scale
            s = s - jnp.max(s, axis=-1, keepdims=True)
            p = jnp.exp(s)
            p = p / jnp.sum(p, axis=-1, keepdims=True)
            oh = jnp.einsum('bqk,bkd->bqd', p, vh,
                            preferred_element_type=f32)
            heads.append(oh.reshape(N, hd))
        # concat heads -> single K=D output projection (1 MXU pass, not H)
        attn = jnp.concatenate(heads, axis=-1)          # (N, D)
        t = t + jnp.dot(attn, wo_ref[l], preferred_element_type=f32)

        # ---- SwiGLU feed-forward (pre-norm, residual) ----
        xn = rmsnorm(t, fn_ref[l])
        g1 = jnp.dot(xn, w1_ref[l], preferred_element_type=f32)
        g3 = jnp.dot(xn, w3_ref[l], preferred_element_type=f32)
        ff = jnp.dot(g1 * jax.nn.sigmoid(g1) * g3, w2_ref[l],
                     preferred_element_type=f32)
        t = t + ff

    # ---- transpose(1,2) + ModulatingFinalLayer + sigmoid + amax ----
    # The (B, dim, S) transposed view is never materialised.  The per-batch
    # modulation  mod_w @ h_b  is one block-diagonal MXU matmul over the whole
    # tile; frame-axis LayerNorm / S->1 projection / amax are sublane/lane
    # reductions vectorized over the batch tile (no XLU transposes, no per-row
    # masked stores).
    mod = jnp.dot(mwb_ref[...], t, preferred_element_type=f32) + mbb_ref[...]
    mod3 = mod.reshape(TB, 2 * S, D)
    shift = mod3[:, 0:S, :]                             # (TB, S, D)
    scale = mod3[:, S:2 * S, :]                         # (TB, S, D)

    h3 = t.reshape(TB, S, D)
    mu_f = jnp.mean(h3, axis=1, keepdims=True)
    cf = h3 - mu_f
    var_f = jnp.mean(cf * cf, axis=1, keepdims=True)
    hn = cf * jax.lax.rsqrt(var_f + eps)                # LN over frames (no affine)
    y = hn * (1.0 + scale) + shift                      # (TB, S, D)

    # Linear(S -> 1) as VPU multiply + frame reduce (no 1-lane MXU matmul)
    z = jnp.sum(y * fw_ref[...], axis=1) + fb_ref[...]  # (TB, D)
    sig = jax.nn.sigmoid(z)
    o_ref[...] = jnp.max(sig, axis=-1, keepdims=True)   # (TB, 1)


def _const_spec(arr):
    zeros = (0,) * arr.ndim
    return pl.BlockSpec(arr.shape, lambda i, _z=zeros: _z)


def wakeword_forward(params, x, *, num_heads=DEFAULT_HEADS, eps=1e-5,
                     batch_tile=8):
    """Fused WakeWordTransformerModel forward. x: (B, 16, 96) f32 -> (B, 1)."""
    B, S, E = x.shape
    TB = min(B, batch_tile)
    pad = (-B) % TB
    if pad:
        x = jnp.concatenate([x, jnp.zeros((pad, S, E), x.dtype)], axis=0)
    nb = (B + pad) // TB

    kernel = functools.partial(_wakeword_kernel, num_heads=num_heads, eps=eps)

    # Host-side weight prep (tiny, done once per call / folded under jit):
    #  * fuse QKV along the output dim,
    #  * block-diagonal modulation weight so the final layer is one matmul.
    f32 = jnp.float32
    wqkv = jnp.concatenate([params['wq'], params['wk'], params['wv']], axis=-1)
    modw_blk = jnp.kron(jnp.eye(TB, dtype=f32), params['mod_w'])  # (TB*2S, TB*S)
    modb_blk = jnp.tile(params['mod_b'], (TB, 1))                 # (TB*2S, 1)

    weights = [params['wi'], params['bi'], params['lg'], params['lb'],
               params['an'], wqkv, params['wo'],
               params['fn'], params['w1'], params['w3'], params['w2'],
               modw_blk, modb_blk, params['fin_w'], params['fin_b']]

    in_specs = ([pl.BlockSpec((TB, S, E), lambda i: (i, 0, 0))]
                + [_const_spec(w) for w in weights])
    out_spec = pl.BlockSpec((TB, 1), lambda i: (i, 0))

    out = pl.pallas_call(
        kernel,
        grid=(nb,),
        in_specs=in_specs,
        out_specs=out_spec,
        out_shape=jax.ShapeDtypeStruct((B + pad, 1), jnp.float32),
        compiler_params=pltpu.CompilerParams(
            dimension_semantics=("parallel",),
            vmem_limit_bytes=32 * 1024 * 1024),
    )(x, *weights)
    return out[:B]


# ---------------------------------------------------------------------------
# Parameters
# ---------------------------------------------------------------------------
def init_wakeword_params(key, *, input_shape=(16, 96), dim=DEFAULT_LAYER_DIM,
                         num_layers=DEFAULT_LAYERS, multiple_of=18):
    S, E = input_shape
    hidden = _ffn_hidden_dim(dim, multiple_of)
    ks = jax.random.split(key, 12)

    def lin(k, din, dout):
        bound = float(din) ** -0.5
        return jax.random.uniform(k, (din, dout), jnp.float32, -bound, bound)

    def stk(k, din, dout):
        return (jax.random.normal(k, (num_layers, din, dout), jnp.float32)
                * (float(din) ** -0.5))

    return dict(
        wi=lin(ks[0], E, dim),
        bi=jax.random.uniform(ks[1], (1, dim), jnp.float32, -0.05, 0.05),
        lg=jnp.ones((1, dim), jnp.float32),
        lb=jnp.zeros((1, dim), jnp.float32),
        an=jnp.ones((num_layers, 1, dim), jnp.float32),
        fn=jnp.ones((num_layers, 1, dim), jnp.float32),
        wq=stk(ks[2], dim, dim),
        wk=stk(ks[3], dim, dim),
        wv=stk(ks[4], dim, dim),
        wo=stk(ks[5], dim, dim),
        w1=stk(ks[6], dim, hidden),
        w3=stk(ks[7], dim, hidden),
        w2=stk(ks[8], hidden, dim),
        mod_w=jax.random.normal(ks[9], (2 * S, S), jnp.float32) * (float(S) ** -0.5),
        mod_b=jnp.zeros((2 * S, 1), jnp.float32),
        fin_w=jax.random.normal(ks[10], (S, 1), jnp.float32) * (float(S) ** -0.5),
        fin_b=jnp.zeros((1, 1), jnp.float32),
    )


# ---------------------------------------------------------------------------
# Pure-JAX reference (for correctness check)
# ---------------------------------------------------------------------------
def wakeword_forward_ref(params, x, *, num_heads=DEFAULT_HEADS, eps=1e-5):
    B, S, E = x.shape
    D = params['wi'].shape[1]
    L = params['wq'].shape[0]
    H = num_heads
    hd = D // H

    t = x.reshape(B * S, E) @ params['wi'] + params['bi']
    mu = t.mean(-1, keepdims=True)
    var = ((t - mu) ** 2).mean(-1, keepdims=True)
    t = (t - mu) * jax.lax.rsqrt(var + eps) * params['lg'] + params['lb']
    t = t * jax.nn.sigmoid(t)
    t = t.reshape(B, S, D)

    def rms(u, w):
        return u * jax.lax.rsqrt((u * u).mean(-1, keepdims=True) + eps) * w

    for l in range(L):
        xn = rms(t, params['an'][l])
        q = (xn @ params['wq'][l]).reshape(B, S, H, hd)
        k = (xn @ params['wk'][l]).reshape(B, S, H, hd)
        v = (xn @ params['wv'][l]).reshape(B, S, H, hd)
        s = jnp.einsum('bqhd,bkhd->bhqk', q, k) * (float(hd) ** -0.5)
        p = jax.nn.softmax(s, axis=-1)
        o = jnp.einsum('bhqk,bkhd->bqhd', p, v).reshape(B, S, D)
        t = t + o @ params['wo'][l]
        xn = rms(t, params['fn'][l])
        g1 = xn @ params['w1'][l]
        g3 = xn @ params['w3'][l]
        t = t + (g1 * jax.nn.sigmoid(g1) * g3) @ params['w2'][l]

    ht = jnp.swapaxes(t, 1, 2)                          # (B, D, S)
    mod = jnp.einsum('bds,ts->bdt', ht, params['mod_w']) + params['mod_b'][:, 0]
    shift, scale = mod[..., :S], mod[..., S:]
    mu = ht.mean(-1, keepdims=True)
    var = ((ht - mu) ** 2).mean(-1, keepdims=True)
    y = (ht - mu) * jax.lax.rsqrt(var + eps) * (1.0 + scale) + shift
    z = jnp.sum(y * params['fin_w'][:, 0], axis=-1) + params['fin_b'][0, 0]
    sig = jax.nn.sigmoid(z)                             # (B, D)
    return jnp.max(sig, axis=1, keepdims=True)          # (B, 1)


# ---------------------------------------------------------------------------
if __name__ == "__main__":
    key = jax.random.PRNGKey(0)
    kx, kp = jax.random.split(key)

    BATCH = 2
    INPUT_SHAPE = (16, 96)

    x = jax.random.normal(kx, (BATCH,) + INPUT_SHAPE, dtype=jnp.float32)
    params = init_wakeword_params(kp, input_shape=INPUT_SHAPE)

    out = jax.block_until_ready(wakeword_forward(params, x))
    ref = jax.block_until_ready(wakeword_forward_ref(params, x))

    assert out.shape == (BATCH, 1), out.shape
    assert bool(jnp.all(jnp.isfinite(out)))
    err = float(jnp.max(jnp.abs(out - ref)))
    assert err < 2e-3, err

    print("KERNEL_OK")
</pallas_src>

<mosaic_0001>
module attributes {stable_mosaic.version = 11 : i64} {
  func.func @_wakeword_kernel(%arg0: i32, %arg1: memref<2x16x96xf32, #tpu.memory_space<vmem>>, %arg2: memref<96x96xf32, #tpu.memory_space<vmem>>, %arg3: memref<1x96xf32, #tpu.memory_space<vmem>>, %arg4: memref<1x96xf32, #tpu.memory_space<vmem>>, %arg5: memref<1x96xf32, #tpu.memory_space<vmem>>, %arg6: memref<2x1x96xf32, #tpu.memory_space<vmem>>, %arg7: memref<2x96x288xf32, #tpu.memory_space<vmem>>, %arg8: memref<2x96x96xf32, #tpu.memory_space<vmem>>, %arg9: memref<2x1x96xf32, #tpu.memory_space<vmem>>, %arg10: memref<2x96x270xf32, #tpu.memory_space<vmem>>, %arg11: memref<2x96x270xf32, #tpu.memory_space<vmem>>, %arg12: memref<2x270x96xf32, #tpu.memory_space<vmem>>, %arg13: memref<64x32xf32, #tpu.memory_space<vmem>>, %arg14: memref<64x1xf32, #tpu.memory_space<vmem>>, %arg15: memref<16x1xf32, #tpu.memory_space<vmem>>, %arg16: memref<1x1xf32, #tpu.memory_space<vmem>>, %arg17: memref<2x1xf32, #tpu.memory_space<vmem>>) attributes {dimension_semantics = [#tpu.dimension_semantics<parallel>], iteration_bounds = array<i64: 1>, scalar_prefetch = 0 : i64, scratch_operands = 0 : i64, tpu.core_type = #tpu.core_type<tc>, window_params = [{transform_indices = @transform_0, window_bounds = array<i64: 2, 16, 96>}, {pipeline_mode = #tpu.pipeline_mode<synchronous>, transform_indices = @transform_1, window_bounds = array<i64: 96, 96>}, {pipeline_mode = #tpu.pipeline_mode<synchronous>, transform_indices = @transform_2, window_bounds = array<i64: 1, 96>}, {pipeline_mode = #tpu.pipeline_mode<synchronous>, transform_indices = @transform_3, window_bounds = array<i64: 1, 96>}, {pipeline_mode = #tpu.pipeline_mode<synchronous>, transform_indices = @transform_4, window_bounds = array<i64: 1, 96>}, {pipeline_mode = #tpu.pipeline_mode<synchronous>, transform_indices = @transform_5, window_bounds = array<i64: 2, 1, 96>}, {pipeline_mode = #tpu.pipeline_mode<synchronous>, transform_indices = @transform_6, window_bounds = array<i64: 2, 96, 288>}, {pipeline_mode = #tpu.pipeline_mode<synchronous>, transform_indices = @transform_7, window_bounds = array<i64: 2, 96, 96>}, {pipeline_mode = #tpu.pipeline_mode<synchronous>, transform_indices = @transform_8, window_bounds = array<i64: 2, 1, 96>}, {pipeline_mode = #tpu.pipeline_mode<synchronous>, transform_indices = @transform_9, window_bounds = array<i64: 2, 96, 270>}, {pipeline_mode = #tpu.pipeline_mode<synchronous>, transform_indices = @transform_10, window_bounds = array<i64: 2, 96, 270>}, {pipeline_mode = #tpu.pipeline_mode<synchronous>, transform_indices = @transform_11, window_bounds = array<i64: 2, 270, 96>}, {pipeline_mode = #tpu.pipeline_mode<synchronous>, transform_indices = @transform_12, window_bounds = array<i64: 64, 32>}, {pipeline_mode = #tpu.pipeline_mode<synchronous>, transform_indices = @transform_13, window_bounds = array<i64: 64, 1>}, {pipeline_mode = #tpu.pipeline_mode<synchronous>, transform_indices = @transform_14, window_bounds = array<i64: 16, 1>}, {pipeline_mode = #tpu.pipeline_mode<synchronous>, transform_indices = @transform_15, window_bounds = array<i64: 1, 1>}, {transform_indices = @transform_16, window_bounds = array<i64: 2, 1>}]} {
    %c0 = arith.constant 0 : index
    %c0_0 = arith.constant 0 : index
    %c0_1 = arith.constant 0 : index
    %0 = vector.load %arg1[%c0, %c0_0, %c0_1] : memref<2x16x96xf32, #tpu.memory_space<vmem>>, vector<2x16x96xf32>
    %1 = vector.shape_cast %0 : vector<2x16x96xf32> to vector<32x96xf32>
    %c0_2 = arith.constant 0 : index
    %c0_3 = arith.constant 0 : index
    %2 = vector.load %arg2[%c0_2, %c0_3] : memref<96x96xf32, #tpu.memory_space<vmem>>, vector<96x96xf32>
    %cst = arith.constant dense<0.000000e+00> : vector<32x96xf32>
    %3 = tpu.matmul %1, %2, %cst {dimension_numbers = #tpu.dot_dimension_numbers<[1], [0], [0], [1], [0, 0, 1, 1], [], []>} : vector<32x96xf32>, vector<96x96xf32>, vector<32x96xf32> -> vector<32x96xf32>
    %c0_4 = arith.constant 0 : index
    %c0_5 = arith.constant 0 : index
    %4 = vector.load %arg3[%c0_4, %c0_5] : memref<1x96xf32, #tpu.memory_space<vmem>>, vector<1x96xf32>
    %5 = vector.broadcast %4 : vector<1x96xf32> to vector<32x96xf32>
    %6 = arith.addf %3, %5 : vector<32x96xf32>
    %cst_6 = arith.constant dense<0.000000e+00> : vector<32xf32>
    %7 = vector.multi_reduction <add>, %6, %cst_6 [1] : vector<32x96xf32> to vector<32xf32>
    %8 = vector.shape_cast %7 : vector<32xf32> to vector<32x1xf32>
    %cst_7 = arith.constant 9.600000e+01 : f32
    %9 = vector.broadcast %cst_7 : f32 to vector<32x1xf32>
    %10 = arith.divf %8, %9 : vector<32x1xf32>
    %11 = vector.broadcast %10 : vector<32x1xf32> to vector<32x96xf32>
    %12 = arith.subf %6, %11 : vector<32x96xf32>
    %13 = arith.mulf %12, %12 : vector<32x96xf32>
    %cst_8 = arith.constant dense<0.000000e+00> : vector<32xf32>
    %14 = vector.multi_reduction <add>, %13, %cst_8 [1] : vector<32x96xf32> to vector<32xf32>
    %15 = vector.shape_cast %14 : vector<32xf32> to vector<32x1xf32>
    %cst_9 = arith.constant 9.600000e+01 : f32
    %16 = vector.broadcast %cst_9 : f32 to vector<32x1xf32>
    %17 = arith.divf %15, %16 : vector<32x1xf32>
    %cst_10 = arith.constant 9.99999974E-6 : f32
    %18 = vector.broadcast %cst_10 : f32 to vector<32x1xf32>
    %19 = arith.addf %17, %18 : vector<32x1xf32>
    %20 = math.rsqrt %19 : vector<32x1xf32>
    %21 = vector.broadcast %20 : vector<32x1xf32> to vector<32x96xf32>
    %22 = arith.mulf %12, %21 : vector<32x96xf32>
    %c0_11 = arith.constant 0 : index
    %c0_12 = arith.constant 0 : index
    %23 = vector.load %arg4[%c0_11, %c0_12] : memref<1x96xf32, #tpu.memory_space<vmem>>, vector<1x96xf32>
    %24 = vector.broadcast %23 : vector<1x96xf32> to vector<32x96xf32>
    %25 = arith.mulf %22, %24 : vector<32x96xf32>
    %c0_13 = arith.constant 0 : index
    %c0_14 = arith.constant 0 : index
    %26 = vector.load %arg5[%c0_13, %c0_14] : memref<1x96xf32, #tpu.memory_space<vmem>>, vector<1x96xf32>
    %27 = vector.broadcast %26 : vector<1x96xf32> to vector<32x96xf32>
    %28 = arith.addf %25, %27 : vector<32x96xf32>
    %29 = arith.negf %28 : vector<32x96xf32>
    %30 = math.exp %29 : vector<32x96xf32>
    %cst_15 = arith.constant 1.000000e+00 : f32
    %31 = vector.broadcast %cst_15 : f32 to vector<32x96xf32>
    %32 = arith.addf %31, %30 : vector<32x96xf32>
    %33 = arith.divf %31, %32 : vector<32x96xf32>
    %34 = arith.mulf %28, %33 : vector<32x96xf32>
    %c0_16 = arith.constant 0 : index
    %c0_17 = arith.constant 0 : index
    %c0_18 = arith.constant 0 : index
    %35 = vector.load %arg6[%c0_16, %c0_17, %c0_18] : memref<2x1x96xf32, #tpu.memory_space<vmem>>, vector<1x1x96xf32>
    %36 = vector.shape_cast %35 : vector<1x1x96xf32> to vector<1x96xf32>
    %37 = arith.mulf %34, %34 : vector<32x96xf32>
    %cst_19 = arith.constant dense<0.000000e+00> : vector<32xf32>
    %38 = vector.multi_reduction <add>, %37, %cst_19 [1] : vector<32x96xf32> to vector<32xf32>
    %39 = vector.shape_cast %38 : vector<32xf32> to vector<32x1xf32>
    %cst_20 = arith.constant 9.600000e+01 : f32
    %40 = vector.broadcast %cst_20 : f32 to vector<32x1xf32>
    %41 = arith.divf %39, %40 : vector<32x1xf32>
    %cst_21 = arith.constant 9.99999974E-6 : f32
    %42 = vector.broadcast %cst_21 : f32 to vector<32x1xf32>
    %43 = arith.addf %41, %42 : vector<32x1xf32>
    %44 = math.rsqrt %43 : vector<32x1xf32>
    %45 = vector.broadcast %44 : vector<32x1xf32> to vector<32x96xf32>
    %46 = arith.mulf %34, %45 : vector<32x96xf32>
    %47 = vector.broadcast %36 : vector<1x96xf32> to vector<32x96xf32>
    %48 = arith.mulf %46, %47 : vector<32x96xf32>
    %c0_22 = arith.constant 0 : index
    %c0_23 = arith.constant 0 : index
    %c0_24 = arith.constant 0 : index
    %49 = vector.load %arg7[%c0_22, %c0_23, %c0_24] : memref<2x96x288xf32, #tpu.memory_space<vmem>>, vector<1x96x288xf32>
    %50 = vector.shape_cast %49 : vector<1x96x288xf32> to vector<96x288xf32>
    %cst_25 = arith.constant dense<0.000000e+00> : vector<32x288xf32>
    %51 = tpu.matmul %48, %50, %cst_25 {dimension_numbers = #tpu.dot_dimension_numbers<[1], [0], [0], [1], [0, 0, 1, 1], [], []>} : vector<32x96xf32>, vector<96x288xf32>, vector<32x288xf32> -> vector<32x288xf32>
    %52 = vector.extract_strided_slice %51 {offsets = [0, 0], sizes = [32, 16], strides = [1, 1]} : vector<32x288xf32> to vector<32x16xf32>
    %53 = vector.shape_cast %52 : vector<32x16xf32> to vector<2x16x16xf32>
    %54 = vector.extract_strided_slice %51 {offsets = [0, 96], sizes = [32, 16], strides = [1, 1]} : vector<32x288xf32> to vector<32x16xf32>
    %55 = vector.shape_cast %54 : vector<32x16xf32> to vector<2x16x16xf32>
    %56 = vector.extract_strided_slice %51 {offsets = [0, 192], sizes = [32, 16], strides = [1, 1]} : vector<32x288xf32> to vector<32x16xf32>
    %57 = vector.shape_cast %56 : vector<32x16xf32> to vector<2x16x16xf32>
    "tpu.trace_start"() <{level = 10 : i32, message = "bqd,bkd->bqk"}> : () -> ()
    %cst_26 = arith.constant dense<0.000000e+00> : vector<2x16x16xf32>
    %58 = tpu.matmul %53, %55, %cst_26 {dimension_numbers = #tpu.dot_dimension_numbers<[2], [2], [1], [1], [0, 0, 0, 1, 1, 1], [0], [0]>} : vector<2x16x16xf32>, vector<2x16x16xf32>, vector<2x16x16xf32> -> vector<2x16x16xf32>
    "tpu.trace_stop"() : () -> ()
    %cst_27 = arith.constant 2.500000e-01 : f32
    %59 = vector.broadcast %cst_27 : f32 to vector<2x16x16xf32>
    %60 = arith.mulf %58, %59 : vector<2x16x16xf32>
    %cst_28 = arith.constant dense<0xFF800000> : vector<2x16xf32>
    %61 = vector.multi_reduction <maximumf>, %60, %cst_28 [2] : vector<2x16x16xf32> to vector<2x16xf32>
    %62 = vector.shape_cast %61 : vector<2x16xf32> to vector<2x16x1xf32>
    %63 = vector.broadcast %62 : vector<2x16x1xf32> to vector<2x16x16xf32>
    %64 = arith.subf %60, %63 : vector<2x16x16xf32>
    %65 = math.exp %64 : vector<2x16x16xf32>
    %cst_29 = arith.constant dense<0.000000e+00> : vector<2x16xf32>
    %66 = vector.multi_reduction <add>, %65, %cst_29 [2] : vector<2x16x16xf32> to vector<2x16xf32>
    %67 = vector.shape_cast %66 : vector<2x16xf32> to vector<2x16x1xf32>
    %68 = vector.broadcast %67 : vector<2x16x1xf32> to vector<2x16x16xf32>
    %69 = arith.divf %65, %68 : vector<2x16x16xf32>
    "tpu.trace_start"() <{level = 10 : i32, message = "bqk,bkd->bqd"}> : () -> ()
    %cst_30 = arith.constant dense<0.000000e+00> : vector<2x16x16xf32>
    %70 = tpu.matmul %69, %57, %cst_30 {dimension_numbers = #tpu.dot_dimension_numbers<[2], [1], [1], [2], [0, 0, 0, 1, 1, 2], [0], [0]>} : vector<2x16x16xf32>, vector<2x16x16xf32>, vector<2x16x16xf32> -> vector<2x16x16xf32>
    "tpu.trace_stop"() : () -> ()
    %71 = vector.shape_cast %70 : vector<2x16x16xf32> to vector<32x16xf32>
    %72 = vector.extract_strided_slice %51 {offsets = [0, 16], sizes = [32, 16], strides = [1, 1]} : vector<32x288xf32> to vector<32x16xf32>
    %73 = vector.shape_cast %72 : vector<32x16xf32> to vector<2x16x16xf32>
    %74 = vector.extract_strided_slice %51 {offsets = [0, 112], sizes = [32, 16], strides = [1, 1]} : vector<32x288xf32> to vector<32x16xf32>
    %75 = vector.shape_cast %74 : vector<32x16xf32> to vector<2x16x16xf32>
    %76 = vector.extract_strided_slice %51 {offsets = [0, 208], sizes = [32, 16], strides = [1, 1]} : vector<32x288xf32> to vector<32x16xf32>
    %77 = vector.shape_cast %76 : vector<32x16xf32> to vector<2x16x16xf32>
    "tpu.trace_start"() <{level = 10 : i32, message = "bqd,bkd->bqk"}> : () -> ()
    %cst_31 = arith.constant dense<0.000000e+00> : vector<2x16x16xf32>
    %78 = tpu.matmul %73, %75, %cst_31 {dimension_numbers = #tpu.dot_dimension_numbers<[2], [2], [1], [1], [0, 0, 0, 1, 1, 1], [0], [0]>} : vector<2x16x16xf32>, vector<2x16x16xf32>, vector<2x16x16xf32> -> vector<2x16x16xf32>
    "tpu.trace_stop"() : () -> ()
    %cst_32 = arith.constant 2.500000e-01 : f32
    %79 = vector.broadcast %cst_32 : f32 to vector<2x16x16xf32>
    %80 = arith.mulf %78, %79 : vector<2x16x16xf32>
    %cst_33 = arith.constant dense<0xFF800000> : vector<2x16xf32>
    %81 = vector.multi_reduction <maximumf>, %80, %cst_33 [2] : vector<2x16x16xf32> to vector<2x16xf32>
    %82 = vector.shape_cast %81 : vector<2x16xf32> to vector<2x16x1xf32>
    %83 = vector.broadcast %82 : vector<2x16x1xf32> to vector<2x16x16xf32>
    %84 = arith.subf %80, %83 : vector<2x16x16xf32>
    %85 = math.exp %84 : vector<2x16x16xf32>
    %cst_34 = arith.constant dense<0.000000e+00> : vector<2x16xf32>
    %86 = vector.multi_reduction <add>, %85, %cst_34 [2] : vector<2x16x16xf32> to vector<2x16xf32>
    %87 = vector.shape_cast %86 : vector<2x16xf32> to vector<2x16x1xf32>
    %88 = vector.broadcast %87 : vector<2x16x1xf32> to vector<2x16x16xf32>
    %89 = arith.divf %85, %88 : vector<2x16x16xf32>
    "tpu.trace_start"() <{level = 10 : i32, message = "bqk,bkd->bqd"}> : () -> ()
    %cst_35 = arith.constant dense<0.000000e+00> : vector<2x16x16xf32>
    %90 = tpu.matmul %89, %77, %cst_35 {dimension_numbers = #tpu.dot_dimension_numbers<[2], [1], [1], [2], [0, 0, 0, 1, 1, 2], [0], [0]>} : vector<2x16x16xf32>, vector<2x16x16xf32>, vector<2x16x16xf32> -> vector<2x16x16xf32>
    "tpu.trace_stop"() : () -> ()
    %91 = vector.shape_cast %90 : vector<2x16x16xf32> to vector<32x16xf32>
    %92 = vector.extract_strided_slice %51 {offsets = [0, 32], sizes = [32, 16], strides = [1, 1]} : vector<32x288xf32> to vector<32x16xf32>
    %93 = vector.shape_cast %92 : vector<32x16xf32> to vector<2x16x16xf32>
    %94 = vector.extract_strided_slice %51 {offsets = [0, 128], sizes = [32, 16], strides = [1, 1]} : vector<32x288xf32> to vector<32x16xf32>
    %95 = vector.shape_cast %94 : vector<32x16xf32> to vector<2x16x16xf32>
    %96 = vector.extract_strided_slice %51 {offsets = [0, 224], sizes = [32, 16], strides = [1, 1]} : vector<32x288xf32> to vector<32x16xf32>
    %97 = vector.shape_cast %96 : vector<32x16xf32> to vector<2x16x16xf32>
    "tpu.trace_start"() <{level = 10 : i32, message = "bqd,bkd->bqk"}> : () -> ()
    %cst_36 = arith.constant dense<0.000000e+00> : vector<2x16x16xf32>
    %98 = tpu.matmul %93, %95, %cst_36 {dimension_numbers = #tpu.dot_dimension_numbers<[2], [2], [1], [1], [0, 0, 0, 1, 1, 1], [0], [0]>} : vector<2x16x16xf32>, vector<2x16x16xf32>, vector<2x16x16xf32> -> vector<2x16x16xf32>
    "tpu.trace_stop"() : () -> ()
    %cst_37 = arith.constant 2.500000e-01 : f32
    %99 = vector.broadcast %cst_37 : f32 to vector<2x16x16xf32>
    %100 = arith.mulf %98, %99 : vector<2x16x16xf32>
    %cst_38 = arith.constant dense<0xFF800000> : vector<2x16xf32>
    %101 = vector.multi_reduction <maximumf>, %100, %cst_38 [2] : vector<2x16x16xf32> to vector<2x16xf32>
    %102 = vector.shape_cast %101 : vector<2x16xf32> to vector<2x16x1xf32>
    %103 = vector.broadcast %102 : vector<2x16x1xf32> to vector<2x16x16xf32>
    %104 = arith.subf %100, %103 : vector<2x16x16xf32>
    %105 = math.exp %104 : vector<2x16x16xf32>
    %cst_39 = arith.constant dense<0.000000e+00> : vector<2x16xf32>
    %106 = vector.multi_reduction <add>, %105, %cst_39 [2] : vector<2x16x16xf32> to vector<2x16xf32>
    %107 = vector.shape_cast %106 : vector<2x16xf32> to vector<2x16x1xf32>
    %108 = vector.broadcast %107 : vector<2x16x1xf32> to vector<2x16x16xf32>
    %109 = arith.divf %105, %108 : vector<2x16x16xf32>
    "tpu.trace_start"() <{level = 10 : i32, message = "bqk,bkd->bqd"}> : () -> ()
    %cst_40 = arith.constant dense<0.000000e+00> : vector<2x16x16xf32>
    %110 = tpu.matmul %109, %97, %cst_40 {dimension_numbers = #tpu.dot_dimension_numbers<[2], [1], [1], [2], [0, 0, 0, 1, 1, 2], [0], [0]>} : vector<2x16x16xf32>, vector<2x16x16xf32>, vector<2x16x16xf32> -> vector<2x16x16xf32>
    "tpu.trace_stop"() : () -> ()
    %111 = vector.shape_cast %110 : vector<2x16x16xf32> to vector<32x16xf32>
    %112 = vector.extract_strided_slice %51 {offsets = [0, 48], sizes = [32, 16], strides = [1, 1]} : vector<32x288xf32> to vector<32x16xf32>
    %113 = vector.shape_cast %112 : vector<32x16xf32> to vector<2x16x16xf32>
    %114 = vector.extract_strided_slice %51 {offsets = [0, 144], sizes = [32, 16], strides = [1, 1]} : vector<32x288xf32> to vector<32x16xf32>
    %115 = vector.shape_cast %114 : vector<32x16xf32> to vector<2x16x16xf32>
    %116 = vector.extract_strided_slice %51 {offsets = [0, 240], sizes = [32, 16], strides = [1, 1]} : vector<32x288xf32> to vector<32x16xf32>
    %117 = vector.shape_cast %116 : vector<32x16xf32> to vector<2x16x16xf32>
    "tpu.trace_start"() <{level = 10 : i32, message = "bqd,bkd->bqk"}> : () -> ()
    %cst_41 = arith.constant dense<0.000000e+00> : vector<2x16x16xf32>
    %118 = tpu.matmul %113, %115, %cst_41 {dimension_numbers = #tpu.dot_dimension_numbers<[2], [2], [1], [1], [0, 0, 0, 1, 1, 1], [0], [0]>} : vector<2x16x16xf32>, vector<2x16x16xf32>, vector<2x16x16xf32> -> vector<2x16x16xf32>
    "tpu.trace_stop"() : () -> ()
    %cst_42 = arith.constant 2.500000e-01 : f32
    %119 = vector.broadcast %cst_42 : f32 to vector<2x16x16xf32>
    %120 = arith.mulf %118, %119 : vector<2x16x16xf32>
    %cst_43 = arith.constant dense<0xFF800000> : vector<2x16xf32>
    %121 = vector.multi_reduction <maximumf>, %120, %cst_43 [2] : vector<2x16x16xf32> to vector<2x16xf32>
    %122 = vector.shape_cast %121 : vector<2x16xf32> to vector<2x16x1xf32>
    %123 = vector.broadcast %122 : vector<2x16x1xf32> to vector<2x16x16xf32>
    %124 = arith.subf %120, %123 : vector<2x16x16xf32>
    %125 = math.exp %124 : vector<2x16x16xf32>
    %cst_44 = arith.constant dense<0.000000e+00> : vector<2x16xf32>
    %126 = vector.multi_reduction <add>, %125, %cst_44 [2] : vector<2x16x16xf32> to vector<2x16xf32>
    %127 = vector.shape_cast %126 : vector<2x16xf32> to vector<2x16x1xf32>
    %128 = vector.broadcast %127 : vector<2x16x1xf32> to vector<2x16x16xf32>
    %129 = arith.divf %125, %128 : vector<2x16x16xf32>
    "tpu.trace_start"() <{level = 10 : i32, message = "bqk,bkd->bqd"}> : () -> ()
    %cst_45 = arith.constant dense<0.000000e+00> : vector<2x16x16xf32>
    %130 = tpu.matmul %129, %117, %cst_45 {dimension_numbers = #tpu.dot_dimension_numbers<[2], [1], [1], [2], [0, 0, 0, 1, 1, 2], [0], [0]>} : vector<2x16x16xf32>, vector<2x16x16xf32>, vector<2x16x16xf32> -> vector<2x16x16xf32>
    "tpu.trace_stop"() : () -> ()
    %131 = vector.shape_cast %130 : vector<2x16x16xf32> to vector<32x16xf32>
    %132 = vector.extract_strided_slice %51 {offsets = [0, 64], sizes = [32, 16], strides = [1, 1]} : vector<32x288xf32> to vector<32x16xf32>
    %133 = vector.shape_cast %132 : vector<32x16xf32> to vector<2x16x16xf32>
    %134 = vector.extract_strided_slice %51 {offsets = [0, 160], sizes = [32, 16], strides = [1, 1]} : vector<32x288xf32> to vector<32x16xf32>
    %135 = vector.shape_cast %134 : vector<32x16xf32> to vector<2x16x16xf32>
    %136 = vector.extract_strided_slice %51 {offsets = [0, 256], sizes = [32, 16], strides = [1, 1]} : vector<32x288xf32> to vector<32x16xf32>
    %137 = vector.shape_cast %136 : vector<32x16xf32> to vector<2x16x16xf32>
    "tpu.trace_start"() <{level = 10 : i32, message = "bqd,bkd->bqk"}> : () -> ()
    %cst_46 = arith.constant dense<0.000000e+00> : vector<2x16x16xf32>
    %138 = tpu.matmul %133, %135, %cst_46 {dimension_numbers = #tpu.dot_dimension_numbers<[2], [2], [1], [1], [0, 0, 0, 1, 1, 1], [0], [0]>} : vector<2x16x16xf32>, vector<2x16x16xf32>, vector<2x16x16xf32> -> vector<2x16x16xf32>
    "tpu.trace_stop"() : () -> ()
    %cst_47 = arith.constant 2.500000e-01 : f32
    %139 = vector.broadcast %cst_47 : f32 to vector<2x16x16xf32>
    %140 = arith.mulf %138, %139 : vector<2x16x16xf32>
    %cst_48 = arith.constant dense<0xFF800000> : vector<2x16xf32>
    %141 = vector.multi_reduction <maximumf>, %140, %cst_48 [2] : vector<2x16x16xf32> to vector<2x16xf32>
    %142 = vector.shape_cast %141 : vector<2x16xf32> to vector<2x16x1xf32>
    %143 = vector.broadcast %142 : vector<2x16x1xf32> to vector<2x16x16xf32>
    %144 = arith.subf %140, %143 : vector<2x16x16xf32>
    %145 = math.exp %144 : vector<2x16x16xf32>
    %cst_49 = arith.constant dense<0.000000e+00> : vector<2x16xf32>
    %146 = vector.multi_reduction <add>, %145, %cst_49 [2] : vector<2x16x16xf32> to vector<2x16xf32>
    %147 = vector.shape_cast %146 : vector<2x16xf32> to vector<2x16x1xf32>
    %148 = vector.broadcast %147 : vector<2x16x1xf32> to vector<2x16x16xf32>
    %149 = arith.divf %145, %148 : vector<2x16x16xf32>
    "tpu.trace_start"() <{level = 10 : i32, message = "bqk,bkd->bqd"}> : () -> ()
    %cst_50 = arith.constant dense<0.000000e+00> : vector<2x16x16xf32>
    %150 = tpu.matmul %149, %137, %cst_50 {dimension_numbers = #tpu.dot_dimension_numbers<[2], [1], [1], [2], [0, 0, 0, 1, 1, 2], [0], [0]>} : vector<2x16x16xf32>, vector<2x16x16xf32>, vector<2x16x16xf32> -> vector<2x16x16xf32>
    "tpu.trace_stop"() : () -> ()
    %151 = vector.shape_cast %150 : vector<2x16x16xf32> to vector<32x16xf32>
    %152 = vector.extract_strided_slice %51 {offsets = [0, 80], sizes = [32, 16], strides = [1, 1]} : vector<32x288xf32> to vector<32x16xf32>
    %153 = vector.shape_cast %152 : vector<32x16xf32> to vector<2x16x16xf32>
    %154 = vector.extract_strided_slice %51 {offsets = [0, 176], sizes = [32, 16], strides = [1, 1]} : vector<32x288xf32> to vector<32x16xf32>
    %155 = vector.shape_cast %154 : vector<32x16xf32> to vector<2x16x16xf32>
    %156 = vector.extract_strided_slice %51 {offsets = [0, 272], sizes = [32, 16], strides = [1, 1]} : vector<32x288xf32> to vector<32x16xf32>
    %157 = vector.shape_cast %156 : vector<32x16xf32> to vector<2x16x16xf32>
    "tpu.trace_start"() <{level = 10 : i32, message = "bqd,bkd->bqk"}> : () -> ()
    %cst_51 = arith.constant dense<0.000000e+00> : vector<2x16x16xf32>
    %158 = tpu.matmul %153, %155, %cst_51 {dimension_numbers = #tpu.dot_dimension_numbers<[2], [2], [1], [1], [0, 0, 0, 1, 1, 1], [0], [0]>} : vector<2x16x16xf32>, vector<2x16x16xf32>, vector<2x16x16xf32> -> vector<2x16x16xf32>
    "tpu.trace_stop"() : () -> ()
    %cst_52 = arith.constant 2.500000e-01 : f32
    %159 = vector.broadcast %cst_52 : f32 to vector<2x16x16xf32>
    %160 = arith.mulf %158, %159 : vector<2x16x16xf32>
    %cst_53 = arith.constant dense<0xFF800000> : vector<2x16xf32>
    %161 = vector.multi_reduction <maximumf>, %160, %cst_53 [2] : vector<2x16x16xf32> to vector<2x16xf32>
    %162 = vector.shape_cast %161 : vector<2x16xf32> to vector<2x16x1xf32>
    %163 = vector.broadcast %162 : vector<2x16x1xf32> to vector<2x16x16xf32>
    %164 = arith.subf %160, %163 : vector<2x16x16xf32>
    %165 = math.exp %164 : vector<2x16x16xf32>
    %cst_54 = arith.constant dense<0.000000e+00> : vector<2x16xf32>
    %166 = vector.multi_reduction <add>, %165, %cst_54 [2] : vector<2x16x16xf32> to vector<2x16xf32>
    %167 = vector.shape_cast %166 : vector<2x16xf32> to vector<2x16x1xf32>
    %168 = vector.broadcast %167 : vector<2x16x1xf32> to vector<2x16x16xf32>
    %169 = arith.divf %165, %168 : vector<2x16x16xf32>
    "tpu.trace_start"() <{level = 10 : i32, message = "bqk,bkd->bqd"}> : () -> ()
    %cst_55 = arith.constant dense<0.000000e+00> : vector<2x16x16xf32>
    %170 = tpu.matmul %169, %157, %cst_55 {dimension_numbers = #tpu.dot_dimension_numbers<[2], [1], [1], [2], [0, 0, 0, 1, 1, 2], [0], [0]>} : vector<2x16x16xf32>, vector<2x16x16xf32>, vector<2x16x16xf32> -> vector<2x16x16xf32>
    "tpu.trace_stop"() : () -> ()
    %171 = vector.shape_cast %170 : vector<2x16x16xf32> to vector<32x16xf32>
    %172 = tpu.concatenate %71, %91, %111, %131, %151, %171 in 1 : vector<32x16xf32>, vector<32x16xf32>, vector<32x16xf32>, vector<32x16xf32>, vector<32x16xf32>, vector<32x16xf32> -> vector<32x96xf32>
    %c0_56 = arith.constant 0 : index
    %c0_57 = arith.constant 0 : index
    %c0_58 = arith.constant 0 : index
    %173 = vector.load %arg8[%c0_56, %c0_57, %c0_58] : memref<2x96x96xf32, #tpu.memory_space<vmem>>, vector<1x96x96xf32>
    %174 = vector.shape_cast %173 : vector<1x96x96xf32> to vector<96x96xf32>
    %cst_59 = arith.constant dense<0.000000e+00> : vector<32x96xf32>
    %175 = tpu.matmul %172, %174, %cst_59 {dimension_numbers = #tpu.dot_dimension_numbers<[1], [0], [0], [1], [0, 0, 1, 1], [], []>} : vector<32x96xf32>, vector<96x96xf32>, vector<32x96xf32> -> vector<32x96xf32>
    %176 = arith.addf %34, %175 : vector<32x96xf32>
    %c0_60 = arith.constant 0 : index
    %c0_61 = arith.constant 0 : index
    %c0_62 = arith.constant 0 : index
    %177 = vector.load %arg9[%c0_60, %c0_61, %c0_62] : memref<2x1x96xf32, #tpu.memory_space<vmem>>, vector<1x1x96xf32>
    %178 = vector.shape_cast %177 : vector<1x1x96xf32> to vector<1x96xf32>
    %179 = arith.mulf %176, %176 : vector<32x96xf32>
    %cst_63 = arith.constant dense<0.000000e+00> : vector<32xf32>
    %180 = vector.multi_reduction <add>, %179, %cst_63 [1] : vector<32x96xf32> to vector<32xf32>
    %181 = vector.shape_cast %180 : vector<32xf32> to vector<32x1xf32>
    %cst_64 = arith.constant 9.600000e+01 : f32
    %182 = vector.broadcast %cst_64 : f32 to vector<32x1xf32>
    %183 = arith.divf %181, %182 : vector<32x1xf32>
    %cst_65 = arith.constant 9.99999974E-6 : f32
    %184 = vector.broadcast %cst_65 : f32 to vector<32x1xf32>
    %185 = arith.addf %183, %184 : vector<32x1xf32>
    %186 = math.rsqrt %185 : vector<32x1xf32>
    %187 = vector.broadcast %186 : vector<32x1xf32> to vector<32x96xf32>
    %188 = arith.mulf %176, %187 : vector<32x96xf32>
    %189 = vector.broadcast %178 : vector<1x96xf32> to vector<32x96xf32>
    %190 = arith.mulf %188, %189 : vector<32x96xf32>
    %c0_66 = arith.constant 0 : index
    %c0_67 = arith.constant 0 : index
    %c0_68 = arith.constant 0 : index
    %191 = vector.load %arg10[%c0_66, %c0_67, %c0_68] : memref<2x96x270xf32, #tpu.memory_space<vmem>>, vector<1x96x270xf32>
    %192 = vector.shape_cast %191 : vector<1x96x270xf32> to vector<96x270xf32>
    %cst_69 = arith.constant dense<0.000000e+00> : vector<32x270xf32>
    %193 = tpu.matmul %190, %192, %cst_69 {dimension_numbers = #tpu.dot_dimension_numbers<[1], [0], [0], [1], [0, 0, 1, 1], [], []>} : vector<32x96xf32>, vector<96x270xf32>, vector<32x270xf32> -> vector<32x270xf32>
    %c0_70 = arith.constant 0 : index
    %c0_71 = arith.constant 0 : index
    %c0_72 = arith.constant 0 : index
    %194 = vector.load %arg11[%c0_70, %c0_71, %c0_72] : memref<2x96x270xf32, #tpu.memory_space<vmem>>, vector<1x96x270xf32>
    %195 = vector.shape_cast %194 : vector<1x96x270xf32> to vector<96x270xf32>
    %cst_73 = arith.constant dense<0.000000e+00> : vector<32x270xf32>
    %196 = tpu.matmul %190, %195, %cst_73 {dimension_numbers = #tpu.dot_dimension_numbers<[1], [0], [0], [1], [0, 0, 1, 1], [], []>} : vector<32x96xf32>, vector<96x270xf32>, vector<32x270xf32> -> vector<32x270xf32>
    %197 = arith.negf %193 : vector<32x270xf32>
    %198 = math.exp %197 : vector<32x270xf32>
    %cst_74 = arith.constant 1.000000e+00 : f32
    %199 = vector.broadcast %cst_74 : f32 to vector<32x270xf32>
    %200 = arith.addf %199, %198 : vector<32x270xf32>
    %201 = arith.divf %199, %200 : vector<32x270xf32>
    %202 = arith.mulf %193, %201 : vector<32x270xf32>
    %203 = arith.mulf %202, %196 : vector<32x270xf32>
    %c0_75 = arith.constant 0 : index
    %c0_76 = arith.constant 0 : index
    %c0_77 = arith.constant 0 : index
    %204 = vector.load %arg12[%c0_75, %c0_76, %c0_77] : memref<2x270x96xf32, #tpu.memory_space<vmem>>, vector<1x270x96xf32>
    %205 = vector.shape_cast %204 : vector<1x270x96xf32> to vector<270x96xf32>
    %cst_78 = arith.constant dense<0.000000e+00> : vector<32x96xf32>
    %206 = tpu.matmul %203, %205, %cst_78 {dimension_numbers = #tpu.dot_dimension_numbers<[1], [0], [0], [1], [0, 0, 1, 1], [], []>} : vector<32x270xf32>, vector<270x96xf32>, vector<32x96xf32> -> vector<32x96xf32>
    %207 = arith.addf %176, %206 : vector<32x96xf32>
    %c1 = arith.constant 1 : index
    %c0_79 = arith.constant 0 : index
    %c0_80 = arith.constant 0 : index
    %208 = vector.load %arg6[%c1, %c0_79, %c0_80] : memref<2x1x96xf32, #tpu.memory_space<vmem>>, vector<1x1x96xf32>
    %209 = vector.shape_cast %208 : vector<1x1x96xf32> to vector<1x96xf32>
    %210 = arith.mulf %207, %207 : vector<32x96xf32>
    %cst_81 = arith.constant dense<0.000000e+00> : vector<32xf32>
    %211 = vector.multi_reduction <add>, %210, %cst_81 [1] : vector<32x96xf32> to vector<32xf32>
    %212 = vector.shape_cast %211 : vector<32xf32> to vector<32x1xf32>
    %cst_82 = arith.constant 9.600000e+01 : f32
    %213 = vector.broadcast %cst_82 : f32 to vector<32x1xf32>
    %214 = arith.divf %212, %213 : vector<32x1xf32>
    %cst_83 = arith.constant 9.99999974E-6 : f32
    %215 = vector.broadcast %cst_83 : f32 to vector<32x1xf32>
    %216 = arith.addf %214, %215 : vector<32x1xf32>
    %217 = math.rsqrt %216 : vector<32x1xf32>
    %218 = vector.broadcast %217 : vector<32x1xf32> to vector<32x96xf32>
    %219 = arith.mulf %207, %218 : vector<32x96xf32>
    %220 = vector.broadcast %209 : vector<1x96xf32> to vector<32x96xf32>
    %221 = arith.mulf %219, %220 : vector<32x96xf32>
    %c1_84 = arith.constant 1 : index
    %c0_85 = arith.constant 0 : index
    %c0_86 = arith.constant 0 : index
    %222 = vector.load %arg7[%c1_84, %c0_85, %c0_86] : memref<2x96x288xf32, #tpu.memory_space<vmem>>, vector<1x96x288xf32>
    %223 = vector.shape_cast %222 : vector<1x96x288xf32> to vector<96x288xf32>
    %cst_87 = arith.constant dense<0.000000e+00> : vector<32x288xf32>
    %224 = tpu.matmul %221, %223, %cst_87 {dimension_numbers = #tpu.dot_dimension_numbers<[1], [0], [0], [1], [0, 0, 1, 1], [], []>} : vector<32x96xf32>, vector<96x288xf32>, vector<32x288xf32> -> vector<32x288xf32>
    %225 = vector.extract_strided_slice %224 {offsets = [0, 0], sizes = [32, 16], strides = [1, 1]} : vector<32x288xf32> to vector<32x16xf32>
    %226 = vector.shape_cast %225 : vector<32x16xf32> to vector<2x16x16xf32>
    %227 = vector.extract_strided_slice %224 {offsets = [0, 96], sizes = [32, 16], strides = [1, 1]} : vector<32x288xf32> to vector<32x16xf32>
    %228 = vector.shape_cast %227 : vector<32x16xf32> to vector<2x16x16xf32>
    %229 = vector.extract_strided_slice %224 {offsets = [0, 192], sizes = [32, 16], strides = [1, 1]} : vector<32x288xf32> to vector<32x16xf32>
    %230 = vector.shape_cast %229 : vector<32x16xf32> to vector<2x16x16xf32>
    "tpu.trace_start"() <{level = 10 : i32, message = "bqd,bkd->bqk"}> : () -> ()
    %cst_88 = arith.constant dense<0.000000e+00> : vector<2x16x16xf32>
    %231 = tpu.matmul %226, %228, %cst_88 {dimension_numbers = #tpu.dot_dimension_numbers<[2], [2], [1], [1], [0, 0, 0, 1, 1, 1], [0], [0]>} : vector<2x16x16xf32>, vector<2x16x16xf32>, vector<2x16x16xf32> -> vector<2x16x16xf32>
    "tpu.trace_stop"() : () -> ()
    %cst_89 = arith.constant 2.500000e-01 : f32
    %232 = vector.broadcast %cst_89 : f32 to vector<2x16x16xf32>
    %233 = arith.mulf %231, %232 : vector<2x16x16xf32>
    %cst_90 = arith.constant dense<0xFF800000> : vector<2x16xf32>
    %234 = vector.multi_reduction <maximumf>, %233, %cst_90 [2] : vector<2x16x16xf32> to vector<2x16xf32>
    %235 = vector.shape_cast %234 : vector<2x16xf32> to vector<2x16x1xf32>
    %236 = vector.broadcast %235 : vector<2x16x1xf32> to vector<2x16x16xf32>
    %237 = arith.subf %233, %236 : vector<2x16x16xf32>
    %238 = math.exp %237 : vector<2x16x16xf32>
    %cst_91 = arith.constant dense<0.000000e+00> : vector<2x16xf32>
    %239 = vector.multi_reduction <add>, %238, %cst_91 [2] : vector<2x16x16xf32> to vector<2x16xf32>
    %240 = vector.shape_cast %239 : vector<2x16xf32> to vector<2x16x1xf32>
    %241 = vector.broadcast %240 : vector<2x16x1xf32> to vector<2x16x16xf32>
    %242 = arith.divf %238, %241 : vector<2x16x16xf32>
    "tpu.trace_start"() <{level = 10 : i32, message = "bqk,bkd->bqd"}> : () -> ()
    %cst_92 = arith.constant dense<0.000000e+00> : vector<2x16x16xf32>
    %243 = tpu.matmul %242, %230, %cst_92 {dimension_numbers = #tpu.dot_dimension_numbers<[2], [1], [1], [2], [0, 0, 0, 1, 1, 2], [0], [0]>} : vector<2x16x16xf32>, vector<2x16x16xf32>, vector<2x16x16xf32> -> vector<2x16x16xf32>
    "tpu.trace_stop"() : () -> ()
    %244 = vector.shape_cast %243 : vector<2x16x16xf32> to vector<32x16xf32>
    %245 = vector.extract_strided_slice %224 {offsets = [0, 16], sizes = [32, 16], strides = [1, 1]} : vector<32x288xf32> to vector<32x16xf32>
    %246 = vector.shape_cast %245 : vector<32x16xf32> to vector<2x16x16xf32>
    %247 = vector.extract_strided_slice %224 {offsets = [0, 112], sizes = [32, 16], strides = [1, 1]} : vector<32x288xf32> to vector<32x16xf32>
    %248 = vector.shape_cast %247 : vector<32x16xf32> to vector<2x16x16xf32>
    %249 = vector.extract_strided_slice %224 {offsets = [0, 208], sizes = [32, 16], strides = [1, 1]} : vector<32x288xf32> to vector<32x16xf32>
    %250 = vector.shape_cast %249 : vector<32x16xf32> to vector<2x16x16xf32>
    "tpu.trace_start"() <{level = 10 : i32, message = "bqd,bkd->bqk"}> : () -> ()
    %cst_93 = arith.constant dense<0.000000e+00> : vector<2x16x16xf32>
    %251 = tpu.matmul %246, %248, %cst_93 {dimension_numbers = #tpu.dot_dimension_numbers<[2], [2], [1], [1], [0, 0, 0, 1, 1, 1], [0], [0]>} : vector<2x16x16xf32>, vector<2x16x16xf32>, vector<2x16x16xf32> -> vector<2x16x16xf32>
    "tpu.trace_stop"() : () -> ()
    %cst_94 = arith.constant 2.500000e-01 : f32
    %252 = vector.broadcast %cst_94 : f32 to vector<2x16x16xf32>
    %253 = arith.mulf %251, %252 : vector<2x16x16xf32>
    %cst_95 = arith.constant dense<0xFF800000> : vector<2x16xf32>
    %254 = vector.multi_reduction <maximumf>, %253, %cst_95 [2] : vector<2x16x16xf32> to vector<2x16xf32>
    %255 = vector.shape_cast %254 : vector<2x16xf32> to vector<2x16x1xf32>
    %256 = vector.broadcast %255 : vector<2x16x1xf32> to vector<2x16x16xf32>
    %257 = arith.subf %253, %256 : vector<2x16x16xf32>
    %258 = math.exp %257 : vector<2x16x16xf32>
    %cst_96 = arith.constant dense<0.000000e+00> : vector<2x16xf32>
    %259 = vector.multi_reduction <add>, %258, %cst_96 [2] : vector<2x16x16xf32> to vector<2x16xf32>
    %260 = vector.shape_cast %259 : vector<2x16xf32> to vector<2x16x1xf32>
    %261 = vector.broadcast %260 : vector<2x16x1xf32> to vector<2x16x16xf32>
    %262 = arith.divf %258, %261 : vector<2x16x16xf32>
    "tpu.trace_start"() <{level = 10 : i32, message = "bqk,bkd->bqd"}> : () -> ()
    %cst_97 = arith.constant dense<0.000000e+00> : vector<2x16x16xf32>
    %263 = tpu.matmul %262, %250, %cst_97 {dimension_numbers = #tpu.dot_dimension_numbers<[2], [1], [1], [2], [0, 0, 0, 1, 1, 2], [0], [0]>} : vector<2x16x16xf32>, vector<2x16x16xf32>, vector<2x16x16xf32> -> vector<2x16x16xf32>
    "tpu.trace_stop"() : () -> ()
    %264 = vector.shape_cast %263 : vector<2x16x16xf32> to vector<32x16xf32>
    %265 = vector.extract_strided_slice %224 {offsets = [0, 32], sizes = [32, 16], strides = [1, 1]} : vector<32x288xf32> to vector<32x16xf32>
    %266 = vector.shape_cast %265 : vector<32x16xf32> to vector<2x16x16xf32>
    %267 = vector.extract_strided_slice %224 {offsets = [0, 128], sizes = [32, 16], strides = [1, 1]} : vector<32x288xf32> to vector<32x16xf32>
    %268 = vector.shape_cast %267 : vector<32x16xf32> to vector<2x16x16xf32>
    %269 = vector.extract_strided_slice %224 {offsets = [0, 224], sizes = [32, 16], strides = [1, 1]} : vector<32x288xf32> to vector<32x16xf32>
    %270 = vector.shape_cast %269 : vector<32x16xf32> to vector<2x16x16xf32>
    "tpu.trace_start"() <{level = 10 : i32, message = "bqd,bkd->bqk"}> : () -> ()
    %cst_98 = arith.constant dense<0.000000e+00> : vector<2x16x16xf32>
    %271 = tpu.matmul %266, %268, %cst_98 {dimension_numbers = #tpu.dot_dimension_numbers<[2], [2], [1], [1], [0, 0, 0, 1, 1, 1], [0], [0]>} : vector<2x16x16xf32>, vector<2x16x16xf32>, vector<2x16x16xf32> -> vector<2x16x16xf32>
    "tpu.trace_stop"() : () -> ()
    %cst_99 = arith.constant 2.500000e-01 : f32
    %272 = vector.broadcast %cst_99 : f32 to vector<2x16x16xf32>
    %273 = arith.mulf %271, %272 : vector<2x16x16xf32>
    %cst_100 = arith.constant dense<0xFF800000> : vector<2x16xf32>
    %274 = vector.multi_reduction <maximumf>, %273, %cst_100 [2] : vector<2x16x16xf32> to vector<2x16xf32>
    %275 = vector.shape_cast %274 : vector<2x16xf32> to vector<2x16x1xf32>
    %276 = vector.broadcast %275 : vector<2x16x1xf32> to vector<2x16x16xf32>
    %277 = arith.subf %273, %276 : vector<2x16x16xf32>
    %278 = math.exp %277 : vector<2x16x16xf32>
    %cst_101 = arith.constant dense<0.000000e+00> : vector<2x16xf32>
    %279 = vector.multi_reduction <add>, %278, %cst_101 [2] : vector<2x16x16xf32> to vector<2x16xf32>
    %280 = vector.shape_cast %279 : vector<2x16xf32> to vector<2x16x1xf32>
    %281 = vector.broadcast %280 : vector<2x16x1xf32> to vector<2x16x16xf32>
    %282 = arith.divf %278, %281 : vector<2x16x16xf32>
    "tpu.trace_start"() <{level = 10 : i32, message = "bqk,bkd->bqd"}> : () -> ()
    %cst_102 = arith.constant dense<0.000000e+00> : vector<2x16x16xf32>
    %283 = tpu.matmul %282, %270, %cst_102 {dimension_numbers = #tpu.dot_dimension_numbers<[2], [1], [1], [2], [0, 0, 0, 1, 1, 2], [0], [0]>} : vector<2x16x16xf32>, vector<2x16x16xf32>, vector<2x16x16xf32> -> vector<2x16x16xf32>
    "tpu.trace_stop"() : () -> ()
    %284 = vector.shape_cast %283 : vector<2x16x16xf32> to vector<32x16xf32>
    %285 = vector.extract_strided_slice %224 {offsets = [0, 48], sizes = [32, 16], strides = [1, 1]} : vector<32x288xf32> to vector<32x16xf32>
    %286 = vector.shape_cast %285 : vector<32x16xf32> to vector<2x16x16xf32>
    %287 = vector.extract_strided_slice %224 {offsets = [0, 144], sizes = [32, 16], strides = [1, 1]} : vector<32x288xf32> to vector<32x16xf32>
    %288 = vector.shape_cast %287 : vector<32x16xf32> to vector<2x16x16xf32>
    %289 = vector.extract_strided_slice %224 {offsets = [0, 240], sizes = [32, 16], strides = [1, 1]} : vector<32x288xf32> to vector<32x16xf32>
    %290 = vector.shape_cast %289 : vector<32x16xf32> to vector<2x16x16xf32>
    "tpu.trace_start"() <{level = 10 : i32, message = "bqd,bkd->bqk"}> : () -> ()
    %cst_103 = arith.constant dense<0.000000e+00> : vector<2x16x16xf32>
    %291 = tpu.matmul %286, %288, %cst_103 {dimension_numbers = #tpu.dot_dimension_numbers<[2], [2], [1], [1], [0, 0, 0, 1, 1, 1], [0], [0]>} : vector<2x16x16xf32>, vector<2x16x16xf32>, vector<2x16x16xf32> -> vector<2x16x16xf32>
    "tpu.trace_stop"() : () -> ()
    %cst_104 = arith.constant 2.500000e-01 : f32
    %292 = vector.broadcast %cst_104 : f32 to vector<2x16x16xf32>
    %293 = arith.mulf %291, %292 : vector<2x16x16xf32>
    %cst_105 = arith.constant dense<0xFF800000> : vector<2x16xf32>
    %294 = vector.multi_reduction <maximumf>, %293, %cst_105 [2] : vector<2x16x16xf32> to vector<2x16xf32>
    %295 = vector.shape_cast %294 : vector<2x16xf32> to vector<2x16x1xf32>
    %296 = vector.broadcast %295 : vector<2x16x1xf32> to vector<2x16x16xf32>
    %297 = arith.subf %293, %296 : vector<2x16x16xf32>
    %298 = math.exp %297 : vector<2x16x16xf32>
    %cst_106 = arith.constant dense<0.000000e+00> : vector<2x16xf32>
    %299 = vector.multi_reduction <add>, %298, %cst_106 [2] : vector<2x16x16xf32> to vector<2x16xf32>
    %300 = vector.shape_cast %299 : vector<2x16xf32> to vector<2x16x1xf32>
    %301 = vector.broadcast %300 : vector<2x16x1xf32> to vector<2x16x16xf32>
    %302 = arith.divf %298, %301 : vector<2x16x16xf32>
    "tpu.trace_start"() <{level = 10 : i32, message = "bqk,bkd->bqd"}> : () -> ()
    %cst_107 = arith.constant dense<0.000000e+00> : vector<2x16x16xf32>
    %303 = tpu.matmul %302, %290, %cst_107 {dimension_numbers = #tpu.dot_dimension_numbers<[2], [1], [1], [2], [0, 0, 0, 1, 1, 2], [0], [0]>} : vector<2x16x16xf32>, vector<2x16x16xf32>, vector<2x16x16xf32> -> vector<2x16x16xf32>
    "tpu.trace_stop"() : () -> ()
    %304 = vector.shape_cast %303 : vector<2x16x16xf32> to vector<32x16xf32>
    %305 = vector.extract_strided_slice %224 {offsets = [0, 64], sizes = [32, 16], strides = [1, 1]} : vector<32x288xf32> to vector<32x16xf32>
    %306 = vector.shape_cast %305 : vector<32x16xf32> to vector<2x16x16xf32>
    %307 = vector.extract_strided_slice %224 {offsets = [0, 160], sizes = [32, 16], strides = [1, 1]} : vector<32x288xf32> to vector<32x16xf32>
    %308 = vector.shape_cast %307 : vector<32x16xf32> to vector<2x16x16xf32>
    %309 = vector.extract_strided_slice %224 {offsets = [0, 256], sizes = [32, 16], strides = [1, 1]} : vector<32x288xf32> to vector<32x16xf32>
    %310 = vector.shape_cast %309 : vector<32x16xf32> to vector<2x16x16xf32>
    "tpu.trace_start"() <{level = 10 : i32, message = "bqd,bkd->bqk"}> : () -> ()
    %cst_108 = arith.constant dense<0.000000e+00> : vector<2x16x16xf32>
    %311 = tpu.matmul %306, %308, %cst_108 {dimension_numbers = #tpu.dot_dimension_numbers<[2], [2], [1], [1], [0, 0, 0, 1, 1, 1], [0], [0]>} : vector<2x16x16xf32>, vector<2x16x16xf32>, vector<2x16x16xf32> -> vector<2x16x16xf32>
    "tpu.trace_stop"() : () -> ()
    %cst_109 = arith.constant 2.500000e-01 : f32
    %312 = vector.broadcast %cst_109 : f32 to vector<2x16x16xf32>
    %313 = arith.mulf %311, %312 : vector<2x16x16xf32>
    %cst_110 = arith.constant dense<0xFF800000> : vector<2x16xf32>
    %314 = vector.multi_reduction <maximumf>, %313, %cst_110 [2] : vector<2x16x16xf32> to vector<2x16xf32>
    %315 = vector.shape_cast %314 : vector<2x16xf32> to vector<2x16x1xf32>
    %316 = vector.broadcast %315 : vector<2x16x1xf32> to vector<2x16x16xf32>
    %317 = arith.subf %313, %316 : vector<2x16x16xf32>
    %318 = math.exp %317 : vector<2x16x16xf32>
    %cst_111 = arith.constant dense<0.000000e+00> : vector<2x16xf32>
    %319 = vector.multi_reduction <add>, %318, %cst_111 [2] : vector<2x16x16xf32> to vector<2x16xf32>
    %320 = vector.shape_cast %319 : vector<2x16xf32> to vector<2x16x1xf32>
    %321 = vector.broadcast %320 : vector<2x16x1xf32> to vector<2x16x16xf32>
    %322 = arith.divf %318, %321 : vector<2x16x16xf32>
    "tpu.trace_start"() <{level = 10 : i32, message = "bqk,bkd->bqd"}> : () -> ()
    %cst_112 = arith.constant dense<0.000000e+00> : vector<2x16x16xf32>
    %323 = tpu.matmul %322, %310, %cst_112 {dimension_numbers = #tpu.dot_dimension_numbers<[2], [1], [1], [2], [0, 0, 0, 1, 1, 2], [0], [0]>} : vector<2x16x16xf32>, vector<2x16x16xf32>, vector<2x16x16xf32> -> vector<2x16x16xf32>
    "tpu.trace_stop"() : () -> ()
    %324 = vector.shape_cast %323 : vector<2x16x16xf32> to vector<32x16xf32>
    %325 = vector.extract_strided_slice %224 {offsets = [0, 80], sizes = [32, 16], strides = [1, 1]} : vector<32x288xf32> to vector<32x16xf32>
    %326 = vector.shape_cast %325 : vector<32x16xf32> to vector<2x16x16xf32>
    %327 = vector.extract_strided_slice %224 {offsets = [0, 176], sizes = [32, 16], strides = [1, 1]} : vector<32x288xf32> to vector<32x16xf32>
    %328 = vector.shape_cast %327 : vector<32x16xf32> to vector<2x16x16xf32>
    %329 = vector.extract_strided_slice %224 {offsets = [0, 272], sizes = [32, 16], strides = [1, 1]} : vector<32x288xf32> to vector<32x16xf32>
    %330 = vector.shape_cast %329 : vector<32x16xf32> to vector<2x16x16xf32>
    "tpu.trace_start"() <{level = 10 : i32, message = "bqd,bkd->bqk"}> : () -> ()
    %cst_113 = arith.constant dense<0.000000e+00> : vector<2x16x16xf32>
    %331 = tpu.matmul %326, %328, %cst_113 {dimension_numbers = #tpu.dot_dimension_numbers<[2], [2], [1], [1], [0, 0, 0, 1, 1, 1], [0], [0]>} : vector<2x16x16xf32>, vector<2x16x16xf32>, vector<2x16x16xf32> -> vector<2x16x16xf32>
    "tpu.trace_stop"() : () -> ()
    %cst_114 = arith.constant 2.500000e-01 : f32
    %332 = vector.broadcast %cst_114 : f32 to vector<2x16x16xf32>
    %333 = arith.mulf %331, %332 : vector<2x16x16xf32>
    %cst_115 = arith.constant dense<0xFF800000> : vector<2x16xf32>
    %334 = vector.multi_reduction <maximumf>, %333, %cst_115 [2] : vector<2x16x16xf32> to vector<2x16xf32>
    %335 = vector.shape_cast %334 : vector<2x16xf32> to vector<2x16x1xf32>
    %336 = vector.broadcast %335 : vector<2x16x1xf32> to vector<2x16x16xf32>
    %337 = arith.subf %333, %336 : vector<2x16x16xf32>
    %338 = math.exp %337 : vector<2x16x16xf32>
    %cst_116 = arith.constant dense<0.000000e+00> : vector<2x16xf32>
    %339 = vector.multi_reduction <add>, %338, %cst_116 [2] : vector<2x16x16xf32> to vector<2x16xf32>
    %340 = vector.shape_cast %339 : vector<2x16xf32> to vector<2x16x1xf32>
    %341 = vector.broadcast %340 : vector<2x16x1xf32> to vector<2x16x16xf32>
    %342 = arith.divf %338, %341 : vector<2x16x16xf32>
    "tpu.trace_start"() <{level = 10 : i32, message = "bqk,bkd->bqd"}> : () -> ()
    %cst_117 = arith.constant dense<0.000000e+00> : vector<2x16x16xf32>
    %343 = tpu.matmul %342, %330, %cst_117 {dimension_numbers = #tpu.dot_dimension_numbers<[2], [1], [1], [2], [0, 0, 0, 1, 1, 2], [0], [0]>} : vector<2x16x16xf32>, vector<2x16x16xf32>, vector<2x16x16xf32> -> vector<2x16x16xf32>
    "tpu.trace_stop"() : () -> ()
    %344 = vector.shape_cast %343 : vector<2x16x16xf32> to vector<32x16xf32>
    %345 = tpu.concatenate %244, %264, %284, %304, %324, %344 in 1 : vector<32x16xf32>, vector<32x16xf32>, vector<32x16xf32>, vector<32x16xf32>, vector<32x16xf32>, vector<32x16xf32> -> vector<32x96xf32>
    %c1_118 = arith.constant 1 : index
    %c0_119 = arith.constant 0 : index
    %c0_120 = arith.constant 0 : index
    %346 = vector.load %arg8[%c1_118, %c0_119, %c0_120] : memref<2x96x96xf32, #tpu.memory_space<vmem>>, vector<1x96x96xf32>
    %347 = vector.shape_cast %346 : vector<1x96x96xf32> to vector<96x96xf32>
    %cst_121 = arith.constant dense<0.000000e+00> : vector<32x96xf32>
    %348 = tpu.matmul %345, %347, %cst_121 {dimension_numbers = #tpu.dot_dimension_numbers<[1], [0], [0], [1], [0, 0, 1, 1], [], []>} : vector<32x96xf32>, vector<96x96xf32>, vector<32x96xf32> -> vector<32x96xf32>
    %349 = arith.addf %207, %348 : vector<32x96xf32>
    %c1_122 = arith.constant 1 : index
    %c0_123 = arith.constant 0 : index
    %c0_124 = arith.constant 0 : index
    %350 = vector.load %arg9[%c1_122, %c0_123, %c0_124] : memref<2x1x96xf32, #tpu.memory_space<vmem>>, vector<1x1x96xf32>
    %351 = vector.shape_cast %350 : vector<1x1x96xf32> to vector<1x96xf32>
    %352 = arith.mulf %349, %349 : vector<32x96xf32>
    %cst_125 = arith.constant dense<0.000000e+00> : vector<32xf32>
    %353 = vector.multi_reduction <add>, %352, %cst_125 [1] : vector<32x96xf32> to vector<32xf32>
    %354 = vector.shape_cast %353 : vector<32xf32> to vector<32x1xf32>
    %cst_126 = arith.constant 9.600000e+01 : f32
    %355 = vector.broadcast %cst_126 : f32 to vector<32x1xf32>
    %356 = arith.divf %354, %355 : vector<32x1xf32>
    %cst_127 = arith.constant 9.99999974E-6 : f32
    %357 = vector.broadcast %cst_127 : f32 to vector<32x1xf32>
    %358 = arith.addf %356, %357 : vector<32x1xf32>
    %359 = math.rsqrt %358 : vector<32x1xf32>
    %360 = vector.broadcast %359 : vector<32x1xf32> to vector<32x96xf32>
    %361 = arith.mulf %349, %360 : vector<32x96xf32>
    %362 = vector.broadcast %351 : vector<1x96xf32> to vector<32x96xf32>
    %363 = arith.mulf %361, %362 : vector<32x96xf32>
    %c1_128 = arith.constant 1 : index
    %c0_129 = arith.constant 0 : index
    %c0_130 = arith.constant 0 : index
    %364 = vector.load %arg10[%c1_128, %c0_129, %c0_130] : memref<2x96x270xf32, #tpu.memory_space<vmem>>, vector<1x96x270xf32>
    %365 = vector.shape_cast %364 : vector<1x96x270xf32> to vector<96x270xf32>
    %cst_131 = arith.constant dense<0.000000e+00> : vector<32x270xf32>
    %366 = tpu.matmul %363, %365, %cst_131 {dimension_numbers = #tpu.dot_dimension_numbers<[1], [0], [0], [1], [0, 0, 1, 1], [], []>} : vector<32x96xf32>, vector<96x270xf32>, vector<32x270xf32> -> vector<32x270xf32>
    %c1_132 = arith.constant 1 : index
    %c0_133 = arith.constant 0 : index
    %c0_134 = arith.constant 0 : index
    %367 = vector.load %arg11[%c1_132, %c0_133, %c0_134] : memref<2x96x270xf32, #tpu.memory_space<vmem>>, vector<1x96x270xf32>
    %368 = vector.shape_cast %367 : vector<1x96x270xf32> to vector<96x270xf32>
    %cst_135 = arith.constant dense<0.000000e+00> : vector<32x270xf32>
    %369 = tpu.matmul %363, %368, %cst_135 {dimension_numbers = #tpu.dot_dimension_numbers<[1], [0], [0], [1], [0, 0, 1, 1], [], []>} : vector<32x96xf32>, vector<96x270xf32>, vector<32x270xf32> -> vector<32x270xf32>
    %370 = arith.negf %366 : vector<32x270xf32>
    %371 = math.exp %370 : vector<32x270xf32>
    %cst_136 = arith.constant 1.000000e+00 : f32
    %372 = vector.broadcast %cst_136 : f32 to vector<32x270xf32>
    %373 = arith.addf %372, %371 : vector<32x270xf32>
    %374 = arith.divf %372, %373 : vector<32x270xf32>
    %375 = arith.mulf %366, %374 : vector<32x270xf32>
    %376 = arith.mulf %375, %369 : vector<32x270xf32>
    %c1_137 = arith.constant 1 : index
    %c0_138 = arith.constant 0 : index
    %c0_139 = arith.constant 0 : index
    %377 = vector.load %arg12[%c1_137, %c0_138, %c0_139] : memref<2x270x96xf32, #tpu.memory_space<vmem>>, vector<1x270x96xf32>
    %378 = vector.shape_cast %377 : vector<1x270x96xf32> to vector<270x96xf32>
    %cst_140 = arith.constant dense<0.000000e+00> : vector<32x96xf32>
    %379 = tpu.matmul %376, %378, %cst_140 {dimension_numbers = #tpu.dot_dimension_numbers<[1], [0], [0], [1], [0, 0, 1, 1], [], []>} : vector<32x270xf32>, vector<270x96xf32>, vector<32x96xf32> -> vector<32x96xf32>
    %380 = arith.addf %349, %379 : vector<32x96xf32>
    %c0_141 = arith.constant 0 : index
    %c0_142 = arith.constant 0 : index
    %381 = vector.load %arg13[%c0_141, %c0_142] : memref<64x32xf32, #tpu.memory_space<vmem>>, vector<64x32xf32>
    %cst_143 = arith.constant dense<0.000000e+00> : vector<64x96xf32>
    %382 = tpu.matmul %381, %380, %cst_143 {dimension_numbers = #tpu.dot_dimension_numbers<[1], [0], [0], [1], [0, 0, 1, 1], [], []>} : vector<64x32xf32>, vector<32x96xf32>, vector<64x96xf32> -> vector<64x96xf32>
    %c0_144 = arith.constant 0 : index
    %c0_145 = arith.constant 0 : index
    %383 = vector.load %arg14[%c0_144, %c0_145] : memref<64x1xf32, #tpu.memory_space<vmem>>, vector<64x1xf32>
    %384 = vector.broadcast %383 : vector<64x1xf32> to vector<64x96xf32>
    %385 = arith.addf %382, %384 : vector<64x96xf32>
    %386 = vector.shape_cast %385 : vector<64x96xf32> to vector<2x32x96xf32>
    %387 = vector.extract_strided_slice %386 {offsets = [0, 0, 0], sizes = [2, 16, 96], strides = [1, 1, 1]} : vector<2x32x96xf32> to vector<2x16x96xf32>
    %388 = vector.extract_strided_slice %386 {offsets = [0, 16, 0], sizes = [2, 16, 96], strides = [1, 1, 1]} : vector<2x32x96xf32> to vector<2x16x96xf32>
    %389 = vector.shape_cast %380 : vector<32x96xf32> to vector<2x16x96xf32>
    %cst_146 = arith.constant dense<0.000000e+00> : vector<2x96xf32>
    %390 = vector.multi_reduction <add>, %389, %cst_146 [1] : vector<2x16x96xf32> to vector<2x96xf32>
    %391 = vector.shape_cast %390 : vector<2x96xf32> to vector<2x1x96xf32>
    %cst_147 = arith.constant 1.600000e+01 : f32
    %392 = vector.broadcast %cst_147 : f32 to vector<2x1x96xf32>
    %393 = arith.divf %391, %392 : vector<2x1x96xf32>
    %394 = vector.broadcast %393 : vector<2x1x96xf32> to vector<2x16x96xf32>
    %395 = arith.subf %389, %394 : vector<2x16x96xf32>
    %396 = arith.mulf %395, %395 : vector<2x16x96xf32>
    %cst_148 = arith.constant dense<0.000000e+00> : vector<2x96xf32>
    %397 = vector.multi_reduction <add>, %396, %cst_148 [1] : vector<2x16x96xf32> to vector<2x96xf32>
    %398 = vector.shape_cast %397 : vector<2x96xf32> to vector<2x1x96xf32>
    %cst_149 = arith.constant 1.600000e+01 : f32
    %399 = vector.broadcast %cst_149 : f32 to vector<2x1x96xf32>
    %400 = arith.divf %398, %399 : vector<2x1x96xf32>
    %cst_150 = arith.constant 9.99999974E-6 : f32
    %401 = vector.broadcast %cst_150 : f32 to vector<2x1x96xf32>
    %402 = arith.addf %400, %401 : vector<2x1x96xf32>
    %403 = math.rsqrt %402 : vector<2x1x96xf32>
    %404 = vector.broadcast %403 : vector<2x1x96xf32> to vector<2x16x96xf32>
    %405 = arith.mulf %395, %404 : vector<2x16x96xf32>
    %cst_151 = arith.constant 1.000000e+00 : f32
    %406 = vector.broadcast %cst_151 : f32 to vector<2x16x96xf32>
    %407 = arith.addf %406, %388 : vector<2x16x96xf32>
    %408 = arith.mulf %405, %407 : vector<2x16x96xf32>
    %409 = arith.addf %408, %387 : vector<2x16x96xf32>
    %c0_152 = arith.constant 0 : index
    %c0_153 = arith.constant 0 : index
    %410 = vector.load %arg15[%c0_152, %c0_153] : memref<16x1xf32, #tpu.memory_space<vmem>>, vector<16x1xf32>
    %411 = vector.shape_cast %410 : vector<16x1xf32> to vector<1x16x1xf32>
    %412 = vector.broadcast %411 : vector<1x16x1xf32> to vector<2x16x96xf32>
    %413 = arith.mulf %409, %412 : vector<2x16x96xf32>
    %cst_154 = arith.constant dense<0.000000e+00> : vector<2x96xf32>
    %414 = vector.multi_reduction <add>, %413, %cst_154 [1] : vector<2x16x96xf32> to vector<2x96xf32>
    %c0_155 = arith.constant 0 : index
    %c0_156 = arith.constant 0 : index
    %415 = vector.load %arg16[%c0_155, %c0_156] : memref<1x1xf32, #tpu.memory_space<vmem>>, vector<1x1xf32>
    %416 = vector.broadcast %415 : vector<1x1xf32> to vector<2x96xf32>
    %417 = arith.addf %414, %416 : vector<2x96xf32>
    %418 = arith.negf %417 : vector<2x96xf32>
    %419 = math.exp %418 : vector<2x96xf32>
    %cst_157 = arith.constant 1.000000e+00 : f32
    %420 = vector.broadcast %cst_157 : f32 to vector<2x96xf32>
    %421 = arith.addf %420, %419 : vector<2x96xf32>
    %422 = arith.divf %420, %421 : vector<2x96xf32>
    %cst_158 = arith.constant dense<0xFF800000> : vector<2xf32>
    %423 = vector.multi_reduction <maximumf>, %422, %cst_158 [1] : vector<2x96xf32> to vector<2xf32>
    %424 = vector.shape_cast %423 : vector<2xf32> to vector<2x1xf32>
    %c0_159 = arith.constant 0 : index
    %c0_160 = arith.constant 0 : index
    %425 = vector.load %arg17[%c0_159, %c0_160] : memref<2x1xf32, #tpu.memory_space<vmem>>, vector<2x1xf32>
    tpu.vector_store %arg17[%c0_159, %c0_160], %424 {strides = array<i32>} : memref<2x1xf32, #tpu.memory_space<vmem>>, vector<2x1xf32>,
    return
  }
  func.func @transform_0(%arg0: i32) -> (i32, i32, i32) {
    %c0_i32 = arith.constant 0 : i32
    %c0_i32_0 = arith.constant 0 : i32
    %c0_i32_1 = arith.constant 0 : i32
    return %arg0, %c0_i32, %c0_i32_0 : i32, i32, i32
  }
  func.func @transform_1(%arg0: i32) -> (i32, i32) {
    %c0_i32 = arith.constant 0 : i32
    %c0_i32_0 = arith.constant 0 : i32
    %c0_i32_1 = arith.constant 0 : i32
    return %c0_i32, %c0_i32_0 : i32, i32
  }
  func.func @transform_2(%arg0: i32) -> (i32, i32) {
    %c0_i32 = arith.constant 0 : i32
    %c0_i32_0 = arith.constant 0 : i32
    %c0_i32_1 = arith.constant 0 : i32
    return %c0_i32, %c0_i32_0 : i32, i32
  }
  func.func @transform_3(%arg0: i32) -> (i32, i32) {
    %c0_i32 = arith.constant 0 : i32
    %c0_i32_0 = arith.constant 0 : i32
    %c0_i32_1 = arith.constant 0 : i32
    return %c0_i32, %c0_i32_0 : i32, i32
  }
  func.func @transform_4(%arg0: i32) -> (i32, i32) {
    %c0_i32 = arith.constant 0 : i32
    %c0_i32_0 = arith.constant 0 : i32
    %c0_i32_1 = arith.constant 0 : i32
    return %c0_i32, %c0_i32_0 : i32, i32
  }
  func.func @transform_5(%arg0: i32) -> (i32, i32, i32) {
    %c0_i32 = arith.constant 0 : i32
    %c0_i32_0 = arith.constant 0 : i32
    %c0_i32_1 = arith.constant 0 : i32
    %c0_i32_2 = arith.constant 0 : i32
    return %c0_i32, %c0_i32_0, %c0_i32_1 : i32, i32, i32
  }
  func.func @transform_6(%arg0: i32) -> (i32, i32, i32) {
    %c0_i32 = arith.constant 0 : i32
    %c0_i32_0 = arith.constant 0 : i32
    %c0_i32_1 = arith.constant 0 : i32
    %c0_i32_2 = arith.constant 0 : i32
    return %c0_i32, %c0_i32_0, %c0_i32_1 : i32, i32, i32
  }
  func.func @transform_7(%arg0: i32) -> (i32, i32, i32) {
    %c0_i32 = arith.constant 0 : i32
    %c0_i32_0 = arith.constant 0 : i32
    %c0_i32_1 = arith.constant 0 : i32
    %c0_i32_2 = arith.constant 0 : i32
    return %c0_i32, %c0_i32_0, %c0_i32_1 : i32, i32, i32
  }
  func.func @transform_8(%arg0: i32) -> (i32, i32, i32) {
    %c0_i32 = arith.constant 0 : i32
    %c0_i32_0 = arith.constant 0 : i32
    %c0_i32_1 = arith.constant 0 : i32
    %c0_i32_2 = arith.constant 0 : i32
    return %c0_i32, %c0_i32_0, %c0_i32_1 : i32, i32, i32
  }
  func.func @transform_9(%arg0: i32) -> (i32, i32, i32) {
    %c0_i32 = arith.constant 0 : i32
    %c0_i32_0 = arith.constant 0 : i32
    %c0_i32_1 = arith.constant 0 : i32
    %c0_i32_2 = arith.constant 0 : i32
    return %c0_i32, %c0_i32_0, %c0_i32_1 : i32, i32, i32
  }
  func.func @transform_10(%arg0: i32) -> (i32, i32, i32) {
    %c0_i32 = arith.constant 0 : i32
    %c0_i32_0 = arith.constant 0 : i32
    %c0_i32_1 = arith.constant 0 : i32
    %c0_i32_2 = arith.constant 0 : i32
    return %c0_i32, %c0_i32_0, %c0_i32_1 : i32, i32, i32
  }
  func.func @transform_11(%arg0: i32) -> (i32, i32, i32) {
    %c0_i32 = arith.constant 0 : i32
    %c0_i32_0 = arith.constant 0 : i32
    %c0_i32_1 = arith.constant 0 : i32
    %c0_i32_2 = arith.constant 0 : i32
    return %c0_i32, %c0_i32_0, %c0_i32_1 : i32, i32, i32
  }
  func.func @transform_12(%arg0: i32) -> (i32, i32) {
    %c0_i32 = arith.constant 0 : i32
    %c0_i32_0 = arith.constant 0 : i32
    %c0_i32_1 = arith.constant 0 : i32
    return %c0_i32, %c0_i32_0 : i32, i32
  }
  func.func @transform_13(%arg0: i32) -> (i32, i32) {
    %c0_i32 = arith.constant 0 : i32
    %c0_i32_0 = arith.constant 0 : i32
    %c0_i32_1 = arith.constant 0 : i32
    return %c0_i32, %c0_i32_0 : i32, i32
  }
  func.func @transform_14(%arg0: i32) -> (i32, i32) {
    %c0_i32 = arith.constant 0 : i32
    %c0_i32_0 = arith.constant 0 : i32
    %c0_i32_1 = arith.constant 0 : i32
    return %c0_i32, %c0_i32_0 : i32, i32
  }
  func.func @transform_15(%arg0: i32) -> (i32, i32) {
    %c0_i32 = arith.constant 0 : i32
    %c0_i32_0 = arith.constant 0 : i32
    %c0_i32_1 = arith.constant 0 : i32
    return %c0_i32, %c0_i32_0 : i32, i32
  }
  func.func @transform_16(%arg0: i32) -> (i32, i32) {
    %c0_i32 = arith.constant 0 : i32
    %c0_i32_0 = arith.constant 0 : i32
    return %arg0, %c0_i32 : i32, i32
  }
}

</mosaic_0001>

<bundles_post_ra>
// kernel: tpu_custom_call.1
= control target key start
LH: loop header
LB: loop body
LE: loop exit
PB: predicated region body
PF: predicated region fallthrough
CT: control target
= control target key end

     0   :  { %vm75_vm0 = vcmask 785408   ;;  %v6679_v29 = vmov 96.0   ;;  %s6680_s27 = smov 32   ;;  %s6681_s28 = smov 16   ;;  %s10170_s1 = inlined_call_operand.vmem [shape: f32[96,96], index: 1, kind: input, shape index: {}]   ;;  %s10171_s0 = inlined_call_operand.vmem [shape: f32[2,16,96], index: 0, kind: input, shape index: {}]   ;;  %s10172_s2 = inlined_call_operand.vmem [shape: f32[1,96], index: 2, kind: input, shape index: {}]   ;;  %s10173_s3 = inlined_call_operand.vmem [shape: f32[1,96], index: 3, kind: input, shape index: {}]   ;;  %s10174_s4 = inlined_call_operand.vmem [shape: f32[1,96], index: 4, kind: input, shape index: {}]   ;;  %s10175_s5 = inlined_call_operand.vmem [shape: f32[2,1,96], index: 5, kind: input, shape index: {}]   ;;  %s10176_s6 = inlined_call_operand.vmem [shape: f32[2,96,288], index: 6, kind: input, shape index: {}]   ;;  %s10177_s7 = inlined_call_operand.vmem [shape: f32[2,96,96], index: 7, kind: input, shape index: {}]   ;;  %s10178_s8 = inlined_call_operand.vmem [shape: f32[2,1,96], index: 8, kind: input, shape index: {}]   ;;  %s10179_s9 = inlined_call_operand.vmem [shape: f32[2,96,270], index: 9, kind: input, shape index: {}]   ;;  %s10180_s10 = inlined_call_operand.vmem [shape: f32[2,96,270], index: 10, kind: input, shape index: {}]   ;;  %s10181_s11 = inlined_call_operand.vmem [shape: f32[2,270,96], index: 11, kind: input, shape index: {}]   ;;  %s10182_s13 = inlined_call_operand.vmem [shape: f32[64,1], index: 13, kind: input, shape index: {}]   ;;  %s10183_s12 = inlined_call_operand.vmem [shape: f32[64,32], index: 12, kind: input, shape index: {}]   ;;  %s10184_s14 = inlined_call_operand.vmem [shape: f32[16,1], index: 14, kind: input, shape index: {}]   ;;  %s10185_s15 = inlined_call_operand.<no memory space> [shape: f32[1,1], index: 15, kind: input, shape index: {}]   ;;  %s10186_s16 = inlined_call_operand.vmem [shape: f32[2,1], index: 16, kind: output, shape index: {}]  }
   0x1   :  { %10190 = sst [smem:[#allocation3_spill]] %s10170_s1  ;;  %v55_v12 = vld [vmem:[%s10171_s0] sm:$0xff]  ;;  %v56_v13 = vld [vmem:[%s10171_s0 + $0x8] sm:$0xff]  ;;  %v57_v14 = vld [vmem:[%s10171_s0 + $0x10] sm:$0xff]  ;;  %6319 = vrcp.f32 %v6679_v29  ;;  %s6684_s29 = smov 80  }
   0x2   :  { %s10191_s23 = sld [smem:[#allocation3_spill]]  ;;  %v58_v15 = vld [vmem:[%s10171_s0 + $0x18] sm:$0xff]  ;;  %v6311_v16 = vld [vmem:[%s10172_s2] ss:$0 sm:$0xff]  ;;  %s6685_s30 = smov 64  }
   0x3   :  { %s6686_s1 = smov 48  }
   0x7   :  { %v6320_v30 = vpop.eup %6319 }
   0x8   :  { %v70_v0 = vld [vmem:[%s10191_s23 + $0x58] sm:$0xff]  ;;  %v69_v1 = vld [vmem:[%s10191_s23 + $0x50] sm:$0xff]  ;;  %v68_v2 = vld [vmem:[%s10191_s23 + $0x48] sm:$0xff]  ;;  %v130_v31 = vmul.f32 96.0, %v6320_v30  ;;  %vm134_vm1 = vweird.f32 %v6320_v30 }
   0x9   :  { %92 = vmatpush.msra.mxu1 %v70_v0  ;;  %v67_v3 = vld [vmem:[%s10191_s23 + $0x40] sm:$0xff]  ;;  %v66_v4 = vld [vmem:[%s10191_s23 + $0x38] sm:$0xff]  ;;  %v65_v5 = vld [vmem:[%s10191_s23 + $0x30] sm:$0xff] }
   0xa   :  { %v64_v6 = vld [vmem:[%s10191_s23 + $0x28] sm:$0xff]  ;;  %v63_v7 = vld [vmem:[%s10191_s23 + $0x20] sm:$0xff]  ;;  %v62_v8 = vld [vmem:[%s10191_s23 + $0x18] sm:$0xff]  ;;  %v131_v32 = vsub.f32 1.0, %v130_v31 }
   0xb   :  { %93 = vmatpush.msra.mxu1 %v69_v1  ;;  %v61_v9 = vld [vmem:[%s10191_s23 + $0x10] sm:$0xff]  ;;  %v60_v10 = vld [vmem:[%s10191_s23 + $0x8] sm:$0xff]  ;;  %v59_v11 = vld [vmem:[%s10191_s23] sm:$0xff] }
   0xc   :  { %v132_v33 = vmul.f32 %v6320_v30, %v131_v32 }
   0xd   :  { %94 = vmatpush.msra.mxu1 %v68_v2 }
   0xe   :  { %v133_v34 = vadd.f32 %v6320_v30, %v132_v33 }
   0xf   :  { %95 = vmatpush.msra.mxu1 %v67_v3 }
  0x10   :  { %v6833_v35 = vsel %vm134_vm1, %v6320_v30, %v133_v34 }
  0x11   :  { %96 = vmatpush.msra.mxu1 %v66_v4 }
  0x13   :  { %97 = vmatpush.msra.mxu1 %v65_v5 }
  0x15   :  { %98 = vmatpush.msra.mxu1 %v64_v6 }
  0x17   :  { %99 = vmatpush.msra.mxu1 %v63_v7 }
  0x19   :  { %100 = vmatpush.msra.mxu1 %v62_v8 }
  0x1b   :  { %101 = vmatpush.msra.mxu1 %v61_v9  ;;  %v6312_v9 = vld [vmem:[%s10173_s3] ss:$0 sm:$0xff]  ;;  %s6682_s3 = smov 96  }
  0x1d   :  { %102 = vmatpush.msra.mxu1 %v60_v10 }
  0x1f   :  { %103 = vmatpush.msra.mxu1 %v59_v11 }
  0x20   :  { %5764 = vmatmul.msk.f32.vlgmr.msra.gmra.mxu1 %vm75_vm0, %v55_v12 }
  0x28   :  { %5765 = vmatmul.msk.f32.gmra.mxu1 %vm75_vm0, %v56_v13  ;;  %v6313_v13 = vld [vmem:[%s10174_s4] ss:$0 sm:$0xff]  ;;  %s6683_s4 = smov 112  }
  0x30   :  { %5766 = vmatmul.msk.f32.gmra.mxu1 %vm75_vm0, %v57_v14 }
  0x38   :  { %5767 = vmatmul.msk.f32.gmra.mxu1 %vm75_vm0, %v58_v15 }
  0x9d   :  { %v105_v17 = vpop.f32.mrf.mxu1 }
  0x9e   :  { %v106_v18 = vadd.f32 %v6311_v16, %v105_v17 }
  0xa0   :  { %v117_v19 = vsel %vm75_vm0, %v106_v18, 0.0 }
  0xa1   :  { %118 = vadd.xlane.f32.xlu0 %v117_v19 }
  0xa5   :  { %v108_v20 = vpop.f32.mrf.mxu1 }
  0xa6   :  { %v109_v21 = vadd.f32 %v6311_v16, %v108_v20 }
  0xa8   :  { %v120_v22 = vsel %vm75_vm0, %v109_v21, 0.0 }
  0xa9   :  { %121 = vadd.xlane.f32.xlu0 %v120_v22 }
  0xad   :  { %v111_v23 = vpop.f32.mrf.mxu1 }
  0xae   :  { %v112_v24 = vadd.f32 %v6311_v16, %v111_v23 }
  0xb0   :  { %v123_v25 = vsel %vm75_vm0, %v112_v24, 0.0 }
  0xb1   :  { %124 = vadd.xlane.f32.xlu1 %v123_v25 }
  0xb5   :  { %v114_v26 = vpop.f32.mrf.mxu1 }
  0xb6   :  { %v115_v27 = vadd.f32 %v6311_v16, %v114_v26 }
  0xb8   :  { %v126_v28 = vsel %vm75_vm0, %v115_v27, 0.0 }
  0xb9   :  { %127 = vadd.xlane.f32.xlu1 %v126_v28 }
 0x114   :  { %v119_v36 = vpop.xlane.xlu0 %118 }
 0x115   :  { %v136_v37 = vmul.f32 %v6833_v35, %v119_v36 }
 0x117   :  { %v140_v38 = vsub.f32 %v106_v18, %v136_v37 }
 0x119   :  { %v144_v39 = vmul.f32 %v140_v38, %v140_v38 }
 0x11b   :  { %v148_v40 = vsel %vm75_vm0, %v144_v39, 0.0 }
 0x11c   :  { %149 = vadd.xlane.f32.xlu2 %v148_v40  ;;  %v122_v41 = vpop.xlane.xlu0 %121 }
 0x11d   :  { %v137_v42 = vmul.f32 %v6833_v35, %v122_v41 }
 0x11f   :  { %v6838_v43 = vsub.f32 %v109_v21, %v137_v42 }
 0x121   :  { %v145_v44 = vmul.f32 %v6838_v43, %v6838_v43 }
 0x123   :  { %v151_v45 = vsel %vm75_vm0, %v145_v44, 0.0 }
 0x124   :  { %v125_v46 = vpop.xlane.xlu1 %124  ;;  %152 = vadd.xlane.f32.xlu2 %v151_v45 }
 0x125   :  { %v138_v47 = vmul.f32 %v6833_v35, %v125_v46 }
 0x127   :  { %v6844_v48 = vsub.f32 %v112_v24, %v138_v47 }
 0x129   :  { %v146_v49 = vmul.f32 %v6844_v48, %v6844_v48 }
 0x12b   :  { %v154_v50 = vsel %vm75_vm0, %v146_v49, 0.0 }
 0x12c   :  { %v128_v51 = vpop.xlane.xlu1 %127  ;;  %155 = vadd.xlane.f32.xlu0 %v154_v50 }
 0x12d   :  { %v139_v52 = vmul.f32 %v6833_v35, %v128_v51 }
 0x12f   :  { %v6850_v53 = vsub.f32 %v115_v27, %v139_v52 }
 0x131   :  { %v147_v54 = vmul.f32 %v6850_v53, %v6850_v53 }
 0x133   :  { %v157_v55 = vsel %vm75_vm0, %v147_v54, 0.0 }
 0x134   :  { %158 = vadd.xlane.f32.xlu1 %v157_v55 }
 0x18f   :  { %v150_v56 = vpop.xlane.xlu2 %149 }
 0x190   :  { %v160_v57 = vmul.f32 %v150_v56, %v6833_v35 }
 0x192   :  { %v164_v58 = vadd.f32 1e-05, %v160_v57 }
 0x194   :  { %6321 = vrsqrt.f32 %v164_v58  ;;  %vm174_vm3 = vweird.f32 %v164_v58 }
 0x197   :  { %v153_v59 = vpop.xlane.xlu2 %152 }
 0x198   :  { %v161_v60 = vmul.f32 %v153_v59, %v6833_v35 }
 0x19a   :  { %v6322_v61 = vpop.eup %6321  ;;  %v165_v62 = vadd.f32 1e-05, %v161_v60 }
 0x19b   :  { %v169_v63 = vmul.f32 %v6322_v61, %v164_v58  ;;  %vm175_vm2 = vweird.f32 %v6322_v61 }
 0x19c   :  { %6323 = vrsqrt.f32 %v165_v62  ;;  %vm176_vm4 = vmor %vm174_vm3, %vm175_vm2  ;;  %vm184_vm6 = vweird.f32 %v165_v62 }
 0x19d   :  { %v170_v0 = vmul.f32 %v6322_v61, %v169_v63 }
 0x19f   :  { %v171_v1 = vmul.f32 0.5, %v170_v0  ;;  %v156_v2 = vpop.xlane.xlu0 %155 }
 0x1a0   :  { %v162_v3 = vmul.f32 %v156_v2, %v6833_v35 }
 0x1a1   :  { %v172_v4 = vsub.f32 1.5, %v171_v1 }
 0x1a2   :  { %v6324_v5 = vpop.eup %6323  ;;  %v166_v6 = vadd.f32 1e-05, %v162_v3 }
 0x1a3   :  { %v173_v7 = vmul.f32 %v6322_v61, %v172_v4  ;;  %v179_v8 = vmul.f32 %v6324_v5, %v165_v62  ;;  %vm185_vm5 = vweird.f32 %v6324_v5 }
 0x1a4   :  { %6325 = vrsqrt.f32 %v166_v6  ;;  %vm186_vm7 = vmor %vm184_vm6, %vm185_vm5  ;;  %vm194_vm9 = vweird.f32 %v166_v6 }
 0x1a5   :  { %v177_v10 = vsel %vm176_vm4, %v6322_v61, %v173_v7  ;;  %v180_v11 = vmul.f32 %v6324_v5, %v179_v8 }
 0x1a6   :  { %v208_v12 = vmul.f32 %v177_v10, %v140_v38 }
 0x1a7   :  { %v181_v14 = vmul.f32 0.5, %v180_v11  ;;  %v159_v15 = vpop.xlane.xlu1 %158 }
 0x1a8   :  { %v163_v16 = vmul.f32 %v159_v15, %v6833_v35  ;;  %v216_v17 = vmul.f32 %v6312_v9, %v208_v12 }
 0x1a9   :  { %v182_v18 = vsub.f32 1.5, %v181_v14 }
 0x1aa   :  { %v6326_v19 = vpop.eup %6325  ;;  %v167_v20 = vadd.f32 1e-05, %v163_v16  ;;  %v6865_v21 = vadd.f32 %v6313_v13, %v216_v17 }
 0x1ab   :  { %v183_v22 = vmul.f32 %v6324_v5, %v182_v18  ;;  %v189_v23 = vmul.f32 %v6326_v19, %v166_v6  ;;  %vm195_vm8 = vweird.f32 %v6326_v19 }
 0x1ac   :  { %6327 = vrsqrt.f32 %v167_v20  ;;  %v5768_v24 = vmul.f32 -1.442695, %v6865_v21  ;;  %vm196_vm10 = vmor %vm194_vm9, %vm195_vm8  ;;  %vm204_vm12 = vweird.f32 %v167_v20 }
 0x1ad   :  { %v187_v25 = vsel %vm186_vm7, %v6324_v5, %v183_v22  ;;  %v190_v26 = vmul.f32 %v6326_v19, %v189_v23 }
 0x1ae   :  { %v209_v27 = vmul.f32 %v187_v25, %v6838_v43  ;;  %6329 = vpow2.f32 %v5768_v24 }
 0x1af   :  { %v191_v28 = vmul.f32 0.5, %v190_v26 }
 0x1b0   :  { %v217_v29 = vmul.f32 %v6312_v9, %v209_v27 }
 0x1b1   :  { %v192_v30 = vsub.f32 1.5, %v191_v28 }
 0x1b2   :  { %v6328_v31 = vpop.eup %6327  ;;  %v6869_v32 = vadd.f32 %v6313_v13, %v217_v29 }
 0x1b3   :  { %v193_v33 = vmul.f32 %v6326_v19, %v192_v30  ;;  %v199_v34 = vmul.f32 %v6328_v31, %v167_v20  ;;  %vm205_vm11 = vweird.f32 %v6328_v31 }
 0x1b4   :  { %v6330_v36 = vpop.eup %6329  ;;  %v5769_v37 = vmul.f32 -1.442695, %v6869_v32  ;;  %vm206_vm13 = vmor %vm204_vm12, %vm205_vm11 }
 0x1b5   :  { %v197_v38 = vsel %vm196_vm10, %v6326_v19, %v193_v33  ;;  %v200_v39 = vmul.f32 %v6328_v31, %v199_v34  ;;  %v240_v40 = vadd.f32 1.0, %v6330_v36 }
 0x1b6   :  { %v210_v41 = vmul.f32 %v197_v38, %v6844_v48  ;;  %6331 = vpow2.f32 %v5769_v37 }
 0x1b7   :  { %v201_v42 = vmul.f32 0.5, %v200_v39  ;;  %6333 = vrcp.f32 %v240_v40  ;;  %v255_v57 = vand.u32 2147483648, %v240_v40  ;;  %v253_v59 = vand.u32 2147483647, %v240_v40 }
 0x1b8   :  { %v218_v43 = vmul.f32 %v6312_v9, %v210_v41  ;;  %vm249_vm15 = vweird.f32 %v240_v40 }
 0x1b9   :  { %v202_v44 = vsub.f32 1.5, %v201_v42  ;;  %v256_v1 = vor.u32 1.1754944e-38, %v255_v57  ;;  %vm254_vm2 = vcmp.eq.f32.partialorder %v253_v59, 8.507059e+37  ;;  %v413_v57 = vld [vmem:[%s10176_s6 + $0xe8] sm:$0xff] }
 0x1ba   :  { %v6873_v45 = vadd.f32 %v6313_v13, %v218_v43  ;;  %v409_v59 = vld [vmem:[%s10176_s6 + $0xc8] sm:$0xff] }
 0x1bb   :  { %v203_v46 = vmul.f32 %v6328_v31, %v202_v44 }
 0x1bc   :  { %v6332_v47 = vpop.eup %6331  ;;  %v5770_v49 = vmul.f32 -1.442695, %v6873_v45 }
 0x1bd   :  { %v6334_v50 = vpop.eup %6333  ;;  %v207_v51 = vsel %vm206_vm13, %v6328_v31, %v203_v46  ;;  %v241_v52 = vadd.f32 1.0, %v6332_v47 }
 0x1be   :  { %v211_v54 = vmul.f32 %v207_v51, %v6850_v53  ;;  %v245_v48 = vmul.f32 %v6334_v50, %v240_v40  ;;  %6335 = vpow2.f32 %v5770_v49  ;;  %vm250_vm14 = vweird.f32 %v6334_v50  ;;  %v417_v49 = vld [vmem:[%s10176_s6 + $0x108] sm:$0xff]  ;;  %v419_v51 = vld [vmem:[%s10176_s6 + $0x118] sm:$0xff] }
 0x1bf   :  { %6337 = vrcp.f32 %v241_v52  ;;  %vm251_vm1 = vmor %vm249_vm15, %vm250_vm14  ;;  %v270_v7 = vand.u32 2147483648, %v241_v52  ;;  %v268_v10 = vand.u32 2147483647, %v241_v52  ;;  %vm264_vm4 = vweird.f32 %v241_v52  ;;  %436 = vmatpush.msrb.mxu1 %v417_v49  ;;  %494 = vmatpush.msra.mxu3 %v419_v51 }
 0x1c0   :  { %v246_v55 = vsub.f32 1.0, %v245_v48  ;;  %v219_v56 = vmul.f32 %v6312_v9, %v211_v54  ;;  %v415_v54 = vld [vmem:[%s10176_s6 + $0xf8] sm:$0xff]  ;;  %v416_v48 = vld [vmem:[%s10176_s6 + $0x100] sm:$0xff] }
 0x1c1   :  { %v271_v15 = vor.u32 1.1754944e-38, %v270_v7  ;;  %vm269_vm6 = vcmp.eq.f32.partialorder %v268_v10, 8.507059e+37  ;;  %495 = vmatpush.msra.mxu3 %v416_v48  ;;  %v397_v7 = vld [vmem:[%s10176_s6 + $0x68] sm:$0xff]  ;;  %v394_v10 = vld [vmem:[%s10176_s6 + $0x50] sm:$0xff] }
 0x1c2   :  { %v247_v58 = vmul.f32 %v6334_v50, %v246_v55  ;;  %v6877_v60 = vadd.f32 %v6313_v13, %v219_v56  ;;  %v411_v55 = vld [vmem:[%s10176_s6 + $0xd8] sm:$0xff]  ;;  %v412_v56 = vld [vmem:[%s10176_s6 + $0xe0] sm:$0xff] }
 0x1c3   :  { %496 = vmatpush.msra.mxu3 %v413_v57 }
 0x1c4   :  { %v6336_v61 = vpop.eup %6335  ;;  %v248_v62 = vadd.f32 %v6334_v50, %v247_v58  ;;  %v5771_v63 = vmul.f32 -1.442695, %v6877_v60  ;;  %v408_v58 = vld [vmem:[%s10176_s6 + $0xc0] sm:$0xff] }
 0x1c5   :  { %v6338_v0 = vpop.eup %6337  ;;  %v242_v53 = vadd.f32 1.0, %v6336_v61  ;;  %v405_v61 = vld [vmem:[%s10176_s6 + $0xa8] sm:$0xff] }
 0x1c6   :  { %v252_v2 = vsel %vm251_vm1, %v6334_v50, %v248_v62  ;;  %v260_v3 = vmul.f32 %v6338_v0, %v241_v52  ;;  %6339 = vpow2.f32 %v5771_v63  ;;  %vm265_vm3 = vweird.f32 %v6338_v0  ;;  %v418_v50 = vld [vmem:[%s10176_s6 + $0x110] sm:$0xff]  ;;  %v407_v63 = vld [vmem:[%s10176_s6 + $0xb8] sm:$0xff] }
 0x1c7   :  { %v257_v4 = vsel %vm254_vm2, %v256_v1, %v252_v2  ;;  %6341 = vrcp.f32 %v242_v53  ;;  %vm266_vm5 = vmor %vm264_vm4, %vm265_vm3  ;;  %v285_v22 = vand.u32 2147483648, %v242_v53  ;;  %v283_v25 = vand.u32 2147483647, %v242_v53  ;;  %465 = vmatpush.msra.mxu2 %v418_v50  ;;  %v414_v52 = vld [vmem:[%s10176_s6 + $0xf0] sm:$0xff]  ;;  %v403_v1 = vld [vmem:[%s10176_s6 + $0x98] sm:$0xff] }
 0x1c8   :  { %v6881_v5 = vmul.f32 %v257_v4, %v6865_v21  ;;  %v261_v6 = vsub.f32 1.0, %v260_v3  ;;  %vm279_vm8 = vweird.f32 %v242_v53  ;;  %437 = vmatpush.msrb.mxu1 %v414_v52  ;;  %v406_v62 = vld [vmem:[%s10176_s6 + $0xb0] sm:$0xff]  ;;  %v399_v2 = vld [vmem:[%s10176_s6 + $0x78] sm:$0xff]  ;;  %v400_v3 = vld [vmem:[%s10176_s6 + $0x80] sm:$0xff] }
 0x1c9   :  { %v286_v29 = vor.u32 1.1754944e-38, %v285_v22  ;;  %vm284_vm10 = vcmp.eq.f32.partialorder %v283_v25, 8.507059e+37  ;;  %466 = vmatpush.msra.mxu2 %v415_v54  ;;  %v401_v4 = vld [vmem:[%s10176_s6 + $0x88] sm:$0xff] }
 0x1ca   :  { %v309_v8 = vmul.f32 %v6881_v5, %v6881_v5  ;;  %v262_v9 = vmul.f32 %v6338_v0, %v261_v6  ;;  %438 = vmatpush.msrb.mxu1 %v411_v55  ;;  %v396_v6 = vld [vmem:[%s10176_s6 + $0x60] sm:$0xff] }
 0x1cb   :  { %467 = vmatpush.msra.mxu2 %v412_v56 }
 0x1cc   :  { %v6340_v11 = vpop.eup %6339  ;;  %v313_v12 = vsel %vm75_vm0, %v309_v8, 0.0  ;;  %v263_v13 = vadd.f32 %v6338_v0, %v262_v9  ;;  %439 = vmatpush.msrb.mxu1 %v408_v58  ;;  %v398_v8 = vld [vmem:[%s10176_s6 + $0x70] sm:$0xff]  ;;  %v393_v9 = vld [vmem:[%s10176_s6 + $0x48] sm:$0xff] }
 0x1cd   :  { %v6342_v14 = vpop.eup %6341  ;;  %314 = vadd.xlane.f32.xlu2 %v313_v12  ;;  %v243_v16 = vadd.f32 1.0, %v6340_v11  ;;  %468 = vmatpush.msra.mxu2 %v409_v59  ;;  %v395_v11 = vld [vmem:[%s10176_s6 + $0x58] sm:$0xff]  ;;  %v390_v12 = vld [vmem:[%s10176_s6 + $0x30] sm:$0xff] }
 0x1ce   :  { %v267_v17 = vsel %vm266_vm5, %v6338_v0, %v263_v13  ;;  %v275_v18 = vmul.f32 %v6342_v14, %v242_v53  ;;  %vm280_vm7 = vweird.f32 %v6342_v14  ;;  %440 = vmatpush.msrb.mxu1 %v405_v61  ;;  %v402_v0 = vld [vmem:[%s10176_s6 + $0x90] sm:$0xff]  ;;  %v404_v53 = vld [vmem:[%s10176_s6 + $0xa0] sm:$0xff]  ;;  %v391_v13 = vld [vmem:[%s10176_s6 + $0x38] sm:$0xff] }
 0x1cf   :  { %v272_v19 = vsel %vm269_vm6, %v271_v15, %v267_v17  ;;  %6343 = vrcp.f32 %v243_v16  ;;  %vm281_vm9 = vmor %vm279_vm8, %vm280_vm7  ;;  %v300_v36 = vand.u32 2147483648, %v243_v16  ;;  %v298_v39 = vand.u32 2147483647, %v243_v16  ;;  %469 = vmatpush.msra.mxu2 %v406_v62  ;;  %v387_v15 = vld [vmem:[%s10176_s6 + $0x18] sm:$0xff]  ;;  %v389_v17 = vld [vmem:[%s10176_s6 + $0x28] sm:$0xff] }
 0x1d0   :  { %v6887_v20 = vmul.f32 %v272_v19, %v6869_v32  ;;  %v276_v21 = vsub.f32 1.0, %v275_v18  ;;  %vm294_vm12 = vweird.f32 %v243_v16  ;;  %441 = vmatpush.msrb.mxu1 %v402_v0  ;;  %v384_v18 = vld [vmem:[%s10176_s6] sm:$0xff]  ;;  %v385_v19 = vld [vmem:[%s10176_s6 + $0x8] sm:$0xff] }
 0x1d1   :  { %v301_v42 = vor.u32 1.1754944e-38, %v300_v36  ;;  %vm299_vm14 = vcmp.eq.f32.partialorder %v298_v39, 8.507059e+37  ;;  %470 = vmatpush.msra.mxu2 %v403_v1 }
 0x1d2   :  { %v310_v23 = vmul.f32 %v6887_v20, %v6887_v20  ;;  %v277_v24 = vmul.f32 %v6342_v14, %v276_v21  ;;  %442 = vmatpush.msrb.mxu1 %v399_v2  ;;  %v386_v21 = vld [vmem:[%s10176_s6 + $0x10] sm:$0xff] }
 0x1d3   :  { %471 = vmatpush.msra.mxu2 %v400_v3 }
 0x1d4   :  { %v316_v26 = vsel %vm75_vm0, %v310_v23, 0.0  ;;  %v278_v27 = vadd.f32 %v6342_v14, %v277_v24  ;;  %443 = vmatpush.msrb.mxu1 %v396_v6 }
 0x1d5   :  { %v6344_v28 = vpop.eup %6343  ;;  %317 = vadd.xlane.f32.xlu0 %v316_v26  ;;  %472 = vmatpush.msra.mxu2 %v397_v7 }
 0x1d6   :  { %v282_v30 = vsel %vm281_vm9, %v6342_v14, %v278_v27  ;;  %v290_v31 = vmul.f32 %v6344_v28, %v243_v16  ;;  %vm295_vm11 = vweird.f32 %v6344_v28  ;;  %444 = vmatpush.msrb.mxu1 %v393_v9  ;;  %v392_v14 = vld [vmem:[%s10176_s6 + $0x40] sm:$0xff] }
 0x1d7   :  { %v287_v32 = vsel %vm284_vm10, %v286_v29, %v282_v30  ;;  %vm296_vm13 = vmor %vm294_vm12, %vm295_vm11  ;;  %473 = vmatpush.msra.mxu2 %v394_v10  ;;  %v388_v16 = vld [vmem:[%s10176_s6 + $0x20] sm:$0xff]  ;;  %vm525_vm12 = vcmask 130048  }
 0x1d8   :  { %v6893_v33 = vmul.f32 %v287_v32, %v6873_v45  ;;  %v291_v34 = vsub.f32 1.0, %v290_v31  ;;  %445 = vmatpush.msrb.mxu1 %v390_v12 }
 0x1d9   :  { %474 = vmatpush.msra.mxu2 %v391_v13 }
 0x1da   :  { %v311_v37 = vmul.f32 %v6893_v33, %v6893_v33  ;;  %v292_v38 = vmul.f32 %v6344_v28, %v291_v34  ;;  %446 = vmatpush.msrb.mxu1 %v387_v15 }
 0x1db   :  { %475 = vmatpush.msra.mxu2 %v388_v16 }
 0x1dc   :  { %v319_v40 = vsel %vm75_vm0, %v311_v37, 0.0  ;;  %v293_v41 = vadd.f32 %v6344_v28, %v292_v38  ;;  %447 = vmatpush.msrb.mxu1 %v384_v18 }
 0x1dd   :  { %320 = vadd.xlane.f32.xlu1 %v319_v40  ;;  %476 = vmatpush.msra.mxu2 %v385_v19 }
 0x1de   :  { %v297_v43 = vsel %vm296_vm13, %v6344_v28, %v293_v41  ;;  %v6314_v41 = vld [vmem:[%s10175_s5] ss:$0 sm:$0xff] }
 0x1df   :  { %v302_v44 = vsel %vm299_vm14, %v301_v42, %v297_v43 }
 0x1e0   :  { %v6899_v45 = vmul.f32 %v302_v44, %v6877_v60  ;;  %v410_v60 = vld [vmem:[%s10176_s6 + $0xd0] sm:$0xff] }
 0x1e1   :  { %497 = vmatpush.msra.mxu3 %v410_v60 }
 0x1e2   :  { %v312_v46 = vmul.f32 %v6899_v45, %v6899_v45 }
 0x1e3   :  { %498 = vmatpush.msra.mxu3 %v407_v63 }
 0x1e4   :  { %v322_v47 = vsel %vm75_vm0, %v312_v46, 0.0 }
 0x1e5   :  { %323 = vadd.xlane.f32.xlu2 %v322_v47  ;;  %499 = vmatpush.msra.mxu3 %v404_v53 }
 0x1e7   :  { %500 = vmatpush.msra.mxu3 %v401_v4 }
 0x1e9   :  { %501 = vmatpush.msra.mxu3 %v398_v8 }
 0x1eb   :  { %502 = vmatpush.msra.mxu3 %v395_v11 }
 0x1ed   :  { %503 = vmatpush.msra.mxu3 %v392_v14 }
 0x1ef   :  { %504 = vmatpush.msra.mxu3 %v389_v17 }
 0x1f1   :  { %505 = vmatpush.msra.mxu3 %v386_v21 }
 0x240   :  { %v315_v22 = vpop.xlane.xlu2 %314 }
 0x241   :  { %v325_v23 = vmul.f32 %v315_v22, %v6833_v35 }
 0x243   :  { %v329_v24 = vadd.f32 1e-05, %v325_v23 }
 0x245   :  { %6345 = vrsqrt.f32 %v329_v24  ;;  %vm339_vm1 = vweird.f32 %v329_v24 }
 0x248   :  { %v318_v25 = vpop.xlane.xlu0 %317 }
 0x249   :  { %v326_v26 = vmul.f32 %v318_v25, %v6833_v35 }
 0x24b   :  { %v6346_v27 = vpop.eup %6345  ;;  %v330_v28 = vadd.f32 1e-05, %v326_v26 }
 0x24c   :  { %v334_v29 = vmul.f32 %v6346_v27, %v329_v24  ;;  %vm340_vm15 = vweird.f32 %v6346_v27 }
 0x24d   :  { %6347 = vrsqrt.f32 %v330_v28  ;;  %vm341_vm2 = vmor %vm339_vm1, %vm340_vm15  ;;  %vm349_vm4 = vweird.f32 %v330_v28 }
 0x24e   :  { %v335_v30 = vmul.f32 %v6346_v27, %v334_v29 }
 0x250   :  { %v336_v31 = vmul.f32 0.5, %v335_v30  ;;  %v321_v32 = vpop.xlane.xlu1 %320 }
 0x251   :  { %v327_v34 = vmul.f32 %v321_v32, %v6833_v35 }
 0x252   :  { %v337_v36 = vsub.f32 1.5, %v336_v31 }
 0x253   :  { %v6348_v37 = vpop.eup %6347  ;;  %v331_v38 = vadd.f32 1e-05, %v327_v34 }
 0x254   :  { %v338_v39 = vmul.f32 %v6346_v27, %v337_v36  ;;  %v344_v40 = vmul.f32 %v6348_v37, %v330_v28  ;;  %vm350_vm3 = vweird.f32 %v6348_v37 }
 0x255   :  { %6349 = vrsqrt.f32 %v331_v38  ;;  %vm351_vm5 = vmor %vm349_vm4, %vm350_vm3  ;;  %vm359_vm7 = vweird.f32 %v331_v38 }
 0x256   :  { %v342_v42 = vsel %vm341_vm2, %v6346_v27, %v338_v39  ;;  %v345_v43 = vmul.f32 %v6348_v37, %v344_v40 }
 0x257   :  { %v373_v44 = vmul.f32 %v342_v42, %v6881_v5 }
 0x258   :  { %v346_v46 = vmul.f32 0.5, %v345_v43  ;;  %v324_v47 = vpop.xlane.xlu2 %323 }
 0x259   :  { %v328_v49 = vmul.f32 %v324_v47, %v6833_v35  ;;  %v380_v50 = vmul.f32 %v6314_v41, %v373_v44 }
 0x25a   :  { %v347_v51 = vsub.f32 1.5, %v346_v46 }
 0x25b   :  { %v6350_v52 = vpop.eup %6349  ;;  %v332_v54 = vadd.f32 1e-05, %v328_v49  ;;  %5772 = vmatmul.msk.f32.vlgmr.msrb.gmra.mxu1 %vm75_vm0, %v380_v50  ;;  %5776 = vmatmul.msk.f32.vlgmr.msra.gmra.mxu2 %vm75_vm0, %v380_v50 }
 0x25c   :  { %v354_v48 = vmul.f32 %v6350_v52, %v331_v38  ;;  %5780 = vmatmul.msk.f32.vlgmr.msra.gmra.mxu3 %vm75_vm0, %v380_v50  ;;  %v348_v55 = vmul.f32 %v6348_v37, %v347_v51  ;;  %vm360_vm6 = vweird.f32 %v6350_v52 }
 0x25d   :  { %6351 = vrsqrt.f32 %v332_v54  ;;  %vm361_vm8 = vmor %vm359_vm7, %vm360_vm6  ;;  %vm369_vm10 = vweird.f32 %v332_v54 }
 0x25e   :  { %v355_v56 = vmul.f32 %v6350_v52, %v354_v48  ;;  %v352_v57 = vsel %vm351_vm5, %v6348_v37, %v348_v55 }
 0x25f   :  { %v374_v58 = vmul.f32 %v352_v57, %v6887_v20 }
 0x260   :  { %v356_v59 = vmul.f32 0.5, %v355_v56 }
 0x261   :  { %v381_v60 = vmul.f32 %v6314_v41, %v374_v58 }
 0x262   :  { %v357_v61 = vsub.f32 1.5, %v356_v59 }
 0x263   :  { %v6352_v62 = vpop.eup %6351  ;;  %5773 = vmatmul.msk.f32.gmra.mxu1 %vm75_vm0, %v381_v60  ;;  %5777 = vmatmul.msk.f32.gmra.mxu2 %vm75_vm0, %v381_v60 }
 0x264   :  { %v364_v63 = vmul.f32 %v6352_v62, %v332_v54  ;;  %5781 = vmatmul.msk.f32.gmra.mxu3 %vm75_vm0, %v381_v60  ;;  %v358_v0 = vmul.f32 %v6350_v52, %v357_v61  ;;  %vm370_vm9 = vweird.f32 %v6352_v62 }
 0x265   :  { %vm371_vm11 = vmor %vm369_vm10, %vm370_vm9 }
 0x266   :  { %v365_v1 = vmul.f32 %v6352_v62, %v364_v63  ;;  %v362_v53 = vsel %vm361_vm8, %v6350_v52, %v358_v0 }
 0x267   :  { %v375_v2 = vmul.f32 %v362_v53, %v6893_v33 }
 0x268   :  { %v366_v3 = vmul.f32 0.5, %v365_v1 }
 0x269   :  { %v382_v4 = vmul.f32 %v6314_v41, %v375_v2 }
 0x26a   :  { %v367_v6 = vsub.f32 1.5, %v366_v3 }
 0x26b   :  { %5774 = vmatmul.msk.f32.gmra.mxu1 %vm75_vm0, %v382_v4  ;;  %5778 = vmatmul.msk.f32.gmra.mxu2 %vm75_vm0, %v382_v4 }
 0x26c   :  { %5782 = vmatmul.msk.f32.gmra.mxu3 %vm75_vm0, %v382_v4  ;;  %v368_v7 = vmul.f32 %v6352_v62, %v367_v6 }
 0x26e   :  { %v372_v8 = vsel %vm371_vm11, %v6352_v62, %v368_v7 }
 0x26f   :  { %v376_v9 = vmul.f32 %v372_v8, %v6899_v45 }
 0x271   :  { %v383_v10 = vmul.f32 %v6314_v41, %v376_v9 }
 0x273   :  { %5775 = vmatmul.msk.f32.gmra.mxu1 %vm75_vm0, %v383_v10  ;;  %5779 = vmatmul.msk.f32.gmra.mxu2 %vm75_vm0, %v383_v10 }
 0x274   :  { %5783 = vmatmul.msk.f32.gmra.mxu3 %vm75_vm0, %v383_v10 }
 0x2d8   :  { %v7035_v11 = vpop.f32.mrf.mxu1 }
 0x2d9   :  { %521 = vrot.lane.b32.xlu1 %v7035_v11, %s6680_s27 }
 0x2de   :  { %v7051_v14 = vpop.f32.mrf.mxu2 }
 0x2e0   :  { %v7039_v12 = vpop.f32.mrf.mxu1 }
 0x2e1   :  { %772 = vrot.lane.b32.xlu1 %v7035_v11, %s6681_s28  ;;  %523 = vrot.lane.b32.xlu0 %v7039_v12, %s6680_s27 }
 0x2e6   :  { %v7061_v16 = vpop.f32.mrf.mxu2 }
 0x2e7   :  { %v6208_v23 = vpack.i.bf16 %v7051_v14, %v7061_v16 }
 0x2e8   :  { %v7045_v13 = vpop.f32.mrf.mxu1 }
 0x2e9   :  { %1016 = vrot.lane.b32.xlu1 %v7035_v11, %s6682_s3  ;;  %559 = vrot.lane.b32.xlu0 %v7045_v13, %s6680_s27 }
 0x2ee   :  { %v7075_v17 = vpop.f32.mrf.mxu2 }
 0x2f0   :  { %v7053_v15 = vpop.f32.mrf.mxu1 }
 0x2f1   :  { %768 = vrot.lane.b32.xlu0 %v7035_v11, %s6683_s4  ;;  %813 = vrot.lane.b32.xlu1 %v7053_v15, %s6681_s28 }
 0x2f2   :  { %561 = vrot.lane.b32.xlu2 %v7053_v15, %s6680_s27 }
 0x2f6   :  { %v7083_v18 = vpop.f32.mrf.mxu2 }
 0x2f7   :  { %v7123_v19 = vpack.i.bf16 %v7075_v17, %v7083_v18 }
 0x2f9   :  { %811 = vrot.lane.b32.xlu0 %v7045_v13, %s6681_s28  ;;  %1262 = vrot.lane.b32.xlu1 %v7061_v16, %s6683_s4 }
 0x2fa   :  { %774 = vrot.lane.b32.xlu2 %v7039_v12, %s6681_s28 }
 0x301   :  { %1260 = vrot.lane.b32.xlu0 %v7051_v14, %s6683_s4  ;;  %1256 = vrot.lane.b32.xlu1 %v7035_v11, %s6684_s29 }
 0x302   :  { %770 = vrot.lane.b32.xlu2 %v7039_v12, %s6683_s4 }
 0x309   :  { %1510 = vrot.lane.b32.xlu0 %v7061_v16, %s6682_s3  ;;  %1508 = vrot.lane.b32.xlu1 %v7051_v14, %s6682_s3 }
 0x30a   :  { %807 = vrot.lane.b32.xlu2 %v7045_v13, %s6683_s4 }
 0x311   :  { %809 = vrot.lane.b32.xlu0 %v7053_v15, %s6683_s4  ;;  %1301 = vrot.lane.b32.xlu1 %v7083_v18, %s6683_s4 }
 0x312   :  { %1018 = vrot.lane.b32.xlu2 %v7039_v12, %s6682_s3 }
 0x319   :  { %1295 = vrot.lane.b32.xlu0 %v7045_v13, %s6684_s29  ;;  %1297 = vrot.lane.b32.xlu1 %v7053_v15, %s6684_s29 }
 0x31a   :  { %1051 = vrot.lane.b32.xlu2 %v7045_v13, %s6682_s3 }
 0x321   :  { %1053 = vrot.lane.b32.xlu0 %v7053_v15, %s6682_s3  ;;  %1746 = vrot.lane.b32.xlu1 %v7061_v16, %s6684_s29 }
 0x322   :  { %1258 = vrot.lane.b32.xlu2 %v7039_v12, %s6684_s29 }
 0x329   :  { %1506 = vrot.lane.b32.xlu0 %v7039_v12, %s6685_s30  ;;  %1543 = vrot.lane.b32.xlu1 %v7045_v13, %s6685_s30 }
 0x32a   :  { %1299 = vrot.lane.b32.xlu2 %v7075_v17, %s6683_s4 }
 0x331   :  { %1547 = vrot.lane.b32.xlu0 %v7075_v17, %s6682_s3  ;;  %1742 = vrot.lane.b32.xlu1 %v7039_v12, %s6686_s1 }
 0x332   :  { %1504 = vrot.lane.b32.xlu2 %v7035_v11, %s6685_s30 }
 0x339   :  { %1740 = vrot.lane.b32.xlu0 %v7035_v11, %s6686_s1  ;;  %1779 = vrot.lane.b32.xlu1 %v7045_v13, %s6686_s1 }
 0x33a   :  { %1549 = vrot.lane.b32.xlu2 %v7083_v18, %s6682_s3 }
 0x341   :  { %1785 = vrot.lane.b32.xlu0 %v7083_v18, %s6684_s29  ;;  %6229 = vrot.lane.b32.xlu1 %v7123_v19, %s6685_s30 }
 0x342   :  { %1744 = vrot.lane.b32.xlu2 %v7051_v14, %s6684_s29 }
 0x349   :  { %1781 = vrot.lane.b32.xlu0 %v7053_v15, %s6686_s1  ;;  %6234 = vrot.lane.b32.xlu1 %v7123_v19, %s6686_s1 }
 0x34a   :  { %1545 = vrot.lane.b32.xlu2 %v7053_v15, %s6685_s30 }
 0x34b   :  { %v522_v21 = vpop.permute.xlu1 %521 }
 0x34c   :  { %v562_v22 = vpop.permute.xlu2 %561 }
 0x34d   :  { %6196 = vmatpush.xpose.msk.msra.mxu1 %vm525_vm12, %v562_v22 }
 0x351   :  { %6209 = vrot.lane.b32.xlu0 %v6208_v23, %s6685_s30 }
 0x352   :  { %1783 = vrot.lane.b32.xlu2 %v7075_v17, %s6684_s29 }
 0x353   :  { %v773_v24 = vpop.permute.xlu1 %772  ;;  %v524_v25 = vpop.permute.xlu0 %523 }
 0x354   :  { %v775_v26 = vpop.permute.xlu2 %774  ;;  %5784 = vmatpush.xpose.msk.msra.mxu0 %vm525_vm12, %v524_v25 }
 0x358   :  { %5785 = vmatpush.xpose.msk.msra.mxu0 %vm525_vm12, %v522_v21 }
 0x359   :  { %6224 = vrot.lane.b32.xlu0 %v6208_v23, %s6681_s28 }
 0x35a   :  { %6214 = vrot.lane.b32.xlu2 %v6208_v23, %s6686_s1 }
 0x35b   :  { %v1017_v27 = vpop.permute.xlu1 %1016  ;;  %5786 = vmatmul.msk.f32.vlgmr.msra.gmra.mxu0 %vm525_vm12, %v7035_v11  ;;  %v560_v28 = vpop.permute.xlu0 %559 }
 0x35c   :  { %5788 = vmatpush.xpose.msk.msrb.mxu0 %vm525_vm12, %v562_v22  ;;  %v771_v29 = vpop.permute.xlu2 %770  ;;  %6197 = vmatpush.xpose.msk.msra.mxu1 %vm525_vm12, %v560_v28 }
 0x35f   :  { %5791 = vmatmul.msk.f32.vlgmr.msra.gmra.mxu1 %vm525_vm12, %v7053_v15 }
 0x360   :  { %5789 = vmatpush.xpose.msk.msrb.mxu0 %vm525_vm12, %v560_v28 }
 0x361   :  { %6239 = vrot.lane.b32.xlu0 %v7123_v19, %s6680_s27 }
 0x362   :  { %6219 = vrot.lane.b32.xlu2 %v6208_v23, %s6680_s27 }
 0x363   :  { %5787 = vmatmul.msk.f32.gmra.mxu0 %vm525_vm12, %v7039_v12  ;;  %v769_v30 = vpop.permute.xlu0 %768  ;;  %v814_v31 = vpop.permute.xlu1 %813 }
 0x364   :  { %5796 = vmatpush.xpose.msk.msra.mxu0 %vm525_vm12, %v775_v26  ;;  %v808_v32 = vpop.permute.xlu2 %807  ;;  %5800 = vmatpush.xpose.msk.msrb.mxu1 %vm525_vm12, %v814_v31 }
 0x368   :  { %5797 = vmatpush.xpose.msk.msra.mxu0 %vm525_vm12, %v773_v24 }
 0x36b   :  { %v812_v34 = vpop.permute.xlu0 %811  ;;  %v1263_v36 = vpop.permute.xlu1 %1262  ;;  %5790 = vmatmul.msk.f32.vlgmr.msrb.gmra.mxu0 %vm525_vm12, %v7045_v13 }
 0x36c   :  { %5808 = vmatpush.xpose.msk.msrb.mxu0 %vm525_vm12, %v7061_v16  ;;  %v1019_v37 = vpop.permute.xlu2 %1018  ;;  %5801 = vmatpush.xpose.msk.msrb.mxu1 %vm525_vm12, %v812_v34 }
 0x36f   :  { %5802 = vmatmul.msk.f32.vlgmr.msrb.gmra.mxu1 %vm525_vm12, %v808_v32 }
 0x370   :  { %5812 = vmatpush.xpose.msk.msra.mxu1 %vm525_vm12, %v7083_v18  ;;  %5809 = vmatpush.xpose.msk.msrb.mxu0 %vm525_vm12, %v7051_v14 }
 0x373   :  { %v1261_v38 = vpop.permute.xlu0 %1260  ;;  %v1257_v39 = vpop.permute.xlu1 %1256  ;;  %5798 = vmatmul.msk.f32.vlgmr.msra.gmra.mxu0 %vm525_vm12, %v769_v30 }
 0x374   :  { %5813 = vmatpush.xpose.msk.msra.mxu1 %vm525_vm12, %v7075_v17  ;;  %5820 = vmatpush.xpose.msk.msra.mxu0 %vm525_vm12, %v1263_v36  ;;  %v1052_v40 = vpop.permute.xlu2 %1051 }
 0x378   :  { %5821 = vmatpush.xpose.msk.msra.mxu0 %vm525_vm12, %v1261_v38 }
 0x37b   :  { %v1511_v41 = vpop.permute.xlu0 %1510  ;;  %v1509_v42 = vpop.permute.xlu1 %1508  ;;  %5799 = vmatmul.msk.f32.gmra.mxu0 %vm525_vm12, %v771_v29 }
 0x37c   :  { %v1259_v43 = vpop.permute.xlu2 %1258 }
 0x383   :  { %v810_v44 = vpop.permute.xlu0 %809  ;;  %v1302_v46 = vpop.permute.xlu1 %1301  ;;  %5810 = vmatmul.msk.f32.vlgmr.msrb.gmra.mxu0 %vm525_vm12, %v1017_v27 }
 0x384   :  { %5832 = vmatpush.xpose.msk.msrb.mxu0 %vm525_vm12, %v1511_v41  ;;  %v1300_v47 = vpop.permute.xlu2 %1299  ;;  %5803 = vmatmul.msk.f32.gmra.mxu1 %vm525_vm12, %v810_v44 }
 0x385   :  { %5824 = vmatpush.xpose.msk.msrb.mxu1 %vm525_vm12, %v1302_v46 }
 0x388   :  { %5833 = vmatpush.xpose.msk.msrb.mxu0 %vm525_vm12, %v1509_v42 }
 0x389   :  { %5825 = vmatpush.xpose.msk.msrb.mxu1 %vm525_vm12, %v1300_v47 }
 0x38b   :  { %v1296_v49 = vpop.permute.xlu0 %1295  ;;  %v1298_v50 = vpop.permute.xlu1 %1297  ;;  %5811 = vmatmul.msk.f32.gmra.mxu0 %vm525_vm12, %v1019_v37 }
 0x38c   :  { %v1505_v51 = vpop.permute.xlu2 %1504  ;;  %5814 = vmatmul.msk.f32.vlgmr.msra.gmra.mxu1 %vm525_vm12, %v1052_v40 }
 0x393   :  { %v1054_v52 = vpop.permute.xlu0 %1053  ;;  %v1747_v54 = vpop.permute.xlu1 %1746  ;;  %5822 = vmatmul.msk.f32.vlgmr.msra.gmra.mxu0 %vm525_vm12, %v1257_v39 }
 0x394   :  { %v1550_v48 = vpop.permute.xlu2 %1549  ;;  %5815 = vmatmul.msk.f32.gmra.mxu1 %vm525_vm12, %v1054_v52  ;;  %5844 = vmatpush.xpose.msk.msra.mxu0 %vm525_vm12, %v1747_v54 }
 0x395   :  { %5836 = vmatpush.xpose.msk.msra.mxu1 %vm525_vm12, %v1550_v48 }
 0x39b   :  { %v1507_v55 = vpop.permute.xlu0 %1506  ;;  %v1544_v56 = vpop.permute.xlu1 %1543  ;;  %5823 = vmatmul.msk.f32.gmra.mxu0 %vm525_vm12, %v1259_v43 }
 0x39c   :  { %v1745_v57 = vpop.permute.xlu2 %1744  ;;  %5826 = vmatmul.msk.f32.vlgmr.msrb.gmra.mxu1 %vm525_vm12, %v1296_v49 }
 0x39d   :  { %5845 = vmatpush.xpose.msk.msra.mxu0 %vm525_vm12, %v1745_v57 }
 0x3a3   :  { %v1548_v58 = vpop.permute.xlu0 %1547  ;;  %v1743_v59 = vpop.permute.xlu1 %1742  ;;  %5834 = vmatmul.msk.f32.vlgmr.msrb.gmra.mxu0 %vm525_vm12, %v1505_v51 }
 0x3a4   :  { %5827 = vmatmul.msk.f32.gmra.mxu1 %vm525_vm12, %v1298_v50  ;;  %v1546_v62 = vpop.permute.xlu2 %1545 }
 0x3a5   :  { %5837 = vmatpush.xpose.msk.msra.mxu1 %vm525_vm12, %v1548_v58 }
 0x3ab   :  { %v1741_v60 = vpop.permute.xlu0 %1740  ;;  %v1780_v61 = vpop.permute.xlu1 %1779  ;;  %5835 = vmatmul.msk.f32.gmra.mxu0 %vm525_vm12, %v1507_v55 }
 0x3ac   :  { %5838 = vmatmul.msk.f32.vlgmr.msra.gmra.mxu1 %vm525_vm12, %v1544_v56  ;;  %v1784_v2 = vpop.permute.xlu2 %1783 }
 0x3b3   :  { %v1786_v63 = vpop.permute.xlu0 %1785  ;;  %v6230_v0 = vpop.permute.xlu1 %6229  ;;  %5846 = vmatmul.msk.f32.vlgmr.msra.gmra.mxu0 %vm525_vm12, %v1741_v60 }
 0x3b4   :  { %5839 = vmatmul.msk.f32.gmra.mxu1 %vm525_vm12, %v1546_v62  ;;  %v6231_v1 = vunpack.i.l.bf16 %v6230_v0  ;;  %v6232_v53 = vunpack.i.h.bf16 %v6230_v0  ;;  %v6215_v9 = vpop.permute.xlu2 %6214 }
 0x3b5   :  { %5848 = vmatpush.xpose.msk.msrb.mxu1 %vm525_vm12, %v1786_v63  ;;  %v6216_v12 = vunpack.i.l.bf16 %v6215_v9  ;;  %v6217_v13 = vunpack.i.h.bf16 %v6215_v9 }
 0x3b6   :  { %759 = vmatpush.msrb.mxu3 %v6231_v1 }
 0x3b8   :  { %760 = vmatpush.msrb.mxu3 %v6232_v53 }
 0x3b9   :  { %5849 = vmatpush.xpose.msk.msrb.mxu1 %vm525_vm12, %v1784_v2 }
 0x3bb   :  { %v1782_v3 = vpop.permute.xlu0 %1781  ;;  %v6235_v4 = vpop.permute.xlu1 %6234  ;;  %5847 = vmatmul.msk.f32.gmra.mxu0 %vm525_vm12, %v1743_v59 }
 0x3bc   :  { %v6236_v6 = vunpack.i.l.bf16 %v6235_v4  ;;  %5850 = vmatmul.msk.f32.vlgmr.msrb.gmra.mxu1 %vm525_vm12, %v1780_v61  ;;  %v6237_v7 = vunpack.i.h.bf16 %v6235_v4 }
 0x3be   :  { %1007 = vmatpush.msra.mxu3 %v6236_v6 }
 0x3c0   :  { %1008 = vmatpush.msra.mxu3 %v6237_v7 }
 0x3c3   :  { %v6210_v8 = vpop.permute.xlu0 %6209 }
 0x3c4   :  { %5851 = vmatmul.msk.f32.gmra.mxu1 %vm525_vm12, %v1782_v3  ;;  %v6211_v10 = vunpack.i.l.bf16 %v6210_v8  ;;  %v6212_v11 = vunpack.i.h.bf16 %v6210_v8 }
 0x3c6   :  { %722 = vmatpush.msrb.mxu2 %v6211_v10 }
 0x3c8   :  { %723 = vmatpush.msrb.mxu2 %v6212_v11 }
 0x3ca   :  { %972 = vmatpush.msra.mxu2 %v6216_v12 }
 0x3cc   :  { %973 = vmatpush.msra.mxu2 %v6217_v13 }
 0x3d8   :  { %v551_v14 = vpop.f32.mrf.mxu0 }
 0x3d9   :  { %v7205_v15 = vmul.f32 0.25, %v551_v14 }
 0x3db   :  { %v598_v16 = vsel %vm525_vm12, %v7205_v15, -inf }
 0x3dc   :  { %599 = vmax.xlane.f32.xlu2 %v598_v16  ;;  %v591_v22 = vpop.f32.mrf.mxu1 }
 0x3dd   :  { %v7213_v23 = vmul.f32 0.25, %v591_v22 }
 0x3df   :  { %v607_v26 = vsel %vm525_vm12, %v7213_v23, -inf }
 0x3e0   :  { %v554_v17 = vpop.f32.mrf.mxu0 }
 0x3e1   :  { %v7209_v18 = vmul.f32 0.25, %v554_v17 }
 0x3e3   :  { %v601_v21 = vsel %vm525_vm12, %v7209_v18, -inf }
 0x3e4   :  { %602 = vmax.xlane.f32.xlu1 %v601_v21 }
 0x3e8   :  { %v588_v24 = vpop.f32.mrf.mxu0 }
 0x3e9   :  { %v7215_v25 = vmul.f32 0.25, %v588_v24 }
 0x3eb   :  { %v604_v27 = vsel %vm525_vm12, %v7215_v25, -inf }
 0x3ec   :  { %608 = vmax.xlane.f32.xlu1 %v607_v26  ;;  %605 = vmax.xlane.f32.xlu0 %v604_v27  ;;  %v840_v31 = vpop.f32.mrf.mxu1 }
 0x3ed   :  { %v7225_v32 = vmul.f32 0.25, %v840_v31 }
 0x3ef   :  { %v856_v38 = vsel %vm525_vm12, %v7225_v32, -inf }
 0x3f0   :  { %v801_v28 = vpop.f32.mrf.mxu0 }
 0x3f1   :  { %v7221_v29 = vmul.f32 0.25, %v801_v28 }
 0x3f3   :  { %v850_v30 = vsel %vm525_vm12, %v7221_v29, -inf }
 0x3f4   :  { %851 = vmax.xlane.f32.xlu2 %v850_v30 }
 0x3f8   :  { %v804_v34 = vpop.f32.mrf.mxu0 }
 0x3f9   :  { %v7227_v36 = vmul.f32 0.25, %v804_v34 }
 0x3fb   :  { %v853_v37 = vsel %vm525_vm12, %v7227_v36, -inf }
 0x3fc   :  { %854 = vmax.xlane.f32.xlu0 %v853_v37  ;;  %857 = vmax.xlane.f32.xlu2 %v856_v38 }
 0x400   :  { %v1045_v39 = vpop.f32.mrf.mxu0 }
 0x401   :  { %v7233_v40 = vmul.f32 0.25, %v1045_v39  ;;  %v843_v41 = vpop.f32.mrf.mxu1  ;;  %v7301_v39 = vpop.permute.xlu2 %6219 }
 0x402   :  { %v7235_v42 = vmul.f32 0.25, %v843_v41  ;;  %v7303_v41 = vpop.permute.xlu0 %6224 }
 0x403   :  { %v1090_v43 = vsel %vm525_vm12, %v7233_v40, -inf }
 0x404   :  { %1091 = vmax.xlane.f32.xlu1 %v1090_v43  ;;  %v859_v44 = vsel %vm525_vm12, %v7235_v42, -inf }
 0x405   :  { %860 = vmax.xlane.f32.xlu0 %v859_v44 }
 0x408   :  { %v1048_v46 = vpop.f32.mrf.mxu0 }
 0x409   :  { %v7241_v47 = vmul.f32 0.25, %v1048_v46  ;;  %v1080_v49 = vpop.f32.mrf.mxu1 }
 0x40a   :  { %v7243_v50 = vmul.f32 0.25, %v1080_v49  ;;  %v7306_v49 = vpop.permute.xlu0 %6239 }
 0x40b   :  { %v1093_v51 = vsel %vm525_vm12, %v7241_v47, -inf }
 0x40c   :  { %1094 = vmax.xlane.f32.xlu2 %v1093_v51  ;;  %v1096_v52 = vsel %vm525_vm12, %v7243_v50, -inf }
 0x40d   :  { %1097 = vmax.xlane.f32.xlu1 %v1096_v52 }
 0x410   :  { %v1289_v54 = vpop.f32.mrf.mxu0 }
 0x411   :  { %v7249_v48 = vmul.f32 0.25, %v1289_v54  ;;  %v1083_v55 = vpop.f32.mrf.mxu1 }
 0x412   :  { %v7251_v56 = vmul.f32 0.25, %v1083_v55 }
 0x413   :  { %v1338_v57 = vsel %vm525_vm12, %v7249_v48, -inf }
 0x414   :  { %1339 = vmax.xlane.f32.xlu0 %v1338_v57  ;;  %v1099_v58 = vsel %vm525_vm12, %v7251_v56, -inf }
 0x415   :  { %1100 = vmax.xlane.f32.xlu1 %v1099_v58 }
 0x418   :  { %v1292_v59 = vpop.f32.mrf.mxu0 }
 0x419   :  { %v7257_v60 = vmul.f32 0.25, %v1292_v59  ;;  %v1328_v61 = vpop.f32.mrf.mxu1 }
 0x41a   :  { %v7259_v62 = vmul.f32 0.25, %v1328_v61 }
 0x41b   :  { %v1341_v63 = vsel %vm525_vm12, %v7257_v60, -inf }
 0x41c   :  { %1342 = vmax.xlane.f32.xlu0 %v1341_v63  ;;  %v1344_v0 = vsel %vm525_vm12, %v7259_v62, -inf }
 0x41d   :  { %1345 = vmax.xlane.f32.xlu1 %v1344_v0 }
 0x420   :  { %v1537_v1 = vpop.f32.mrf.mxu0 }
 0x421   :  { %v7265_v53 = vmul.f32 0.25, %v1537_v1  ;;  %v1331_v2 = vpop.f32.mrf.mxu1 }
 0x422   :  { %v7267_v3 = vmul.f32 0.25, %v1331_v2 }
 0x423   :  { %v1586_v4 = vsel %vm525_vm12, %v7265_v53, -inf }
 0x424   :  { %1587 = vmax.xlane.f32.xlu0 %v1586_v4  ;;  %v1347_v6 = vsel %vm525_vm12, %v7267_v3, -inf }
 0x425   :  { %1348 = vmax.xlane.f32.xlu2 %v1347_v6 }
 0x428   :  { %v1540_v7 = vpop.f32.mrf.mxu0 }
 0x429   :  { %v7273_v8 = vmul.f32 0.25, %v1540_v7  ;;  %v1576_v9 = vpop.f32.mrf.mxu1 }
 0x42a   :  { %v7275_v10 = vmul.f32 0.25, %v1576_v9 }
 0x42b   :  { %v1589_v11 = vsel %vm525_vm12, %v7273_v8, -inf }
 0x42c   :  { %1590 = vmax.xlane.f32.xlu1 %v1589_v11  ;;  %v1592_v12 = vsel %vm525_vm12, %v7275_v10, -inf }
 0x42d   :  { %1593 = vmax.xlane.f32.xlu2 %v1592_v12 }
 0x430   :  { %v1773_v13 = vpop.f32.mrf.mxu0 }
 0x431   :  { %v7281_v14 = vmul.f32 0.25, %v1773_v13  ;;  %v1579_v16 = vpop.f32.mrf.mxu1 }
 0x432   :  { %v7283_v17 = vmul.f32 0.25, %v1579_v16 }
 0x433   :  { %v1822_v21 = vsel %vm525_vm12, %v7281_v14, -inf }
 0x434   :  { %1823 = vmax.xlane.f32.xlu0 %v1822_v21  ;;  %v1595_v22 = vsel %vm525_vm12, %v7283_v17, -inf }
 0x435   :  { %1596 = vmax.xlane.f32.xlu1 %v1595_v22 }
 0x438   :  { %v1776_v24 = vpop.f32.mrf.mxu0 }
 0x439   :  { %v7289_v26 = vmul.f32 0.25, %v1776_v24  ;;  %v1812_v27 = vpop.f32.mrf.mxu1 }
 0x43a   :  { %v7291_v28 = vmul.f32 0.25, %v1812_v27 }
 0x43b   :  { %v1825_v30 = vsel %vm525_vm12, %v7289_v26, -inf }
 0x43c   :  { %1826 = vmax.xlane.f32.xlu2 %v1825_v30  ;;  %v1828_v31 = vsel %vm525_vm12, %v7291_v28, -inf }
 0x43d   :  { %1829 = vmax.xlane.f32.xlu0 %v1828_v31 }
 0x441   :  { %v1815_v34 = vpop.f32.mrf.mxu1 }
 0x442   :  { %v7297_v37 = vmul.f32 0.25, %v1815_v34 }
 0x444   :  { %v1831_v38 = vsel %vm525_vm12, %v7297_v37, -inf }
 0x445   :  { %1832 = vmax.xlane.f32.xlu0 %v1831_v38 }
 0x44f   :  { %v600_v43 = vpop.xlane.xlu2 %599 }
 0x450   :  { %v610_v44 = vsub.f32 %v7205_v15, %v600_v43 }
 0x452   :  { %v614_v46 = vmul.f32 1.442695, %v610_v44 }
 0x454   :  { %6353 = vpow2.f32 %v614_v46 }
 0x457   :  { %v603_v51 = vpop.xlane.xlu1 %602 }
 0x458   :  { %v611_v52 = vsub.f32 %v7209_v18, %v603_v51 }
 0x45a   :  { %v7309_v54 = vpop.eup %6353  ;;  %v616_v55 = vmul.f32 1.442695, %v611_v52 }
 0x45b   :  { %v622_v57 = vsel %vm525_vm12, %v7309_v54, 0.0 }
 0x45c   :  { %6355 = vpow2.f32 %v616_v55  ;;  %623 = vadd.xlane.f32.xlu2 %v622_v57 }
 0x45f   :  { %v606_v58 = vpop.xlane.xlu0 %605  ;;  %v609_v59 = vpop.xlane.xlu1 %608 }
 0x460   :  { %v612_v61 = vsub.f32 %v7215_v25, %v606_v58  ;;  %v613_v0 = vsub.f32 %v7213_v23, %v609_v59 }
 0x462   :  { %v7314_v15 = vpop.eup %6355  ;;  %v618_v63 = vmul.f32 1.442695, %v612_v61  ;;  %v620_v1 = vmul.f32 1.442695, %v613_v0 }
 0x463   :  { %v625_v18 = vsel %vm525_vm12, %v7314_v15, 0.0 }
 0x464   :  { %626 = vadd.xlane.f32.xlu2 %v625_v18  ;;  %6357 = vpow2.f32 %v618_v63 }
 0x465   :  { %6359 = vpow2.f32 %v620_v1 }
 0x467   :  { %v852_v2 = vpop.xlane.xlu2 %851 }
 0x468   :  { %v862_v4 = vsub.f32 %v7221_v29, %v852_v2 }
 0x46a   :  { %v866_v6 = vmul.f32 1.442695, %v862_v4  ;;  %v7320_v7 = vpop.eup %6357 }
 0x46b   :  { %v628_v25 = vsel %vm525_vm12, %v7320_v7, 0.0  ;;  %v7325_v12 = vpop.eup %6359 }
 0x46c   :  { %6361 = vpow2.f32 %v866_v6  ;;  %629 = vadd.xlane.f32.xlu2 %v628_v25  ;;  %v631_v22 = vsel %vm525_vm12, %v7325_v12, 0.0 }
 0x46f   :  { %v855_v9 = vpop.xlane.xlu0 %854  ;;  %v858_v23 = vpop.xlane.xlu2 %857 }
 0x470   :  { %v864_v11 = vsub.f32 %v7225_v32, %v858_v23  ;;  %v863_v29 = vsub.f32 %v7227_v36, %v855_v9 }
 0x472   :  { %v7327_v13 = vpop.eup %6361  ;;  %v870_v16 = vmul.f32 1.442695, %v864_v11  ;;  %v868_v24 = vmul.f32 1.442695, %v863_v29 }
 0x473   :  { %v874_v21 = vsel %vm525_vm12, %v7327_v13, 0.0 }
 0x474   :  { %875 = vadd.xlane.f32.xlu1 %v874_v21  ;;  %6363 = vpow2.f32 %v870_v16  ;;  %632 = vadd.xlane.f32.xlu2 %v631_v22 }
 0x475   :  { %6365 = vpow2.f32 %v868_v24 }
 0x477   :  { %v1092_v27 = vpop.xlane.xlu1 %1091 }
 0x478   :  { %v1102_v32 = vsub.f32 %v7233_v40, %v1092_v27  ;;  %v861_v30 = vpop.xlane.xlu0 %860 }
 0x479   :  { %v865_v31 = vsub.f32 %v7235_v42, %v861_v30 }
 0x47a   :  { %v1106_v34 = vmul.f32 1.442695, %v1102_v32  ;;  %v7336_v38 = vpop.eup %6363 }
 0x47b   :  { %v872_v36 = vmul.f32 1.442695, %v865_v31  ;;  %v880_v43 = vsel %vm525_vm12, %v7336_v38, 0.0  ;;  %v7340_v51 = vpop.eup %6365 }
 0x47c   :  { %6367 = vpow2.f32 %v1106_v34  ;;  %881 = vadd.xlane.f32.xlu1 %v880_v43  ;;  %v877_v59 = vsel %vm525_vm12, %v7340_v51, 0.0 }
 0x47d   :  { %6369 = vpow2.f32 %v872_v36 }
 0x47f   :  { %v1095_v44 = vpop.xlane.xlu2 %1094 }
 0x480   :  { %v1098_v46 = vpop.xlane.xlu1 %1097  ;;  %v1103_v55 = vsub.f32 %v7241_v47, %v1095_v44 }
 0x481   :  { %v1104_v40 = vsub.f32 %v7243_v50, %v1098_v46 }
 0x482   :  { %v7343_v52 = vpop.eup %6367  ;;  %v1108_v50 = vmul.f32 1.442695, %v1103_v55 }
 0x483   :  { %v7345_v42 = vpop.eup %6369  ;;  %v1110_v57 = vmul.f32 1.442695, %v1104_v40  ;;  %v1114_v58 = vsel %vm525_vm12, %v7343_v52, 0.0 }
 0x484   :  { %1115 = vadd.xlane.f32.xlu2 %v1114_v58  ;;  %v883_v61 = vsel %vm525_vm12, %v7345_v42, 0.0  ;;  %878 = vadd.xlane.f32.xlu1 %v877_v59 }
 0x485   :  { %6371 = vpow2.f32 %v1110_v57  ;;  %884 = vadd.xlane.f32.xlu0 %v883_v61 }
 0x486   :  { %6373 = vpow2.f32 %v1108_v50 }
 0x487   :  { %v1340_v63 = vpop.xlane.xlu0 %1339 }
 0x488   :  { %v1101_v0 = vpop.xlane.xlu1 %1100  ;;  %v1350_v23 = vsub.f32 %v7249_v48, %v1340_v63 }
 0x489   :  { %v1105_v47 = vsub.f32 %v7251_v56, %v1101_v0 }
 0x48a   :  { %v1354_v56 = vmul.f32 1.442695, %v1350_v23 }
 0x48b   :  { %v7354_v18 = vpop.eup %6371  ;;  %v1112_v2 = vmul.f32 1.442695, %v1105_v47 }
 0x48c   :  { %v1120_v1 = vsel %vm525_vm12, %v7354_v18, 0.0  ;;  %v7359_v25 = vpop.eup %6373 }
 0x48d   :  { %1121 = vadd.xlane.f32.xlu0 %v1120_v1  ;;  %6375 = vpow2.f32 %v1112_v2  ;;  %v1117_v16 = vsel %vm525_vm12, %v7359_v25, 0.0 }
 0x48f   :  { %v1343_v4 = vpop.xlane.xlu0 %1342 }
 0x490   :  { %v1346_v6 = vpop.xlane.xlu1 %1345  ;;  %v1351_v48 = vsub.f32 %v7257_v60, %v1343_v4 }
 0x491   :  { %v1352_v9 = vsub.f32 %v7259_v62, %v1346_v6 }
 0x492   :  { %v1356_v31 = vmul.f32 1.442695, %v1351_v48 }
 0x493   :  { %v1358_v11 = vmul.f32 1.442695, %v1352_v9  ;;  %v7366_v24 = vpop.eup %6375 }
 0x494   :  { %v1123_v30 = vsel %vm525_vm12, %v7366_v24, 0.0 }
 0x495   :  { %6377 = vpow2.f32 %v1358_v11  ;;  %1118 = vadd.xlane.f32.xlu0 %v1117_v16 }
 0x496   :  { %6379 = vpow2.f32 %v1354_v56 }
 0x497   :  { %v1588_v29 = vpop.xlane.xlu0 %1587 }
 0x498   :  { %v1598_v21 = vsub.f32 %v7265_v53, %v1588_v29  ;;  %v1349_v22 = vpop.xlane.xlu2 %1348 }
 0x499   :  { %v1353_v40 = vsub.f32 %v7267_v3, %v1349_v22  ;;  %v7411_v22 = vpop.f32.mrf.mxu3 }
 0x49a   :  { %v1602_v27 = vmul.f32 1.442695, %v1598_v21 }
 0x49b   :  { %v7368_v32 = vpop.eup %6377  ;;  %v1360_v58 = vmul.f32 1.442695, %v1353_v40 }
 0x49c   :  { %6381 = vpow2.f32 %v1602_v27  ;;  %v1368_v62 = vsel %vm525_vm12, %v7368_v32, 0.0  ;;  %v7376_v43 = vpop.eup %6379 }
 0x49d   :  { %1369 = vadd.xlane.f32.xlu1 %v1368_v62  ;;  %1124 = vadd.xlane.f32.xlu0 %v1123_v30  ;;  %6383 = vpow2.f32 %v1356_v31 }
 0x49f   :  { %v1591_v53 = vpop.xlane.xlu1 %1590 }
 0x4a0   :  { %v1599_v34 = vsub.f32 %v7273_v8, %v1591_v53  ;;  %v1594_v36 = vpop.xlane.xlu2 %1593  ;;  %v1362_v8 = vsel %vm525_vm12, %v7376_v43, 0.0 }
 0x4a1   :  { %v1600_v44 = vsub.f32 %v7275_v10, %v1594_v36  ;;  %v7418_v30 = vpop.f32.mrf.mxu3 }
 0x4a2   :  { %v7379_v46 = vpop.eup %6381  ;;  %v1604_v60 = vmul.f32 1.442695, %v1599_v34 }
 0x4a3   :  { %v1606_v55 = vmul.f32 1.442695, %v1600_v44  ;;  %v1610_v57 = vsel %vm525_vm12, %v7379_v46, 0.0  ;;  %v7386_v61 = vpop.eup %6383 }
 0x4a4   :  { %6385 = vpow2.f32 %v1604_v60  ;;  %1611 = vadd.xlane.f32.xlu2 %v1610_v57  ;;  %v1365_v2 = vsel %vm525_vm12, %v7386_v61, 0.0 }
 0x4a5   :  { %6387 = vpow2.f32 %v1606_v55  ;;  %1363 = vadd.xlane.f32.xlu0 %v1362_v8 }
 0x4a6   :  { %6389 = vpow2.f32 %v1360_v58 }
 0x4a7   :  { %v1824_v59 = vpop.xlane.xlu0 %1823 }
 0x4a8   :  { %v1597_v10 = vpop.xlane.xlu1 %1596  ;;  %v1834_v0 = vsub.f32 %v7281_v14, %v1824_v59 }
 0x4a9   :  { %v1601_v50 = vsub.f32 %v7283_v17, %v1597_v10  ;;  %v7431_v60 = vpop.f32.mrf.mxu3 }
 0x4aa   :  { %v7389_v63 = vpop.eup %6385  ;;  %v1838_v17 = vmul.f32 1.442695, %v1834_v0 }
 0x4ab   :  { %v7391_v3 = vpop.eup %6387  ;;  %v1608_v47 = vmul.f32 1.442695, %v1601_v50  ;;  %v1613_v1 = vsel %vm525_vm12, %v7389_v63, 0.0 }
 0x4ac   :  { %1614 = vadd.xlane.f32.xlu1 %v1613_v1  ;;  %v1616_v4 = vsel %vm525_vm12, %v7391_v3, 0.0  ;;  %v7400_v9 = vpop.eup %6389 }
 0x4ad   :  { %6391 = vpow2.f32 %v1608_v47  ;;  %1366 = vadd.xlane.f32.xlu0 %v1365_v2  ;;  %1617 = vadd.xlane.f32.xlu2 %v1616_v4  ;;  %v1371_v16 = vsel %vm525_vm12, %v7400_v9, 0.0 }
 0x4ae   :  { %6393 = vpow2.f32 %v1838_v17 }
 0x4af   :  { %v1827_v29 = vpop.xlane.xlu2 %1826 }
 0x4b0   :  { %v1830_v6 = vpop.xlane.xlu0 %1829  ;;  %v1835_v27 = vsub.f32 %v7289_v26, %v1827_v29  ;;  %v6248_v26 = vpack.i.bf16 %v7411_v22, %v7418_v30 }
 0x4b1   :  { %v1836_v14 = vsub.f32 %v7291_v28, %v1830_v6 }
 0x4b2   :  { %v1840_v48 = vmul.f32 1.442695, %v1835_v27 }
 0x4b3   :  { %v7402_v23 = vpop.eup %6391  ;;  %v1842_v56 = vmul.f32 1.442695, %v1836_v14  ;;  %v7434_v14 = vpop.f32.mrf.mxu3 }
 0x4b4   :  { %v1619_v11 = vsel %vm525_vm12, %v7402_v23, 0.0  ;;  %v7409_v21 = vpop.eup %6393  ;;  %v6253_v27 = vpack.i.bf16 %v7431_v60, %v7434_v14 }
 0x4b5   :  { %1620 = vadd.xlane.f32.xlu1 %v1619_v11  ;;  %1372 = vadd.xlane.f32.xlu0 %v1371_v16  ;;  %6395 = vpow2.f32 %v1842_v56  ;;  %v1846_v28 = vsel %vm525_vm12, %v7409_v21, 0.0  ;;  %v6221_v56 = vunpack.i.l.bf16 %v7301_v39 }
 0x4b6   :  { %6397 = vpow2.f32 %v1840_v48  ;;  %v6222_v48 = vunpack.i.h.bf16 %v7301_v39 }
 0x4bb   :  { %v7416_v62 = vpop.eup %6395 }
 0x4bc   :  { %v1852_v31 = vsel %vm525_vm12, %v7416_v62, 0.0  ;;  %v7426_v53 = vpop.eup %6397 }
 0x4bd   :  { %1847 = vadd.xlane.f32.xlu1 %v1846_v28  ;;  %v1849_v34 = vsel %vm525_vm12, %v7426_v53, 0.0 }
 0x4c5   :  { %1853 = vadd.xlane.f32.xlu1 %v1852_v31  ;;  %6244 = vrot.lane.b32.xlu2 %v7123_v19, %s6681_s28  ;;  %v1833_v19 = vpop.xlane.xlu0 %1832 }
 0x4c6   :  { %v1837_v10 = vsub.f32 %v7297_v37, %v1833_v19 }
 0x4c8   :  { %v1844_v4 = vmul.f32 1.442695, %v1837_v10 }
 0x4c9   :  { %6249 = vrot.lane.b32.xlu0 %v6248_v26, %s6683_s4 }
 0x4cd   :  { %1850 = vadd.xlane.f32.xlu1 %v1849_v34 }
 0x4cf   :  { %v624_v36 = vpop.xlane.xlu2 %623 }
 0x4d0   :  { %6399 = vrcp.f32 %v624_v36  ;;  %v645_v8 = vand.u32 2147483648, %v624_v36  ;;  %v643_v59 = vand.u32 2147483647, %v624_v36  ;;  %vm639_vm14 = vweird.f32 %v624_v36 }
 0x4d2   :  { %v646_v47 = vor.u32 1.1754944e-38, %v645_v8  ;;  %vm644_vm1 = vcmp.eq.f32.partialorder %v643_v59, 8.507059e+37 }
 0x4d6   :  { %v6400_v44 = vpop.eup %6399 }
 0x4d7   :  { %v635_v40 = vmul.f32 %v6400_v44, %v624_v36  ;;  %v627_v55 = vpop.xlane.xlu2 %626  ;;  %vm640_vm13 = vweird.f32 %v6400_v44 }
 0x4d8   :  { %6401 = vrcp.f32 %v627_v55  ;;  %vm641_vm15 = vmor %vm639_vm14, %vm640_vm13  ;;  %v660_v29 = vand.u32 2147483648, %v627_v55  ;;  %v658_v28 = vand.u32 2147483647, %v627_v55  ;;  %vm654_vm3 = vweird.f32 %v627_v55 }
 0x4d9   :  { %v636_v57 = vsub.f32 1.0, %v635_v40 }
 0x4da   :  { %v661_v36 = vor.u32 1.1754944e-38, %v660_v29  ;;  %vm659_vm5 = vcmp.eq.f32.partialorder %v658_v28, 8.507059e+37 }
 0x4db   :  { %v637_v58 = vmul.f32 %v6400_v44, %v636_v57 }
 0x4dd   :  { %v638_v50 = vadd.f32 %v6400_v44, %v637_v58 }
 0x4de   :  { %v6402_v0 = vpop.eup %6401 }
 0x4df   :  { %v650_v1 = vmul.f32 %v6402_v0, %v627_v55  ;;  %v642_v2 = vsel %vm641_vm15, %v6400_v44, %v638_v50  ;;  %v630_v17 = vpop.xlane.xlu2 %629  ;;  %vm655_vm2 = vweird.f32 %v6402_v0 }
 0x4e0   :  { %v647_v6 = vsel %vm644_vm1, %v646_v47, %v642_v2  ;;  %6403 = vrcp.f32 %v630_v17  ;;  %vm656_vm4 = vmor %vm654_vm3, %vm655_vm2  ;;  %v675_v58 = vand.u32 2147483648, %v630_v17  ;;  %v673_v10 = vand.u32 2147483647, %v630_v17 }
 0x4e1   :  { %v651_v11 = vsub.f32 1.0, %v650_v1  ;;  %v648_v16 = vmul.f32 %v7309_v54, %v647_v6  ;;  %6405 = vpow2.f32 %v1844_v4  ;;  %vm669_vm7 = vweird.f32 %v630_v17 }
 0x4e2   :  { %v676_v2 = vor.u32 1.1754944e-38, %v675_v58  ;;  %vm674_vm9 = vcmp.eq.f32.partialorder %v673_v10, 8.507059e+37 }
 0x4e3   :  { %v652_v37 = vmul.f32 %v6402_v0, %v651_v11  ;;  %5792 = vmatmul.msk.f32.vlgmr.msrb.gmra.mxu2 %vm525_vm12, %v648_v16 }
 0x4e4   :  { %1212 = vmatpush.msrb.mxu2 %v6221_v56 }
 0x4e5   :  { %v653_v31 = vadd.f32 %v6402_v0, %v652_v37  ;;  %v6241_v37 = vunpack.i.l.bf16 %v7306_v49 }
 0x4e6   :  { %6254 = vrot.lane.b32.xlu1 %v6253_v27, %s6683_s4  ;;  %v6404_v54 = vpop.eup %6403  ;;  %1213 = vmatpush.msrb.mxu2 %v6222_v48 }
 0x4e7   :  { %v7443_v26 = vpop.xlane.xlu1 %875  ;;  %v657_v34 = vsel %vm656_vm4, %v6402_v0, %v653_v31  ;;  %v665_v44 = vmul.f32 %v6404_v54, %v630_v17  ;;  %v633_v40 = vpop.xlane.xlu2 %632  ;;  %vm670_vm6 = vweird.f32 %v6404_v54 }
 0x4e8   :  { %6407 = vrcp.f32 %v7443_v26  ;;  %v662_v19 = vsel %vm659_vm5, %v661_v36, %v657_v34  ;;  %v7446_v39 = vpop.eup %6405  ;;  %vm671_vm8 = vmor %vm669_vm7, %vm670_vm6  ;;  %vm891_vm11 = vweird.f32 %v7443_v26  ;;  %v897_v27 = vand.u32 2147483648, %v7443_v26 }
 0x4e9   :  { %6409 = vrcp.f32 %v633_v40  ;;  %v666_v57 = vsub.f32 1.0, %v665_v44  ;;  %v663_v55 = vmul.f32 %v7314_v15, %v662_v19  ;;  %v1855_v59 = vsel %vm525_vm12, %v7446_v39, 0.0 }
 0x4ea   :  { %v690_v48 = vand.u32 2147483648, %v633_v40  ;;  %v688_v34 = vand.u32 2147483647, %v633_v40  ;;  %v6242_v36 = vunpack.i.h.bf16 %v7306_v49  ;;  %vm684_vm15 = vweird.f32 %v633_v40 }
 0x4eb   :  { %v667_v8 = vmul.f32 %v6404_v54, %v666_v57  ;;  %5793 = vmatmul.msk.f32.gmra.mxu2 %vm525_vm12, %v663_v55 }
 0x4ec   :  { %vm689_vm3 = vcmp.eq.f32.partialorder %v688_v34, 8.507059e+37 }
 0x4ed   :  { %v668_v0 = vadd.f32 %v6404_v54, %v667_v8 }
 0x4ee   :  { %v6408_v50 = vpop.eup %6407  ;;  %1856 = vadd.xlane.f32.xlu2 %v1855_v59  ;;  %v691_v59 = vor.u32 1.1754944e-38, %v690_v48 }
 0x4ef   :  { %v6410_v47 = vpop.eup %6409  ;;  %v887_v1 = vmul.f32 %v6408_v50, %v7443_v26  ;;  %v7453_v15 = vpop.xlane.xlu1 %881  ;;  %v672_v6 = vsel %vm671_vm8, %v6404_v54, %v668_v0  ;;  %vm892_vm10 = vweird.f32 %v6408_v50  ;;  %v895_v54 = vand.u32 2147483647, %v7443_v26 }
 0x4f0   :  { %v680_v4 = vmul.f32 %v6410_v47, %v633_v40  ;;  %6411 = vrcp.f32 %v7453_v15  ;;  %v677_v56 = vsel %vm674_vm9, %v676_v2, %v672_v6  ;;  %vm685_vm13 = vweird.f32 %v6410_v47  ;;  %vm7463_vm14 = vmor %vm891_vm11, %vm892_vm10 }
 0x4f1   :  { %v888_v11 = vsub.f32 1.0, %v887_v1  ;;  %v678_v29 = vmul.f32 %v7320_v7, %v677_v56  ;;  %v898_v26 = vor.u32 1.1754944e-38, %v897_v27  ;;  %vm686_vm1 = vmor %vm684_vm15, %vm685_vm13  ;;  %vm896_vm2 = vcmp.eq.f32.partialorder %v895_v54, 8.507059e+37 }
 0x4f2   :  { %v681_v16 = vsub.f32 1.0, %v680_v4  ;;  %v6226_v4 = vunpack.i.l.bf16 %v7303_v41  ;;  %v6227_v56 = vunpack.i.h.bf16 %v7303_v41  ;;  %vm921_vm5 = vweird.f32 %v7453_v15 }
 0x4f3   :  { %v889_v17 = vmul.f32 %v6408_v50, %v888_v11  ;;  %5794 = vmatmul.msk.f32.vlgmr.msrb.gmra.mxu3 %vm525_vm12, %v678_v29  ;;  %v927_v11 = vand.u32 2147483648, %v7453_v15 }
 0x4f4   :  { %v682_v28 = vmul.f32 %v6410_v47, %v681_v16  ;;  %1247 = vmatpush.msrb.mxu3 %v6241_v37  ;;  %v925_v16 = vand.u32 2147483647, %v7453_v15 }
 0x4f5   :  { %v890_v31 = vadd.f32 %v6408_v50, %v889_v17  ;;  %v928_v27 = vor.u32 1.1754944e-38, %v927_v11 }
 0x4f6   :  { %v683_v7 = vadd.f32 %v6410_v47, %v682_v28  ;;  %v6412_v19 = vpop.eup %6411  ;;  %1248 = vmatpush.msrb.mxu3 %v6242_v36  ;;  %vm926_vm7 = vcmp.eq.f32.partialorder %v925_v16, 8.507059e+37 }
 0x4f7   :  { %v894_v57 = vsel %vm7463_vm14, %v6408_v50, %v890_v31  ;;  %v7469_v55 = vpop.xlane.xlu2 %1115  ;;  %v917_v8 = vmul.f32 %v6412_v19, %v7453_v15  ;;  %v7472_v58 = vpop.xlane.xlu1 %878  ;;  %vm922_vm4 = vweird.f32 %v6412_v19 }
 0x4f8   :  { %6413 = vrcp.f32 %v7469_v55  ;;  %v7475_v49 = vpop.xlane.xlu0 %884  ;;  %v687_v10 = vsel %vm686_vm1, %v6410_v47, %v683_v7  ;;  %v899_v0 = vsel %vm896_vm2, %v898_v26, %v894_v57  ;;  %vm923_vm6 = vmor %vm921_vm5, %vm922_vm4  ;;  %v910_v44 = vand.u32 2147483647, %v7472_v58 }
 0x4f9   :  { %6415 = vrcp.f32 %v7472_v58  ;;  %v918_v50 = vsub.f32 1.0, %v917_v8  ;;  %v692_v40 = vsel %vm689_vm3, %v691_v59, %v687_v10  ;;  %v900_v2 = vmul.f32 %v7327_v13, %v899_v0 }
 0x4fa   :  { %6417 = vrcp.f32 %v7475_v49  ;;  %v693_v1 = vmul.f32 %v7325_v12, %v692_v40  ;;  %v912_v7 = vand.u32 2147483648, %v7472_v58  ;;  %v942_v26 = vand.u32 2147483648, %v7475_v49 }
 0x4fb   :  { %v919_v6 = vmul.f32 %v6412_v19, %v918_v50  ;;  %5804 = vmatmul.msk.f32.vlgmr.msra.gmra.mxu2 %vm525_vm12, %v900_v2  ;;  %vm1131_vm9 = vweird.f32 %v7469_v55  ;;  %v940_v59 = vand.u32 2147483647, %v7475_v49  ;;  %vm906_vm11 = vweird.f32 %v7472_v58 }
 0x4fc   :  { %5795 = vmatmul.msk.f32.gmra.mxu3 %vm525_vm12, %v693_v1  ;;  %1460 = vmatpush.msra.mxu2 %v6226_v4  ;;  %vm936_vm13 = vweird.f32 %v7475_v49  ;;  %vm911_vm1 = vcmp.eq.f32.partialorder %v910_v44, 8.507059e+37  ;;  %v913_v40 = vor.u32 1.1754944e-38, %v912_v7  ;;  %v943_v11 = vor.u32 1.1754944e-38, %v942_v26 }
 0x4fd   :  { %v920_v37 = vadd.f32 %v6412_v19, %v919_v6  ;;  %vm941_vm3 = vcmp.eq.f32.partialorder %v940_v59, 8.507059e+37  ;;  %v1135_v16 = vand.u32 2147483647, %v7469_v55 }
 0x4fe   :  { %v7487_v47 = vpop.eup %6413  ;;  %1461 = vmatpush.msra.mxu2 %v6227_v56 }
 0x4ff   :  { %v6416_v12 = vpop.eup %6415  ;;  %v1127_v13 = vmul.f32 %v7487_v47, %v7469_v55  ;;  %v924_v29 = vsel %vm923_vm6, %v6412_v19, %v920_v37  ;;  %vm1132_vm14 = vweird.f32 %v7487_v47  ;;  %vm1136_vm6 = vcmp.eq.f32.partialorder %v1135_v16, 8.507059e+37 }
 0x500   :  { %v6418_v17 = vpop.eup %6417  ;;  %v902_v28 = vmul.f32 %v6416_v12, %v7472_v58  ;;  %v7494_v48 = vpop.xlane.xlu0 %1121  ;;  %v929_v54 = vsel %vm926_vm7, %v928_v27, %v924_v29  ;;  %vm907_vm8 = vweird.f32 %v6416_v12  ;;  %vm7522_vm4 = vmor %vm1131_vm9, %vm1132_vm14 }
 0x501   :  { %v1128_v31 = vsub.f32 1.0, %v1127_v13  ;;  %v932_v41 = vmul.f32 %v6418_v17, %v7475_v49  ;;  %6419 = vrcp.f32 %v7494_v48  ;;  %v930_v36 = vmul.f32 %v7336_v38, %v929_v54  ;;  %vm908_vm15 = vmor %vm906_vm11, %vm907_vm8 }
 0x502   :  { %v903_v15 = vsub.f32 1.0, %v902_v28  ;;  %vm937_vm10 = vweird.f32 %v6418_v17  ;;  %v1137_v38 = vand.u32 2147483648, %v7469_v55  ;;  %v1167_v28 = vand.u32 2147483648, %v7494_v48 }
 0x503   :  { %v933_v34 = vsub.f32 1.0, %v932_v41  ;;  %v1129_v19 = vmul.f32 %v7487_v47, %v1128_v31  ;;  %vm938_vm2 = vmor %vm936_vm13, %vm937_vm10  ;;  %v1165_v31 = vand.u32 2147483647, %v7494_v48  ;;  %vm1161_vm7 = vweird.f32 %v7494_v48 }
 0x504   :  { %v904_v57 = vmul.f32 %v6416_v12, %v903_v15  ;;  %5806 = vmatmul.msk.f32.vlgmr.msra.gmra.mxu3 %vm525_vm12, %v930_v36 }
 0x505   :  { %v934_v8 = vmul.f32 %v6418_v17, %v933_v34  ;;  %v1130_v1 = vadd.f32 %v7487_v47, %v1129_v19  ;;  %vm1166_vm9 = vcmp.eq.f32.partialorder %v1165_v31, 8.507059e+37 }
 0x506   :  { %v905_v10 = vadd.f32 %v6416_v12, %v904_v57 }
 0x507   :  { %v6420_v50 = vpop.eup %6419  ;;  %v935_v0 = vadd.f32 %v6418_v17, %v934_v8 }
 0x508   :  { %v1157_v2 = vmul.f32 %v6420_v50, %v7494_v48  ;;  %v7512_v4 = vpop.xlane.xlu0 %1118  ;;  %v909_v6 = vsel %vm908_vm15, %v6416_v12, %v905_v10  ;;  %vm1162_vm5 = vweird.f32 %v6420_v50 }
 0x509   :  { %6421 = vrcp.f32 %v7512_v4  ;;  %v914_v58 = vsel %vm911_vm1, %v913_v40, %v909_v6  ;;  %v939_v49 = vsel %vm938_vm2, %v6418_v17, %v935_v0  ;;  %v1134_v17 = vsel %vm7522_vm4, %v7487_v47, %v1130_v1  ;;  %vm1163_vm8 = vmor %vm1161_vm7, %vm1162_vm5 }
 0x50a   :  { %v1158_v56 = vsub.f32 1.0, %v1157_v2  ;;  %v915_v37 = vmul.f32 %v7340_v51, %v914_v58  ;;  %v944_v13 = vsel %vm941_vm3, %v943_v11, %v939_v49  ;;  %v1138_v51 = vor.u32 1.1754944e-38, %v1137_v38 }
 0x50b   :  { %v945_v29 = vmul.f32 %v7345_v42, %v944_v13  ;;  %v1168_v47 = vor.u32 1.1754944e-38, %v1167_v28  ;;  %v1152_v26 = vand.u32 2147483648, %v7512_v4  ;;  %vm1146_vm11 = vweird.f32 %v7512_v4 }
 0x50c   :  { %v1159_v27 = vmul.f32 %v6420_v50, %v1158_v56  ;;  %5805 = vmatmul.msk.f32.gmra.mxu2 %vm525_vm12, %v915_v37  ;;  %v1139_v41 = vsel %vm1136_vm6, %v1138_v51, %v1134_v17 }
 0x50d   :  { %5807 = vmatmul.msk.f32.gmra.mxu3 %vm525_vm12, %v945_v29  ;;  %v1140_v7 = vmul.f32 %v7343_v52, %v1139_v41  ;;  %v1150_v52 = vand.u32 2147483647, %v7512_v4  ;;  %v1153_v40 = vor.u32 1.1754944e-38, %v1152_v26 }
 0x50e   :  { %v1160_v55 = vadd.f32 %v6420_v50, %v1159_v27 }
 0x50f   :  { %v6422_v42 = vpop.eup %6421  ;;  %vm1151_vm14 = vcmp.eq.f32.partialorder %v1150_v52, 8.507059e+37 }
 0x510   :  { %v1164_v15 = vsel %vm1163_vm8, %v6420_v50, %v1160_v55  ;;  %v1142_v54 = vmul.f32 %v6422_v42, %v7512_v4  ;;  %v7536_v34 = vpop.xlane.xlu1 %1369  ;;  %v1125_v36 = vpop.xlane.xlu0 %1124  ;;  %vm1147_vm10 = vweird.f32 %v6422_v42 }
 0x511   :  { %6423 = vrcp.f32 %v7536_v34  ;;  %v1169_v19 = vsel %vm1166_vm9, %v1168_v47, %v1164_v15  ;;  %vm1148_vm13 = vmor %vm1146_vm11, %vm1147_vm10  ;;  %v1182_v58 = vand.u32 2147483648, %v1125_v36  ;;  %v1180_v49 = vand.u32 2147483647, %v1125_v36 }
 0x512   :  { %v1143_v44 = vsub.f32 1.0, %v1142_v54  ;;  %6425 = vrcp.f32 %v1125_v36  ;;  %v1170_v48 = vmul.f32 %v7354_v18, %v1169_v19  ;;  %vm1176_vm1 = vweird.f32 %v1125_v36 }
 0x513   :  { %vm1409_vm2 = vweird.f32 %v7536_v34  ;;  %v1415_v27 = vand.u32 2147483648, %v7536_v34  ;;  %vm1181_vm4 = vcmp.eq.f32.partialorder %v1180_v49, 8.507059e+37  ;;  %v1413_v47 = vand.u32 2147483647, %v7536_v34 }
 0x514   :  { %5816 = vmatmul.msk.f32.vlgmr.msrb.gmra.mxu2 %vm525_vm12, %v1140_v7  ;;  %v1144_v57 = vmul.f32 %v6422_v42, %v1143_v44 }
 0x515   :  { %1702 = vmatpush.msrb.mxu2 %v7418_v30  ;;  %5818 = vmatmul.msk.f32.vlgmr.msrb.gmra.mxu3 %vm525_vm12, %v1170_v48  ;;  %v1416_v26 = vor.u32 1.1754944e-38, %v1415_v27  ;;  %vm1414_vm10 = vcmp.eq.f32.partialorder %v1413_v47, 8.507059e+37 }
 0x516   :  { %v1145_v38 = vadd.f32 %v6422_v42, %v1144_v57 }
 0x517   :  { %v7545_v8 = vpop.eup %6423  ;;  %1703 = vmatpush.msrb.mxu2 %v7411_v22  ;;  %v7548_v59 = vpop.xlane.xlu2 %1611 }
 0x518   :  { %v6426_v18 = vpop.eup %6425  ;;  %v1405_v10 = vmul.f32 %v7545_v8, %v7536_v34  ;;  %v1364_v50 = vpop.xlane.xlu0 %1363  ;;  %v1149_v1 = vsel %vm1148_vm13, %v6422_v42, %v1145_v38  ;;  %vm1410_vm5 = vweird.f32 %v7545_v8 }
 0x519   :  { %v1172_v30 = vmul.f32 %v6426_v18, %v1125_v36  ;;  %6427 = vrcp.f32 %v1364_v50  ;;  %v1154_v2 = vsel %vm1151_vm14, %v1153_v40, %v1149_v1  ;;  %vm1177_vm15 = vweird.f32 %v6426_v18  ;;  %vm7579_vm7 = vmor %vm1409_vm2, %vm1410_vm5 }
 0x51a   :  { %6429 = vrcp.f32 %v7548_v59  ;;  %v1406_v22 = vsub.f32 1.0, %v1405_v10  ;;  %v1155_v6 = vmul.f32 %v7359_v25, %v1154_v2  ;;  %vm1178_vm3 = vmor %vm1176_vm1, %vm1177_vm15  ;;  %v1183_v25 = vor.u32 1.1754944e-38, %v1182_v58 }
 0x51b   :  { %v1173_v0 = vsub.f32 1.0, %v1172_v30  ;;  %v1383_v54 = vand.u32 2147483647, %v1364_v50  ;;  %v1385_v36 = vand.u32 2147483648, %v1364_v50  ;;  %vm1379_vm8 = vweird.f32 %v1364_v50 }
 0x51c   :  { %v1407_v56 = vmul.f32 %v7545_v8, %v1406_v22  ;;  %5817 = vmatmul.msk.f32.gmra.mxu2 %vm525_vm12, %v1155_v6  ;;  %vm1627_vm2 = vweird.f32 %v7548_v59 }
 0x51d   :  { %v1174_v11 = vmul.f32 %v6426_v18, %v1173_v0  ;;  %vm1384_vm11 = vcmp.eq.f32.partialorder %v1383_v54, 8.507059e+37  ;;  %v1386_v10 = vor.u32 1.1754944e-38, %v1385_v36  ;;  %v1631_v54 = vand.u32 2147483647, %v7548_v59 }
 0x51e   :  { %v1408_v31 = vadd.f32 %v7545_v8, %v1407_v56 }
 0x51f   :  { %v6428_v16 = vpop.eup %6427  ;;  %v7558_v4 = vpop.xlane.xlu1 %1614  ;;  %v1175_v37 = vadd.f32 %v6426_v18, %v1174_v11 }
 0x520   :  { %v7560_v13 = vpop.eup %6429  ;;  %v1375_v12 = vmul.f32 %v6428_v16, %v1364_v50  ;;  %v7562_v29 = vpop.xlane.xlu0 %1366  ;;  %vm1380_vm6 = vweird.f32 %v6428_v16 }
 0x521   :  { %v7564_v17 = vpop.xlane.xlu2 %1617  ;;  %6431 = vrcp.f32 %v7562_v29  ;;  %v1179_v51 = vsel %vm1178_vm3, %v6426_v18, %v1175_v37  ;;  %v1623_v55 = vmul.f32 %v7560_v13, %v7548_v59  ;;  %vm7587_vm9 = vmor %vm1379_vm8, %vm1380_vm6  ;;  %v1400_v6 = vand.u32 2147483648, %v7562_v29 }
 0x522   :  { %v1376_v28 = vsub.f32 1.0, %v1375_v12  ;;  %v1184_v42 = vsel %vm1181_vm4, %v1183_v25, %v1179_v51  ;;  %6433 = vrcp.f32 %v7558_v4  ;;  %v1398_v56 = vand.u32 2147483647, %v7562_v29 }
 0x523   :  { %v1185_v15 = vmul.f32 %v7366_v24, %v1184_v42  ;;  %6435 = vrcp.f32 %v7564_v17  ;;  %v1412_v24 = vsel %vm7579_vm7, %v7545_v8, %v1408_v31  ;;  %v1624_v48 = vsub.f32 1.0, %v1623_v55 }
 0x524   :  { %v1377_v41 = vmul.f32 %v6428_v16, %v1376_v28  ;;  %v1417_v22 = vsel %vm1414_vm10, %v1416_v26, %v1412_v24  ;;  %vm1394_vm14 = vweird.f32 %v7562_v29  ;;  %vm1628_vm1 = vweird.f32 %v7560_v13 }
 0x525   :  { %5819 = vmatmul.msk.f32.gmra.mxu3 %vm525_vm12, %v1185_v15  ;;  %v1625_v1 = vmul.f32 %v7560_v13, %v1624_v48  ;;  %vm1399_vm3 = vcmp.eq.f32.partialorder %v1398_v56, 8.507059e+37  ;;  %v1633_v42 = vand.u32 2147483648, %v7548_v59  ;;  %vm7637_vm4 = vmor %vm1627_vm2, %vm1628_vm1  ;;  %vm1632_vm6 = vcmp.eq.f32.partialorder %v1631_v54, 8.507059e+37 }
 0x526   :  { %v1378_v7 = vadd.f32 %v6428_v16, %v1377_v41  ;;  %vm1657_vm7 = vweird.f32 %v7564_v17 }
 0x527   :  { %v6432_v19 = vpop.eup %6431  ;;  %v1626_v27 = vadd.f32 %v7560_v13, %v1625_v1  ;;  %v1634_v57 = vor.u32 1.1754944e-38, %v1633_v42 }
 0x528   :  { %v1382_v34 = vsel %vm7587_vm9, %v6428_v16, %v1378_v7  ;;  %v1390_v38 = vmul.f32 %v6432_v19, %v7562_v29  ;;  %v7594_v52 = vpop.xlane.xlu1 %1620  ;;  %v7596_v18 = vpop.xlane.xlu0 %1372  ;;  %vm1395_vm13 = vweird.f32 %v6432_v19  ;;  %v1418_v16 = vmul.f32 %v7368_v32, %v1417_v22 }
 0x529   :  { %v6245_v50 = vpop.permute.xlu2 %6244  ;;  %v7598_v8 = vpop.eup %6433  ;;  %6437 = vrcp.f32 %v7596_v18  ;;  %v1387_v2 = vsel %vm1384_vm11, %v1386_v10, %v1382_v34  ;;  %vm7617_vm15 = vmor %vm1394_vm14, %vm1395_vm13  ;;  %v1401_v29 = vor.u32 1.1754944e-38, %v1400_v6  ;;  %v1630_v7 = vsel %vm7637_vm4, %v7560_v13, %v1626_v27 }
 0x52a   :  { %v1391_v30 = vsub.f32 1.0, %v1390_v38  ;;  %v6246_v40 = vunpack.i.l.bf16 %v6245_v50  ;;  %v7601_v0 = vpop.eup %6435  ;;  %6439 = vrcp.f32 %v7594_v52  ;;  %v6247_v11 = vunpack.i.h.bf16 %v6245_v50 }
 0x52b   :  { %v1388_v58 = vmul.f32 %v7376_v43, %v1387_v2  ;;  %v1638_v37 = vmul.f32 %v7598_v8, %v7558_v4  ;;  %v1653_v12 = vmul.f32 %v7601_v0, %v7564_v17  ;;  %v1428_v24 = vand.u32 2147483647, %v7596_v18 }
 0x52c   :  { %1495 = vmatpush.msra.mxu3 %v6246_v40  ;;  %v1392_v49 = vmul.f32 %v6432_v19, %v1391_v30  ;;  %v1430_v48 = vand.u32 2147483648, %v7596_v18  ;;  %v1661_v13 = vand.u32 2147483647, %v7564_v17  ;;  %vm1658_vm8 = vweird.f32 %v7601_v0 }
 0x52d   :  { %5828 = vmatmul.msk.f32.vlgmr.msra.gmra.mxu2 %vm525_vm12, %v1388_v58  ;;  %v1639_v41 = vsub.f32 1.0, %v1638_v37  ;;  %v1654_v15 = vsub.f32 1.0, %v1653_v12  ;;  %vm1424_vm9 = vweird.f32 %v7596_v18  ;;  %v1635_v50 = vsel %vm1632_vm6, %v1634_v57, %v1630_v7 }
 0x52e   :  { %1496 = vmatpush.msra.mxu3 %v6247_v11  ;;  %v1393_v25 = vadd.f32 %v6432_v19, %v1392_v49  ;;  %vm1429_vm11 = vcmp.eq.f32.partialorder %v1428_v24, 8.507059e+37  ;;  %v1431_v40 = vor.u32 1.1754944e-38, %v1430_v48  ;;  %vm1643_vm13 = vweird.f32 %v7598_v8 }
 0x52f   :  { %5830 = vmatmul.msk.f32.vlgmr.msra.gmra.mxu3 %vm525_vm12, %v1418_v16  ;;  %v6438_v32 = vpop.eup %6437  ;;  %v1655_v26 = vmul.f32 %v7601_v0, %v1654_v15  ;;  %v1663_v11 = vand.u32 2147483648, %v7564_v17  ;;  %vm1642_vm14 = vweird.f32 %v7558_v4  ;;  %v1636_v12 = vmul.f32 %v7379_v46, %v1635_v50 }
 0x530   :  { %1731 = vmatpush.msrb.mxu3 %v7434_v14  ;;  %v7624_v28 = vpop.xlane.xlu1 %1847  ;;  %v1397_v51 = vsel %vm7617_vm15, %v6432_v19, %v1393_v25  ;;  %v1420_v31 = vmul.f32 %v6438_v32, %v7596_v18  ;;  %v7631_v55 = vpop.eup %6439  ;;  %vm1425_vm5 = vweird.f32 %v6438_v32  ;;  %v1648_v18 = vand.u32 2147483648, %v7558_v4  ;;  %vm7673_vm15 = vmor %vm1657_vm7, %vm1658_vm8 }
 0x531   :  { %6441 = vrcp.f32 %v7624_v28  ;;  %v1402_v14 = vsel %vm1399_vm3, %v1401_v29, %v1397_v51  ;;  %v1668_v19 = vmul.f32 %v7631_v55, %v7594_v52  ;;  %vm1426_vm10 = vmor %vm1424_vm9, %vm1425_vm5  ;;  %v1656_v22 = vadd.f32 %v7601_v0, %v1655_v26 }
 0x532   :  { %1732 = vmatpush.msrb.mxu3 %v7431_v60  ;;  %v1421_v36 = vsub.f32 1.0, %v1420_v31  ;;  %v1403_v44 = vmul.f32 %v7386_v61, %v1402_v14  ;;  %v1640_v61 = vmul.f32 %v7598_v8, %v1639_v41  ;;  %v1646_v25 = vand.u32 2147483647, %v7558_v4  ;;  %vm7683_vm1 = vmor %vm1642_vm14, %vm1643_vm13 }
 0x533   :  { %v1669_v30 = vsub.f32 1.0, %v1668_v19  ;;  %v1664_v4 = vor.u32 1.1754944e-38, %v1663_v11  ;;  %v1649_v51 = vor.u32 1.1754944e-38, %v1648_v18  ;;  %vm1662_vm2 = vcmp.eq.f32.partialorder %v1661_v13, 8.507059e+37 }
 0x534   :  { %v1422_v60 = vmul.f32 %v6438_v32, %v1421_v36  ;;  %v1641_v6 = vadd.f32 %v7598_v8, %v1640_v61  ;;  %vm1647_vm3 = vcmp.eq.f32.partialorder %v1646_v25, 8.507059e+37  ;;  %vm1673_vm4 = vweird.f32 %v7631_v55 }
 0x535   :  { %5829 = vmatmul.msk.f32.gmra.mxu2 %vm525_vm12, %v1403_v44  ;;  %v1670_v17 = vmul.f32 %v7631_v55, %v1669_v30  ;;  %v1869_v14 = vand.u32 2147483648, %v7624_v28  ;;  %vm1672_vm6 = vweird.f32 %v7594_v52  ;;  %v1676_v47 = vand.u32 2147483647, %v7594_v52 }
 0x536   :  { %v1423_v34 = vadd.f32 %v6438_v32, %v1422_v60  ;;  %v1645_v46 = vsel %vm7683_vm1, %v7598_v8, %v1641_v6  ;;  %v1678_v8 = vand.u32 2147483648, %v7594_v52  ;;  %vm1863_vm7 = vweird.f32 %v7624_v28  ;;  %vm1674_vm8 = vmor %vm1672_vm6, %vm1673_vm4 }
 0x537   :  { %v7653_v59 = vpop.eup %6441  ;;  %v1671_v42 = vadd.f32 %v7631_v55, %v1670_v17  ;;  %v1867_v54 = vand.u32 2147483647, %v7624_v28  ;;  %v1870_v24 = vor.u32 1.1754944e-38, %v1869_v14 }
 0x538   :  { %v1859_v38 = vmul.f32 %v7653_v59, %v7624_v28  ;;  %v7660_v10 = vpop.xlane.xlu1 %1853  ;;  %v1427_v2 = vsel %vm1426_vm10, %v6438_v32, %v1423_v34  ;;  %v1660_v32 = vsel %vm7673_vm15, %v7601_v0, %v1656_v22  ;;  %v1650_v0 = vsel %vm1647_vm3, %v1649_v51, %v1645_v46 }
 0x539   :  { %v1432_v49 = vsel %vm1429_vm11, %v1431_v40, %v1427_v2  ;;  %6443 = vrcp.f32 %v7660_v10  ;;  %v1665_v31 = vsel %vm1662_vm2, %v1664_v4, %v1660_v32  ;;  %vm1864_vm5 = vweird.f32 %v7653_v59 }
 0x53a   :  { %v1860_v1 = vsub.f32 1.0, %v1859_v38  ;;  %v1433_v37 = vmul.f32 %v7400_v9, %v1432_v49  ;;  %v1651_v36 = vmul.f32 %v7389_v63, %v1650_v0  ;;  %v1666_v44 = vmul.f32 %v7391_v3, %v1665_v31  ;;  %vm1865_vm9 = vmor %vm1863_vm7, %vm1864_vm5 }
 0x53b   :  { %v6250_v58 = vpop.permute.xlu0 %6249  ;;  %v1675_v7 = vsel %vm1674_vm8, %v7631_v55, %v1671_v42  ;;  %v1679_v52 = vor.u32 1.1754944e-38, %v1678_v8  ;;  %vm1677_vm10 = vcmp.eq.f32.partialorder %v1676_v47, 8.507059e+37  ;;  %vm1868_vm11 = vcmp.eq.f32.partialorder %v1867_v54, 8.507059e+37 }
 0x53c   :  { %v6251_v56 = vunpack.i.l.bf16 %v6250_v58  ;;  %v1861_v9 = vmul.f32 %v7653_v59, %v1860_v1  ;;  %5831 = vmatmul.msk.f32.gmra.mxu3 %vm525_vm12, %v1433_v37  ;;  %v6252_v27 = vunpack.i.h.bf16 %v6250_v58  ;;  %vm1893_vm3 = vweird.f32 %v7660_v10 }
 0x53d   :  { %5840 = vmatmul.msk.f32.vlgmr.msrb.gmra.mxu2 %vm525_vm12, %v1636_v12  ;;  %v1680_v3 = vsel %vm1677_vm10, %v1679_v52, %v1675_v7  ;;  %v1897_v2 = vand.u32 2147483647, %v7660_v10  ;;  %vm2076_vm10 = vcmask 261120  }
 0x53e   :  { %1946 = vmatpush.msra.mxu2 %v6251_v56  ;;  %v1862_v41 = vadd.f32 %v7653_v59, %v1861_v9  ;;  %v1681_v55 = vmul.f32 %v7402_v23, %v1680_v3 }
 0x53f   :  { %v6444_v15 = vpop.eup %6443  ;;  %vm1898_vm5 = vcmp.eq.f32.partialorder %v1897_v2, 8.507059e+37 }
 0x540   :  { %v1851_v29 = vpop.xlane.xlu1 %1850  ;;  %1947 = vmatpush.msra.mxu2 %v6252_v27  ;;  %v1866_v19 = vsel %vm1865_vm9, %v7653_v59, %v1862_v41  ;;  %v1889_v60 = vmul.f32 %v6444_v15, %v7660_v10  ;;  %vm1894_vm2 = vweird.f32 %v6444_v15 }
 0x541   :  { %6445 = vrcp.f32 %v1851_v29  ;;  %v1871_v48 = vsel %vm1868_vm11, %v1870_v24, %v1866_v19  ;;  %v1884_v61 = vand.u32 2147483648, %v1851_v29  ;;  %v1882_v34 = vand.u32 2147483647, %v1851_v29  ;;  %vm1895_vm4 = vmor %vm1893_vm3, %vm1894_vm2 }
 0x542   :  { %v1890_v57 = vsub.f32 1.0, %v1889_v60  ;;  %v1872_v59 = vmul.f32 %v7409_v21, %v1871_v48  ;;  %vm1878_vm14 = vweird.f32 %v1851_v29  ;;  %v1899_v21 = vand.u32 2147483648, %v7660_v10 }
 0x543   :  { %v1885_v30 = vor.u32 1.1754944e-38, %v1884_v61  ;;  %vm1883_vm1 = vcmp.eq.f32.partialorder %v1882_v34, 8.507059e+37  ;;  %v2104_v61 = vld [vmem:[%s10177_s7 + $0x40] sm:$0xff]  ;;  %v2101_v34 = vld [vmem:[%s10177_s7 + $0x28] sm:$0xff]  ;;  %vm2086_vm11 = vcmask 523264  }
 0x544   :  { %5842 = vmatmul.msk.f32.vlgmr.msrb.gmra.mxu3 %vm525_vm12, %v1666_v44  ;;  %v1891_v38 = vmul.f32 %v6444_v15, %v1890_v57  ;;  %v1900_v11 = vor.u32 1.1754944e-38, %v1899_v21  ;;  %v2107_v57 = vld [vmem:[%s10177_s7 + $0x58] sm:$0xff] }
 0x545   :  { %5841 = vmatmul.msk.f32.gmra.mxu2 %vm525_vm12, %v1651_v36  ;;  %2124 = vmatpush.msrb.mxu0 %v2107_v57 }
 0x546   :  { %v1892_v1 = vadd.f32 %v6444_v15, %v1891_v38 }
 0x547   :  { %v6446_v28 = vpop.eup %6445 }
 0x548   :  { %v1874_v63 = vmul.f32 %v6446_v28, %v1851_v29  ;;  %vm1879_vm13 = vweird.f32 %v6446_v28  ;;  %v1896_v6 = vsel %vm1895_vm4, %v6444_v15, %v1892_v1 }
 0x549   :  { %vm1880_vm15 = vmor %vm1878_vm14, %vm1879_vm13  ;;  %v1901_v18 = vsel %vm1898_vm5, %v1900_v11, %v1896_v6  ;;  %vm2081_vm13 = vcmask 392192   ;;  %vm2091_vm14 = vcmask 654336  }
 0x54a   :  { %v1875_v26 = vsub.f32 1.0, %v1874_v63  ;;  %v1902_v56 = vmul.f32 %v7416_v62, %v1901_v18 }
 0x54c   :  { %v1876_v13 = vmul.f32 %v6446_v28, %v1875_v26  ;;  %5843 = vmatmul.msk.f32.gmra.mxu3 %vm525_vm12, %v1681_v55  ;;  %v2106_v26 = vld [vmem:[%s10177_s7 + $0x50] sm:$0xff]  ;;  %v2105_v55 = vld [vmem:[%s10177_s7 + $0x48] sm:$0xff] }
 0x54d   :  { %5852 = vmatmul.msk.f32.vlgmr.msra.gmra.mxu2 %vm525_vm12, %v1872_v59  ;;  %2125 = vmatpush.msrb.mxu0 %v2106_v26  ;;  %v2103_v59 = vld [vmem:[%s10177_s7 + $0x38] sm:$0xff] }
 0x54e   :  { %v1877_v50 = vadd.f32 %v6446_v28, %v1876_v13  ;;  %v2102_v13 = vld [vmem:[%s10177_s7 + $0x30] sm:$0xff] }
 0x54f   :  { %2126 = vmatpush.msrb.mxu0 %v2105_v55 }
 0x550   :  { %v1881_v40 = vsel %vm1880_vm15, %v6446_v28, %v1877_v50  ;;  %v2100_v50 = vld [vmem:[%s10177_s7 + $0x20] sm:$0xff] }
 0x551   :  { %v1886_v22 = vsel %vm1883_vm1, %v1885_v30, %v1881_v40  ;;  %2127 = vmatpush.msrb.mxu0 %v2104_v61  ;;  %v2099_v30 = vld [vmem:[%s10177_s7 + $0x18] sm:$0xff]  ;;  %v2098_v40 = vld [vmem:[%s10177_s7 + $0x10] sm:$0xff] }
 0x552   :  { %v1887_v23 = vmul.f32 %v7426_v53, %v1886_v22  ;;  %v2097_v22 = vld [vmem:[%s10177_s7 + $0x8] sm:$0xff] }
 0x553   :  { %2128 = vmatpush.msrb.mxu0 %v2103_v59 }
 0x555   :  { %5853 = vmatmul.msk.f32.gmra.mxu2 %vm525_vm12, %v1887_v23  ;;  %2129 = vmatpush.msrb.mxu0 %v2102_v13  ;;  %v2096_v23 = vld [vmem:[%s10177_s7] sm:$0xff] }
 0x557   :  { %2130 = vmatpush.msrb.mxu0 %v2101_v34 }
 0x558   :  { %v6255_v58 = vpop.permute.xlu1 %6254 }
 0x559   :  { %v6256_v49 = vunpack.i.l.bf16 %v6255_v58  ;;  %v6257_v16 = vunpack.i.h.bf16 %v6255_v58  ;;  %2131 = vmatpush.msrb.mxu0 %v2100_v50  ;;  %v2264_v50 = vld [vmem:[%s10179_s9 + $0x118] sm:$0xff] }
 0x55b   :  { %1983 = vmatpush.msra.mxu3 %v6256_v49  ;;  %2132 = vmatpush.msrb.mxu0 %v2099_v30  ;;  %v2259_v30 = vld [vmem:[%s10179_s9 + $0xf0] sm:$0xff] }
 0x55d   :  { %1984 = vmatpush.msra.mxu3 %v6257_v16  ;;  %2133 = vmatpush.msrb.mxu0 %v2098_v40  ;;  %v2260_v40 = vld [vmem:[%s10179_s9 + $0xf8] sm:$0xff] }
 0x55e   :  { %5854 = vmatmul.msk.f32.vlgmr.msra.gmra.mxu3 %vm525_vm12, %v1902_v56 }
 0x55f   :  { %2134 = vmatpush.msrb.mxu0 %v2097_v22  ;;  %2339 = vmatpush.msrb.mxu3 %v2264_v50  ;;  %v2261_v22 = vld [vmem:[%s10179_s9 + $0x100] sm:$0xff] }
 0x561   :  { %v1857_v53 = vpop.xlane.xlu2 %1856  ;;  %2135 = vmatpush.msrb.mxu0 %v2096_v23  ;;  %2340 = vmatpush.msrb.mxu3 %v2261_v22  ;;  %v2256_v23 = vld [vmem:[%s10179_s9 + $0xd8] sm:$0xff]  ;;  %v7995_v22 = vld [vmem:[%s10178_s8] ss:$0 sm:$0xff] }
 0x562   :  { %6447 = vrcp.f32 %v1857_v53  ;;  %v1914_v25 = vand.u32 2147483648, %v1857_v53  ;;  %v1912_v17 = vand.u32 2147483647, %v1857_v53  ;;  %vm1908_vm7 = vweird.f32 %v1857_v53 }
 0x564   :  { %v1915_v46 = vor.u32 1.1754944e-38, %v1914_v25  ;;  %vm1913_vm9 = vcmp.eq.f32.partialorder %v1912_v17, 8.507059e+37 }
 0x566   :  { %v7727_v32 = vpop.f32.mrf.mxu2 }
 0x568   :  { %v6448_v37 = vpop.eup %6447 }
 0x569   :  { %v1904_v10 = vmul.f32 %v6448_v37, %v1857_v53  ;;  %vm1909_vm6 = vweird.f32 %v6448_v37 }
 0x56a   :  { %vm1910_vm8 = vmor %vm1908_vm7, %vm1909_vm6 }
 0x56b   :  { %v1905_v12 = vsub.f32 1.0, %v1904_v10 }
 0x56d   :  { %v1906_v43 = vmul.f32 %v6448_v37, %v1905_v12 }
 0x56e   :  { %v7731_v51 = vpop.f32.mrf.mxu2 }
 0x56f   :  { %v1907_v9 = vadd.f32 %v6448_v37, %v1906_v43 }
 0x571   :  { %v1911_v4 = vsel %vm1910_vm8, %v6448_v37, %v1907_v9 }
 0x572   :  { %v1916_v62 = vsel %vm1913_vm9, %v1915_v46, %v1911_v4 }
 0x573   :  { %v1917_v27 = vmul.f32 %v7446_v39, %v1916_v62 }
 0x575   :  { %5855 = vmatmul.msk.f32.gmra.mxu3 %vm525_vm12, %v1917_v27 }
 0x576   :  { %v7733_v29 = vpop.f32.mrf.mxu3 }
 0x57e   :  { %v975_v31 = vpop.f32.mrf.mxu2 }
 0x57f   :  { %v7735_v0 = vpop.f32.mrf.mxu3  ;;  %1996 = vrot.lane.b32.xlu0 %v975_v31, %s6681_s28 }
 0x587   :  { %v1010_v42 = vpop.f32.mrf.mxu3 }
 0x588   :  { %2000 = vrot.lane.b32.xlu0 %v1010_v42, %s6681_s28 }
 0x58f   :  { %v978_v41 = vpop.f32.mrf.mxu2 }
 0x590   :  { %v1013_v8 = vpop.f32.mrf.mxu3  ;;  %1998 = vrot.lane.b32.xlu2 %v978_v41, %s6681_s28 }
 0x597   :  { %v1215_v15 = vpop.f32.mrf.mxu2 }
 0x598   :  { %v1250_v39 = vpop.f32.mrf.mxu3  ;;  %2012 = vrot.lane.b32.xlu0 %v1215_v15, %s6680_s27 }
 0x599   :  { %2016 = vrot.lane.b32.xlu1 %v1250_v39, %s6680_s27 }
 0x59f   :  { %v1218_v14 = vpop.f32.mrf.mxu2 }
 0x5a0   :  { %2014 = vrot.lane.b32.xlu0 %v1218_v14, %s6680_s27 }
 0x5a8   :  { %v1253_v47 = vpop.f32.mrf.mxu3 }
 0x5b0   :  { %v1463_v54 = vpop.f32.mrf.mxu2 }
 0x5b1   :  { %2028 = vrot.lane.b32.xlu1 %v1463_v54, %s6686_s1 }
 0x5b2   :  { %v1498_v36 = vpop.f32.mrf.mxu3 }
 0x5b3   :  { %2032 = vrot.lane.b32.xlu2 %v1498_v36, %s6686_s1 }
 0x5b8   :  { %v1466_v44 = vpop.f32.mrf.mxu2 }
 0x5b9   :  { %2030 = vrot.lane.b32.xlu1 %v1466_v44, %s6686_s1 }
 0x5bb   :  { %2002 = vrot.lane.b32.xlu2 %v1013_v8, %s6681_s28 }
 0x5bf   :  { %v1501_v7 = vpop.f32.mrf.mxu3 }
 0x5c0   :  { %v1705_v19 = vpop.f32.mrf.mxu2 }
 0x5c1   :  { %2044 = vrot.lane.b32.xlu0 %v1705_v19, %s6685_s30 }
 0x5c7   :  { %v1734_v52 = vpop.f32.mrf.mxu3 }
 0x5c8   :  { %v1708_v60 = vpop.f32.mrf.mxu2 }
 0x5c9   :  { %2046 = vrot.lane.b32.xlu0 %v1708_v60, %s6685_s30 }
 0x5cf   :  { %v1737_v28 = vpop.f32.mrf.mxu3 }
 0x5d0   :  { %v1949_v24 = vpop.f32.mrf.mxu2  ;;  %2050 = vrot.lane.b32.xlu2 %v1737_v28, %s6685_s30 }
 0x5d1   :  { %2048 = vrot.lane.b32.xlu0 %v1734_v52, %s6685_s30  ;;  %2060 = vrot.lane.b32.xlu1 %v1949_v24, %s6684_s29 }
 0x5d8   :  { %v1952_v63 = vpop.f32.mrf.mxu2 }
 0x5d9   :  { %2018 = vrot.lane.b32.xlu0 %v1253_v47, %s6680_s27  ;;  %2062 = vrot.lane.b32.xlu1 %v1952_v63, %s6684_s29 }
 0x5e1   :  { %v1986_v3 = vpop.f32.mrf.mxu3 }
 0x5e2   :  { %2064 = vrot.lane.b32.xlu1 %v1986_v3, %s6684_s29 }
 0x5ea   :  { %2034 = vrot.lane.b32.xlu1 %v1501_v7, %s6686_s1  ;;  %v1999_v12 = vpop.permute.xlu2 %1998 }
 0x5eb   :  { %v2073_v43 = vsel %vm525_vm12, %v7731_v51, %v1999_v12  ;;  %v2248_v12 = vld [vmem:[%s10179_s9 + $0x98] sm:$0xff] }
 0x5f1   :  { %v1997_v38 = vpop.permute.xlu0 %1996 }
 0x5f2   :  { %v2072_v18 = vsel %vm525_vm12, %v7727_v32, %v1997_v38  ;;  %v2263_v38 = vld [vmem:[%s10179_s9 + $0x110] sm:$0xff] }
 0x5f3   :  { %2310 = vmatpush.msrb.mxu2 %v2263_v38 }
 0x5f5   :  { %2311 = vmatpush.msrb.mxu2 %v2260_v40 }
 0x5f8   :  { %v1989_v48 = vpop.f32.mrf.mxu3 }
 0x5f9   :  { %2066 = vrot.lane.b32.xlu0 %v1989_v48, %s6684_s29 }
 0x5fa   :  { %v2001_v1 = vpop.permute.xlu0 %2000 }
 0x5fb   :  { %v2074_v62 = vsel %vm525_vm12, %v7733_v29, %v2001_v1  ;;  %v2394_v1 = vld [vmem:[%s10180_s10 + $0xf0] sm:$0xff] }
 0x60a   :  { %v2013_v2 = vpop.permute.xlu0 %2012 }
 0x60b   :  { %v2017_v21 = vpop.permute.xlu1 %2016  ;;  %v2077_v16 = vsel %vm2076_vm10, %v2072_v18, %v2013_v2  ;;  %v2258_v2 = vld [vmem:[%s10179_s9 + $0xe8] sm:$0xff]  ;;  %v2388_v18 = vld [vmem:[%s10180_s10 + $0xc0] sm:$0xff] }
 0x60c   :  { %v2079_v27 = vsel %vm2076_vm10, %v2074_v62, %v2017_v21  ;;  %v2257_v21 = vld [vmem:[%s10179_s9 + $0xe0] sm:$0xff]  ;;  %2341 = vmatpush.msrb.mxu3 %v2258_v2  ;;  %v2242_v62 = vld [vmem:[%s10179_s9 + $0x68] sm:$0xff] }
 0x60d   :  { %v2033_v31 = vpop.permute.xlu2 %2032  ;;  %2312 = vmatpush.msrb.mxu2 %v2257_v21 }
 0x60e   :  { %v2084_v51 = vsel %vm2081_vm13, %v2079_v27, %v2033_v31  ;;  %v2243_v27 = vld [vmem:[%s10179_s9 + $0x70] sm:$0xff]  ;;  %v2376_v31 = vld [vmem:[%s10180_s10 + $0x60] sm:$0xff] }
 0x612   :  { %v2015_v11 = vpop.permute.xlu0 %2014 }
 0x613   :  { %v2078_v17 = vsel %vm2076_vm10, %v2073_v43, %v2015_v11  ;;  %v2253_v11 = vld [vmem:[%s10179_s9 + $0xc0] sm:$0xff]  ;;  %v2382_v43 = vld [vmem:[%s10180_s10 + $0x90] sm:$0xff] }
 0x615   :  { %v2003_v39 = vpop.permute.xlu2 %2002 }
 0x616   :  { %v2075_v54 = vsel %vm525_vm12, %v7735_v0, %v2003_v39  ;;  %v2236_v39 = vld [vmem:[%s10179_s9 + $0x38] sm:$0xff] }
 0x623   :  { %v2029_v6 = vpop.permute.xlu1 %2028 }
 0x624   :  { %v2082_v56 = vsel %vm2081_vm13, %v2077_v16, %v2029_v6  ;;  %v2391_v6 = vld [vmem:[%s10180_s10 + $0xd8] sm:$0xff]  ;;  %v2250_v16 = vld [vmem:[%s10179_s9 + $0xa8] sm:$0xff] }
 0x62a   :  { %v2051_v44 = vpop.permute.xlu2 %2050 }
 0x62b   :  { %v2031_v58 = vpop.permute.xlu1 %2030 }
 0x62c   :  { %v2083_v32 = vsel %vm2081_vm13, %v2078_v17, %v2031_v58  ;;  %v2254_v58 = vld [vmem:[%s10179_s9 + $0xc8] sm:$0xff]  ;;  %v2244_v17 = vld [vmem:[%s10179_s9 + $0x78] sm:$0xff] }
 0x62d   :  { %2313 = vmatpush.msrb.mxu2 %v2254_v58 }
 0x633   :  { %v2045_v49 = vpop.permute.xlu0 %2044 }
 0x634   :  { %v2087_v53 = vsel %vm2086_vm11, %v2082_v56, %v2045_v49  ;;  %v2255_v49 = vld [vmem:[%s10179_s9 + $0xd0] sm:$0xff] }
 0x635   :  { %2342 = vmatpush.msrb.mxu3 %v2255_v49  ;;  %v2251_v56 = vld [vmem:[%s10179_s9 + $0xb0] sm:$0xff] }
 0x636   :  { %2314 = vmatpush.msrb.mxu2 %v2251_v56  ;;  %v2399_v56 = vld [vmem:[%s10180_s10 + $0x118] sm:$0xff] }
 0x638   :  { %2315 = vmatpush.msrb.mxu2 %v2248_v12  ;;  %v2395_v12 = vld [vmem:[%s10180_s10 + $0xf8] sm:$0xff] }
 0x63b   :  { %v2047_v25 = vpop.permute.xlu0 %2046 }
 0x63c   :  { %v2088_v9 = vsel %vm2086_vm11, %v2083_v32, %v2047_v25  ;;  %v2249_v25 = vld [vmem:[%s10179_s9 + $0xa0] sm:$0xff] }
 0x63d   :  { %v2245_v32 = vld [vmem:[%s10179_s9 + $0x80] sm:$0xff] }
 0x63e   :  { %2316 = vmatpush.msrb.mxu2 %v2245_v32  ;;  %v2393_v32 = vld [vmem:[%s10180_s10 + $0xe8] sm:$0xff] }
 0x640   :  { %2317 = vmatpush.msrb.mxu2 %v2242_v62  ;;  %v2390_v62 = vld [vmem:[%s10180_s10 + $0xd0] sm:$0xff] }
 0x643   :  { %v2061_v37 = vpop.permute.xlu1 %2060  ;;  %v2049_v42 = vpop.permute.xlu0 %2048 }
 0x644   :  { %v2092_v10 = vsel %vm2091_vm14, %v2087_v53, %v2061_v37  ;;  %v2089_v41 = vsel %vm2086_vm11, %v2084_v51, %v2049_v42  ;;  %v2252_v53 = vld [vmem:[%s10179_s9 + $0xb8] sm:$0xff]  ;;  %v2385_v37 = vld [vmem:[%s10180_s10 + $0xa8] sm:$0xff]  ;;  %v2239_v51 = vld [vmem:[%s10179_s9 + $0x50] sm:$0xff] }
 0x645   :  { %5856 = vmatmul.msk.f32.vlgmr.msrb.gmra.mxu0 %vm75_vm0, %v2092_v10  ;;  %2343 = vmatpush.msrb.mxu3 %v2252_v53  ;;  %v2247_v10 = vld [vmem:[%s10179_s9 + $0x90] sm:$0xff]  ;;  %v2238_v42 = vld [vmem:[%s10179_s9 + $0x48] sm:$0xff] }
 0x646   :  { %2318 = vmatpush.msrb.mxu2 %v2239_v51 }
 0x647   :  { %2344 = vmatpush.msrb.mxu3 %v2249_v25  ;;  %v2396_v25 = vld [vmem:[%s10180_s10 + $0x100] sm:$0xff] }
 0x648   :  { %2319 = vmatpush.msrb.mxu2 %v2236_v39 }
 0x64b   :  { %v2063_v46 = vpop.permute.xlu1 %2062  ;;  %v2019_v14 = vpop.permute.xlu0 %2018 }
 0x64c   :  { %v2093_v4 = vsel %vm2091_vm14, %v2088_v9, %v2063_v46  ;;  %v2080_v29 = vsel %vm2076_vm10, %v2075_v54, %v2019_v14  ;;  %v2246_v9 = vld [vmem:[%s10179_s9 + $0x88] sm:$0xff]  ;;  %v2379_v46 = vld [vmem:[%s10180_s10 + $0x78] sm:$0xff]  ;;  %v2237_v14 = vld [vmem:[%s10179_s9 + $0x40] sm:$0xff] }
 0x64d   :  { %5857 = vmatmul.msk.f32.gmra.mxu0 %vm75_vm0, %v2093_v4  ;;  %2345 = vmatpush.msrb.mxu3 %v2246_v9  ;;  %v2241_v4 = vld [vmem:[%s10179_s9 + $0x60] sm:$0xff] }
 0x64f   :  { %2346 = vmatpush.msrb.mxu3 %v2243_v27 }
 0x654   :  { %v2065_v8 = vpop.permute.xlu1 %2064 }
 0x655   :  { %v2094_v15 = vsel %vm2091_vm14, %v2089_v41, %v2065_v8  ;;  %v2240_v41 = vld [vmem:[%s10179_s9 + $0x58] sm:$0xff]  ;;  %v2373_v8 = vld [vmem:[%s10180_s10 + $0x48] sm:$0xff] }
 0x656   :  { %5858 = vmatmul.msk.f32.gmra.mxu0 %vm75_vm0, %v2094_v15  ;;  %2347 = vmatpush.msrb.mxu3 %v2240_v41  ;;  %v2235_v15 = vld [vmem:[%s10179_s9 + $0x30] sm:$0xff] }
 0x658   :  { %2348 = vmatpush.msrb.mxu3 %v2237_v14 }
 0x65c   :  { %v2035_v47 = vpop.permute.xlu1 %2034 }
 0x65d   :  { %v2085_v36 = vsel %vm2081_vm13, %v2080_v29, %v2035_v47  ;;  %v2370_v47 = vld [vmem:[%s10180_s10 + $0x30] sm:$0xff]  ;;  %v2232_v29 = vld [vmem:[%s10179_s9 + $0x18] sm:$0xff] }
 0x65e   :  { %v2090_v19 = vsel %vm2086_vm11, %v2085_v36, %v2051_v44  ;;  %v2233_v36 = vld [vmem:[%s10179_s9 + $0x20] sm:$0xff]  ;;  %v2234_v44 = vld [vmem:[%s10179_s9 + $0x28] sm:$0xff] }
 0x65f   :  { %2320 = vmatpush.msrb.mxu2 %v2233_v36  ;;  %2349 = vmatpush.msrb.mxu3 %v2234_v44  ;;  %v2381_v36 = vld [vmem:[%s10180_s10 + $0x88] sm:$0xff] }
 0x660   :  { %v2377_v44 = vld [vmem:[%s10180_s10 + $0x68] sm:$0xff] }
 0x66b   :  { %v2067_v7 = vpop.permute.xlu0 %2066 }
 0x66c   :  { %v2095_v60 = vsel %vm2091_vm14, %v2090_v19, %v2067_v7  ;;  %v2367_v19 = vld [vmem:[%s10180_s10 + $0x18] sm:$0xff] }
 0x66d   :  { %5859 = vmatmul.msk.f32.gmra.mxu0 %vm75_vm0, %v2095_v60  ;;  %v2229_v60 = vld [vmem:[%s10179_s9] sm:$0xff] }
 0x6c2   :  { %v2137_v52 = vpop.f32.mrf.mxu0 }
 0x6c3   :  { %v7822_v28 = vadd.f32 %v2137_v52, %v6881_v5  ;;  %v2230_v52 = vld [vmem:[%s10179_s9 + $0x8] sm:$0xff] }
 0x6c4   :  { %2321 = vmatpush.msrb.mxu2 %v2230_v52  ;;  %v2371_v52 = vld [vmem:[%s10180_s10 + $0x38] sm:$0xff] }
 0x6c5   :  { %v2154_v24 = vmul.f32 %v7822_v28, %v7822_v28 }
 0x6c6   :  { %2462 = vmatpush.msra.mxu2 %v2399_v56  ;;  %v2743_v56 = vld [vmem:[%s10181_s11 + $0x20] sm:$0xff] }
 0x6c7   :  { %v2158_v0 = vsel %vm75_vm0, %v2154_v24, 0.0  ;;  %v2231_v24 = vld [vmem:[%s10179_s9 + $0x10] sm:$0xff] }
 0x6c8   :  { %2159 = vadd.xlane.f32.xlu1 %v2158_v0  ;;  %2350 = vmatpush.msrb.mxu3 %v2231_v24  ;;  %v2372_v24 = vld [vmem:[%s10180_s10 + $0x40] sm:$0xff] }
 0x6c9   :  { %2463 = vmatpush.msra.mxu2 %v2396_v25  ;;  %v2741_v25 = vld [vmem:[%s10181_s11 + $0x10] sm:$0xff] }
 0x6ca   :  { %v2140_v63 = vpop.f32.mrf.mxu0 }
 0x6cb   :  { %v7828_v3 = vadd.f32 %v2140_v63, %v6887_v20  ;;  %v2364_v63 = vld [vmem:[%s10180_s10] sm:$0xff]  ;;  %2464 = vmatpush.msra.mxu2 %v2393_v32  ;;  %v2740_v32 = vld [vmem:[%s10181_s11 + $0x8] sm:$0xff] }
 0x6cd   :  { %v2155_v48 = vmul.f32 %v7828_v3, %v7828_v3  ;;  %2465 = vmatpush.msra.mxu2 %v2390_v62 }
 0x6cf   :  { %v2161_v57 = vsel %vm75_vm0, %v2155_v48, 0.0 }
 0x6d0   :  { %2162 = vadd.xlane.f32.xlu2 %v2161_v57 }
 0x6d3   :  { %v2143_v26 = vpop.f32.mrf.mxu0 }
 0x6d4   :  { %v7834_v5 = vadd.f32 %v2143_v26, %v6893_v33  ;;  %v2262_v33 = vld [vmem:[%s10179_s9 + $0x108] sm:$0xff] }
 0x6d5   :  { %2281 = vmatpush.msra.mxu1 %v2262_v33 }
 0x6d6   :  { %v2156_v55 = vmul.f32 %v7834_v5, %v7834_v5 }
 0x6d7   :  { %2282 = vmatpush.msra.mxu1 %v2259_v30 }
 0x6d8   :  { %v2164_v61 = vsel %vm75_vm0, %v2156_v55, 0.0 }
 0x6d9   :  { %2165 = vadd.xlane.f32.xlu0 %v2164_v61  ;;  %2283 = vmatpush.msra.mxu1 %v2256_v23 }
 0x6db   :  { %2284 = vmatpush.msra.mxu1 %v2253_v11 }
 0x6dd   :  { %2285 = vmatpush.msra.mxu1 %v2250_v16  ;;  %v2398_v16 = vld [vmem:[%s10180_s10 + $0x110] sm:$0xff] }
 0x6df   :  { %2286 = vmatpush.msra.mxu1 %v2247_v10 }
 0x6e1   :  { %2287 = vmatpush.msra.mxu1 %v2244_v17 }
 0x6e3   :  { %2288 = vmatpush.msra.mxu1 %v2241_v4  ;;  %v2389_v4 = vld [vmem:[%s10180_s10 + $0xc8] sm:$0xff] }
 0x6e5   :  { %2289 = vmatpush.msra.mxu1 %v2238_v42  ;;  %v2387_v42 = vld [vmem:[%s10180_s10 + $0xb8] sm:$0xff] }
 0x6e6   :  { %2466 = vmatpush.msra.mxu2 %v2387_v42 }
 0x6e7   :  { %2290 = vmatpush.msra.mxu1 %v2235_v15  ;;  %v2384_v15 = vld [vmem:[%s10180_s10 + $0xa0] sm:$0xff] }
 0x6e8   :  { %2467 = vmatpush.msra.mxu2 %v2384_v15  ;;  %v2763_v15 = vld [vmem:[%s10181_s11 + $0xc0] sm:$0xff] }
 0x6e9   :  { %2291 = vmatpush.msra.mxu1 %v2232_v29  ;;  %v2380_v29 = vld [vmem:[%s10180_s10 + $0x80] sm:$0xff] }
 0x6ea   :  { %v2146_v59 = vpop.f32.mrf.mxu0  ;;  %2468 = vmatpush.msra.mxu2 %v2381_v36  ;;  %v2761_v36 = vld [vmem:[%s10181_s11 + $0xb0] sm:$0xff] }
 0x6eb   :  { %v7840_v20 = vadd.f32 %v2146_v59, %v6899_v45  ;;  %v2397_v45 = vld [vmem:[%s10180_s10 + $0x108] sm:$0xff]  ;;  %2292 = vmatpush.msra.mxu1 %v2229_v60  ;;  %v2375_v60 = vld [vmem:[%s10180_s10 + $0x58] sm:$0xff] }
 0x6ec   :  { %2404 = vmatpush.msra.mxu0 %v2397_v45 }
 0x6ed   :  { %v2157_v13 = vmul.f32 %v7840_v20, %v7840_v20  ;;  %2433 = vmatpush.msrb.mxu1 %v2398_v16 }
 0x6ee   :  { %2405 = vmatpush.msra.mxu0 %v2394_v1 }
 0x6ef   :  { %v2167_v34 = vsel %vm75_vm0, %v2157_v13, 0.0  ;;  %2434 = vmatpush.msrb.mxu1 %v2395_v12  ;;  %v2767_v12 = vld [vmem:[%s10181_s11 + $0xe0] sm:$0xff] }
 0x6f0   :  { %2168 = vadd.xlane.f32.xlu1 %v2167_v34  ;;  %2406 = vmatpush.msra.mxu0 %v2391_v6 }
 0x6f2   :  { %2407 = vmatpush.msra.mxu0 %v2388_v18 }
 0x6f4   :  { %2408 = vmatpush.msra.mxu0 %v2385_v37 }
 0x6f6   :  { %2409 = vmatpush.msra.mxu0 %v2382_v43  ;;  %v2392_v43 = vld [vmem:[%s10180_s10 + $0xe0] sm:$0xff] }
 0x6f7   :  { %2435 = vmatpush.msrb.mxu1 %v2392_v43  ;;  %v2766_v43 = vld [vmem:[%s10181_s11 + $0xd8] sm:$0xff] }
 0x6f8   :  { %2410 = vmatpush.msra.mxu0 %v2379_v46 }
 0x6f9   :  { %2436 = vmatpush.msrb.mxu1 %v2389_v4  ;;  %v2765_v4 = vld [vmem:[%s10181_s11 + $0xd0] sm:$0xff] }
 0x6fa   :  { %2411 = vmatpush.msra.mxu0 %v2376_v31  ;;  %v2386_v31 = vld [vmem:[%s10180_s10 + $0xb0] sm:$0xff] }
 0x6fb   :  { %2437 = vmatpush.msrb.mxu1 %v2386_v31  ;;  %v2739_v31 = vld [vmem:[%s10181_s11] sm:$0xff] }
 0x6fc   :  { %2412 = vmatpush.msra.mxu0 %v2373_v8  ;;  %v2383_v8 = vld [vmem:[%s10180_s10 + $0x98] sm:$0xff] }
 0x6fd   :  { %2438 = vmatpush.msrb.mxu1 %v2383_v8 }
 0x6fe   :  { %2413 = vmatpush.msra.mxu0 %v2370_v47 }
 0x6ff   :  { %2439 = vmatpush.msrb.mxu1 %v2380_v29 }
 0x700   :  { %2414 = vmatpush.msra.mxu0 %v2367_v19  ;;  %v2374_v19 = vld [vmem:[%s10180_s10 + $0x50] sm:$0xff] }
 0x701   :  { %2440 = vmatpush.msrb.mxu1 %v2377_v44 }
 0x702   :  { %2415 = vmatpush.msra.mxu0 %v2364_v63 }
 0x703   :  { %2441 = vmatpush.msrb.mxu1 %v2374_v19 }
 0x705   :  { %2442 = vmatpush.msrb.mxu1 %v2371_v52 }
 0x73b   :  { %v2160_v54 = vpop.xlane.xlu1 %2159 }
 0x73c   :  { %v2170_v7 = vmul.f32 %v2160_v54, %v6833_v35 }
 0x73e   :  { %v2174_v0 = vadd.f32 1e-05, %v2170_v7  ;;  %v2378_v7 = vld [vmem:[%s10180_s10 + $0x70] sm:$0xff] }
 0x73f   :  { %2469 = vmatpush.msra.mxu2 %v2378_v7 }
 0x740   :  { %6449 = vrsqrt.f32 %v2174_v0  ;;  %vm2184_vm1 = vweird.f32 %v2174_v0 }
 0x741   :  { %2470 = vmatpush.msra.mxu2 %v2375_v60 }
 0x743   :  { %v2163_v48 = vpop.xlane.xlu2 %2162  ;;  %2471 = vmatpush.msra.mxu2 %v2372_v24 }
 0x744   :  { %v2171_v57 = vmul.f32 %v2163_v48, %v6833_v35  ;;  %v2368_v48 = vld [vmem:[%s10180_s10 + $0x20] sm:$0xff] }
 0x745   :  { %2443 = vmatpush.msrb.mxu1 %v2368_v48 }
 0x746   :  { %v6450_v26 = vpop.eup %6449  ;;  %v2175_v55 = vadd.f32 1e-05, %v2171_v57  ;;  %v2369_v57 = vld [vmem:[%s10180_s10 + $0x28] sm:$0xff] }
 0x747   :  { %v2179_v61 = vmul.f32 %v6450_v26, %v2174_v0  ;;  %vm2185_vm15 = vweird.f32 %v6450_v26  ;;  %2472 = vmatpush.msra.mxu2 %v2369_v57 }
 0x748   :  { %6451 = vrsqrt.f32 %v2175_v55  ;;  %vm2186_vm2 = vmor %vm2184_vm1, %vm2185_vm15  ;;  %vm2194_vm4 = vweird.f32 %v2175_v55 }
 0x749   :  { %v2180_v59 = vmul.f32 %v6450_v26, %v2179_v61  ;;  %v2366_v61 = vld [vmem:[%s10180_s10 + $0x10] sm:$0xff] }
 0x74a   :  { %2473 = vmatpush.msra.mxu2 %v2366_v61 }
 0x74b   :  { %v2181_v13 = vmul.f32 0.5, %v2180_v59 }
 0x74c   :  { %v2166_v34 = vpop.xlane.xlu0 %2165 }
 0x74d   :  { %v2172_v33 = vmul.f32 %v2166_v34, %v6833_v35  ;;  %v2182_v38 = vsub.f32 1.5, %v2181_v13 }
 0x74e   :  { %v6452_v50 = vpop.eup %6451 }
 0x74f   :  { %v2176_v45 = vadd.f32 1e-05, %v2172_v33  ;;  %v2183_v30 = vmul.f32 %v6450_v26, %v2182_v38  ;;  %v2189_v40 = vmul.f32 %v6452_v50, %v2175_v55  ;;  %vm2195_vm3 = vweird.f32 %v6452_v50  ;;  %v2365_v55 = vld [vmem:[%s10180_s10 + $0x8] sm:$0xff] }
 0x750   :  { %vm2196_vm5 = vmor %vm2194_vm4, %vm2195_vm3  ;;  %2444 = vmatpush.msrb.mxu1 %v2365_v55 }
 0x751   :  { %6453 = vrsqrt.f32 %v2176_v45  ;;  %v2187_v1 = vsel %vm2186_vm2, %v6450_v26, %v2183_v30  ;;  %v2190_v23 = vmul.f32 %v6452_v50, %v2189_v40  ;;  %vm2204_vm7 = vweird.f32 %v2176_v45  ;;  %v2753_v30 = vld [vmem:[%s10181_s11 + $0x70] sm:$0xff]  ;;  %v2752_v40 = vld [vmem:[%s10181_s11 + $0x68] sm:$0xff] }
 0x752   :  { %v2218_v21 = vmul.f32 %v2187_v1, %v7822_v28  ;;  %v2750_v1 = vld [vmem:[%s10181_s11 + $0x58] sm:$0xff] }
 0x753   :  { %v2191_v2 = vmul.f32 0.5, %v2190_v23  ;;  %v2749_v23 = vld [vmem:[%s10181_s11 + $0x50] sm:$0xff] }
 0x754   :  { %v7999_v6 = vmul.f32 %v7995_v22, %v2218_v21  ;;  %v2748_v21 = vld [vmem:[%s10181_s11 + $0x48] sm:$0xff] }
 0x755   :  { %v2192_v11 = vsub.f32 1.5, %v2191_v2  ;;  %v2747_v2 = vld [vmem:[%s10181_s11 + $0x40] sm:$0xff] }
 0x756   :  { %5860 = vmatmul.msk.f32.vlgmr.msra.gmra.mxu1 %vm75_vm0, %v7999_v6  ;;  %5864 = vmatmul.msk.f32.vlgmr.msrb.gmra.mxu2 %vm75_vm0, %v7999_v6 }
 0x757   :  { %v6454_v58 = vpop.eup %6453  ;;  %v2193_v49 = vmul.f32 %v6452_v50, %v2192_v11  ;;  %5868 = vmatmul.msk.f32.vlgmr.msrb.gmra.mxu3 %vm75_vm0, %v7999_v6  ;;  %5872 = vmatmul.msk.f32.vlgmr.msra.gmra.mxu0 %vm75_vm0, %v7999_v6  ;;  %v2745_v11 = vld [vmem:[%s10181_s11 + $0x30] sm:$0xff] }
 0x758   :  { %v2199_v18 = vmul.f32 %v6454_v58, %v2176_v45  ;;  %vm2205_vm6 = vweird.f32 %v6454_v58  ;;  %v2754_v45 = vld [vmem:[%s10181_s11 + $0x78] sm:$0xff] }
 0x759   :  { %v2197_v53 = vsel %vm2196_vm5, %v6452_v50, %v2193_v49  ;;  %vm2206_vm8 = vmor %vm2204_vm7, %vm2205_vm6  ;;  %2790 = vmatpush.msra.mxu3 %v2754_v45  ;;  %v2744_v49 = vld [vmem:[%s10181_s11 + $0x28] sm:$0xff] }
 0x75a   :  { %v2200_v37 = vmul.f32 %v6454_v58, %v2199_v18  ;;  %v2219_v10 = vmul.f32 %v2197_v53, %v7828_v3  ;;  %v2769_v18 = vld [vmem:[%s10181_s11 + $0xf0] sm:$0xff] }
 0x75b   :  { %2791 = vmatpush.msra.mxu3 %v2753_v30 }
 0x75c   :  { %v2201_v17 = vmul.f32 0.5, %v2200_v37  ;;  %v8029_v9 = vmul.f32 %v7995_v22, %v2219_v10  ;;  %v2768_v37 = vld [vmem:[%s10181_s11 + $0xe8] sm:$0xff]  ;;  %v2742_v10 = vld [vmem:[%s10181_s11 + $0x18] sm:$0xff] }
 0x75d   :  { %2792 = vmatpush.msra.mxu3 %v2752_v40  ;;  %v2757_v40 = vld [vmem:[%s10181_s11 + $0x90] sm:$0xff] }
 0x75e   :  { %v2202_v46 = vsub.f32 1.5, %v2201_v17  ;;  %5861 = vmatmul.msk.f32.gmra.mxu1 %vm75_vm0, %v8029_v9  ;;  %5865 = vmatmul.msk.f32.gmra.mxu2 %vm75_vm0, %v8029_v9 }
 0x75f   :  { %5869 = vmatmul.msk.f32.gmra.mxu3 %vm75_vm0, %v8029_v9  ;;  %5873 = vmatmul.msk.f32.gmra.mxu0 %vm75_vm0, %v8029_v9 }
 0x760   :  { %v2203_v27 = vmul.f32 %v6454_v58, %v2202_v46 }
 0x762   :  { %v2207_v51 = vsel %vm2206_vm8, %v6454_v58, %v2203_v27  ;;  %v2770_v58 = vld [vmem:[%s10181_s11 + $0xf8] sm:$0xff] }
 0x763   :  { %v2169_v41 = vpop.xlane.xlu1 %2168  ;;  %v2220_v39 = vmul.f32 %v2207_v51, %v7834_v5  ;;  %2819 = vmatpush.msrb.mxu0 %v2770_v58 }
 0x764   :  { %v2173_v14 = vmul.f32 %v2169_v41, %v6833_v35  ;;  %v2764_v41 = vld [vmem:[%s10181_s11 + $0xc8] sm:$0xff] }
 0x765   :  { %v2227_v47 = vmul.f32 %v7995_v22, %v2220_v39  ;;  %2820 = vmatpush.msrb.mxu0 %v2769_v18  ;;  %v2762_v39 = vld [vmem:[%s10181_s11 + $0xb8] sm:$0xff] }
 0x766   :  { %v2177_v54 = vadd.f32 1e-05, %v2173_v14 }
 0x767   :  { %5862 = vmatmul.msk.f32.gmra.mxu1 %vm75_vm0, %v2227_v47  ;;  %5866 = vmatmul.msk.f32.gmra.mxu2 %vm75_vm0, %v2227_v47 }
 0x768   :  { %6455 = vrsqrt.f32 %v2177_v54  ;;  %5870 = vmatmul.msk.f32.gmra.mxu3 %vm75_vm0, %v2227_v47  ;;  %5874 = vmatmul.msk.f32.gmra.mxu0 %vm75_vm0, %v2227_v47  ;;  %vm2214_vm15 = vweird.f32 %v2177_v54 }
 0x769   :  { %2821 = vmatpush.msrb.mxu0 %v2768_v37 }
 0x76b   :  { %2822 = vmatpush.msrb.mxu0 %v2767_v12 }
 0x76d   :  { %2823 = vmatpush.msrb.mxu0 %v2766_v43 }
 0x76e   :  { %v6456_v0 = vpop.eup %6455 }
 0x76f   :  { %v2209_v63 = vmul.f32 %v6456_v0, %v2177_v54  ;;  %vm2215_vm9 = vweird.f32 %v6456_v0  ;;  %2824 = vmatpush.msrb.mxu0 %v2765_v4 }
 0x770   :  { %vm2216_vm1 = vmor %vm2214_vm15, %vm2215_vm9 }
 0x771   :  { %v2210_v26 = vmul.f32 %v6456_v0, %v2209_v63  ;;  %2825 = vmatpush.msrb.mxu0 %v2764_v41 }
 0x773   :  { %v2211_v59 = vmul.f32 0.5, %v2210_v26  ;;  %2826 = vmatpush.msrb.mxu0 %v2763_v15  ;;  %v2759_v26 = vld [vmem:[%s10181_s11 + $0xa0] sm:$0xff] }
 0x775   :  { %v2212_v13 = vsub.f32 1.5, %v2211_v59  ;;  %2827 = vmatpush.msrb.mxu0 %v2762_v39 }
 0x777   :  { %v2213_v34 = vmul.f32 %v6456_v0, %v2212_v13  ;;  %2828 = vmatpush.msrb.mxu0 %v2761_v36  ;;  %v2758_v13 = vld [vmem:[%s10181_s11 + $0x98] sm:$0xff] }
 0x779   :  { %v2217_v33 = vsel %vm2216_vm1, %v6456_v0, %v2213_v34  ;;  %v2760_v0 = vld [vmem:[%s10181_s11 + $0xa8] sm:$0xff] }
 0x77a   :  { %v2221_v38 = vmul.f32 %v2217_v33, %v7840_v20  ;;  %2829 = vmatpush.msrb.mxu0 %v2760_v0 }
 0x77c   :  { %v2228_v50 = vmul.f32 %v7995_v22, %v2221_v38  ;;  %v2751_v22 = vld [vmem:[%s10181_s11 + $0x60] sm:$0xff]  ;;  %2830 = vmatpush.msrb.mxu0 %v2759_v26 }
 0x77d   :  { %2793 = vmatpush.msra.mxu3 %v2751_v22 }
 0x77e   :  { %5863 = vmatmul.msk.f32.gmra.mxu1 %vm75_vm0, %v2228_v50  ;;  %5867 = vmatmul.msk.f32.gmra.mxu2 %vm75_vm0, %v2228_v50 }
 0x77f   :  { %5871 = vmatmul.msk.f32.gmra.mxu3 %vm75_vm0, %v2228_v50  ;;  %5875 = vmatmul.msk.f32.gmra.mxu0 %vm75_vm0, %v2228_v50 }
 0x780   :  { %2794 = vmatpush.msra.mxu3 %v2750_v1  ;;  %2831 = vmatpush.msrb.mxu0 %v2758_v13 }
 0x782   :  { %2795 = vmatpush.msra.mxu3 %v2749_v23  ;;  %2832 = vmatpush.msrb.mxu0 %v2757_v40 }
 0x784   :  { %2796 = vmatpush.msra.mxu3 %v2748_v21 }
 0x786   :  { %5876 = vmatmul.msk.f32.vlgmr.msrb.gmra.mxu1 %vm75_vm0, %v7999_v6  ;;  %5880 = vmatmul.msk.f32.vlgmr.msra.gmra.mxu2 %vm75_vm0, %v7999_v6  ;;  %v2746_v6 = vld [vmem:[%s10181_s11 + $0x38] sm:$0xff] }
 0x787   :  { %2797 = vmatpush.msra.mxu3 %v2747_v2 }
 0x789   :  { %2798 = vmatpush.msra.mxu3 %v2746_v6  ;;  %v2756_v6 = vld [vmem:[%s10181_s11 + $0x88] sm:$0xff] }
 0x78a   :  { %2833 = vmatpush.msrb.mxu0 %v2756_v6 }
 0x78b   :  { %2799 = vmatpush.msra.mxu3 %v2745_v11 }
 0x78d   :  { %2800 = vmatpush.msra.mxu3 %v2744_v49 }
 0x78e   :  { %5877 = vmatmul.msk.f32.gmra.mxu1 %vm75_vm0, %v8029_v9  ;;  %5881 = vmatmul.msk.f32.gmra.mxu2 %vm75_vm0, %v8029_v9 }
 0x78f   :  { %2801 = vmatpush.msra.mxu3 %v2743_v56 }
 0x791   :  { %2802 = vmatpush.msra.mxu3 %v2742_v10 }
 0x793   :  { %2803 = vmatpush.msra.mxu3 %v2741_v25 }
 0x795   :  { %2804 = vmatpush.msra.mxu3 %v2740_v32 }
 0x796   :  { %5878 = vmatmul.msk.f32.gmra.mxu1 %vm75_vm0, %v2227_v47  ;;  %5882 = vmatmul.msk.f32.gmra.mxu2 %vm75_vm0, %v2227_v47 }
 0x797   :  { %2805 = vmatpush.msra.mxu3 %v2739_v31 }
 0x79e   :  { %5879 = vmatmul.msk.f32.gmra.mxu1 %vm75_vm0, %v2228_v50  ;;  %5883 = vmatmul.msk.f32.gmra.mxu2 %vm75_vm0, %v2228_v50 }
 0x7d3   :  { %v8157_v16 = vpop.f32.mrf.mxu1 }
 0x7d4   :  { %v5884_v53 = vmul.f32 -1.442695, %v8157_v16  ;;  %v2417_v41 = vpop.f32.mrf.mxu0 }
 0x7d6   :  { %6457 = vpow2.f32 %v5884_v53 }
 0x7d9   :  { %v8178_v17 = vpop.f32.mrf.mxu2 }
 0x7da   :  { %v5885_v9 = vmul.f32 -1.442695, %v8178_v17  ;;  %v8184_v46 = vpop.f32.mrf.mxu3 }
 0x7db   :  { %v5886_v62 = vmul.f32 -1.442695, %v8184_v46  ;;  %v8190_v27 = vpop.f32.mrf.mxu1 }
 0x7dc   :  { %v6458_v42 = vpop.eup %6457  ;;  %6459 = vpow2.f32 %v5885_v9  ;;  %v5887_v51 = vmul.f32 -1.442695, %v8190_v27  ;;  %v2755_v9 = vld [vmem:[%s10181_s11 + $0x80] sm:$0xff] }
 0x7dd   :  { %v2523_v8 = vadd.f32 1.0, %v6458_v42  ;;  %6461 = vpow2.f32 %v5886_v62  ;;  %2834 = vmatpush.msrb.mxu0 %v2755_v9  ;;  %v2771_v9 = vld [vmem:[%s10181_s11 + $0x100] sm:$0xff] }
 0x7de   :  { %6463 = vpow2.f32 %v5887_v51 }
 0x7df   :  { %6465 = vrcp.f32 %v2523_v8  ;;  %v2544_v61 = vand.u32 2147483647, %v2523_v8  ;;  %v2546_v34 = vand.u32 2147483648, %v2523_v8  ;;  %vm2540_vm3 = vweird.f32 %v2523_v8 }
 0x7e1   :  { %v8205_v14 = vpop.f32.mrf.mxu2  ;;  %vm2545_vm4 = vcmp.eq.f32.partialorder %v2544_v61, 8.507059e+37  ;;  %v2547_v11 = vor.u32 1.1754944e-38, %v2546_v34 }
 0x7e2   :  { %v6460_v47 = vpop.eup %6459  ;;  %v5888_v54 = vmul.f32 -1.442695, %v8205_v14  ;;  %v8208_v29 = vpop.f32.mrf.mxu3 }
 0x7e3   :  { %v6462_v44 = vpop.eup %6461  ;;  %v8213_v7 = vadd.f32 1.0, %v6460_v47  ;;  %v5889_v24 = vmul.f32 -1.442695, %v8208_v29 }
 0x7e4   :  { %v8215_v19 = vpop.f32.mrf.mxu1  ;;  %v6464_v60 = vpop.eup %6463  ;;  %v8217_v52 = vadd.f32 1.0, %v6462_v44  ;;  %6467 = vpow2.f32 %v5888_v54 }
 0x7e5   :  { %v6466_v63 = vpop.eup %6465  ;;  %6469 = vrcp.f32 %v8213_v7  ;;  %v5890_v48 = vmul.f32 -1.442695, %v8215_v19  ;;  %v8229_v59 = vadd.f32 1.0, %v6464_v60  ;;  %v2559_v58 = vand.u32 2147483647, %v8213_v7 }
 0x7e6   :  { %v2536_v57 = vmul.f32 %v6466_v63, %v2523_v8  ;;  %6471 = vrcp.f32 %v8217_v52  ;;  %vm2541_vm2 = vweird.f32 %v6466_v63  ;;  %v2561_v37 = vand.u32 2147483648, %v8213_v7 }
 0x7e7   :  { %6473 = vpow2.f32 %v5889_v24  ;;  %vm2542_vm5 = vmor %vm2540_vm3, %vm2541_vm2  ;;  %v2574_v42 = vand.u32 2147483647, %v8217_v52  ;;  %v2576_v8 = vand.u32 2147483648, %v8217_v52  ;;  %v2589_v15 = vand.u32 2147483647, %v8229_v59 }
 0x7e8   :  { %v2537_v55 = vsub.f32 1.0, %v2536_v57  ;;  %6475 = vpow2.f32 %v5890_v48  ;;  %v2591_v44 = vand.u32 2147483648, %v8229_v59  ;;  %vm2555_vm7 = vweird.f32 %v8213_v7 }
 0x7e9   :  { %6477 = vrcp.f32 %v8229_v59  ;;  %vm8283_vm8 = vcmp.eq.f32.partialorder %v2559_v58, 8.507059e+37  ;;  %v2562_v0 = vor.u32 1.1754944e-38, %v2561_v37  ;;  %vm2570_vm9 = vweird.f32 %v8217_v52 }
 0x7ea   :  { %v8234_v33 = vpop.f32.mrf.mxu2  ;;  %v6468_v38 = vpop.eup %6467  ;;  %v2538_v50 = vmul.f32 %v6466_v63, %v2537_v55  ;;  %vm8295_vm2 = vcmp.eq.f32.partialorder %v2574_v42, 8.507059e+37  ;;  %vm2585_vm3 = vweird.f32 %v8229_v59 }
 0x7eb   :  { %v5891_v45 = vmul.f32 -1.442695, %v8234_v33  ;;  %v8238_v30 = vpop.f32.mrf.mxu3  ;;  %v8243_v22 = vpop.eup %6469  ;;  %v8257_v43 = vadd.f32 1.0, %v6468_v38 }
 0x7ec   :  { %v5892_v1 = vmul.f32 -1.442695, %v8238_v30  ;;  %v8246_v23 = vpop.eup %6471  ;;  %v2539_v21 = vadd.f32 %v6466_v63, %v2538_v50  ;;  %v2551_v2 = vmul.f32 %v8243_v22, %v8213_v7  ;;  %vm2556_vm6 = vweird.f32 %v8243_v22 }
 0x7ed   :  { %v2566_v49 = vmul.f32 %v8246_v23, %v8217_v52  ;;  %6479 = vpow2.f32 %v5891_v45  ;;  %v6474_v18 = vpop.eup %6473  ;;  %vm8290_vm15 = vmor %vm2555_vm7, %vm2556_vm6  ;;  %vm2571_vm1 = vweird.f32 %v8246_v23  ;;  %v2577_v7 = vor.u32 1.1754944e-38, %v2576_v8 }
 0x7ee   :  { %v2543_v56 = vsel %vm2542_vm5, %v6466_v63, %v2539_v21  ;;  %v2552_v53 = vsub.f32 1.0, %v2551_v2  ;;  %6481 = vpow2.f32 %v5892_v1  ;;  %v6476_v10 = vpop.eup %6475  ;;  %v8259_v32 = vadd.f32 1.0, %v6474_v18  ;;  %vm8331_vm6 = vmor %vm2570_vm9, %vm2571_vm1 }
 0x7ef   :  { %v2548_v12 = vsel %vm2545_vm4, %v2547_v11, %v2543_v56  ;;  %v2567_v25 = vsub.f32 1.0, %v2566_v49  ;;  %v8264_v4 = vpop.eup %6477  ;;  %v8269_v51 = vadd.f32 1.0, %v6476_v10  ;;  %vm8306_vm4 = vcmp.eq.f32.partialorder %v2589_v15, 8.507059e+37  ;;  %v2772_v56 = vld [vmem:[%s10181_s11 + $0x108] sm:$0x3f] }
 0x7f0   :  { %v2715_v62 = vmul.f32 %v2548_v12, %v8157_v16  ;;  %v2553_v31 = vmul.f32 %v8243_v22, %v2552_v53  ;;  %6483 = vrcp.f32 %v8259_v32  ;;  %v2581_v36 = vmul.f32 %v8264_v4, %v8229_v59 }
 0x7f1   :  { %v2568_v16 = vmul.f32 %v8246_v23, %v2567_v25  ;;  %6485 = vrcp.f32 %v8269_v51  ;;  %v2592_v50 = vor.u32 1.1754944e-38, %v2591_v44  ;;  %v2604_v45 = vand.u32 2147483647, %v8257_v43 }
 0x7f2   :  { %v2727_v39 = vmul.f32 %v2715_v62, %v2417_v41  ;;  %v2554_v47 = vadd.f32 %v8243_v22, %v2553_v31  ;;  %6487 = vrcp.f32 %v8257_v43  ;;  %v2582_v61 = vsub.f32 1.0, %v2581_v36  ;;  %v2420_v41 = vpop.f32.mrf.mxu0 }
 0x7f3   :  { %v6480_v54 = vpop.eup %6479  ;;  %v2569_v55 = vadd.f32 %v8246_v23, %v2568_v16  ;;  %v2619_v1 = vand.u32 2147483647, %v8259_v32  ;;  %vm2586_vm5 = vweird.f32 %v8264_v4  ;;  %v2621_v58 = vand.u32 2147483648, %v8259_v32 }
 0x7f4   :  { %v6482_v60 = vpop.eup %6481  ;;  %2806 = vmatmul.f32.vlgmr.msra.gmra.mxu3 %v2727_v39  ;;  %v2558_v26 = vsel %vm8290_vm15, %v8243_v22, %v2554_v47  ;;  %v8312_v38 = vadd.f32 1.0, %v6480_v54  ;;  %v2583_v21 = vmul.f32 %v8264_v4, %v2582_v61  ;;  %vm2630_vm7 = vweird.f32 %v8269_v51 }
 0x7f5   :  { %v8299_v57 = vadd.f32 1.0, %v6482_v60  ;;  %v2563_v6 = vsel %vm8283_vm8, %v2562_v0, %v2558_v26  ;;  %v2573_v52 = vsel %vm8331_vm6, %v8246_v23, %v2569_v55  ;;  %vm2587_vm8 = vmor %vm2585_vm3, %vm2586_vm5  ;;  %v2634_v25 = vand.u32 2147483647, %v8269_v51 }
 0x7f6   :  { %v8310_v34 = vpop.eup %6483  ;;  %v2584_v10 = vadd.f32 %v8264_v4, %v2583_v21  ;;  %vm10189_vm9 = vcmask 1045504   ;;  %vm2600_vm15 = vweird.f32 %v8257_v43  ;;  %v2636_v62 = vand.u32 2147483648, %v8269_v51 }
 0x7f7   :  { %6489 = vrcp.f32 %v8299_v57  ;;  %v8316_v40 = vpop.eup %6485  ;;  %v2611_v22 = vmul.f32 %v8310_v34, %v8259_v32  ;;  %5896 = vmatpush.msk.msra.mxu1 %vm10189_vm9, %v2772_v56  ;;  %v2716_v42 = vmul.f32 %v2563_v6, %v8178_v17  ;;  %vm2616_vm3 = vweird.f32 %v8310_v34 }
 0x7f8   :  { %v8323_v2 = vpop.eup %6487  ;;  %v2626_v18 = vmul.f32 %v8316_v40, %v8269_v51  ;;  %6491 = vrcp.f32 %v8312_v38  ;;  %v2588_v23 = vsel %vm2587_vm8, %v8264_v4, %v2584_v10  ;;  %vm2631_vm1 = vweird.f32 %v8316_v40 }
 0x7f9   :  { %v2612_v53 = vsub.f32 1.0, %v2611_v22  ;;  %v2596_v59 = vmul.f32 %v8323_v2, %v8257_v43  ;;  %v2593_v8 = vsel %vm8306_vm4, %v2592_v50, %v2588_v23  ;;  %v2578_v4 = vsel %vm8295_vm2, %v2577_v7, %v2573_v52  ;;  %2863 = vmatpush.msra.mxu1 %v2771_v9  ;;  %vm8388_vm2 = vmor %vm2630_vm7, %vm2631_vm1 }
 0x7fa   :  { %v2627_v12 = vsub.f32 1.0, %v2626_v18  ;;  %v2718_v16 = vmul.f32 %v2593_v8, %v8190_v27  ;;  %vm8379_vm4 = vcmp.eq.f32.partialorder %v2634_v25, 8.507059e+37  ;;  %v2637_v63 = vor.u32 1.1754944e-38, %v2636_v62 }
 0x7fb   :  { %v8336_v49 = vpop.f32.mrf.mxu1  ;;  %v2613_v39 = vmul.f32 %v8310_v34, %v2612_v53  ;;  %v2597_v44 = vsub.f32 1.0, %v2596_v59  ;;  %v2606_v48 = vand.u32 2147483648, %v8257_v43  ;;  %vm2601_vm5 = vweird.f32 %v8323_v2 }
 0x7fc   :  { %v5893_v37 = vmul.f32 -1.442695, %v8336_v49  ;;  %v2628_v15 = vmul.f32 %v8316_v40, %v2627_v12  ;;  %v2730_v60 = vmul.f32 %v2718_v16, %v2420_v41  ;;  %vm2615_vm6 = vweird.f32 %v8259_v32  ;;  %vm2602_vm7 = vmor %vm2600_vm15, %vm2601_vm5 }
 0x7fd   :  { %v8362_v31 = vpop.eup %6489  ;;  %v2598_v13 = vmul.f32 %v8323_v2, %v2597_v44  ;;  %v2614_v50 = vadd.f32 %v8310_v34, %v2613_v39  ;;  %v2607_v56 = vor.u32 1.1754944e-38, %v2606_v48  ;;  %v2717_v53 = vmul.f32 %v2578_v4, %v8184_v46  ;;  %vm8420_vm1 = vmor %vm2615_vm6, %vm2616_vm3 }
 0x7fe   :  { %6493 = vpow2.f32 %v5893_v37  ;;  %v2656_v47 = vmul.f32 %v8362_v31, %v8299_v57  ;;  %v2629_v54 = vadd.f32 %v8316_v40, %v2628_v15  ;;  %v8393_v7 = vpop.eup %6491  ;;  %2809 = vmatmul.f32.gmra.mxu3 %v2730_v60  ;;  %v2423_v37 = vpop.f32.mrf.mxu0  ;;  %vm2605_vm8 = vcmp.eq.f32.partialorder %v2604_v45, 8.507059e+37 }
 0x7ff   :  { %v2599_v18 = vadd.f32 %v8323_v2, %v2598_v13  ;;  %v2641_v52 = vmul.f32 %v8393_v7, %v8312_v38  ;;  %v2618_v46 = vsel %vm8420_vm1, %v8310_v34, %v2614_v50  ;;  %vm8430_vm15 = vcmp.eq.f32.partialorder %v2619_v1, 8.507059e+37 }
 0x800   :  { %v2633_v61 = vsel %vm8388_vm2, %v8316_v40, %v2629_v54  ;;  %v2657_v22 = vsub.f32 1.0, %v2656_v47  ;;  %v2622_v45 = vor.u32 1.1754944e-38, %v2621_v58  ;;  %vm10188_vm3 = vcmask 113664  }
 0x801   :  { %v8376_v17 = vpop.f32.mrf.mxu2  ;;  %v2638_v11 = vsel %vm8379_vm4, %v2637_v63, %v2633_v61  ;;  %v2603_v10 = vsel %vm2602_vm7, %v8323_v2, %v2599_v18  ;;  %v2642_v23 = vsub.f32 1.0, %v2641_v52  ;;  %v2651_v8 = vand.u32 2147483648, %v8312_v38 }
 0x802   :  { %v5894_v24 = vmul.f32 -1.442695, %v8376_v17  ;;  %v8384_v0 = vpop.f32.mrf.mxu3  ;;  %v2721_v40 = vmul.f32 %v2638_v11, %v8215_v19  ;;  %v2658_v12 = vmul.f32 %v8362_v31, %v2657_v22  ;;  %v2608_v9 = vsel %vm2605_vm8, %v2607_v56, %v2603_v10 }
 0x803   :  { %v5895_v26 = vmul.f32 -1.442695, %v8384_v0  ;;  %v2446_v55 = vpop.f32.mrf.mxu1  ;;  %v2643_v41 = vmul.f32 %v8393_v7, %v2642_v23  ;;  %vm2661_vm4 = vweird.f32 %v8362_v31  ;;  %vm2646_vm2 = vweird.f32 %v8393_v7 }
 0x804   :  { %v6494_v51 = vpop.eup %6493  ;;  %6495 = vpow2.f32 %v5894_v24  ;;  %v2728_v21 = vmul.f32 %v2716_v42, %v2446_v55  ;;  %v2733_v25 = vmul.f32 %v2721_v40, %v2423_v37  ;;  %v2719_v42 = vmul.f32 %v2608_v9, %v8205_v14 }
 0x805   :  { %v8402_v6 = vadd.f32 1.0, %v6494_v51  ;;  %6497 = vpow2.f32 %v5895_v26  ;;  %v2649_v32 = vand.u32 2147483647, %v8312_v38  ;;  %v2659_v58 = vadd.f32 %v8362_v31, %v2658_v12 }
 0x806   :  { %2835 = vmatmul.f32.vlgmr.msrb.gmra.mxu0 %v2728_v21  ;;  %2812 = vmatmul.f32.gmra.mxu3 %v2733_v25  ;;  %v2644_v39 = vadd.f32 %v8393_v7, %v2643_v41  ;;  %v2623_v16 = vsel %vm8430_vm15, %v2622_v45, %v2618_v46  ;;  %v2666_v54 = vand.u32 2147483648, %v8299_v57  ;;  %vm2645_vm5 = vweird.f32 %v8312_v38  ;;  %v2426_v45 = vpop.f32.mrf.mxu0 }
 0x807   :  { %6499 = vrcp.f32 %v8402_v6  ;;  %vm2660_vm6 = vweird.f32 %v8299_v57  ;;  %v2664_v36 = vand.u32 2147483647, %v8299_v57  ;;  %vm2647_vm7 = vmor %vm2645_vm5, %vm2646_vm2  ;;  %v2652_v44 = vor.u32 1.1754944e-38, %v2651_v8 }
 0x808   :  { %vm8461_vm8 = vmor %vm2660_vm6, %vm2661_vm4  ;;  %v2648_v24 = vsel %vm2647_vm7, %v8393_v7, %v2644_v39  ;;  %vm2650_vm1 = vcmp.eq.f32.partialorder %v2649_v32, 8.507059e+37  ;;  %v2720_v57 = vmul.f32 %v2623_v16, %v8208_v29  ;;  %v2667_v48 = vor.u32 1.1754944e-38, %v2666_v54 }
 0x809   :  { %v2475_v2 = vpop.f32.mrf.mxu2  ;;  %v2663_v27 = vsel %vm8461_vm8, %v8362_v31, %v2659_v58  ;;  %v2653_v63 = vsel %vm2650_vm1, %v2652_v44, %v2648_v24  ;;  %vm2665_vm15 = vcmp.eq.f32.partialorder %v2664_v36, 8.507059e+37  ;;  %v2681_v51 = vand.u32 2147483648, %v8402_v6 }
 0x80a   :  { %v6496_v62 = vpop.eup %6495  ;;  %v2729_v59 = vmul.f32 %v2717_v53, %v2475_v2  ;;  %v2722_v13 = vmul.f32 %v2653_v63, %v8234_v33  ;;  %v2668_v50 = vsel %vm2665_vm15, %v2667_v48, %v2663_v27  ;;  %v2679_v29 = vand.u32 2147483647, %v8402_v6 }
 0x80b   :  { %v6498_v34 = vpop.eup %6497  ;;  %v8440_v1 = vadd.f32 1.0, %v6496_v62  ;;  %v2449_v15 = vpop.f32.mrf.mxu1  ;;  %vm2675_vm2 = vweird.f32 %v8402_v6  ;;  %v2723_v33 = vmul.f32 %v2668_v50, %v8238_v30  ;;  %v2682_v37 = vor.u32 1.1754944e-38, %v2681_v51 }
 0x80c   :  { %v8445_v4 = vadd.f32 1.0, %v6498_v34  ;;  %5897 = vmatmul.msk.f32.vlgmr.msra.gmra.mxu1 %vm10188_vm3, %v2729_v59  ;;  %v2731_v14 = vmul.f32 %v2719_v42, %v2449_v15  ;;  %vm2680_vm6 = vcmp.eq.f32.partialorder %v2679_v29, 8.507059e+37 }
 0x80d   :  { %v6500_v47 = vpop.eup %6499  ;;  %6501 = vrcp.f32 %v8440_v1  ;;  %v2694_v53 = vand.u32 2147483647, %v8440_v1  ;;  %v2696_v10 = vand.u32 2147483648, %v8440_v1  ;;  %vm2690_vm1 = vweird.f32 %v8440_v1 }
 0x80e   :  { %6503 = vrcp.f32 %v8445_v4  ;;  %2838 = vmatmul.f32.gmra.mxu0 %v2731_v14  ;;  %v2671_v38 = vmul.f32 %v6500_v47, %v8402_v6  ;;  %vm2676_vm4 = vweird.f32 %v6500_v47  ;;  %v2711_v9 = vand.u32 2147483648, %v8445_v4 }
 0x80f   :  { %vm2677_vm5 = vmor %vm2675_vm2, %vm2676_vm4  ;;  %v2709_v30 = vand.u32 2147483647, %v8445_v4  ;;  %v2697_v59 = vor.u32 1.1754944e-38, %v2696_v10  ;;  %vm2705_vm4 = vweird.f32 %v8445_v4  ;;  %vm2695_vm2 = vcmp.eq.f32.partialorder %v2694_v53, 8.507059e+37  ;;  %v5936_v53 = vld [vmem:[%s10176_s6 + $0x230] sm:$0xff]  ;;  %v5933_v10 = vld [vmem:[%s10176_s6 + $0x218] sm:$0xff] }
 0x810   :  { %v2672_v55 = vsub.f32 1.0, %v2671_v38  ;;  %v2712_v34 = vor.u32 1.1754944e-38, %v2711_v9  ;;  %3040 = vmatpush.msrb.mxu3 %v5936_v53  ;;  %v5931_v9 = vld [vmem:[%s10176_s6 + $0x208] sm:$0xff] }
 0x811   :  { %v2478_v26 = vpop.f32.mrf.mxu2 }
 0x812   :  { %v2732_v61 = vmul.f32 %v2720_v57, %v2478_v26  ;;  %v2673_v21 = vmul.f32 %v6500_v47, %v2672_v55  ;;  %3041 = vmatpush.msrb.mxu3 %v5933_v10 }
 0x813   :  { %v6502_v7 = vpop.eup %6501  ;;  %v2452_v22 = vpop.f32.mrf.mxu1 }
 0x814   :  { %v6504_v11 = vpop.eup %6503  ;;  %v2686_v31 = vmul.f32 %v6502_v7, %v8440_v1  ;;  %5898 = vmatmul.msk.f32.gmra.mxu1 %vm10188_vm3, %v2732_v61  ;;  %v2734_v18 = vmul.f32 %v2722_v13, %v2452_v22  ;;  %v2674_v56 = vadd.f32 %v6500_v47, %v2673_v21  ;;  %vm2691_vm7 = vweird.f32 %v6502_v7 }
 0x815   :  { %v2701_v40 = vmul.f32 %v6504_v11, %v8445_v4  ;;  %vm2706_vm8 = vweird.f32 %v6504_v11  ;;  %vm2692_vm15 = vmor %vm2690_vm1, %vm2691_vm7 }
 0x816   :  { %v2687_v52 = vsub.f32 1.0, %v2686_v31  ;;  %2841 = vmatmul.f32.gmra.mxu0 %v2734_v18  ;;  %v2678_v12 = vsel %vm2677_vm5, %v6500_v47, %v2674_v56  ;;  %vm2707_vm5 = vmor %vm2705_vm4, %vm2706_vm8 }
 0x817   :  { %v2702_v19 = vsub.f32 1.0, %v2701_v40  ;;  %v2683_v23 = vsel %vm2680_vm6, %v2682_v37, %v2678_v12  ;;  %vm2710_vm6 = vcmp.eq.f32.partialorder %v2709_v30, 8.507059e+37  ;;  %v5937_v37 = vld [vmem:[%s10176_s6 + $0x238] sm:$0xff]  ;;  %v5928_v30 = vld [vmem:[%s10176_s6 + $0x1f0] sm:$0xff] }
 0x818   :  { %v2688_v25 = vmul.f32 %v6502_v7, %v2687_v52  ;;  %v2724_v43 = vmul.f32 %v2683_v23, %v8336_v49  ;;  %v5935_v52 = vld [vmem:[%s10176_s6 + $0x228] sm:$0xff]  ;;  %3069 = vmatpush.msra.mxu0 %v5937_v37  ;;  %v5929_v12 = vld [vmem:[%s10176_s6 + $0x1f8] sm:$0xff]  ;;  %v5926_v23 = vld [vmem:[%s10176_s6 + $0x1e0] sm:$0xff] }
 0x819   :  { %v2703_v46 = vmul.f32 %v6504_v11, %v2702_v19  ;;  %v2481_v6 = vpop.f32.mrf.mxu2  ;;  %3011 = vmatpush.msrb.mxu2 %v5935_v52  ;;  %v5934_v19 = vld [vmem:[%s10176_s6 + $0x220] sm:$0xff] }
 0x81a   :  { %v2689_v2 = vadd.f32 %v6502_v7, %v2688_v25  ;;  %v2735_v62 = vmul.f32 %v2723_v33, %v2481_v6  ;;  %v2736_v41 = vmul.f32 %v2724_v43, %v2426_v45  ;;  %v5930_v25 = vld [vmem:[%s10176_s6 + $0x200] sm:$0xff]  ;;  %3070 = vmatpush.msra.mxu0 %v5934_v19  ;;  %v5923_v6 = vld [vmem:[%s10176_s6 + $0x1c8] sm:$0xff]  ;;  %v5924_v43 = vld [vmem:[%s10176_s6 + $0x1d0] sm:$0xff] }
 0x81b   :  { %v2704_v42 = vadd.f32 %v6504_v11, %v2703_v46  ;;  %v2455_v58 = vpop.f32.mrf.mxu1  ;;  %3042 = vmatpush.msrb.mxu3 %v5930_v25  ;;  %v5927_v46 = vld [vmem:[%s10176_s6 + $0x1e8] sm:$0xff] }
 0x81c   :  { %v2693_v8 = vsel %vm2692_vm15, %v6502_v7, %v2689_v2  ;;  %5899 = vmatmul.msk.f32.gmra.mxu1 %vm10188_vm3, %v2735_v62  ;;  %2815 = vmatmul.f32.gmra.mxu3 %v2736_v41  ;;  %v5925_v2 = vld [vmem:[%s10176_s6 + $0x1d8] sm:$0xff]  ;;  %v5922_v41 = vld [vmem:[%s10176_s6 + $0x1c0] sm:$0xff] }
 0x81d   :  { %v2698_v15 = vsel %vm2695_vm2, %v2697_v59, %v2693_v8  ;;  %v2708_v49 = vsel %vm2707_vm5, %v6504_v11, %v2704_v42  ;;  %3071 = vmatpush.msra.mxu0 %v5931_v9  ;;  %3043 = vmatpush.msrb.mxu3 %v5927_v46  ;;  %v5920_v59 = vld [vmem:[%s10176_s6 + $0x1b0] sm:$0xff]  ;;  %v5921_v42 = vld [vmem:[%s10176_s6 + $0x1b8] sm:$0xff] }
 0x81e   :  { %v2725_v1 = vmul.f32 %v2698_v15, %v8376_v17  ;;  %v2713_v32 = vsel %vm2710_vm6, %v2712_v34, %v2708_v49  ;;  %v5917_v34 = vld [vmem:[%s10176_s6 + $0x198] sm:$0xff]  ;;  %v5918_v15 = vld [vmem:[%s10176_s6 + $0x1a0] sm:$0xff]  ;;  %v5919_v49 = vld [vmem:[%s10176_s6 + $0x1a8] sm:$0xff] }
 0x81f   :  { %v2726_v14 = vmul.f32 %v2713_v32, %v8384_v0  ;;  %3072 = vmatpush.msra.mxu0 %v5928_v30  ;;  %3044 = vmatpush.msrb.mxu3 %v5924_v43  ;;  %v5915_v32 = vld [vmem:[%s10176_s6 + $0x188] sm:$0xff] }
 0x820   :  { %v2737_v39 = vmul.f32 %v2725_v1, %v2455_v58  ;;  %v5914_v1 = vld [vmem:[%s10176_s6 + $0x180] sm:$0xff]  ;;  %v5916_v58 = vld [vmem:[%s10176_s6 + $0x190] sm:$0xff] }
 0x821   :  { %v2484_v4 = vpop.f32.mrf.mxu2  ;;  %3073 = vmatpush.msra.mxu0 %v5925_v2  ;;  %3045 = vmatpush.msrb.mxu3 %v5921_v42 }
 0x822   :  { %v2738_v47 = vmul.f32 %v2726_v14, %v2484_v4  ;;  %2844 = vmatmul.f32.gmra.mxu0 %v2737_v39  ;;  %v5911_v14 = vld [vmem:[%s10176_s6 + $0x168] sm:$0xff]  ;;  %v5912_v39 = vld [vmem:[%s10176_s6 + $0x170] sm:$0xff] }
 0x823   :  { %3074 = vmatpush.msra.mxu0 %v5922_v41  ;;  %3046 = vmatpush.msrb.mxu3 %v5918_v15 }
 0x824   :  { %5900 = vmatmul.msk.f32.gmra.mxu1 %vm10188_vm3, %v2738_v47  ;;  %v5913_v47 = vld [vmem:[%s10176_s6 + $0x178] sm:$0xff] }
 0x825   :  { %3075 = vmatpush.msra.mxu0 %v5919_v49  ;;  %3047 = vmatpush.msrb.mxu3 %v5915_v32 }
 0x827   :  { %3076 = vmatpush.msra.mxu0 %v5916_v58  ;;  %3048 = vmatpush.msrb.mxu3 %v5912_v39 }
 0x829   :  { %3077 = vmatpush.msra.mxu0 %v5913_v47 }
 0x877   :  { %v2807_v54 = vpop.f32.mrf.mxu3 }
 0x881   :  { %v2810_v57 = vpop.f32.mrf.mxu3 }
 0x883   :  { %v2836_v16 = vpop.f32.mrf.mxu0 }
 0x884   :  { %v2837_v36 = vadd.f32 %v2836_v16, %v2807_v54  ;;  %v5908_v54 = vld [vmem:[%s10176_s6 + $0x150] sm:$0xff] }
 0x889   :  { %v2865_v44 = vpop.f32.mrf.mxu1  ;;  %v2813_v13 = vpop.f32.mrf.mxu3 }
 0x88a   :  { %v2866_v60 = vadd.f32 %v2865_v44, %v2837_v36  ;;  %v5909_v36 = vld [vmem:[%s10176_s6 + $0x158] sm:$0xff]  ;;  %v5910_v44 = vld [vmem:[%s10176_s6 + $0x160] sm:$0xff] }
 0x88b   :  { %v2839_v24 = vpop.f32.mrf.mxu0  ;;  %3049 = vmatpush.msrb.mxu3 %v5909_v36  ;;  %3078 = vmatpush.msra.mxu0 %v5910_v44 }
 0x88c   :  { %v8492_v38 = vadd.f32 %v2866_v60, %v7822_v28  ;;  %v2840_v0 = vadd.f32 %v2839_v24, %v2810_v57  ;;  %v5906_v57 = vld [vmem:[%s10176_s6 + $0x140] sm:$0xff] }
 0x88d   :  { %3050 = vmatpush.msrb.mxu3 %v5906_v57 }
 0x88e   :  { %v2883_v17 = vmul.f32 %v8492_v38, %v8492_v38 }
 0x890   :  { %v2887_v27 = vsel %vm75_vm0, %v2883_v17, 0.0  ;;  %v5905_v17 = vld [vmem:[%s10176_s6 + $0x138] sm:$0xff] }
 0x891   :  { %v2868_v63 = vpop.f32.mrf.mxu1  ;;  %2888 = vadd.xlane.f32.xlu2 %v2887_v27  ;;  %v5907_v27 = vld [vmem:[%s10176_s6 + $0x148] sm:$0xff] }
 0x892   :  { %v2869_v48 = vadd.f32 %v2868_v63, %v2840_v0  ;;  %3079 = vmatpush.msra.mxu0 %v5907_v27 }
 0x893   :  { %v2842_v55 = vpop.f32.mrf.mxu0 }
 0x894   :  { %v8498_v26 = vadd.f32 %v2869_v48, %v7828_v3  ;;  %v2843_v28 = vadd.f32 %v2842_v55, %v2813_v13  ;;  %v5902_v48 = vld [vmem:[%s10176_s6 + $0x120] sm:$0xff]  ;;  %v5903_v55 = vld [vmem:[%s10176_s6 + $0x128] sm:$0xff] }
 0x895   :  { %3051 = vmatpush.msrb.mxu3 %v5903_v55 }
 0x896   :  { %v2884_v61 = vmul.f32 %v8498_v26, %v8498_v26 }
 0x898   :  { %v2890_v51 = vsel %vm75_vm0, %v2884_v61, 0.0  ;;  %v5904_v61 = vld [vmem:[%s10176_s6 + $0x130] sm:$0xff] }
 0x899   :  { %v2871_v7 = vpop.f32.mrf.mxu1  ;;  %2891 = vadd.xlane.f32.xlu0 %v2890_v51  ;;  %3080 = vmatpush.msra.mxu0 %v5904_v61 }
 0x89a   :  { %v2872_v50 = vadd.f32 %v2871_v7, %v2843_v28 }
 0x89c   :  { %v8504_v22 = vadd.f32 %v2872_v50, %v7834_v5 }
 0x89e   :  { %v2885_v21 = vmul.f32 %v8504_v22, %v8504_v22 }
 0x89f   :  { %v2845_v29 = vpop.f32.mrf.mxu0  ;;  %v2816_v3 = vpop.f32.mrf.mxu3 }
 0x8a0   :  { %v2893_v11 = vsel %vm75_vm0, %v2885_v21, 0.0  ;;  %v2846_v31 = vadd.f32 %v2845_v29, %v2816_v3 }
 0x8a1   :  { %v2874_v18 = vpop.f32.mrf.mxu1  ;;  %2894 = vadd.xlane.f32.xlu0 %v2893_v11  ;;  %v6315_v11 = vld [vmem:[%s10175_s5 + $0x1] ss:$0 sm:$0xff] }
 0x8a2   :  { %v2875_v40 = vadd.f32 %v2874_v18, %v2846_v31 }
 0x8a4   :  { %v8510_v56 = vadd.f32 %v2875_v40, %v7840_v20  ;;  %v5932_v20 = vld [vmem:[%s10176_s6 + $0x210] sm:$0xff] }
 0x8a5   :  { %3012 = vmatpush.msrb.mxu2 %v5932_v20 }
 0x8a6   :  { %v2886_v33 = vmul.f32 %v8510_v56, %v8510_v56 }
 0x8a7   :  { %3013 = vmatpush.msrb.mxu2 %v5929_v12 }
 0x8a8   :  { %v2896_v5 = vsel %vm75_vm0, %v2886_v33, 0.0 }
 0x8a9   :  { %2897 = vadd.xlane.f32.xlu0 %v2896_v5  ;;  %3014 = vmatpush.msrb.mxu2 %v5926_v23 }
 0x8ab   :  { %3015 = vmatpush.msrb.mxu2 %v5923_v6 }
 0x8ad   :  { %3016 = vmatpush.msrb.mxu2 %v5920_v59 }
 0x8af   :  { %3017 = vmatpush.msrb.mxu2 %v5917_v34 }
 0x8b1   :  { %3018 = vmatpush.msrb.mxu2 %v5914_v1 }
 0x8b3   :  { %3019 = vmatpush.msrb.mxu2 %v5911_v14 }
 0x8b5   :  { %3020 = vmatpush.msrb.mxu2 %v5908_v54 }
 0x8b7   :  { %3021 = vmatpush.msrb.mxu2 %v5905_v17 }
 0x8b9   :  { %3022 = vmatpush.msrb.mxu2 %v5902_v48 }
 0x904   :  { %v2889_v45 = vpop.xlane.xlu2 %2888 }
 0x905   :  { %v2899_v62 = vmul.f32 %v2889_v45, %v6833_v35 }
 0x907   :  { %v2903_v8 = vadd.f32 1e-05, %v2899_v62 }
 0x909   :  { %6505 = vrsqrt.f32 %v2903_v8  ;;  %vm2913_vm8 = vweird.f32 %v2903_v8 }
 0x90c   :  { %v2892_v4 = vpop.xlane.xlu0 %2891 }
 0x90d   :  { %v2900_v16 = vmul.f32 %v2892_v4, %v6833_v35 }
 0x90f   :  { %v6506_v60 = vpop.eup %6505  ;;  %v2904_v24 = vadd.f32 1e-05, %v2900_v16 }
 0x910   :  { %v2908_v0 = vmul.f32 %v6506_v60, %v2903_v8  ;;  %vm2914_vm7 = vweird.f32 %v6506_v60 }
 0x911   :  { %6507 = vrsqrt.f32 %v2904_v24  ;;  %vm2915_vm1 = vmor %vm2913_vm8, %vm2914_vm7  ;;  %vm2923_vm4 = vweird.f32 %v2904_v24 }
 0x912   :  { %v2909_v63 = vmul.f32 %v6506_v60, %v2908_v0 }
 0x914   :  { %v2910_v13 = vmul.f32 0.5, %v2909_v63  ;;  %v2895_v28 = vpop.xlane.xlu0 %2894 }
 0x915   :  { %v2901_v51 = vmul.f32 %v2895_v28, %v6833_v35 }
 0x916   :  { %v2911_v7 = vsub.f32 1.5, %v2910_v13 }
 0x917   :  { %v6508_v50 = vpop.eup %6507  ;;  %v2905_v21 = vadd.f32 1e-05, %v2901_v51 }
 0x918   :  { %v2912_v29 = vmul.f32 %v6506_v60, %v2911_v7  ;;  %v2918_v3 = vmul.f32 %v6508_v50, %v2904_v24  ;;  %vm2924_vm15 = vweird.f32 %v6508_v50 }
 0x919   :  { %6509 = vrsqrt.f32 %v2905_v21  ;;  %vm2925_vm2 = vmor %vm2923_vm4, %vm2924_vm15  ;;  %vm2933_vm6 = vweird.f32 %v2905_v21 }
 0x91a   :  { %v2916_v31 = vsel %vm2915_vm1, %v6506_v60, %v2912_v29  ;;  %v2919_v18 = vmul.f32 %v6508_v50, %v2918_v3 }
 0x91b   :  { %v2947_v40 = vmul.f32 %v2916_v31, %v8492_v38 }
 0x91c   :  { %v2920_v33 = vmul.f32 0.5, %v2919_v18  ;;  %v2898_v52 = vpop.xlane.xlu0 %2897 }
 0x91d   :  { %v2954_v5 = vmul.f32 %v6315_v11, %v2947_v40  ;;  %v2902_v37 = vmul.f32 %v2898_v52, %v6833_v35 }
 0x91e   :  { %v2921_v53 = vsub.f32 1.5, %v2920_v33 }
 0x91f   :  { %v6510_v20 = vpop.eup %6509  ;;  %5938 = vmatmul.msk.f32.vlgmr.msrb.gmra.mxu2 %vm75_vm0, %v2954_v5  ;;  %5942 = vmatmul.msk.f32.vlgmr.msrb.gmra.mxu3 %vm75_vm0, %v2954_v5  ;;  %v2906_v12 = vadd.f32 1e-05, %v2902_v37 }
 0x920   :  { %v2922_v10 = vmul.f32 %v6508_v50, %v2921_v53  ;;  %v2928_v19 = vmul.f32 %v6510_v20, %v2905_v21  ;;  %5946 = vmatmul.msk.f32.vlgmr.msra.gmra.mxu0 %vm75_vm0, %v2954_v5  ;;  %vm2934_vm5 = vweird.f32 %v6510_v20 }
 0x921   :  { %6511 = vrsqrt.f32 %v2906_v12  ;;  %vm2935_vm7 = vmor %vm2933_vm6, %vm2934_vm5  ;;  %vm2943_vm1 = vweird.f32 %v2906_v12 }
 0x922   :  { %v2926_v25 = vsel %vm2925_vm2, %v6508_v50, %v2922_v10  ;;  %v2929_v9 = vmul.f32 %v6510_v20, %v2928_v19 }
 0x923   :  { %v2948_v23 = vmul.f32 %v2926_v25, %v8498_v26 }
 0x924   :  { %v2930_v46 = vmul.f32 0.5, %v2929_v9 }
 0x925   :  { %v2955_v30 = vmul.f32 %v6315_v11, %v2948_v23 }
 0x926   :  { %v2931_v6 = vsub.f32 1.5, %v2930_v46 }
 0x927   :  { %5939 = vmatmul.msk.f32.gmra.mxu2 %vm75_vm0, %v2955_v30  ;;  %5943 = vmatmul.msk.f32.gmra.mxu3 %vm75_vm0, %v2955_v30  ;;  %v6512_v43 = vpop.eup %6511 }
 0x928   :  { %v2932_v45 = vmul.f32 %v6510_v20, %v2931_v6  ;;  %5947 = vmatmul.msk.f32.gmra.mxu0 %vm75_vm0, %v2955_v30  ;;  %v2938_v2 = vmul.f32 %v6512_v43, %v2906_v12  ;;  %vm2944_vm8 = vweird.f32 %v6512_v43 }
 0x929   :  { %vm2945_vm15 = vmor %vm2943_vm1, %vm2944_vm8 }
 0x92a   :  { %v2936_v62 = vsel %vm2935_vm7, %v6510_v20, %v2932_v45  ;;  %v2939_v59 = vmul.f32 %v6512_v43, %v2938_v2 }
 0x92b   :  { %v2949_v42 = vmul.f32 %v2936_v62, %v8504_v22 }
 0x92c   :  { %v2940_v41 = vmul.f32 0.5, %v2939_v59 }
 0x92d   :  { %v2956_v8 = vmul.f32 %v6315_v11, %v2949_v42 }
 0x92e   :  { %v2941_v34 = vsub.f32 1.5, %v2940_v41 }
 0x92f   :  { %5940 = vmatmul.msk.f32.gmra.mxu2 %vm75_vm0, %v2956_v8  ;;  %5944 = vmatmul.msk.f32.gmra.mxu3 %vm75_vm0, %v2956_v8 }
 0x930   :  { %5948 = vmatmul.msk.f32.gmra.mxu0 %vm75_vm0, %v2956_v8  ;;  %v2942_v15 = vmul.f32 %v6512_v43, %v2941_v34 }
 0x932   :  { %v2946_v49 = vsel %vm2945_vm15, %v6512_v43, %v2942_v15 }
 0x933   :  { %v2950_v1 = vmul.f32 %v2946_v49, %v8510_v56 }
 0x935   :  { %v2957_v32 = vmul.f32 %v6315_v11, %v2950_v1 }
 0x937   :  { %5941 = vmatmul.msk.f32.gmra.mxu2 %vm75_vm0, %v2957_v32  ;;  %5945 = vmatmul.msk.f32.gmra.mxu3 %vm75_vm0, %v2957_v32 }
 0x938   :  { %5949 = vmatmul.msk.f32.gmra.mxu0 %vm75_vm0, %v2957_v32 }
 0x9a2   :  { %v8646_v58 = vpop.f32.mrf.mxu2  ;;  %v8648_v14 = vpop.f32.mrf.mxu3 }
 0x9a3   :  { %3096 = vrot.lane.b32.xlu2 %v8646_v58, %s6680_s27  ;;  %3830 = vrot.lane.b32.xlu0 %v8646_v58, %s6684_s29 }
 0x9aa   :  { %v8654_v39 = vpop.f32.mrf.mxu2  ;;  %v8656_v4 = vpop.f32.mrf.mxu3 }
 0x9ab   :  { %3346 = vrot.lane.b32.xlu2 %v8646_v58, %s6681_s28  ;;  %3098 = vrot.lane.b32.xlu1 %v8654_v39, %s6680_s27  ;;  %v8664_v47 = vpack.i.bf16 %v8648_v14, %v8656_v4 }
 0x9ad   :  { %6259 = vrot.lane.b32.xlu0 %v8664_v47, %s6685_s30 }
 0x9b2   :  { %v8674_v16 = vpop.f32.mrf.mxu2  ;;  %v8688_v54 = vpop.f32.mrf.mxu3 }
 0x9b3   :  { %3342 = vrot.lane.b32.xlu2 %v8646_v58, %s6683_s4  ;;  %3832 = vrot.lane.b32.xlu1 %v8654_v39, %s6684_s29 }
 0x9b5   :  { %3344 = vrot.lane.b32.xlu0 %v8654_v39, %s6683_s4 }
 0x9ba   :  { %v8694_v36 = vpop.f32.mrf.mxu2  ;;  %v8719_v55 = vpop.f32.mrf.mxu3 }
 0x9bb   :  { %3590 = vrot.lane.b32.xlu2 %v8646_v58, %s6682_s3  ;;  %3385 = vrot.lane.b32.xlu1 %v8674_v16, %s6681_s28 }
 0x9bd   :  { %3836 = vrot.lane.b32.xlu0 %v8656_v4, %s6683_s4 }
 0x9c3   :  { %3834 = vrot.lane.b32.xlu2 %v8648_v14, %s6683_s4  ;;  %3625 = vrot.lane.b32.xlu1 %v8674_v16, %s6682_s3 }
 0x9c5   :  { %3381 = vrot.lane.b32.xlu0 %v8674_v16, %s6683_s4 }
 0x9cb   :  { %3348 = vrot.lane.b32.xlu2 %v8654_v39, %s6681_s28  ;;  %3873 = vrot.lane.b32.xlu1 %v8688_v54, %s6683_s4 }
 0x9cd   :  { %3383 = vrot.lane.b32.xlu0 %v8694_v36, %s6683_s4 }
 0x9d3   :  { %3592 = vrot.lane.b32.xlu2 %v8654_v39, %s6682_s3 }
 0x9db   :  { %3133 = vrot.lane.b32.xlu2 %v8674_v16, %s6680_s27 }
 0x9e3   :  { %3135 = vrot.lane.b32.xlu2 %v8694_v36, %s6680_s27 }
 0x9eb   :  { %3387 = vrot.lane.b32.xlu2 %v8694_v36, %s6681_s28 }
 0x9f3   :  { %3627 = vrot.lane.b32.xlu2 %v8694_v36, %s6682_s3 }
 0x9fb   :  { %4084 = vrot.lane.b32.xlu2 %v8656_v4, %s6682_s3 }
 0x9fd   :  { %v3097_v44 = vpop.permute.xlu2 %3096 }
 0xa03   :  { %3869 = vrot.lane.b32.xlu2 %v8674_v16, %s6684_s29 }
 0xa05   :  { %v3347_v60 = vpop.permute.xlu2 %3346 }
 0xa0b   :  { %4080 = vrot.lane.b32.xlu2 %v8654_v39, %s6685_s30 }
 0xa0d   :  { %v3343_v24 = vpop.permute.xlu2 %3342 }
 0xa13   :  { %4121 = vrot.lane.b32.xlu2 %v8688_v54, %s6682_s3 }
 0xa15   :  { %v3591_v17 = vpop.permute.xlu2 %3590  ;;  %v3831_v57 = vpop.permute.xlu0 %3830 }
 0xa1b   :  { %4314 = vrot.lane.b32.xlu2 %v8646_v58, %s6686_s1 }
 0xa1d   :  { %v3835_v0 = vpop.permute.xlu2 %3834  ;;  %v3099_v27 = vpop.permute.xlu1 %3098 }
 0xa1e   :  { %5950 = vmatpush.xpose.msk.msrb.mxu1 %vm525_vm12, %v3099_v27 }
 0xa1f   :  { %v6260_v63 = vpop.permute.xlu0 %6259 }
 0xa20   :  { %v6261_v48 = vunpack.i.l.bf16 %v6260_v63  ;;  %v6262_v61 = vunpack.i.h.bf16 %v6260_v63 }
 0xa22   :  { %5951 = vmatpush.xpose.msk.msrb.mxu1 %vm525_vm12, %v3097_v44  ;;  %3296 = vmatpush.msra.mxu3 %v6261_v48 }
 0xa23   :  { %4359 = vrot.lane.b32.xlu2 %v8719_v55, %s6684_s29 }
 0xa24   :  { %3297 = vmatpush.msra.mxu3 %v6262_v61 }
 0xa25   :  { %v3349_v13 = vpop.permute.xlu2 %3348  ;;  %5952 = vmatmul.msk.f32.vlgmr.msrb.gmra.mxu1 %vm525_vm12, %v8646_v58  ;;  %v3833_v50 = vpop.permute.xlu1 %3832 }
 0xa27   :  { %v3345_v3 = vpop.permute.xlu0 %3344 }
 0xa2b   :  { %4355 = vrot.lane.b32.xlu2 %v8694_v36, %s6686_s1 }
 0xa2d   :  { %v3593_v28 = vpop.permute.xlu2 %3592  ;;  %5953 = vmatmul.msk.f32.gmra.mxu1 %vm525_vm12, %v8654_v39  ;;  %v3386_v29 = vpop.permute.xlu1 %3385 }
 0xa2f   :  { %v3837_v11 = vpop.permute.xlu0 %3836 }
 0xa35   :  { %v3134_v51 = vpop.permute.xlu2 %3133  ;;  %v8785_v41 = vpop.permute.xlu1 %3625 }
 0xa37   :  { %v8781_v59 = vpop.permute.xlu0 %3381 }
 0xa3d   :  { %v3136_v7 = vpop.permute.xlu2 %3135  ;;  %v8795_v1 = vpop.permute.xlu1 %3873 }
 0xa3e   :  { %5954 = vmatpush.xpose.msk.msra.mxu2 %vm525_vm12, %v3136_v7 }
 0xa3f   :  { %v8789_v34 = vpop.permute.xlu0 %3383 }
 0xa42   :  { %5955 = vmatpush.xpose.msk.msra.mxu2 %vm525_vm12, %v3134_v51 }
 0xa45   :  { %5956 = vmatmul.msk.f32.vlgmr.msra.gmra.mxu2 %vm525_vm12, %v8674_v16  ;;  %v3388_v21 = vpop.permute.xlu2 %3387 }
 0xa46   :  { %5962 = vmatpush.xpose.msk.msrb.mxu2 %vm525_vm12, %v3349_v13  ;;  %5966 = vmatpush.xpose.msk.msrb.mxu3 %vm525_vm12, %v3388_v21 }
 0xa4a   :  { %5963 = vmatpush.xpose.msk.msrb.mxu2 %vm525_vm12, %v3347_v60  ;;  %5967 = vmatpush.xpose.msk.msrb.mxu3 %vm525_vm12, %v3386_v29 }
 0xa4d   :  { %5957 = vmatmul.msk.f32.gmra.mxu2 %vm525_vm12, %v8694_v36  ;;  %v8747_v31 = vpop.permute.xlu2 %3627 }
 0xa4e   :  { %5974 = vmatpush.xpose.msk.msra.mxu2 %vm525_vm12, %v8656_v4 }
 0xa52   :  { %5975 = vmatpush.xpose.msk.msra.mxu2 %vm525_vm12, %v8648_v14 }
 0xa55   :  { %5964 = vmatmul.msk.f32.vlgmr.msrb.gmra.mxu2 %vm525_vm12, %v3343_v24  ;;  %v4085_v18 = vpop.permute.xlu2 %4084 }
 0xa56   :  { %5986 = vmatpush.xpose.msk.msrb.mxu2 %vm525_vm12, %v3837_v11 }
 0xa5a   :  { %5987 = vmatpush.xpose.msk.msrb.mxu2 %vm525_vm12, %v3835_v0 }
 0xa5d   :  { %5965 = vmatmul.msk.f32.gmra.mxu2 %vm525_vm12, %v3345_v3 }
 0xa65   :  { %5976 = vmatmul.msk.f32.vlgmr.msra.gmra.mxu2 %vm525_vm12, %v3591_v17 }
 0xa66   :  { %5998 = vmatpush.xpose.msk.msra.mxu2 %vm525_vm12, %v4085_v18 }
 0xa6d   :  { %5977 = vmatmul.msk.f32.gmra.mxu2 %vm525_vm12, %v3593_v28 }
 0xa75   :  { %5988 = vmatmul.msk.f32.vlgmr.msrb.gmra.mxu2 %vm525_vm12, %v3831_v57 }
 0xa7d   :  { %5989 = vmatmul.msk.f32.gmra.mxu2 %vm525_vm12, %v3833_v50 }
 0xaa2   :  { %v3125_v40 = vpop.f32.mrf.mxu1 }
 0xaa3   :  { %v3168_v33 = vmul.f32 0.25, %v3125_v40 }
 0xaa5   :  { %v3172_v5 = vsel %vm525_vm12, %v3168_v33, -inf }
 0xaa6   :  { %3173 = vmax.xlane.f32.xlu0 %v3172_v5 }
 0xaaa   :  { %v3128_v52 = vpop.f32.mrf.mxu1 }
 0xaab   :  { %v3169_v53 = vmul.f32 0.25, %v3128_v52 }
 0xaad   :  { %v3175_v37 = vsel %vm525_vm12, %v3169_v53, -inf }
 0xaae   :  { %3176 = vmax.xlane.f32.xlu1 %v3175_v37 }
 0xaba   :  { %3875 = vrot.lane.b32.xlu0 %v8719_v55, %s6683_s4 }
 0xac7   :  { %4078 = vrot.lane.b32.xlu1 %v8646_v58, %s6685_s30 }
 0xac8   :  { %v3162_v20 = vpop.f32.mrf.mxu2 }
 0xac9   :  { %v8783_v42 = vmul.f32 0.25, %v3162_v20 }
 0xacb   :  { %v3178_v8 = vsel %vm525_vm12, %v8783_v42, -inf }
 0xacf   :  { %4123 = vrot.lane.b32.xlu1 %v8719_v55, %s6682_s3 }
 0xad0   :  { %v3165_v10 = vpop.f32.mrf.mxu2 }
 0xad1   :  { %v8763_v19 = vmul.f32 0.25, %v3165_v10  ;;  %v3870_v10 = vpop.permute.xlu2 %3869 }
 0xad3   :  { %v3181_v12 = vsel %vm525_vm12, %v8763_v19, -inf }
 0xad4   :  { %3182 = vmax.xlane.f32.xlu2 %v3181_v12 }
 0xad7   :  { %4318 = vrot.lane.b32.xlu1 %v8648_v14, %s6684_s29 }
 0xad8   :  { %v3375_v25 = vpop.f32.mrf.mxu2 }
 0xad9   :  { %v8815_v13 = vmul.f32 0.25, %v3375_v25 }
 0xadf   :  { %4119 = vrot.lane.b32.xlu1 %v8694_v36, %s6685_s30 }
 0xae0   :  { %v3378_v9 = vpop.f32.mrf.mxu2 }
 0xae1   :  { %v8791_v15 = vmul.f32 0.25, %v3378_v9 }
 0xae3   :  { %v3427_v49 = vsel %vm525_vm12, %v8791_v15, -inf }
 0xae7   :  { %4357 = vrot.lane.b32.xlu1 %v8688_v54, %s6684_s29 }
 0xae8   :  { %v3619_v23 = vpop.f32.mrf.mxu2 }
 0xae9   :  { %v8773_v46 = vmul.f32 0.25, %v3619_v23 }
 0xaeb   :  { %v3664_v30 = vsel %vm525_vm12, %v8773_v46, -inf }
 0xaec   :  { %3665 = vmax.xlane.f32.xlu2 %v3664_v30 }
 0xaf0   :  { %v3622_v6 = vpop.f32.mrf.mxu2 }
 0xaf8   :  { %v3863_v43 = vpop.f32.mrf.mxu2 }
 0xaf9   :  { %v8797_v44 = vmul.f32 0.25, %v3863_v43 }
 0xafb   :  { %v3912_v24 = vsel %vm525_vm12, %v8797_v44, -inf }
 0xb00   :  { %v3866_v45 = vpop.f32.mrf.mxu2 }
 0xb01   :  { %v8777_v2 = vmul.f32 0.25, %v3866_v45 }
 0xb03   :  { %v3915_v62 = vsel %vm525_vm12, %v8777_v2, -inf }
 0xb04   :  { %3916 = vmax.xlane.f32.xlu2 %v3915_v62 }
 0xb11   :  { %3179 = vmax.xlane.f32.xlu1 %v3178_v8  ;;  %v4081_v8 = vpop.permute.xlu2 %4080 }
 0xb19   :  { %3428 = vmax.xlane.f32.xlu1 %v3427_v49  ;;  %v3174_v32 = vpop.xlane.xlu0 %3173 }
 0xb1a   :  { %v3184_v58 = vsub.f32 %v3168_v33, %v3174_v32 }
 0xb1c   :  { %v3188_v60 = vmul.f32 1.442695, %v3184_v58  ;;  %v4122_v58 = vpop.permute.xlu2 %4121 }
 0xb1e   :  { %6513 = vpow2.f32 %v3188_v60 }
 0xb21   :  { %v3177_v17 = vpop.xlane.xlu1 %3176  ;;  %3913 = vmax.xlane.f32.xlu1 %v3912_v24 }
 0xb22   :  { %v3185_v57 = vsub.f32 %v3169_v53, %v3177_v17 }
 0xb24   :  { %v6514_v0 = vpop.eup %6513  ;;  %v3190_v27 = vmul.f32 1.442695, %v3185_v57  ;;  %v4315_v17 = vpop.permute.xlu2 %4314 }
 0xb25   :  { %v3196_v63 = vsel %vm525_vm12, %v6514_v0, 0.0 }
 0xb26   :  { %6515 = vpow2.f32 %v3190_v27  ;;  %3197 = vadd.xlane.f32.xlu0 %v3196_v63 }
 0xb2c   :  { %v6516_v48 = vpop.eup %6515  ;;  %v3876_v28 = vpop.permute.xlu0 %3875 }
 0xb2d   :  { %v3199_v61 = vsel %vm525_vm12, %v6516_v48, 0.0  ;;  %v4360_v57 = vpop.permute.xlu2 %4359 }
 0xb2e   :  { %3200 = vadd.xlane.f32.xlu0 %v3199_v61 }
 0xb39   :  { %v4079_v45 = vpop.permute.xlu1 %4078 }
 0xb41   :  { %v4124_v32 = vpop.permute.xlu1 %4123 }
 0xb42   :  { %4082 = vrot.lane.b32.xlu0 %v8648_v14, %s6682_s3  ;;  %v3424_v14 = vsel %vm525_vm12, %v8815_v13, -inf }
 0xb49   :  { %v4319_v24 = vpop.permute.xlu1 %4318 }
 0xb4a   :  { %3871 = vrot.lane.b32.xlu0 %v8694_v36, %s6684_s29  ;;  %v8819_v36 = vmul.f32 0.25, %v3622_v6 }
 0xb52   :  { %4320 = vrot.lane.b32.xlu0 %v8656_v4, %s6684_s29  ;;  %v3667_v4 = vsel %vm525_vm12, %v8819_v36, -inf }
 0xb5a   :  { %4117 = vrot.lane.b32.xlu0 %v8674_v16, %s6685_s30 }
 0xb62   :  { %4316 = vrot.lane.b32.xlu0 %v8654_v39, %s6686_s1 }
 0xb6a   :  { %4353 = vrot.lane.b32.xlu0 %v8674_v16, %s6686_s1 }
 0xb94   :  { %3425 = vmax.xlane.f32.xlu0 %v3424_v14 }
 0xb99   :  { %v3198_v51 = vpop.xlane.xlu0 %3197 }
 0xb9a   :  { %6517 = vrcp.f32 %v3198_v51  ;;  %v3219_v21 = vand.u32 2147483648, %v3198_v51  ;;  %v3217_v3 = vand.u32 2147483647, %v3198_v51  ;;  %vm3213_vm2 = vweird.f32 %v3198_v51 }
 0xb9c   :  { %3668 = vmax.xlane.f32.xlu0 %v3667_v4  ;;  %v3220_v40 = vor.u32 1.1754944e-38, %v3219_v21  ;;  %vm3218_vm6 = vcmp.eq.f32.partialorder %v3217_v3, 8.507059e+37 }
 0xba0   :  { %v6518_v7 = vpop.eup %6517 }
 0xba1   :  { %v3209_v39 = vmul.f32 %v6518_v7, %v3198_v51  ;;  %v3201_v50 = vpop.xlane.xlu0 %3200  ;;  %vm3214_vm4 = vweird.f32 %v6518_v7 }
 0xba2   :  { %6519 = vrcp.f32 %v3201_v50  ;;  %vm3215_vm5 = vmor %vm3213_vm2, %vm3214_vm4  ;;  %v3234_v20 = vand.u32 2147483648, %v3201_v50  ;;  %v3232_v25 = vand.u32 2147483647, %v3201_v50  ;;  %vm3228_vm8 = vweird.f32 %v3201_v50 }
 0xba3   :  { %v3210_v16 = vsub.f32 1.0, %v3209_v39 }
 0xba4   :  { %v3235_v23 = vor.u32 1.1754944e-38, %v3234_v20  ;;  %vm3233_vm15 = vcmp.eq.f32.partialorder %v3232_v25, 8.507059e+37 }
 0xba5   :  { %v3211_v29 = vmul.f32 %v6518_v7, %v3210_v16 }
 0xba7   :  { %v3212_v11 = vadd.f32 %v6518_v7, %v3211_v29  ;;  %v8879_v29 = vpack.i.bf16 %v8688_v54, %v8719_v55 }
 0xba8   :  { %v6520_v18 = vpop.eup %6519 }
 0xba9   :  { %v3216_v33 = vsel %vm3215_vm5, %v6518_v7, %v3212_v11  ;;  %v3224_v5 = vmul.f32 %v6520_v18, %v3201_v50  ;;  %vm3229_vm7 = vweird.f32 %v6520_v18 }
 0xbaa   :  { %v3221_v52 = vsel %vm3218_vm6, %v3220_v40, %v3216_v33  ;;  %vm3230_vm1 = vmor %vm3228_vm8, %vm3229_vm7 }
 0xbab   :  { %v3222_v53 = vmul.f32 %v6514_v0, %v3221_v52  ;;  %v3225_v37 = vsub.f32 1.0, %v3224_v5 }
 0xbad   :  { %v3226_v12 = vmul.f32 %v6520_v18, %v3225_v37  ;;  %5958 = vmatmul.msk.f32.vlgmr.msra.gmra.mxu3 %vm525_vm12, %v3222_v53 }
 0xbae   :  { %5978 = vmatpush.xpose.msk.msra.mxu3 %vm525_vm12, %v8719_v55 }
 0xbaf   :  { %v3227_v9 = vadd.f32 %v6520_v18, %v3226_v12 }
 0xbb1   :  { %v3231_v30 = vsel %vm3230_vm1, %v6520_v18, %v3227_v9 }
 0xbb2   :  { %5979 = vmatpush.xpose.msk.msra.mxu3 %vm525_vm12, %v8688_v54  ;;  %v3236_v6 = vsel %vm3233_vm15, %v3235_v23, %v3231_v30 }
 0xbb3   :  { %v3237_v43 = vmul.f32 %v6516_v48, %v3236_v6 }
 0xbb4   :  { %v4083_v62 = vpop.permute.xlu0 %4082 }
 0xbb5   :  { %5959 = vmatmul.msk.f32.gmra.mxu3 %vm525_vm12, %v3237_v43  ;;  %5999 = vmatpush.xpose.msk.msra.mxu2 %vm525_vm12, %v4083_v62 }
 0xbb8   :  { %6000 = vmatmul.msk.f32.vlgmr.msra.gmra.mxu2 %vm525_vm12, %v4079_v45 }
 0xbbc   :  { %v3872_v49 = vpop.permute.xlu0 %3871 }
 0xbbd   :  { %5968 = vmatmul.msk.f32.vlgmr.msrb.gmra.mxu3 %vm525_vm12, %v8781_v59 }
 0xbbe   :  { %5990 = vmatpush.xpose.msk.msrb.mxu3 %vm525_vm12, %v3876_v28 }
 0xbc0   :  { %6001 = vmatmul.msk.f32.gmra.mxu2 %vm525_vm12, %v4081_v8 }
 0xbc2   :  { %5991 = vmatpush.xpose.msk.msrb.mxu3 %vm525_vm12, %v8795_v1 }
 0xbc4   :  { %v4321_v60 = vpop.permute.xlu0 %4320 }
 0xbc5   :  { %5969 = vmatmul.msk.f32.gmra.mxu3 %vm525_vm12, %v8789_v34  ;;  %6010 = vmatpush.xpose.msk.msrb.mxu2 %vm525_vm12, %v4321_v60  ;;  %v4120_v34 = vpop.permute.xlu1 %4119 }
 0xbc9   :  { %6011 = vmatpush.xpose.msk.msrb.mxu2 %vm525_vm12, %v4319_v24 }
 0xbcc   :  { %6012 = vmatmul.msk.f32.vlgmr.msrb.gmra.mxu2 %vm525_vm12, %v4315_v17  ;;  %v4118_v59 = vpop.permute.xlu0 %4117 }
 0xbcd   :  { %5980 = vmatmul.msk.f32.vlgmr.msra.gmra.mxu3 %vm525_vm12, %v8785_v41  ;;  %v4358_v0 = vpop.permute.xlu1 %4357 }
 0xbce   :  { %6002 = vmatpush.xpose.msk.msra.mxu3 %vm525_vm12, %v4124_v32 }
 0xbd2   :  { %6003 = vmatpush.xpose.msk.msra.mxu3 %vm525_vm12, %v4122_v58 }
 0xbd4   :  { %v4317_v1 = vpop.permute.xlu0 %4316 }
 0xbd5   :  { %5981 = vmatmul.msk.f32.gmra.mxu3 %vm525_vm12, %v8747_v31  ;;  %6013 = vmatmul.msk.f32.gmra.mxu2 %vm525_vm12, %v4317_v1  ;;  %v4356_v31 = vpop.permute.xlu2 %4355  ;;  %v3180_v21 = vpop.xlane.xlu1 %3179 }
 0xbd6   :  { %v3186_v9 = vsub.f32 %v8783_v42, %v3180_v21 }
 0xbd8   :  { %v3192_v6 = vmul.f32 1.442695, %v3186_v9 }
 0xbdc   :  { %v4354_v41 = vpop.permute.xlu0 %4353 }
 0xbdd   :  { %5992 = vmatmul.msk.f32.vlgmr.msrb.gmra.mxu3 %vm525_vm12, %v3870_v10  ;;  %v3429_v11 = vpop.xlane.xlu1 %3428  ;;  %v3183_v55 = vpop.xlane.xlu2 %3182 }
 0xbde   :  { %6014 = vmatpush.xpose.msk.msrb.mxu3 %vm525_vm12, %v4360_v57  ;;  %v3437_v18 = vsub.f32 %v8791_v15, %v3429_v11  ;;  %v3187_v20 = vsub.f32 %v8763_v19, %v3183_v55 }
 0xbe0   :  { %v3442_v40 = vmul.f32 1.442695, %v3437_v18  ;;  %v3194_v10 = vmul.f32 1.442695, %v3187_v20 }
 0xbe2   :  { %6015 = vmatpush.xpose.msk.msrb.mxu3 %vm525_vm12, %v4358_v0  ;;  %6521 = vpow2.f32 %v3442_v40 }
 0xbe5   :  { %5993 = vmatmul.msk.f32.gmra.mxu3 %vm525_vm12, %v3872_v49  ;;  %v3666_v25 = vpop.xlane.xlu2 %3665  ;;  %v3914_v60 = vpop.xlane.xlu1 %3913 }
 0xbe6   :  { %v3676_v8 = vsub.f32 %v8773_v46, %v3666_v25  ;;  %v3924_v46 = vsub.f32 %v8797_v44, %v3914_v60 }
 0xbe8   :  { %v8889_v54 = vpop.eup %6521  ;;  %v3680_v32 = vmul.f32 1.442695, %v3676_v8  ;;  %v3928_v1 = vmul.f32 1.442695, %v3924_v46 }
 0xbe9   :  { %v3451_v15 = vsel %vm525_vm12, %v8889_v54, 0.0 }
 0xbed   :  { %6004 = vmatmul.msk.f32.vlgmr.msra.gmra.mxu3 %vm525_vm12, %v4118_v59  ;;  %v3917_v45 = vpop.xlane.xlu2 %3916 }
 0xbee   :  { %v3925_v42 = vsub.f32 %v8777_v2, %v3917_v45 }
 0xbf0   :  { %v3930_v58 = vmul.f32 1.442695, %v3925_v42 }
 0xbf5   :  { %6005 = vmatmul.msk.f32.gmra.mxu3 %vm525_vm12, %v4120_v34 }
 0xbfd   :  { %6016 = vmatmul.msk.f32.vlgmr.msrb.gmra.mxu3 %vm525_vm12, %v4354_v41 }
 0xc05   :  { %6017 = vmatmul.msk.f32.gmra.mxu3 %vm525_vm12, %v4356_v31 }
 0xc07   :  { %v3426_v3 = vpop.xlane.xlu0 %3425 }
 0xc0f   :  { %v3669_v33 = vpop.xlane.xlu0 %3668 }
 0xc10   :  { %v3677_v52 = vsub.f32 %v8819_v36, %v3669_v33  ;;  %v3436_v36 = vsub.f32 %v8815_v13, %v3426_v3 }
 0xc12   :  { %v3682_v53 = vmul.f32 1.442695, %v3677_v52  ;;  %v3440_v19 = vmul.f32 1.442695, %v3436_v36 }
 0xc14   :  { %6523 = vpow2.f32 %v3682_v53 }
 0xc15   :  { %6525 = vpow2.f32 %v3194_v10 }
 0xc16   :  { %6527 = vpow2.f32 %v3192_v6 }
 0xc17   :  { %6529 = vpow2.f32 %v3440_v19 }
 0xc18   :  { %6531 = vpow2.f32 %v3680_v32 }
 0xc19   :  { %6533 = vpow2.f32 %v3930_v58 }
 0xc1a   :  { %v8896_v12 = vpop.eup %6523  ;;  %6535 = vpow2.f32 %v3928_v1 }
 0xc1b   :  { %v3691_v23 = vsel %vm525_vm12, %v8896_v12, 0.0  ;;  %v8904_v62 = vpop.eup %6525 }
 0xc1c   :  { %v3205_v49 = vsel %vm525_vm12, %v8904_v62, 0.0  ;;  %v8912_v24 = vpop.eup %6527 }
 0xc1d   :  { %v8914_v17 = vpop.eup %6529  ;;  %v3202_v2 = vsel %vm525_vm12, %v8912_v24, 0.0 }
 0xc1e   :  { %v3448_v59 = vsel %vm525_vm12, %v8914_v17, 0.0  ;;  %v8921_v34 = vpop.eup %6531 }
 0xc1f   :  { %v8923_v57 = vpop.eup %6533  ;;  %v3688_v41 = vsel %vm525_vm12, %v8921_v34, 0.0 }
 0xc20   :  { %v3939_v44 = vsel %vm525_vm12, %v8923_v57, 0.0  ;;  %v8929_v31 = vpop.eup %6535 }
 0xc30   :  { %v8886_v5 = vpop.f32.mrf.mxu3 }
 0xc38   :  { %v8891_v37 = vpop.f32.mrf.mxu3 }
 0xc3b   :  { %v4111_v27 = vpop.f32.mrf.mxu2 }
 0xc3c   :  { %v8857_v63 = vmul.f32 0.25, %v4111_v27 }
 0xc3e   :  { %v4160_v48 = vsel %vm525_vm12, %v8857_v63, -inf }
 0xc3f   :  { %4161 = vmax.xlane.f32.xlu0 %v4160_v48  ;;  %v3936_v48 = vsel %vm525_vm12, %v8929_v31, 0.0 }
 0xc40   :  { %v3414_v30 = vpop.f32.mrf.mxu3 }
 0xc41   :  { %v8902_v43 = vmul.f32 0.25, %v3414_v30 }
 0xc43   :  { %v4114_v61 = vpop.f32.mrf.mxu2  ;;  %v3430_v13 = vsel %vm525_vm12, %v8902_v43, -inf }
 0xc44   :  { %v8861_v28 = vmul.f32 0.25, %v4114_v61 }
 0xc46   :  { %v4163_v14 = vsel %vm525_vm12, %v8861_v28, -inf }
 0xc47   :  { %4164 = vmax.xlane.f32.xlu2 %v4163_v14 }
 0xc48   :  { %v3417_v0 = vpop.f32.mrf.mxu3 }
 0xc49   :  { %v8931_v27 = vmul.f32 0.25, %v3417_v0 }
 0xc4b   :  { %v3433_v14 = vsel %vm525_vm12, %v8931_v27, -inf }
 0xc4f   :  { %v4347_v51 = vpop.f32.mrf.mxu2 }
 0xc50   :  { %v8865_v4 = vmul.f32 0.25, %v4347_v51  ;;  %v3654_v61 = vpop.f32.mrf.mxu3 }
 0xc51   :  { %v8937_v51 = vmul.f32 0.25, %v3654_v61 }
 0xc52   :  { %v4396_v7 = vsel %vm525_vm12, %v8865_v4, -inf }
 0xc53   :  { %6269 = vrot.lane.b32.xlu0 %v8664_v47, %s6686_s1  ;;  %4397 = vmax.xlane.f32.xlu1 %v4396_v7 }
 0xc58   :  { %v4350_v39 = vpop.f32.mrf.mxu2  ;;  %v3657_v40 = vpop.f32.mrf.mxu3 }
 0xc59   :  { %v8871_v50 = vmul.f32 0.25, %v4350_v39  ;;  %v8954_v36 = vmul.f32 0.25, %v3657_v40 }
 0xc5b   :  { %6279 = vrot.lane.b32.xlu0 %v8664_v47, %s6680_s27  ;;  %v4399_v16 = vsel %vm525_vm12, %v8871_v50, -inf  ;;  %v3673_v6 = vsel %vm525_vm12, %v8954_v36, -inf }
 0xc5c   :  { %4400 = vmax.xlane.f32.xlu2 %v4399_v16  ;;  %v3670_v16 = vsel %vm525_vm12, %v8937_v51, -inf }
 0xc60   :  { %v3902_v10 = vpop.f32.mrf.mxu3 }
 0xc61   :  { %v8970_v0 = vmul.f32 0.25, %v3902_v10 }
 0xc68   :  { %v3905_v19 = vpop.f32.mrf.mxu3 }
 0xc6c   :  { %6264 = vrot.lane.b32.xlu1 %v8879_v29, %s6685_s30 }
 0xc74   :  { %6274 = vrot.lane.b32.xlu2 %v8879_v29, %s6686_s1 }
 0xc85   :  { %3452 = vadd.xlane.f32.xlu0 %v3451_v15 }
 0xc8d   :  { %3692 = vadd.xlane.f32.xlu0 %v3691_v23 }
 0xc95   :  { %3431 = vmax.xlane.f32.xlu0 %v3430_v13  ;;  %v8966_v13 = vmul.f32 0.25, %v3905_v19 }
 0xc96   :  { %3206 = vadd.xlane.f32.xlu1 %v3205_v49 }
 0xc97   :  { %v3921_v32 = vsel %vm525_vm12, %v8966_v13, -inf }
 0xc9d   :  { %3203 = vadd.xlane.f32.xlu2 %v3202_v2 }
 0xc9e   :  { %3449 = vadd.xlane.f32.xlu1 %v3448_v59 }
 0xca5   :  { %3689 = vadd.xlane.f32.xlu2 %v3688_v41 }
 0xca6   :  { %3940 = vadd.xlane.f32.xlu1 %v3939_v44  ;;  %v3918_v44 = vsel %vm525_vm12, %v8970_v0, -inf }
 0xcad   :  { %3937 = vadd.xlane.f32.xlu2 %v3936_v48 }
 0xcae   :  { %3434 = vmax.xlane.f32.xlu1 %v3433_v14 }
 0xcb2   :  { %v4162_v7 = vpop.xlane.xlu0 %4161 }
 0xcb3   :  { %v4172_v39 = vsub.f32 %v8857_v63, %v4162_v7 }
 0xcb5   :  { %v4176_v21 = vmul.f32 1.442695, %v4172_v39  ;;  %3671 = vmax.xlane.f32.xlu2 %v3670_v16 }
 0xcb7   :  { %6537 = vpow2.f32 %v4176_v21 }
 0xcba   :  { %v4165_v3 = vpop.xlane.xlu2 %4164 }
 0xcbb   :  { %v4173_v11 = vsub.f32 %v8861_v28, %v4165_v3 }
 0xcbd   :  { %v8943_v18 = vpop.eup %6537  ;;  %v4178_v33 = vmul.f32 1.442695, %v4173_v11 }
 0xcbe   :  { %v4184_v52 = vsel %vm525_vm12, %v8943_v18, 0.0 }
 0xcbf   :  { %6539 = vpow2.f32 %v4178_v33  ;;  %4185 = vadd.xlane.f32.xlu0 %v4184_v52 }
 0xcc5   :  { %v8947_v53 = vpop.eup %6539  ;;  %v6270_v63 = vpop.permute.xlu0 %6269 }
 0xcc6   :  { %v6271_v55 = vunpack.i.l.bf16 %v6270_v63  ;;  %v4398_v20 = vpop.xlane.xlu1 %4397  ;;  %v4187_v15 = vsel %vm525_vm12, %v8947_v53, 0.0  ;;  %v6272_v25 = vunpack.i.h.bf16 %v6270_v63 }
 0xcc7   :  { %v4408_v28 = vsub.f32 %v8865_v4, %v4398_v20  ;;  %4188 = vadd.xlane.f32.xlu0 %v4187_v15  ;;  %6284 = vrot.lane.b32.xlu1 %v8879_v29, %s6680_s27 }
 0xcc8   :  { %3546 = vmatpush.msrb.mxu0 %v6271_v55 }
 0xcc9   :  { %v4412_v9 = vmul.f32 1.442695, %v4408_v28 }
 0xcca   :  { %3547 = vmatpush.msrb.mxu0 %v6272_v25 }
 0xccb   :  { %6541 = vpow2.f32 %v4412_v9 }
 0xccd   :  { %v6280_v23 = vpop.permute.xlu0 %6279  ;;  %6289 = vrot.lane.b32.xlu2 %v8664_v47, %s6681_s28  ;;  %v4150_v47 = vpop.f32.mrf.mxu3 }
 0xcce   :  { %v6281_v30 = vunpack.i.l.bf16 %v6280_v23  ;;  %v6282_v4 = vunpack.i.h.bf16 %v6280_v23  ;;  %v8974_v48 = vmul.f32 0.25, %v4150_v47 }
 0xccf   :  { %3674 = vmax.xlane.f32.xlu0 %v3673_v6  ;;  %v8962_v8 = vpop.xlane.xlu2 %4400 }
 0xcd0   :  { %3786 = vmatpush.msra.mxu0 %v6281_v30  ;;  %v4166_v14 = vsel %vm525_vm12, %v8974_v48, -inf }
 0xcd1   :  { %v8960_v45 = vpop.eup %6541 }
 0xcd2   :  { %3787 = vmatpush.msra.mxu0 %v6282_v4  ;;  %v4420_v42 = vsel %vm525_vm12, %v8960_v45, 0.0 }
 0xcd5   :  { %v4153_v1 = vpop.f32.mrf.mxu3 }
 0xcd6   :  { %v8984_v16 = vmul.f32 0.25, %v4153_v1 }
 0xcd7   :  { %4421 = vadd.xlane.f32.xlu0 %v4420_v42  ;;  %v6275_v58 = vpop.permute.xlu2 %6274 }
 0xcd8   :  { %v6276_v2 = vunpack.i.l.bf16 %v6275_v58  ;;  %v6277_v59 = vunpack.i.h.bf16 %v6275_v58  ;;  %v4169_v11 = vsel %vm525_vm12, %v8984_v16, -inf }
 0xcdd   :  { %v4386_v41 = vpop.f32.mrf.mxu3 }
 0xcde   :  { %v6265_v49 = vpop.permute.xlu1 %6264  ;;  %v8976_v61 = vmul.f32 0.25, %v4386_v41 }
 0xcdf   :  { %v6266_v60 = vunpack.i.l.bf16 %v6265_v49  ;;  %3922 = vmax.xlane.f32.xlu0 %v3921_v32  ;;  %v6267_v46 = vunpack.i.h.bf16 %v6265_v49 }
 0xce0   :  { %v4402_v39 = vsel %vm525_vm12, %v8976_v61, -inf }
 0xce1   :  { %3333 = vmatpush.msra.mxu1 %v6266_v60 }
 0xce3   :  { %3334 = vmatpush.msra.mxu1 %v6267_v46 }
 0xce5   :  { %3581 = vmatpush.msrb.mxu1 %v6276_v2  ;;  %v4389_v21 = vpop.f32.mrf.mxu3 }
 0xce6   :  { %v8986_v3 = vmul.f32 0.25, %v4389_v21 }
 0xce7   :  { %3582 = vmatpush.msrb.mxu1 %v6277_v59 }
 0xce8   :  { %v4405_v33 = vsel %vm525_vm12, %v8986_v3, -inf }
 0xcf1   :  { %3919 = vmax.xlane.f32.xlu1 %v3918_v44 }
 0xcf6   :  { %4167 = vmax.xlane.f32.xlu2 %v4166_v14 }
 0xcf8   :  { %v8980_v7 = vpop.xlane.xlu0 %3452 }
 0xcf9   :  { %4403 = vmax.xlane.f32.xlu1 %v4402_v39  ;;  %6543 = vrcp.f32 %v8980_v7  ;;  %v3486_v46 = vand.u32 2147483648, %v8980_v7 }
 0xcfe   :  { %4170 = vmax.xlane.f32.xlu2 %v4169_v11 }
 0xcff   :  { %v8999_v15 = vpop.eup %6543 }
 0xd00   :  { %v8990_v40 = vpop.xlane.xlu0 %3692  ;;  %v3476_v25 = vmul.f32 %v8999_v15, %v8980_v7  ;;  %vm3481_vm4 = vweird.f32 %v8999_v15 }
 0xd01   :  { %4406 = vmax.xlane.f32.xlu1 %v4405_v33 }
 0xd02   :  { %v3477_v6 = vsub.f32 1.0, %v3476_v25 }
 0xd04   :  { %v3478_v32 = vmul.f32 %v8999_v15, %v3477_v6 }
 0xd06   :  { %v3479_v21 = vadd.f32 %v8999_v15, %v3478_v32 }
 0xd08   :  { %v3432_v52 = vpop.xlane.xlu0 %3431 }
 0xd09   :  { %v3438_v63 = vsub.f32 %v8902_v43, %v3432_v52  ;;  %v8996_v55 = vpop.xlane.xlu1 %3206 }
 0xd0a   :  { %6545 = vrcp.f32 %v8996_v55  ;;  %vm3258_vm6 = vweird.f32 %v8996_v55 }
 0xd0b   :  { %v3444_v20 = vmul.f32 1.442695, %v3438_v63 }
 0xd0d   :  { %6547 = vpow2.f32 %v3444_v20 }
 0xd10   :  { %v3204_v10 = vpop.xlane.xlu2 %3203  ;;  %v9001_v28 = vpop.eup %6545 }
 0xd11   :  { %6549 = vrcp.f32 %v3204_v10  ;;  %v3450_v9 = vpop.xlane.xlu1 %3449  ;;  %v3254_v43 = vmul.f32 %v9001_v28, %v8996_v55  ;;  %v3247_v59 = vand.u32 2147483647, %v3204_v10  ;;  %v3249_v1 = vand.u32 2147483648, %v3204_v10 }
 0xd12   :  { %6551 = vrcp.f32 %v3450_v9  ;;  %v3471_v39 = vand.u32 2147483648, %v3450_v9  ;;  %v3469_v33 = vand.u32 2147483647, %v3450_v9  ;;  %vm3259_vm7 = vweird.f32 %v9001_v28 }
 0xd13   :  { %v9005_v23 = vpop.eup %6547  ;;  %v3255_v42 = vsub.f32 1.0, %v3254_v43  ;;  %vm3243_vm8 = vweird.f32 %v3204_v10  ;;  %vm3248_vm15 = vcmp.eq.f32.partialorder %v3247_v59, 8.507059e+37  ;;  %v3250_v20 = vor.u32 1.1754944e-38, %v3249_v1 }
 0xd14   :  { %v3454_v30 = vsel %vm525_vm12, %v9005_v23, 0.0  ;;  %vm3465_vm3 = vweird.f32 %v3450_v9  ;;  %v3472_v6 = vor.u32 1.1754944e-38, %v3471_v39 }
 0xd15   :  { %3455 = vadd.xlane.f32.xlu0 %v3454_v30  ;;  %v3256_v44 = vmul.f32 %v9001_v28, %v3255_v42 }
 0xd17   :  { %v6550_v4 = vpop.eup %6549  ;;  %v3257_v43 = vadd.f32 %v9001_v28, %v3256_v44  ;;  %v3484_v44 = vand.u32 2147483647, %v8980_v7 }
 0xd18   :  { %v6552_v19 = vpop.eup %6551  ;;  %v3239_v47 = vmul.f32 %v6550_v4, %v3204_v10  ;;  %v9011_v49 = vpop.xlane.xlu2 %3689  ;;  %vm3244_vm2 = vweird.f32 %v6550_v4  ;;  %v3264_v10 = vand.u32 2147483648, %v8996_v55 }
 0xd19   :  { %v3461_v58 = vmul.f32 %v6552_v19, %v3450_v9  ;;  %6553 = vrcp.f32 %v9011_v49  ;;  %v9015_v60 = vpop.xlane.xlu1 %3940  ;;  %vm3466_vm5 = vweird.f32 %v6552_v19  ;;  %vm3245_vm1 = vmor %vm3243_vm8, %vm3244_vm2  ;;  %vm3470_vm2 = vcmp.eq.f32.partialorder %v3469_v33, 8.507059e+37 }
 0xd1a   :  { %v3240_v2 = vsub.f32 1.0, %v3239_v47  ;;  %6555 = vrcp.f32 %v8990_v40  ;;  %vm3467_vm9 = vmor %vm3465_vm3, %vm3466_vm5  ;;  %v3262_v9 = vand.u32 2147483647, %v8996_v55  ;;  %vm3480_vm3 = vweird.f32 %v8980_v7 }
 0xd1b   :  { %v3462_v41 = vsub.f32 1.0, %v3461_v58  ;;  %vm9042_vm5 = vmor %vm3258_vm6, %vm3259_vm7  ;;  %vm3485_vm6 = vcmp.eq.f32.partialorder %v3484_v44, 8.507059e+37  ;;  %vm3705_vm8 = vweird.f32 %v9011_v49 }
 0xd1c   :  { %v3241_v14 = vmul.f32 %v6550_v4, %v3240_v2  ;;  %v3261_v55 = vsel %vm9042_vm5, %v9001_v28, %v3257_v43 }
 0xd1d   :  { %v3463_v11 = vmul.f32 %v6552_v19, %v3462_v41 }
 0xd1e   :  { %v3242_v52 = vadd.f32 %v6550_v4, %v3241_v14  ;;  %v3726_v14 = vand.u32 2147483648, %v8990_v40 }
 0xd1f   :  { %v9024_v63 = vpop.eup %6553  ;;  %v3464_v25 = vadd.f32 %v6552_v19, %v3463_v11 }
 0xd20   :  { %v3246_v30 = vsel %vm3245_vm1, %v6550_v4, %v3242_v52  ;;  %v3701_v42 = vmul.f32 %v9024_v63, %v9011_v49  ;;  %v9029_v47 = vpop.xlane.xlu2 %3937  ;;  %v9031_v32 = vpop.eup %6555  ;;  %v3487_v52 = vor.u32 1.1754944e-38, %v3486_v46  ;;  %vm3706_vm7 = vweird.f32 %v9024_v63 }
 0xd21   :  { %v3251_v58 = vsel %vm3248_vm15, %v3250_v20, %v3246_v30  ;;  %v3468_v2 = vsel %vm3467_vm9, %v6552_v19, %v3464_v25  ;;  %v3435_v59 = vpop.xlane.xlu1 %3434  ;;  %vm9049_vm9 = vmor %vm3480_vm3, %vm3481_vm4  ;;  %6557 = vrcp.f32 %v9029_v47  ;;  %v3716_v39 = vmul.f32 %v9031_v32, %v8990_v40 }
 0xd22   :  { %v3252_v1 = vmul.f32 %v8912_v24, %v3251_v58  ;;  %v3473_v4 = vsel %vm3470_vm2, %v3472_v6, %v3468_v2  ;;  %v3702_v41 = vsub.f32 1.0, %v3701_v42  ;;  %v3439_v7 = vsub.f32 %v8931_v27, %v3435_v59  ;;  %v9078_v2 = vpop.f32.mrf.mxu0  ;;  %vm3707_vm1 = vmor %vm3705_vm8, %vm3706_vm7 }
 0xd23   :  { %v3474_v19 = vmul.f32 %v8914_v17, %v3473_v4  ;;  %v3265_v17 = vor.u32 1.1754944e-38, %v3264_v10  ;;  %v3483_v33 = vsel %vm9049_vm9, %v8999_v15, %v3479_v21  ;;  %vm3263_vm4 = vcmp.eq.f32.partialorder %v3262_v9, 8.507059e+37 }
 0xd24   :  { %5960 = vmatmul.msk.f32.vlgmr.msra.gmra.mxu1 %vm525_vm12, %v3252_v1  ;;  %v3703_v11 = vmul.f32 %v9024_v63, %v3702_v41  ;;  %v3446_v27 = vmul.f32 1.442695, %v3439_v7  ;;  %v3488_v28 = vsel %vm3485_vm6, %v3487_v52, %v3483_v33  ;;  %v3717_v43 = vsub.f32 1.0, %v3716_v39 }
 0xd25   :  { %5970 = vmatmul.msk.f32.vlgmr.msrb.gmra.mxu0 %vm525_vm12, %v3474_v19  ;;  %v3266_v20 = vsel %vm3263_vm4, %v3265_v17, %v3261_v55  ;;  %v3711_v15 = vand.u32 2147483648, %v9011_v49  ;;  %v3709_v21 = vand.u32 2147483647, %v9011_v49  ;;  %v3489_v58 = vmul.f32 %v8889_v54, %v3488_v28 }
 0xd26   :  { %6559 = vpow2.f32 %v3446_v27  ;;  %v3704_v30 = vadd.f32 %v9024_v63, %v3703_v11  ;;  %v3267_v46 = vmul.f32 %v8904_v62, %v3266_v20  ;;  %vm3721_vm2 = vweird.f32 %v9031_v32 }
 0xd27   :  { %v9071_v42 = vpop.eup %6557  ;;  %6561 = vrcp.f32 %v9015_v60  ;;  %v3712_v54 = vor.u32 1.1754944e-38, %v3711_v15  ;;  %vm3710_vm15 = vcmp.eq.f32.partialorder %v3709_v21, 8.507059e+37  ;;  %vm3720_vm3 = vweird.f32 %v8990_v40 }
 0xd28   :  { %v3672_v25 = vpop.xlane.xlu2 %3671  ;;  %v3949_v62 = vmul.f32 %v9071_v42, %v9029_v47  ;;  %v3724_v7 = vand.u32 2147483647, %v8990_v40  ;;  %vm3722_vm5 = vmor %vm3720_vm3, %vm3721_vm2  ;;  %vm3954_vm4 = vweird.f32 %v9071_v42  ;;  %vm3953_vm6 = vweird.f32 %v9029_v47 }
 0xd29   :  { %v3678_v6 = vsub.f32 %v8937_v51, %v3672_v25  ;;  %6294 = vrot.lane.b32.xlu0 %v8879_v29, %s6681_s28  ;;  %v3718_v29 = vmul.f32 %v9031_v32, %v3717_v43  ;;  %v3708_v51 = vsel %vm3707_vm1, %v9024_v63, %v3704_v30  ;;  %v3957_v15 = vand.u32 2147483647, %v9029_v47  ;;  %vm3955_vm7 = vmor %vm3953_vm6, %vm3954_vm4 }
 0xd2a   :  { %v3713_v9 = vsel %vm3710_vm15, %v3712_v54, %v3708_v51  ;;  %v3950_v63 = vsub.f32 1.0, %v3949_v62  ;;  %v9111_v40 = vpop.f32.mrf.mxu0  ;;  %vm3725_vm9 = vcmp.eq.f32.partialorder %v3724_v7, 8.507059e+37  ;;  %vm3968_vm15 = vweird.f32 %v9015_v60 }
 0xd2b   :  { %v3684_v10 = vmul.f32 1.442695, %v3678_v6  ;;  %v3719_v4 = vadd.f32 %v9031_v32, %v3718_v29  ;;  %v3714_v55 = vmul.f32 %v8921_v34, %v3713_v9  ;;  %v3727_v34 = vor.u32 1.1754944e-38, %v3726_v14 }
 0xd2c   :  { %5961 = vmatmul.msk.f32.gmra.mxu1 %vm525_vm12, %v3267_v46  ;;  %v9087_v49 = vpop.eup %6559  ;;  %v3951_v11 = vmul.f32 %v9071_v42, %v3950_v63  ;;  %vm3958_vm8 = vcmp.eq.f32.partialorder %v3957_v15, 8.507059e+37  ;;  %v3974_v9 = vand.u32 2147483648, %v9015_v60 }
 0xd2d   :  { %6563 = vpow2.f32 %v3684_v10  ;;  %5971 = vmatmul.msk.f32.gmra.mxu0 %vm525_vm12, %v3489_v58  ;;  %v3457_v59 = vsel %vm525_vm12, %v9087_v49, 0.0  ;;  %v9093_v44 = vpop.eup %6561  ;;  %v3723_v52 = vsel %vm3722_vm5, %v9031_v32, %v3719_v4  ;;  %v3959_v32 = vand.u32 2147483648, %v9029_v47 }
 0xd2e   :  { %3458 = vadd.xlane.f32.xlu2 %v3457_v59  ;;  %v3964_v17 = vmul.f32 %v9093_v44, %v9015_v60  ;;  %v3728_v27 = vsel %vm3725_vm9, %v3727_v34, %v3723_v52  ;;  %v3952_v25 = vadd.f32 %v9071_v42, %v3951_v11  ;;  %v4409_v47 = vsub.f32 %v8871_v50, %v8962_v8 }
 0xd2f   :  { %v3729_v46 = vmul.f32 %v8896_v12, %v3728_v27  ;;  %v3960_v51 = vor.u32 1.1754944e-38, %v3959_v32  ;;  %vm3969_vm1 = vweird.f32 %v9093_v44 }
 0xd30   :  { %v6290_v1 = vpop.permute.xlu2 %6289  ;;  %v3965_v20 = vsub.f32 1.0, %v3964_v17  ;;  %v3956_v58 = vsel %vm3955_vm7, %v9071_v42, %v3952_v25  ;;  %vm3970_vm2 = vmor %vm3968_vm15, %vm3969_vm1 }
 0xd31   :  { %v6291_v41 = vunpack.i.l.bf16 %v6290_v1  ;;  %v6292_v39 = vunpack.i.h.bf16 %v6290_v1  ;;  %v3961_v12 = vsel %vm3958_vm8, %v3960_v51, %v3956_v58  ;;  %v3972_v1 = vand.u32 2147483647, %v9015_v60 }
 0xd32   :  { %v9096_v19 = vpop.xlane.xlu0 %4185  ;;  %v3966_v10 = vmul.f32 %v9093_v44, %v3965_v20  ;;  %v3962_v4 = vmul.f32 %v8929_v31, %v3961_v12 }
 0xd33   :  { %v9098_v24 = vpop.eup %6563  ;;  %4034 = vmatpush.msrb.mxu0 %v6291_v41  ;;  %6565 = vrcp.f32 %v9096_v19  ;;  %v4414_v41 = vmul.f32 1.442695, %v4409_v47  ;;  %vm3973_vm3 = vcmp.eq.f32.partialorder %v3972_v1, 8.507059e+37  ;;  %vm4201_vm9 = vweird.f32 %v9096_v19 }
 0xd34   :  { %v3694_v33 = vsel %vm525_vm12, %v9098_v24, 0.0  ;;  %v3967_v62 = vadd.f32 %v9093_v44, %v3966_v10  ;;  %v4205_v17 = vand.u32 2147483647, %v9096_v19 }
 0xd35   :  { %5982 = vmatmul.msk.f32.vlgmr.msra.gmra.mxu0 %vm525_vm12, %v3714_v55  ;;  %v3975_v55 = vor.u32 1.1754944e-38, %v3974_v9 }
 0xd36   :  { %4035 = vmatpush.msrb.mxu0 %v6292_v39  ;;  %3695 = vadd.xlane.f32.xlu2 %v3694_v33  ;;  %v3971_v7 = vsel %vm3970_vm2, %v9093_v44, %v3967_v62  ;;  %vm4206_vm6 = vcmp.eq.f32.partialorder %v4205_v17, 8.507059e+37 }
 0xd37   :  { %v3976_v39 = vsel %vm3973_vm3, %v3975_v55, %v3971_v7 }
 0xd38   :  { %4276 = vmatpush.msra.mxu0 %v9111_v40  ;;  %v3977_v11 = vmul.f32 %v8923_v57, %v3976_v39 }
 0xd39   :  { %v6285_v28 = vpop.permute.xlu1 %6284  ;;  %v6566_v43 = vpop.eup %6565 }
 0xd3a   :  { %4277 = vmatpush.msra.mxu0 %v9078_v2  ;;  %v6286_v30 = vunpack.i.l.bf16 %v6285_v28  ;;  %v9118_v6 = vpop.xlane.xlu0 %4188  ;;  %v6287_v21 = vunpack.i.h.bf16 %v6285_v28  ;;  %v4197_v29 = vmul.f32 %v6566_v43, %v9096_v19  ;;  %vm4202_vm5 = vweird.f32 %v6566_v43 }
 0xd3b   :  { %6567 = vrcp.f32 %v9118_v6  ;;  %vm4203_vm4 = vmor %vm4201_vm9, %vm4202_vm5  ;;  %v4222_v57 = vand.u32 2147483648, %v9118_v6  ;;  %vm4216_vm8 = vweird.f32 %v9118_v6  ;;  %v4220_v32 = vand.u32 2147483647, %v9118_v6 }
 0xd3c   :  { %3821 = vmatpush.msra.mxu1 %v6286_v30  ;;  %v4198_v54 = vsub.f32 1.0, %v4197_v29 }
 0xd3d   :  { %5983 = vmatmul.msk.f32.gmra.mxu0 %vm525_vm12, %v3729_v46  ;;  %v4223_v15 = vor.u32 1.1754944e-38, %v4222_v57  ;;  %vm4221_vm15 = vcmp.eq.f32.partialorder %v4220_v32, 8.507059e+37 }
 0xd3e   :  { %3822 = vmatpush.msra.mxu1 %v6287_v21  ;;  %v4199_v50 = vmul.f32 %v6566_v43, %v4198_v54 }
 0xd40   :  { %v4200_v60 = vadd.f32 %v6566_v43, %v4199_v50 }
 0xd41   :  { %v6568_v59 = vpop.eup %6567 }
 0xd42   :  { %v3675_v42 = vpop.xlane.xlu0 %3674  ;;  %v4212_v8 = vmul.f32 %v6568_v59, %v9118_v6  ;;  %v4204_v44 = vsel %vm4203_vm4, %v6566_v43, %v4200_v60  ;;  %vm4217_vm7 = vweird.f32 %v6568_v59 }
 0xd43   :  { %v3679_v63 = vsub.f32 %v8954_v36, %v3675_v42  ;;  %v4207_v36 = vand.u32 2147483648, %v9096_v19  ;;  %vm4218_vm1 = vmor %vm4216_vm8, %vm4217_vm7 }
 0xd44   :  { %v4213_v31 = vsub.f32 1.0, %v4212_v8 }
 0xd45   :  { %v3686_v14 = vmul.f32 1.442695, %v3679_v63  ;;  %5994 = vmatmul.msk.f32.vlgmr.msrb.gmra.mxu0 %vm525_vm12, %v3962_v4  ;;  %v4208_v34 = vor.u32 1.1754944e-38, %v4207_v36  ;;  %v9192_v36 = vpop.f32.mrf.mxu0 }
 0xd46   :  { %v4214_v52 = vmul.f32 %v6568_v59, %v4213_v31 }
 0xd47   :  { %6569 = vpow2.f32 %v3686_v14  ;;  %v4209_v25 = vsel %vm4206_vm6, %v4208_v34, %v4204_v44 }
 0xd48   :  { %6571 = vpow2.f32 %v4414_v41  ;;  %v4215_v28 = vadd.f32 %v6568_v59, %v4214_v52  ;;  %v4210_v43 = vmul.f32 %v8943_v18, %v4209_v25 }
 0xd4a   :  { %v4219_v30 = vsel %vm4218_vm1, %v6568_v59, %v4215_v28  ;;  %v9158_v21 = vpop.xlane.xlu0 %4421 }
 0xd4b   :  { %v4224_v46 = vsel %vm4221_vm15, %v4223_v15, %v4219_v30 }
 0xd4c   :  { %v4225_v10 = vmul.f32 %v8947_v53, %v4224_v46 }
 0xd4d   :  { %v9144_v33 = vpop.eup %6569  ;;  %5995 = vmatmul.msk.f32.gmra.mxu0 %vm525_vm12, %v3977_v11  ;;  %v9194_v34 = vpop.f32.mrf.mxu0 }
 0xd4e   :  { %v3697_v27 = vsel %vm525_vm12, %v9144_v33, 0.0  ;;  %v9149_v20 = vpop.eup %6571  ;;  %v6303_v57 = vpack.i.bf16 %v9192_v36, %v9194_v34 }
 0xd4f   :  { %3698 = vadd.xlane.f32.xlu2 %v3697_v27  ;;  %v4423_v19 = vsel %vm525_vm12, %v9149_v20, 0.0 }
 0xd52   :  { %v3923_v58 = vpop.xlane.xlu0 %3922 }
 0xd53   :  { %4424 = vadd.xlane.f32.xlu0 %v4423_v19  ;;  %v3927_v6 = vsub.f32 %v8966_v13, %v3923_v58  ;;  %v6298_v58 = vpack.i.bf16 %v9078_v2, %v9111_v40 }
 0xd55   :  { %6006 = vmatmul.msk.f32.vlgmr.msra.gmra.mxu0 %vm525_vm12, %v4210_v43  ;;  %v3934_v62 = vmul.f32 1.442695, %v3927_v6 }
 0xd5d   :  { %6007 = vmatmul.msk.f32.gmra.mxu0 %vm525_vm12, %v4225_v10 }
 0xd64   :  { %v3920_v18 = vpop.xlane.xlu1 %3919 }
 0xd65   :  { %v3926_v29 = vsub.f32 %v8970_v0, %v3920_v18 }
 0xd67   :  { %v3932_v51 = vmul.f32 1.442695, %v3926_v29 }
 0xd69   :  { %6573 = vpow2.f32 %v3932_v51  ;;  %v4168_v47 = vpop.xlane.xlu2 %4167 }
 0xd6a   :  { %v4174_v12 = vsub.f32 %v8974_v48, %v4168_v47 }
 0xd6c   :  { %v4180_v54 = vmul.f32 1.442695, %v4174_v12  ;;  %v4404_v59 = vpop.xlane.xlu1 %4403 }
 0xd6d   :  { %v4410_v50 = vsub.f32 %v8976_v61, %v4404_v59 }
 0xd6e   :  { %6575 = vpow2.f32 %v4180_v54 }
 0xd6f   :  { %v9165_v9 = vpop.eup %6573  ;;  %6577 = vpow2.f32 %v3934_v62 }
 0xd70   :  { %v3942_v53 = vsel %vm525_vm12, %v9165_v9, 0.0 }
 0xd71   :  { %v4171_v42 = vpop.xlane.xlu2 %4170  ;;  %3943 = vadd.xlane.f32.xlu1 %v3942_v53 }
 0xd72   :  { %v4175_v0 = vsub.f32 %v8984_v16, %v4171_v42  ;;  %v4416_v16 = vmul.f32 1.442695, %v4410_v50 }
 0xd74   :  { %v9170_v13 = vpop.eup %6575  ;;  %v4182_v1 = vmul.f32 1.442695, %v4175_v0  ;;  %v4407_v4 = vpop.xlane.xlu1 %4406 }
 0xd75   :  { %v9172_v63 = vpop.eup %6577  ;;  %v4411_v48 = vsub.f32 %v8986_v3, %v4407_v4  ;;  %v4190_v41 = vsel %vm525_vm12, %v9170_v13, 0.0 }
 0xd76   :  { %4191 = vadd.xlane.f32.xlu2 %v4190_v41  ;;  %6579 = vpow2.f32 %v4182_v1  ;;  %v3945_v14 = vsel %vm525_vm12, %v9172_v63, 0.0 }
 0xd77   :  { %v4418_v8 = vmul.f32 1.442695, %v4411_v48 }
 0xd79   :  { %6581 = vpow2.f32 %v4418_v8  ;;  %3946 = vadd.xlane.f32.xlu1 %v3945_v14 }
 0xd7a   :  { %6583 = vpow2.f32 %v4416_v16 }
 0xd7c   :  { %v9180_v7 = vpop.eup %6579 }
 0xd7d   :  { %v4193_v3 = vsel %vm525_vm12, %v9180_v7, 0.0 }
 0xd7f   :  { %v9182_v55 = vpop.eup %6581 }
 0xd80   :  { %v4429_v39 = vsel %vm525_vm12, %v9182_v55, 0.0  ;;  %v9188_v61 = vpop.eup %6583 }
 0xd81   :  { %4194 = vadd.xlane.f32.xlu1 %v4193_v3  ;;  %4430 = vadd.xlane.f32.xlu2 %v4429_v39  ;;  %v4426_v31 = vsel %vm525_vm12, %v9188_v61, 0.0 }
 0xd88   :  { %v3456_v60 = vpop.xlane.xlu0 %3455 }
 0xd89   :  { %6585 = vrcp.f32 %v3456_v60  ;;  %4427 = vadd.xlane.f32.xlu1 %v4426_v31  ;;  %v3501_v52 = vand.u32 2147483648, %v3456_v60  ;;  %v3499_v25 = vand.u32 2147483647, %v3456_v60  ;;  %vm3495_vm3 = vweird.f32 %v3456_v60 }
 0xd8b   :  { %v3502_v19 = vor.u32 1.1754944e-38, %v3501_v52  ;;  %vm3500_vm9 = vcmp.eq.f32.partialorder %v3499_v25, 8.507059e+37 }
 0xd8f   :  { %v6586_v17 = vpop.eup %6585 }
 0xd90   :  { %v3491_v11 = vmul.f32 %v6586_v17, %v3456_v60  ;;  %vm3496_vm2 = vweird.f32 %v6586_v17 }
 0xd91   :  { %vm3497_vm5 = vmor %vm3495_vm3, %vm3496_vm2 }
 0xd92   :  { %v3492_v44 = vsub.f32 1.0, %v3491_v11 }
 0xd94   :  { %v3493_v27 = vmul.f32 %v6586_v17, %v3492_v44 }
 0xd96   :  { %v3494_v28 = vadd.f32 %v6586_v17, %v3493_v27 }
 0xd98   :  { %v3498_v43 = vsel %vm3497_vm5, %v6586_v17, %v3494_v28 }
 0xd99   :  { %v3503_v32 = vsel %vm3500_vm9, %v3502_v19, %v3498_v43  ;;  %6304 = vrot.lane.b32.xlu2 %v6303_v57, %s6683_s4 }
 0xd9a   :  { %v3504_v30 = vmul.f32 %v9005_v23, %v3503_v32 }
 0xd9b   :  { %v6295_v15 = vpop.permute.xlu0 %6294 }
 0xd9c   :  { %v6296_v46 = vunpack.i.l.bf16 %v6295_v15  ;;  %5972 = vmatmul.msk.f32.vlgmr.msrb.gmra.mxu1 %vm525_vm12, %v3504_v30  ;;  %v6297_v10 = vunpack.i.h.bf16 %v6295_v15 }
 0xd9e   :  { %4069 = vmatpush.msrb.mxu1 %v6296_v46 }
 0xda0   :  { %4070 = vmatpush.msrb.mxu1 %v6297_v10 }
 0xda1   :  { %v3459_v29 = vpop.xlane.xlu2 %3458 }
 0xda2   :  { %v3549_v18 = vpop.f32.mrf.mxu0  ;;  %6299 = vrot.lane.b32.xlu1 %v6298_v58, %s6683_s4  ;;  %6587 = vrcp.f32 %v3459_v29  ;;  %v3516_v62 = vand.u32 2147483648, %v3459_v29  ;;  %v3514_v59 = vand.u32 2147483647, %v3459_v29  ;;  %vm3510_vm6 = vweird.f32 %v3459_v29 }
 0xda4   :  { %v3517_v53 = vor.u32 1.1754944e-38, %v3516_v62  ;;  %vm3515_vm8 = vcmp.eq.f32.partialorder %v3514_v59, 8.507059e+37 }
 0xda8   :  { %v6588_v6 = vpop.eup %6587 }
 0xda9   :  { %v3506_v23 = vmul.f32 %v6588_v6, %v3459_v29  ;;  %v3696_v47 = vpop.xlane.xlu2 %3695  ;;  %vm3511_vm4 = vweird.f32 %v6588_v6 }
 0xdaa   :  { %v9204_v51 = vpop.f32.mrf.mxu0  ;;  %4570 = vrot.lane.b32.xlu1 %v3549_v18, %s6681_s28  ;;  %6589 = vrcp.f32 %v3696_v47  ;;  %vm3512_vm7 = vmor %vm3510_vm6, %vm3511_vm4  ;;  %v3741_v50 = vand.u32 2147483648, %v3696_v47  ;;  %v3739_v14 = vand.u32 2147483647, %v3696_v47  ;;  %vm3735_vm15 = vweird.f32 %v3696_v47 }
 0xdab   :  { %v3507_v12 = vsub.f32 1.0, %v3506_v23 }
 0xdac   :  { %v3742_v3 = vor.u32 1.1754944e-38, %v3741_v50  ;;  %vm3740_vm3 = vcmp.eq.f32.partialorder %v3739_v14, 8.507059e+37 }
 0xdad   :  { %v3508_v54 = vmul.f32 %v6588_v6, %v3507_v12 }
 0xdaf   :  { %v3509_v2 = vadd.f32 %v6588_v6, %v3508_v54 }
 0xdb0   :  { %v6590_v40 = vpop.eup %6589 }
 0xdb1   :  { %v3731_v0 = vmul.f32 %v6590_v40, %v3696_v47  ;;  %v3513_v1 = vsel %vm3512_vm7, %v6588_v6, %v3509_v2  ;;  %vm3736_vm1 = vweird.f32 %v6590_v40 }
 0xdb2   :  { %v3789_v42 = vpop.f32.mrf.mxu0  ;;  %v3518_v4 = vsel %vm3515_vm8, %v3517_v53, %v3513_v1  ;;  %vm3737_vm2 = vmor %vm3735_vm15, %vm3736_vm1 }
 0xdb3   :  { %4586 = vrot.lane.b32.xlu0 %v3789_v42, %s6680_s27  ;;  %v3732_v48 = vsub.f32 1.0, %v3731_v0  ;;  %v3519_v41 = vmul.f32 %v9087_v49, %v3518_v4 }
 0xdb5   :  { %v3733_v8 = vmul.f32 %v6590_v40, %v3732_v48  ;;  %5973 = vmatmul.msk.f32.gmra.mxu1 %vm525_vm12, %v3519_v41 }
 0xdb7   :  { %v3734_v16 = vadd.f32 %v6590_v40, %v3733_v8 }
 0xdb9   :  { %v3738_v60 = vsel %vm3737_vm2, %v6590_v40, %v3734_v16 }
 0xdba   :  { %v9210_v39 = vpop.f32.mrf.mxu0  ;;  %v3743_v31 = vsel %vm3740_vm3, %v3742_v3, %v3738_v60 }
 0xdbb   :  { %v3744_v17 = vmul.f32 %v9098_v24, %v3743_v31 }
 0xdbd   :  { %5984 = vmatmul.msk.f32.vlgmr.msra.gmra.mxu1 %vm525_vm12, %v3744_v17 }
 0xdbe   :  { %4305 = vmatpush.msra.mxu1 %v9194_v34 }
 0xdc0   :  { %4306 = vmatpush.msra.mxu1 %v9192_v36 }
 0xdc2   :  { %v4037_v49 = vpop.f32.mrf.mxu0  ;;  %v3699_v11 = vpop.xlane.xlu2 %3698 }
 0xdc3   :  { %6591 = vrcp.f32 %v3699_v11  ;;  %4602 = vrot.lane.b32.xlu2 %v4037_v49, %s6686_s1  ;;  %v3756_v28 = vand.u32 2147483648, %v3699_v11  ;;  %v3754_v19 = vand.u32 2147483647, %v3699_v11  ;;  %vm3750_vm9 = vweird.f32 %v3699_v11 }
 0xdc5   :  { %v3757_v43 = vor.u32 1.1754944e-38, %v3756_v28  ;;  %vm3755_vm6 = vcmp.eq.f32.partialorder %v3754_v19, 8.507059e+37 }
 0xdc9   :  { %v6592_v44 = vpop.eup %6591 }
 0xdca   :  { %v3746_v52 = vmul.f32 %v6592_v44, %v3699_v11  ;;  %v4040_v27 = vpop.f32.mrf.mxu0  ;;  %vm3751_vm5 = vweird.f32 %v6592_v44 }
 0xdcb   :  { %vm3752_vm4 = vmor %vm3750_vm9, %vm3751_vm5 }
 0xdcc   :  { %v3747_v25 = vsub.f32 1.0, %v3746_v52 }
 0xdce   :  { %v3748_v57 = vmul.f32 %v6592_v44, %v3747_v25  ;;  %v9254_v25 = vpop.xlane.xlu0 %4424 }
 0xdd0   :  { %v3749_v24 = vadd.f32 %v6592_v44, %v3748_v57 }
 0xdd2   :  { %v4279_v34 = vpop.f32.mrf.mxu0  ;;  %v3753_v36 = vsel %vm3752_vm4, %v6592_v44, %v3749_v24 }
 0xdd3   :  { %4618 = vrot.lane.b32.xlu1 %v4279_v34, %s6685_s30  ;;  %v3758_v32 = vsel %vm3755_vm6, %v3757_v43, %v3753_v36 }
 0xdd4   :  { %v3759_v30 = vmul.f32 %v9144_v33, %v3758_v32 }
 0xdd6   :  { %5985 = vmatmul.msk.f32.gmra.mxu1 %vm525_vm12, %v3759_v30 }
 0xdda   :  { %v4282_v15 = vpop.f32.mrf.mxu0 }
 0xddb   :  { %4620 = vrot.lane.b32.xlu0 %v4282_v15, %s6685_s30  ;;  %4572 = vrot.lane.b32.xlu1 %v9204_v51, %s6681_s28 }
 0xde3   :  { %4604 = vrot.lane.b32.xlu1 %v4040_v27, %s6686_s1 }
 0xde4   :  { %v3944_v46 = vpop.xlane.xlu1 %3943 }
 0xde5   :  { %6593 = vrcp.f32 %v3944_v46  ;;  %v3989_v6 = vand.u32 2147483648, %v3944_v46  ;;  %v3987_v12 = vand.u32 2147483647, %v3944_v46  ;;  %vm3983_vm8 = vweird.f32 %v3944_v46 }
 0xde7   :  { %v3990_v59 = vor.u32 1.1754944e-38, %v3989_v6  ;;  %vm3988_vm15 = vcmp.eq.f32.partialorder %v3987_v12, 8.507059e+37  ;;  %v9269_v6 = vpop.f32.mrf.mxu1 }
 0xde9   :  { %v9224_v10 = vpop.xlane.xlu2 %4191 }
 0xdea   :  { %6595 = vrcp.f32 %v9224_v10  ;;  %v4237_v28 = vand.u32 2147483648, %v9224_v10  ;;  %vm4231_vm6 = vweird.f32 %v9224_v10  ;;  %v4235_v24 = vand.u32 2147483647, %v9224_v10 }
 0xdeb   :  { %v6594_v58 = vpop.eup %6593 }
 0xdec   :  { %v3979_v18 = vmul.f32 %v6594_v58, %v3944_v46  ;;  %v3947_v29 = vpop.xlane.xlu1 %3946  ;;  %vm3984_vm7 = vweird.f32 %v6594_v58  ;;  %v4238_v46 = vor.u32 1.1754944e-38, %v4237_v28 }
 0xded   :  { %6597 = vrcp.f32 %v3947_v29  ;;  %vm3985_vm1 = vmor %vm3983_vm8, %vm3984_vm7  ;;  %v4004_v50 = vand.u32 2147483648, %v3947_v29  ;;  %vm3998_vm3 = vweird.f32 %v3947_v29  ;;  %v4002_v16 = vand.u32 2147483647, %v3947_v29 }
 0xdee   :  { %v3980_v33 = vsub.f32 1.0, %v3979_v18  ;;  %vm4236_vm8 = vcmp.eq.f32.partialorder %v4235_v24, 8.507059e+37  ;;  %v4458_v24 = vand.u32 2147483648, %v9254_v25 }
 0xdef   :  { %v4005_v49 = vor.u32 1.1754944e-38, %v4004_v50  ;;  %vm4003_vm4 = vcmp.eq.f32.partialorder %v4002_v16, 8.507059e+37  ;;  %v4443_v50 = vand.u32 2147483648, %v9158_v21  ;;  %v4441_v16 = vand.u32 2147483647, %v9158_v21  ;;  %v9292_v3 = vpop.f32.mrf.mxu1 }
 0xdf0   :  { %v9227_v23 = vpop.eup %6595  ;;  %v3981_v47 = vmul.f32 %v6594_v58, %v3980_v33 }
 0xdf1   :  { %v4227_v62 = vmul.f32 %v9227_v23, %v9224_v10  ;;  %vm4232_vm9 = vweird.f32 %v9227_v23 }
 0xdf2   :  { %v3982_v51 = vadd.f32 %v6594_v58, %v3981_v47  ;;  %vm4233_vm7 = vmor %vm4231_vm6, %vm4232_vm9  ;;  %vm4437_vm6 = vweird.f32 %v9158_v21 }
 0xdf3   :  { %v6598_v54 = vpop.eup %6597  ;;  %v4228_v4 = vsub.f32 1.0, %v4227_v62 }
 0xdf4   :  { %v3986_v2 = vsel %vm3985_vm1, %v6594_v58, %v3982_v51  ;;  %v3994_v40 = vmul.f32 %v6598_v54, %v3947_v29  ;;  %v9231_v53 = vpop.xlane.xlu2 %4430  ;;  %v9233_v42 = vpop.xlane.xlu1 %4194  ;;  %vm3999_vm2 = vweird.f32 %v6598_v54 }
 0xdf5   :  { %v3991_v0 = vsel %vm3988_vm15, %v3990_v59, %v3986_v2  ;;  %6599 = vrcp.f32 %v9233_v42  ;;  %v4229_v8 = vmul.f32 %v9227_v23, %v4228_v4  ;;  %vm9240_vm5 = vmor %vm3998_vm3, %vm3999_vm2  ;;  %vm4246_vm15 = vweird.f32 %v9233_v42 }
 0xdf6   :  { %v3992_v1 = vmul.f32 %v9165_v9, %v3991_v0  ;;  %v3995_v48 = vsub.f32 1.0, %v3994_v40  ;;  %6601 = vrcp.f32 %v9158_v21  ;;  %v4250_v51 = vand.u32 2147483647, %v9233_v42 }
 0xdf7   :  { %v4230_v44 = vadd.f32 %v9227_v23, %v4229_v8 }
 0xdf8   :  { %v3996_v41 = vmul.f32 %v6598_v54, %v3995_v48  ;;  %5996 = vmatmul.msk.f32.vlgmr.msrb.gmra.mxu1 %vm525_vm12, %v3992_v1  ;;  %vm4251_vm3 = vcmp.eq.f32.partialorder %v4250_v51, 8.507059e+37 }
 0xdf9   :  { %v4234_v36 = vsel %vm4233_vm7, %v9227_v23, %v4230_v44  ;;  %v4252_v23 = vand.u32 2147483648, %v9233_v42 }
 0xdfa   :  { %v3997_v14 = vadd.f32 %v6598_v54, %v3996_v41 }
 0xdfb   :  { %v6600_v17 = vpop.eup %6599  ;;  %v4253_v0 = vor.u32 1.1754944e-38, %v4252_v23 }
 0xdfc   :  { %v6305_v9 = vpop.permute.xlu2 %6304  ;;  %v9244_v60 = vpop.xlane.xlu1 %4427  ;;  %v4001_v31 = vsel %vm9240_vm5, %v6598_v54, %v3997_v14  ;;  %v4242_v52 = vmul.f32 %v6600_v17, %v9233_v42  ;;  %vm4247_vm1 = vweird.f32 %v6600_v17 }
 0xdfd   :  { %v6306_v11 = vunpack.i.l.bf16 %v6305_v9  ;;  %6603 = vrcp.f32 %v9244_v60  ;;  %v9252_v27 = vpop.eup %6601  ;;  %v6307_v57 = vunpack.i.h.bf16 %v6305_v9  ;;  %v4006_v19 = vsel %vm4003_vm4, %v4005_v49, %v4001_v31  ;;  %vm4248_vm2 = vmor %vm4246_vm15, %vm4247_vm1 }
 0xdfe   :  { %v4243_v43 = vsub.f32 1.0, %v4242_v52  ;;  %v4007_v34 = vmul.f32 %v9172_v63, %v4006_v19  ;;  %6605 = vrcp.f32 %v9231_v53  ;;  %v4433_v15 = vmul.f32 %v9252_v27, %v9158_v21 }
 0xdff   :  { %4557 = vmatpush.msrb.mxu1 %v6306_v11  ;;  %6607 = vrcp.f32 %v9254_v25  ;;  %v4239_v63 = vsel %vm4236_vm8, %v4238_v46, %v4234_v36  ;;  %vm4438_vm9 = vweird.f32 %v9252_v27  ;;  %v4473_v41 = vand.u32 2147483648, %v9244_v60 }
 0xe00   :  { %v4244_v32 = vmul.f32 %v6600_v17, %v4243_v43  ;;  %5997 = vmatmul.msk.f32.gmra.mxu1 %vm525_vm12, %v4007_v34  ;;  %v4434_v33 = vsub.f32 1.0, %v4433_v15  ;;  %v4240_v12 = vmul.f32 %v9170_v13, %v4239_v63  ;;  %vm4467_vm4 = vweird.f32 %v9244_v60  ;;  %vm4439_vm8 = vmor %vm4437_vm6, %vm4438_vm9 }
 0xe01   :  { %4558 = vmatpush.msrb.mxu1 %v6307_v57  ;;  %v4471_v8 = vand.u32 2147483647, %v9244_v60  ;;  %v4444_v11 = vor.u32 1.1754944e-38, %v4443_v50  ;;  %vm4442_vm15 = vcmp.eq.f32.partialorder %v4441_v16, 8.507059e+37  ;;  %v4486_v43 = vand.u32 2147483647, %v9231_v53 }
 0xe02   :  { %v4245_v58 = vadd.f32 %v6600_v17, %v4244_v32  ;;  %v4435_v2 = vmul.f32 %v9252_v27, %v4434_v33  ;;  %vm4452_vm9 = vweird.f32 %v9254_v25  ;;  %v4456_v32 = vand.u32 2147483647, %v9254_v25 }
 0xe03   :  { %v6604_v30 = vpop.eup %6603  ;;  %vm4472_vm1 = vcmp.eq.f32.partialorder %v4471_v8, 8.507059e+37 }
 0xe04   :  { %v4463_v10 = vmul.f32 %v6604_v30, %v9244_v60  ;;  %v9267_v29 = vpop.eup %6605  ;;  %v4249_v59 = vsel %vm4248_vm2, %v6600_v17, %v4245_v58  ;;  %vm4468_vm5 = vweird.f32 %v6604_v30  ;;  %v4436_v42 = vadd.f32 %v9252_v27, %v4435_v2  ;;  %v6030_v2 = vld [vmem:[%s10177_s7 + $0xa0] sm:$0xff] }
 0xe05   :  { %v9272_v47 = vpop.eup %6607  ;;  %v4478_v62 = vmul.f32 %v9267_v29, %v9231_v53  ;;  %v4254_v13 = vsel %vm4251_vm3, %v4253_v0, %v4249_v59  ;;  %vm4469_vm7 = vmor %vm4467_vm4, %vm4468_vm5  ;;  %v4474_v60 = vor.u32 1.1754944e-38, %v4473_v41  ;;  %vm4483_vm2 = vweird.f32 %v9267_v29  ;;  %v6031_v59 = vld [vmem:[%s10177_s7 + $0xa8] sm:$0xff]  ;;  %v6028_v0 = vld [vmem:[%s10177_s7 + $0x90] sm:$0xff] }
 0xe06   :  { %v4464_v18 = vsub.f32 1.0, %v4463_v10  ;;  %v4448_v40 = vmul.f32 %v9272_v47, %v9254_v25  ;;  %v4255_v14 = vmul.f32 %v9180_v7, %v4254_v13  ;;  %v4440_v17 = vsel %vm4439_vm8, %v9252_v27, %v4436_v42  ;;  %v6027_v13 = vld [vmem:[%s10177_s7 + $0x88] sm:$0xff]  ;;  %v6024_v42 = vld [vmem:[%s10177_s7 + $0x70] sm:$0xff]  ;;  %v6022_v41 = vld [vmem:[%s10177_s7 + $0x60] sm:$0xff] }
 0xe07   :  { %v4479_v1 = vsub.f32 1.0, %v4478_v62  ;;  %v4445_v52 = vsel %vm4442_vm15, %v4444_v11, %v4440_v17  ;;  %vm4453_vm3 = vweird.f32 %v9272_v47  ;;  %v4488_v27 = vand.u32 2147483648, %v9231_v53  ;;  %v6033_v62 = vld [vmem:[%s10177_s7 + $0xb8] sm:$0xff] }
 0xe08   :  { %v4465_v54 = vmul.f32 %v6604_v30, %v4464_v18  ;;  %6008 = vmatmul.msk.f32.vlgmr.msra.gmra.mxu1 %vm525_vm12, %v4240_v12  ;;  %v4449_v48 = vsub.f32 1.0, %v4448_v40  ;;  %vm4482_vm5 = vweird.f32 %v9231_v53  ;;  %v4446_v36 = vmul.f32 %v8960_v45, %v4445_v52  ;;  %vm4454_vm6 = vmor %vm4452_vm9, %vm4453_vm3  ;;  %4695 = vmatpush.msra.mxu2 %v6033_v62 }
 0xe09   :  { %v4480_v9 = vmul.f32 %v9267_v29, %v4479_v1  ;;  %vm4484_vm4 = vmor %vm4482_vm5, %vm4483_vm2  ;;  %v4489_v46 = vor.u32 1.1754944e-38, %v4488_v27  ;;  %v4459_v45 = vor.u32 1.1754944e-38, %v4458_v24  ;;  %vm4457_vm8 = vcmp.eq.f32.partialorder %v4456_v32, 8.507059e+37  ;;  %v6026_v1 = vld [vmem:[%s10177_s7 + $0x80] sm:$0xff] }
 0xe0a   :  { %v4466_v4 = vadd.f32 %v6604_v30, %v4465_v54  ;;  %v4450_v49 = vmul.f32 %v9272_v47, %v4449_v48  ;;  %v6032_v54 = vld [vmem:[%s10177_s7 + $0xb0] sm:$0xff]  ;;  %v6023_v48 = vld [vmem:[%s10177_s7 + $0x68] sm:$0xff] }
 0xe0b   :  { %v4481_v28 = vadd.f32 %v9267_v29, %v4480_v9  ;;  %4696 = vmatpush.msra.mxu2 %v6032_v54 }
 0xe0c   :  { %v4470_v31 = vsel %vm4469_vm7, %v6604_v30, %v4466_v4  ;;  %v4451_v57 = vadd.f32 %v9272_v47, %v4450_v49  ;;  %vm4487_vm7 = vcmp.eq.f32.partialorder %v4486_v43, 8.507059e+37  ;;  %v6025_v4 = vld [vmem:[%s10177_s7 + $0x78] sm:$0xff] }
 0xe0d   :  { %v4475_v44 = vsel %vm4472_vm1, %v4474_v60, %v4470_v31  ;;  %v4485_v15 = vsel %vm4484_vm4, %v9267_v29, %v4481_v28  ;;  %4697 = vmatpush.msra.mxu2 %v6031_v59 }
 0xe0e   :  { %v4476_v34 = vmul.f32 %v9188_v61, %v4475_v44  ;;  %v4455_v61 = vsel %vm4454_vm6, %v9272_v47, %v4451_v57  ;;  %v4490_v53 = vsel %vm4487_vm7, %v4489_v46, %v4485_v15 }
 0xe0f   :  { %v4460_v25 = vsel %vm4457_vm8, %v4459_v45, %v4455_v61  ;;  %v4491_v10 = vmul.f32 %v9182_v55, %v4490_v53  ;;  %4698 = vmatpush.msra.mxu2 %v6030_v2 }
 0xe10   :  { %6009 = vmatmul.msk.f32.gmra.mxu1 %vm525_vm12, %v4255_v14  ;;  %v4461_v63 = vmul.f32 %v9149_v20, %v4460_v25 }
 0xe14   :  { %v6300_v7 = vpop.permute.xlu1 %6299 }
 0xe15   :  { %v6301_v21 = vunpack.i.l.bf16 %v6300_v7  ;;  %v6302_v19 = vunpack.i.h.bf16 %v6300_v7 }
 0xe17   :  { %4520 = vmatpush.msrb.mxu0 %v6301_v21 }
 0xe18   :  { %6020 = vmatmul.msk.f32.vlgmr.msrb.gmra.mxu1 %vm525_vm12, %v4476_v34 }
 0xe19   :  { %v3584_v30 = vpop.f32.mrf.mxu1  ;;  %4521 = vmatpush.msrb.mxu0 %v6302_v19 }
 0xe1a   :  { %4574 = vrot.lane.b32.xlu1 %v3584_v30, %s6681_s28  ;;  %6018 = vmatmul.msk.f32.vlgmr.msrb.gmra.mxu0 %vm525_vm12, %v4446_v36 }
 0xe1c   :  { %v4571_v50 = vpop.permute.xlu1 %4570 }
 0xe1d   :  { %v4603_v14 = vpop.permute.xlu2 %4602  ;;  %v4646_v9 = vsel %vm525_vm12, %v8886_v5, %v4571_v50  ;;  %v6117_v50 = vld [vmem:[%s10180_s10 + $0x210] sm:$0xff] }
 0xe20   :  { %6021 = vmatmul.msk.f32.gmra.mxu1 %vm525_vm12, %v4491_v10 }
 0xe22   :  { %6019 = vmatmul.msk.f32.gmra.mxu0 %vm525_vm12, %v4461_v63 }
 0xe25   :  { %v4587_v16 = vpop.permute.xlu0 %4586 }
 0xe26   :  { %v4650_v31 = vsel %vm2076_vm10, %v4646_v9, %v4587_v16  ;;  %v6068_v16 = vld [vmem:[%s10179_s9 + $0x208] sm:$0xff]  ;;  %v6114_v9 = vld [vmem:[%s10180_s10 + $0x1f8] sm:$0xff] }
 0xe27   :  { %v4654_v49 = vsel %vm2081_vm13, %v4650_v31, %v4603_v14  ;;  %v6067_v14 = vld [vmem:[%s10179_s9 + $0x200] sm:$0xff] }
 0xe28   :  { %v6063_v31 = vld [vmem:[%s10179_s9 + $0x1e0] sm:$0xff] }
 0xe32   :  { %v3587_v58 = vpop.f32.mrf.mxu1 }
 0xe3a   :  { %v3824_v18 = vpop.f32.mrf.mxu1 }
 0xe3b   :  { %4590 = vrot.lane.b32.xlu0 %v3824_v18, %s6680_s27 }
 0xe45   :  { %v4619_v8 = vpop.permute.xlu1 %4618 }
 0xe46   :  { %v4658_v60 = vsel %vm2086_vm11, %v4654_v49, %v4619_v8  ;;  %v6066_v8 = vld [vmem:[%s10179_s9 + $0x1f8] sm:$0xff]  ;;  %v6065_v49 = vld [vmem:[%s10179_s9 + $0x1f0] sm:$0xff] }
 0xe4d   :  { %v4573_v17 = vpop.permute.xlu1 %4572  ;;  %v4621_v28 = vpop.permute.xlu0 %4620 }
 0xe4e   :  { %v4647_v52 = vsel %vm525_vm12, %v8891_v37, %v4573_v17  ;;  %v6064_v17 = vld [vmem:[%s10179_s9 + $0x1e8] sm:$0xff] }
 0xe53   :  { %v3827_v29 = vpop.f32.mrf.mxu1 }
 0xe55   :  { %v4605_v44 = vpop.permute.xlu1 %4604 }
 0xe75   :  { %v4072_v33 = vpop.f32.mrf.mxu1 }
 0xe7d   :  { %v4075_v23 = vpop.f32.mrf.mxu1 }
 0xe85   :  { %v4308_v47 = vpop.f32.mrf.mxu1 }
 0xe86   :  { %4622 = vrot.lane.b32.xlu1 %v4308_v47, %s6685_s30 }
 0xe8c   :  { %v4575_v27 = vpop.permute.xlu1 %4574 }
 0xe8d   :  { %v4311_v12 = vpop.f32.mrf.mxu1  ;;  %v4648_v36 = vsel %vm525_vm12, %v9269_v6, %v4575_v27  ;;  %v6059_v27 = vld [vmem:[%s10179_s9 + $0x1c0] sm:$0xff] }
 0xe8e   :  { %4592 = vrot.lane.b32.xlu1 %v3827_v29, %s6680_s27 }
 0xe95   :  { %v4560_v55 = vpop.f32.mrf.mxu1 }
 0xe96   :  { %4638 = vrot.lane.b32.xlu0 %v4560_v55, %s6684_s29 }
 0xe97   :  { %v4523_v20 = vpop.f32.mrf.mxu0 }
 0xe98   :  { %4634 = vrot.lane.b32.xlu2 %v4523_v20, %s6684_s29 }
 0xe9d   :  { %v4563_v51 = vpop.f32.mrf.mxu1 }
 0xe9e   :  { %4608 = vrot.lane.b32.xlu0 %v4075_v23, %s6686_s1  ;;  %4640 = vrot.lane.b32.xlu1 %v4563_v51, %s6684_s29 }
 0xe9f   :  { %v4526_v40 = vpop.f32.mrf.mxu0 }
 0xea0   :  { %4588 = vrot.lane.b32.xlu2 %v9210_v39, %s6680_s27  ;;  %v6029_v39 = vld [vmem:[%s10177_s7 + $0x98] sm:$0xff] }
 0xea1   :  { %4699 = vmatpush.msra.mxu2 %v6029_v39 }
 0xea3   :  { %4700 = vmatpush.msra.mxu2 %v6028_v0 }
 0xea5   :  { %4701 = vmatpush.msra.mxu2 %v6027_v13 }
 0xea7   :  { %4702 = vmatpush.msra.mxu2 %v6026_v1  ;;  %v6073_v1 = vld [vmem:[%s10179_s9 + $0x230] sm:$0xff] }
 0xea8   :  { %4636 = vrot.lane.b32.xlu2 %v4526_v40, %s6684_s29  ;;  %4883 = vmatpush.msra.mxu0 %v6073_v1  ;;  %v9574_v1 = vld [vmem:[%s10178_s8 + $0x1] ss:$0 sm:$0xff] }
 0xea9   :  { %4703 = vmatpush.msra.mxu2 %v6025_v4  ;;  %v6074_v4 = vld [vmem:[%s10179_s9 + $0x238] sm:$0xff] }
 0xeaa   :  { %4912 = vmatpush.msra.mxu1 %v6074_v4 }
 0xeab   :  { %4704 = vmatpush.msra.mxu2 %v6024_v42  ;;  %v6069_v42 = vld [vmem:[%s10179_s9 + $0x210] sm:$0xff] }
 0xead   :  { %4705 = vmatpush.msra.mxu2 %v6023_v48  ;;  %v4591_v34 = vpop.permute.xlu0 %4590  ;;  %v6070_v48 = vld [vmem:[%s10179_s9 + $0x218] sm:$0xff] }
 0xeae   :  { %v4652_v37 = vsel %vm2076_vm10, %v4648_v36, %v4591_v34  ;;  %4884 = vmatpush.msra.mxu0 %v6070_v48  ;;  %v6055_v34 = vld [vmem:[%s10179_s9 + $0x1a0] sm:$0xff]  ;;  %v6056_v36 = vld [vmem:[%s10179_s9 + $0x1a8] sm:$0xff] }
 0xeaf   :  { %4706 = vmatpush.msra.mxu2 %v6022_v41  ;;  %v6071_v41 = vld [vmem:[%s10179_s9 + $0x220] sm:$0xff] }
 0xeb0   :  { %4606 = vrot.lane.b32.xlu2 %v4072_v33, %s6686_s1  ;;  %4913 = vmatpush.msra.mxu1 %v6071_v41 }
 0xeb1   :  { %4885 = vmatpush.msra.mxu0 %v6067_v14 }
 0xeb2   :  { %4914 = vmatpush.msra.mxu1 %v6068_v16 }
 0xeb3   :  { %4886 = vmatpush.msra.mxu0 %v6064_v17  ;;  %v6121_v17 = vld [vmem:[%s10180_s10 + $0x230] sm:$0xff] }
 0xeb4   :  { %4915 = vmatpush.msra.mxu1 %v6065_v49  ;;  %v6122_v49 = vld [vmem:[%s10180_s10 + $0x238] sm:$0xff] }
 0xeb8   :  { %4576 = vrot.lane.b32.xlu2 %v3587_v58, %s6681_s28 }
 0xec0   :  { %4624 = vrot.lane.b32.xlu2 %v4311_v12, %s6685_s30 }
 0xef2   :  { %v4635_v11 = vpop.permute.xlu2 %4634 }
 0xef3   :  { %v4662_v7 = vsel %vm2091_vm14, %v4658_v60, %v4635_v11  ;;  %v6111_v60 = vld [vmem:[%s10180_s10 + $0x1e0] sm:$0xff]  ;;  %v6060_v11 = vld [vmem:[%s10179_s9 + $0x1c8] sm:$0xff] }
 0xef4   :  { %6034 = vmatmul.msk.f32.vlgmr.msra.gmra.mxu2 %vm75_vm0, %v4662_v7  ;;  %v6061_v7 = vld [vmem:[%s10179_s9 + $0x1d0] sm:$0xff] }
 0xef5   :  { %4887 = vmatpush.msra.mxu0 %v6061_v7 }
 0xef8   :  { %v4623_v32 = vpop.permute.xlu1 %4622 }
 0xefa   :  { %v4589_v21 = vpop.permute.xlu2 %4588 }
 0xefb   :  { %v4651_v5 = vsel %vm2076_vm10, %v4647_v52, %v4589_v21  ;;  %v6062_v21 = vld [vmem:[%s10179_s9 + $0x1d8] sm:$0xff]  ;;  %v6108_v52 = vld [vmem:[%s10180_s10 + $0x1c8] sm:$0xff] }
 0xefc   :  { %v4655_v57 = vsel %vm2081_vm13, %v4651_v5, %v4605_v44  ;;  %v6057_v5 = vld [vmem:[%s10179_s9 + $0x1b0] sm:$0xff]  ;;  %4916 = vmatpush.msra.mxu1 %v6062_v21  ;;  %v6116_v21 = vld [vmem:[%s10180_s10 + $0x208] sm:$0xff] }
 0xefd   :  { %v4659_v19 = vsel %vm2086_vm11, %v4655_v57, %v4621_v28  ;;  %v6058_v57 = vld [vmem:[%s10179_s9 + $0x1b8] sm:$0xff] }
 0xefe   :  { %4888 = vmatpush.msra.mxu0 %v6058_v57  ;;  %4917 = vmatpush.msra.mxu1 %v6059_v27  ;;  %v6112_v57 = vld [vmem:[%s10180_s10 + $0x1e8] sm:$0xff]  ;;  %v6113_v27 = vld [vmem:[%s10180_s10 + $0x1f0] sm:$0xff] }
 0xf00   :  { %v4593_v25 = vpop.permute.xlu1 %4592  ;;  %4889 = vmatpush.msra.mxu0 %v6055_v34  ;;  %4918 = vmatpush.msra.mxu1 %v6056_v36 }
 0xf02   :  { %v4637_v24 = vpop.permute.xlu2 %4636 }
 0xf03   :  { %v4663_v43 = vsel %vm2091_vm14, %v4659_v19, %v4637_v24  ;;  %v6105_v19 = vld [vmem:[%s10180_s10 + $0x1b0] sm:$0xff] }
 0xf04   :  { %6035 = vmatmul.msk.f32.gmra.mxu2 %vm75_vm0, %v4663_v43  ;;  %v6054_v43 = vld [vmem:[%s10179_s9 + $0x198] sm:$0xff] }
 0xf08   :  { %v4639_v46 = vpop.permute.xlu0 %4638 }
 0xf0a   :  { %v4607_v30 = vpop.permute.xlu2 %4606 }
 0xf0b   :  { %v4656_v15 = vsel %vm2081_vm13, %v4652_v37, %v4607_v30  ;;  %v6051_v37 = vld [vmem:[%s10179_s9 + $0x180] sm:$0xff]  ;;  %v6052_v30 = vld [vmem:[%s10179_s9 + $0x188] sm:$0xff] }
 0xf0c   :  { %v4660_v61 = vsel %vm2086_vm11, %v4656_v15, %v4623_v32  ;;  %v6102_v32 = vld [vmem:[%s10180_s10 + $0x198] sm:$0xff]  ;;  %v6053_v15 = vld [vmem:[%s10179_s9 + $0x190] sm:$0xff]  ;;  %4890 = vmatpush.msra.mxu0 %v6052_v30 }
 0xf0d   :  { %v4664_v45 = vsel %vm2091_vm14, %v4660_v61, %v4639_v46  ;;  %v6099_v46 = vld [vmem:[%s10180_s10 + $0x180] sm:$0xff]  ;;  %v6048_v61 = vld [vmem:[%s10179_s9 + $0x168] sm:$0xff]  ;;  %4919 = vmatpush.msra.mxu1 %v6053_v15  ;;  %v6110_v30 = vld [vmem:[%s10180_s10 + $0x1d8] sm:$0xff] }
 0xf0e   :  { %6036 = vmatmul.msk.f32.gmra.mxu2 %vm75_vm0, %v4664_v45  ;;  %v6049_v45 = vld [vmem:[%s10179_s9 + $0x170] sm:$0xff] }
 0xf0f   :  { %4891 = vmatpush.msra.mxu0 %v6049_v45 }
 0xf10   :  { %v4609_v63 = vpop.permute.xlu0 %4608  ;;  %v4641_v29 = vpop.permute.xlu1 %4640 }
 0xf12   :  { %v4577_v53 = vpop.permute.xlu2 %4576 }
 0xf13   :  { %v4649_v10 = vsel %vm525_vm12, %v9292_v3, %v4577_v53  ;;  %v6050_v53 = vld [vmem:[%s10179_s9 + $0x178] sm:$0xff] }
 0xf14   :  { %v4653_v6 = vsel %vm2076_vm10, %v4649_v10, %v4593_v25  ;;  %v6096_v25 = vld [vmem:[%s10180_s10 + $0x168] sm:$0xff]  ;;  %v6045_v10 = vld [vmem:[%s10179_s9 + $0x150] sm:$0xff]  ;;  %4920 = vmatpush.msra.mxu1 %v6050_v53  ;;  %v6103_v53 = vld [vmem:[%s10180_s10 + $0x1a0] sm:$0xff] }
 0xf15   :  { %v4657_v18 = vsel %vm2081_vm13, %v4653_v6, %v4609_v63  ;;  %v6046_v63 = vld [vmem:[%s10179_s9 + $0x158] sm:$0xff] }
 0xf16   :  { %4892 = vmatpush.msra.mxu0 %v6046_v63  ;;  %v6101_v63 = vld [vmem:[%s10180_s10 + $0x190] sm:$0xff] }
 0xf1a   :  { %v4625_v58 = vpop.permute.xlu2 %4624 }
 0xf1b   :  { %v4661_v33 = vsel %vm2086_vm11, %v4657_v18, %v4625_v58  ;;  %v6047_v58 = vld [vmem:[%s10179_s9 + $0x160] sm:$0xff]  ;;  %v6093_v18 = vld [vmem:[%s10180_s10 + $0x150] sm:$0xff] }
 0xf1c   :  { %v4665_v23 = vsel %vm2091_vm14, %v4661_v33, %v4641_v29  ;;  %v6042_v33 = vld [vmem:[%s10179_s9 + $0x138] sm:$0xff]  ;;  %4921 = vmatpush.msra.mxu1 %v6047_v58 }
 0xf1d   :  { %6037 = vmatmul.msk.f32.gmra.mxu2 %vm75_vm0, %v4665_v23  ;;  %v6043_v23 = vld [vmem:[%s10179_s9 + $0x140] sm:$0xff] }
 0xf1e   :  { %4893 = vmatpush.msra.mxu0 %v6043_v23  ;;  %v6098_v23 = vld [vmem:[%s10180_s10 + $0x178] sm:$0xff] }
 0xf77   :  { %v4708_v47 = vpop.f32.mrf.mxu2 }
 0xf78   :  { %v9397_v12 = vadd.f32 %v4708_v47, %v8492_v38  ;;  %v6044_v47 = vld [vmem:[%s10179_s9 + $0x148] sm:$0xff] }
 0xf79   :  { %4922 = vmatpush.msra.mxu1 %v6044_v47 }
 0xf7a   :  { %v4726_v3 = vmul.f32 %v9397_v12, %v9397_v12 }
 0xf7c   :  { %v4730_v55 = vsel %vm75_vm0, %v4726_v3, 0.0  ;;  %v6090_v3 = vld [vmem:[%s10180_s10 + $0x138] sm:$0xff] }
 0xf7d   :  { %4731 = vadd.xlane.f32.xlu0 %v4730_v55 }
 0xf87   :  { %v4711_v20 = vpop.f32.mrf.mxu2 }
 0xf88   :  { %v9403_v51 = vadd.f32 %v4711_v20, %v8498_v26  ;;  %v6039_v20 = vld [vmem:[%s10179_s9 + $0x120] sm:$0xff] }
 0xf8a   :  { %v4727_v62 = vmul.f32 %v9403_v51, %v9403_v51 }
 0xf8c   :  { %v4733_v54 = vsel %vm75_vm0, %v4727_v62, 0.0  ;;  %v6040_v62 = vld [vmem:[%s10179_s9 + $0x128] sm:$0xff] }
 0xf8d   :  { %4734 = vadd.xlane.f32.xlu2 %v4733_v54  ;;  %v6041_v54 = vld [vmem:[%s10179_s9 + $0x130] sm:$0xff]  ;;  %4894 = vmatpush.msra.mxu0 %v6040_v62  ;;  %v6091_v62 = vld [vmem:[%s10180_s10 + $0x140] sm:$0xff] }
 0xf8e   :  { %4923 = vmatpush.msra.mxu1 %v6041_v54  ;;  %v6092_v54 = vld [vmem:[%s10180_s10 + $0x148] sm:$0xff] }
 0xf8f   :  { %5036 = vmatpush.msrb.mxu0 %v6122_v49 }
 0xf91   :  { %v4714_v59 = vpop.f32.mrf.mxu2 }
 0xf92   :  { %v9409_v38 = vadd.f32 %v4714_v59, %v8504_v22  ;;  %v6072_v22 = vld [vmem:[%s10179_s9 + $0x228] sm:$0xff]  ;;  %v6087_v59 = vld [vmem:[%s10180_s10 + $0x120] sm:$0xff] }
 0xf93   :  { %4854 = vmatpush.msra.mxu3 %v6072_v22 }
 0xf94   :  { %v4728_v2 = vmul.f32 %v9409_v38, %v9409_v38 }
 0xf95   :  { %4855 = vmatpush.msra.mxu3 %v6069_v42 }
 0xf96   :  { %v4736_v39 = vsel %vm75_vm0, %v4728_v2, 0.0 }
 0xf97   :  { %4737 = vadd.xlane.f32.xlu1 %v4736_v39  ;;  %4856 = vmatpush.msra.mxu3 %v6066_v8 }
 0xf99   :  { %4857 = vmatpush.msra.mxu3 %v6063_v31 }
 0xf9b   :  { %4858 = vmatpush.msra.mxu3 %v6060_v11  ;;  %v6119_v11 = vld [vmem:[%s10180_s10 + $0x220] sm:$0xff] }
 0xf9c   :  { %5037 = vmatpush.msrb.mxu0 %v6119_v11 }
 0xf9d   :  { %4859 = vmatpush.msra.mxu3 %v6057_v5 }
 0xf9e   :  { %5038 = vmatpush.msrb.mxu0 %v6116_v21  ;;  %v6155_v21 = vld [vmem:[%s10181_s11 + $0x150] sm:$0xff] }
 0xf9f   :  { %4860 = vmatpush.msra.mxu3 %v6054_v43 }
 0xfa0   :  { %v4717_v40 = vpop.f32.mrf.mxu2  ;;  %5039 = vmatpush.msrb.mxu0 %v6113_v27  ;;  %v6153_v27 = vld [vmem:[%s10181_s11 + $0x140] sm:$0xff] }
 0xfa1   :  { %v9415_v26 = vadd.f32 %v4717_v40, %v8510_v56  ;;  %v6120_v56 = vld [vmem:[%s10180_s10 + $0x228] sm:$0xff]  ;;  %4861 = vmatpush.msra.mxu3 %v6051_v37  ;;  %v6109_v37 = vld [vmem:[%s10180_s10 + $0x1d0] sm:$0xff] }
 0xfa2   :  { %4978 = vmatpush.msrb.mxu2 %v6120_v56  ;;  %5040 = vmatpush.msrb.mxu0 %v6110_v30  ;;  %v6177_v30 = vld [vmem:[%s10181_s11 + $0x200] sm:$0xff] }
 0xfa3   :  { %v4729_v0 = vmul.f32 %v9415_v26, %v9415_v26  ;;  %4862 = vmatpush.msra.mxu3 %v6048_v61  ;;  %v6107_v61 = vld [vmem:[%s10180_s10 + $0x1c0] sm:$0xff] }
 0xfa4   :  { %4979 = vmatpush.msrb.mxu2 %v6117_v50  ;;  %5041 = vmatpush.msrb.mxu0 %v6107_v61 }
 0xfa5   :  { %v4739_v13 = vsel %vm75_vm0, %v4729_v0, 0.0  ;;  %4863 = vmatpush.msra.mxu3 %v6045_v10 }
 0xfa6   :  { %4740 = vadd.xlane.f32.xlu0 %v4739_v13  ;;  %4980 = vmatpush.msrb.mxu2 %v6114_v9 }
 0xfa7   :  { %4864 = vmatpush.msra.mxu3 %v6042_v33  ;;  %v6097_v33 = vld [vmem:[%s10180_s10 + $0x170] sm:$0xff] }
 0xfa8   :  { %4981 = vmatpush.msrb.mxu2 %v6111_v60  ;;  %v6118_v60 = vld [vmem:[%s10180_s10 + $0x218] sm:$0xff] }
 0xfa9   :  { %4865 = vmatpush.msra.mxu3 %v6039_v20 }
 0xfaa   :  { %4982 = vmatpush.msrb.mxu2 %v6108_v52 }
 0xfab   :  { %5007 = vmatpush.msrb.mxu3 %v6121_v17  ;;  %v6157_v17 = vld [vmem:[%s10181_s11 + $0x160] sm:$0xff] }
 0xfac   :  { %4983 = vmatpush.msrb.mxu2 %v6105_v19 }
 0xfad   :  { %5008 = vmatpush.msrb.mxu3 %v6118_v60 }
 0xfae   :  { %4984 = vmatpush.msrb.mxu2 %v6102_v32 }
 0xfb0   :  { %4985 = vmatpush.msrb.mxu2 %v6099_v46 }
 0xfb2   :  { %4986 = vmatpush.msrb.mxu2 %v6096_v25  ;;  %v6104_v25 = vld [vmem:[%s10180_s10 + $0x1a8] sm:$0xff] }
 0xfb3   :  { %5042 = vmatpush.msrb.mxu0 %v6104_v25 }
 0xfb4   :  { %4987 = vmatpush.msrb.mxu2 %v6093_v18 }
 0xfb5   :  { %5043 = vmatpush.msrb.mxu0 %v6101_v63  ;;  %v6149_v63 = vld [vmem:[%s10181_s11 + $0x120] sm:$0xff] }
 0xfb6   :  { %4988 = vmatpush.msrb.mxu2 %v6090_v3  ;;  %v6094_v3 = vld [vmem:[%s10180_s10 + $0x158] sm:$0xff] }
 0xfb7   :  { %5044 = vmatpush.msrb.mxu0 %v6098_v23 }
 0xfb8   :  { %4989 = vmatpush.msrb.mxu2 %v6087_v59 }
 0xff0   :  { %v4732_v44 = vpop.xlane.xlu0 %4731 }
 0xff1   :  { %v4742_v28 = vmul.f32 %v4732_v44, %v6833_v35  ;;  %v6115_v44 = vld [vmem:[%s10180_s10 + $0x200] sm:$0xff] }
 0xff2   :  { %5009 = vmatpush.msrb.mxu3 %v6115_v44 }
 0xff3   :  { %v9493_v24 = vadd.f32 1e-05, %v4742_v28 }
 0xff4   :  { %5010 = vmatpush.msrb.mxu3 %v6112_v57 }
 0xff5   :  { %6609 = vrsqrt.f32 %v9493_v24  ;;  %vm4756_vm11 = vweird.f32 %v9493_v24 }
 0xff6   :  { %5011 = vmatpush.msrb.mxu3 %v6109_v37 }
 0xffb   :  { %v6610_v6 = vpop.eup %6609 }
 0xffc   :  { %v4751_v29 = vmul.f32 %v6610_v6, %v9493_v24  ;;  %vm4757_vm12 = vweird.f32 %v6610_v6 }
 0xffd   :  { %vm4758_vm13 = vmor %vm4756_vm11, %vm4757_vm12 }
 0xffe   :  { %v4752_v55 = vmul.f32 %v6610_v6, %v4751_v29 }
0x1000   :  { %v4753_v2 = vmul.f32 0.5, %v4752_v55  ;;  %v4735_v39 = vpop.xlane.xlu2 %4734  ;;  %v6095_v55 = vld [vmem:[%s10180_s10 + $0x160] sm:$0xff] }
0x1001   :  { %v4743_v40 = vmul.f32 %v4735_v39, %v6833_v35  ;;  %5045 = vmatpush.msrb.mxu0 %v6095_v55  ;;  %v6089_v39 = vld [vmem:[%s10180_s10 + $0x130] sm:$0xff]  ;;  %v6148_v55 = vld [vmem:[%s10181_s11 + $0x118] sm:$0xff] }
0x1002   :  { %v4754_v0 = vsub.f32 1.5, %v4753_v2  ;;  %v6088_v2 = vld [vmem:[%s10180_s10 + $0x128] sm:$0xff] }
0x1003   :  { %v4747_v13 = vadd.f32 1e-05, %v4743_v40  ;;  %5046 = vmatpush.msrb.mxu0 %v6092_v54 }
0x1004   :  { %v4755_v22 = vmul.f32 %v6610_v6, %v4754_v0 }
0x1005   :  { %6611 = vrsqrt.f32 %v4747_v13  ;;  %vm4766_vm1 = vweird.f32 %v4747_v13  ;;  %5047 = vmatpush.msrb.mxu0 %v6089_v39 }
0x1006   :  { %v4759_v4 = vsel %vm4758_vm13, %v6610_v6, %v4755_v22  ;;  %v6100_v6 = vld [vmem:[%s10180_s10 + $0x188] sm:$0xff] }
0x1007   :  { %v4790_v56 = vmul.f32 %v4759_v4, %v9397_v12 }
0x1009   :  { %v9578_v42 = vmul.f32 %v9574_v1, %v4790_v56 }
0x100a   :  { %v4738_v48 = vpop.xlane.xlu1 %4737 }
0x100b   :  { %v6612_v41 = vpop.eup %6611  ;;  %v4744_v50 = vmul.f32 %v4738_v48, %v6833_v35  ;;  %6075 = vmatmul.msk.f32.vlgmr.msra.gmra.mxu3 %vm75_vm0, %v9578_v42  ;;  %6079 = vmatmul.msk.f32.vlgmr.msra.gmra.mxu0 %vm75_vm0, %v9578_v42 }
0x100c   :  { %v4761_v8 = vmul.f32 %v6612_v41, %v4747_v13  ;;  %6083 = vmatmul.msk.f32.vlgmr.msra.gmra.mxu1 %vm75_vm0, %v9578_v42  ;;  %6123 = vmatmul.msk.f32.vlgmr.msrb.gmra.mxu2 %vm75_vm0, %v9578_v42  ;;  %vm4767_vm14 = vweird.f32 %v6612_v41 }
0x100d   :  { %v4748_v14 = vadd.f32 1e-05, %v4744_v50  ;;  %vm4768_vm15 = vmor %vm4766_vm1, %vm4767_vm14 }
0x100e   :  { %v4762_v16 = vmul.f32 %v6612_v41, %v4761_v8  ;;  %v6160_v8 = vld [vmem:[%s10181_s11 + $0x178] sm:$0xff] }
0x100f   :  { %6613 = vrsqrt.f32 %v4748_v14  ;;  %vm4776_vm3 = vweird.f32 %v4748_v14 }
0x1010   :  { %v4763_v9 = vmul.f32 0.5, %v4762_v16 }
0x1012   :  { %v4764_v31 = vsub.f32 1.5, %v4763_v9  ;;  %v6158_v9 = vld [vmem:[%s10181_s11 + $0x168] sm:$0xff] }
0x1014   :  { %v4765_v7 = vmul.f32 %v6612_v41, %v4764_v31 }
0x1015   :  { %v6614_v52 = vpop.eup %6613 }
0x1016   :  { %v4769_v28 = vsel %vm4768_vm15, %v6612_v41, %v4765_v7  ;;  %v4771_v5 = vmul.f32 %v6614_v52, %v4748_v14  ;;  %vm4777_vm2 = vweird.f32 %v6614_v52  ;;  %v6159_v14 = vld [vmem:[%s10181_s11 + $0x170] sm:$0xff]  ;;  %v6156_v7 = vld [vmem:[%s10181_s11 + $0x158] sm:$0xff] }
0x1017   :  { %v4791_v19 = vmul.f32 %v4769_v28, %v9403_v51  ;;  %vm4778_vm5 = vmor %vm4776_vm3, %vm4777_vm2 }
0x1018   :  { %v4772_v24 = vmul.f32 %v6614_v52, %v4771_v5 }
0x1019   :  { %v9615_v43 = vmul.f32 %v9574_v1, %v4791_v19  ;;  %v4741_v34 = vpop.xlane.xlu0 %4740 }
0x101a   :  { %v4773_v36 = vmul.f32 0.5, %v4772_v24  ;;  %v4745_v32 = vmul.f32 %v4741_v34, %v6833_v35  ;;  %v6106_v35 = vld [vmem:[%s10180_s10 + $0x1b8] sm:$0xff] }
0x101b   :  { %6076 = vmatmul.msk.f32.gmra.mxu3 %vm75_vm0, %v9615_v43  ;;  %6080 = vmatmul.msk.f32.gmra.mxu0 %vm75_vm0, %v9615_v43 }
0x101c   :  { %v4774_v15 = vsub.f32 1.5, %v4773_v36  ;;  %v4749_v46 = vadd.f32 1e-05, %v4745_v32  ;;  %6084 = vmatmul.msk.f32.gmra.mxu1 %vm75_vm0, %v9615_v43  ;;  %6124 = vmatmul.msk.f32.gmra.mxu2 %vm75_vm0, %v9615_v43  ;;  %v6152_v36 = vld [vmem:[%s10181_s11 + $0x138] sm:$0xff] }
0x101d   :  { %5012 = vmatpush.msrb.mxu3 %v6106_v35  ;;  %v6176_v35 = vld [vmem:[%s10181_s11 + $0x1f8] sm:$0xff] }
0x101e   :  { %v4775_v45 = vmul.f32 %v6614_v52, %v4774_v15  ;;  %6615 = vrsqrt.f32 %v4749_v46  ;;  %vm4786_vm4 = vweird.f32 %v4749_v46  ;;  %v6151_v15 = vld [vmem:[%s10181_s11 + $0x130] sm:$0xff] }
0x101f   :  { %5013 = vmatpush.msrb.mxu3 %v6103_v53  ;;  %v6150_v53 = vld [vmem:[%s10181_s11 + $0x128] sm:$0xff] }
0x1020   :  { %v4779_v10 = vsel %vm4778_vm5, %v6614_v52, %v4775_v45  ;;  %v6154_v52 = vld [vmem:[%s10181_s11 + $0x148] sm:$0xff] }
0x1021   :  { %v4792_v58 = vmul.f32 %v4779_v10, %v9409_v38  ;;  %5014 = vmatpush.msrb.mxu3 %v6100_v6  ;;  %v6175_v10 = vld [vmem:[%s10181_s11 + $0x1f0] sm:$0xff] }
0x1023   :  { %v4799_v18 = vmul.f32 %v9574_v1, %v4792_v58  ;;  %5015 = vmatpush.msrb.mxu3 %v6097_v33  ;;  %v6174_v33 = vld [vmem:[%s10181_s11 + $0x1e8] sm:$0xff] }
0x1024   :  { %v6616_v29 = vpop.eup %6615 }
0x1025   :  { %v4781_v47 = vmul.f32 %v6616_v29, %v4749_v46  ;;  %6077 = vmatmul.msk.f32.gmra.mxu3 %vm75_vm0, %v4799_v18  ;;  %6081 = vmatmul.msk.f32.gmra.mxu0 %vm75_vm0, %v4799_v18  ;;  %vm4787_vm9 = vweird.f32 %v6616_v29 }
0x1026   :  { %6085 = vmatmul.msk.f32.gmra.mxu1 %vm75_vm0, %v4799_v18  ;;  %6125 = vmatmul.msk.f32.gmra.mxu2 %vm75_vm0, %v4799_v18  ;;  %vm4788_vm6 = vmor %vm4786_vm4, %vm4787_vm9  ;;  %vm10238_vm4 = vcmask 1045504  }
0x1027   :  { %v4782_v20 = vmul.f32 %v6616_v29, %v4781_v47  ;;  %5016 = vmatpush.msrb.mxu3 %v6094_v3 }
0x1029   :  { %v4783_v59 = vmul.f32 0.5, %v4782_v20  ;;  %5017 = vmatpush.msrb.mxu3 %v6091_v62 }
0x102b   :  { %v4784_v40 = vsub.f32 1.5, %v4783_v59  ;;  %5018 = vmatpush.msrb.mxu3 %v6088_v2  ;;  %v6173_v59 = vld [vmem:[%s10181_s11 + $0x1e0] sm:$0xff] }
0x102d   :  { %v4785_v0 = vmul.f32 %v6616_v29, %v4784_v40 }
0x102f   :  { %v4789_v13 = vsel %vm4788_vm6, %v6616_v29, %v4785_v0  ;;  %v6147_v0 = vld [vmem:[%s10181_s11 + $0x110] sm:$0xff] }
0x1030   :  { %v4793_v22 = vmul.f32 %v4789_v13, %v9415_v26 }
0x1032   :  { %v4800_v4 = vmul.f32 %v9574_v1, %v4793_v22  ;;  %v6162_v1 = vld [vmem:[%s10181_s11 + $0x188] sm:$0xff] }
0x1033   :  { %5363 = vmatpush.msrb.mxu1 %v6162_v1 }
0x1034   :  { %6078 = vmatmul.msk.f32.gmra.mxu3 %vm75_vm0, %v4800_v4  ;;  %6082 = vmatmul.msk.f32.gmra.mxu0 %vm75_vm0, %v4800_v4 }
0x1035   :  { %6086 = vmatmul.msk.f32.gmra.mxu1 %vm75_vm0, %v4800_v4  ;;  %6126 = vmatmul.msk.f32.gmra.mxu2 %vm75_vm0, %v4800_v4 }
0x103c   :  { %6127 = vmatmul.msk.f32.vlgmr.msrb.gmra.mxu3 %vm75_vm0, %v9578_v42  ;;  %6131 = vmatmul.msk.f32.vlgmr.msrb.gmra.mxu0 %vm75_vm0, %v9578_v42  ;;  %v6161_v42 = vld [vmem:[%s10181_s11 + $0x180] sm:$0xff] }
0x103d   :  { %5364 = vmatpush.msrb.mxu1 %v6161_v42 }
0x103f   :  { %5365 = vmatpush.msrb.mxu1 %v6160_v8 }
0x1041   :  { %5366 = vmatpush.msrb.mxu1 %v6159_v14 }
0x1043   :  { %5367 = vmatpush.msrb.mxu1 %v6158_v9  ;;  %v6171_v9 = vld [vmem:[%s10181_s11 + $0x1d0] sm:$0xff] }
0x1044   :  { %6128 = vmatmul.msk.f32.gmra.mxu3 %vm75_vm0, %v9615_v43  ;;  %6132 = vmatmul.msk.f32.gmra.mxu0 %vm75_vm0, %v9615_v43  ;;  %v6178_v43 = vld [vmem:[%s10181_s11 + $0x208] sm:$0xff] }
0x1045   :  { %5368 = vmatpush.msrb.mxu1 %v6157_v17  ;;  %5392 = vmatpush.msra.mxu2 %v6178_v43 }
0x1047   :  { %5369 = vmatpush.msrb.mxu1 %v6156_v7  ;;  %5393 = vmatpush.msra.mxu2 %v6177_v30 }
0x1049   :  { %5370 = vmatpush.msrb.mxu1 %v6155_v21  ;;  %5394 = vmatpush.msra.mxu2 %v6176_v35  ;;  %v6170_v21 = vld [vmem:[%s10181_s11 + $0x1c8] sm:$0xff] }
0x104b   :  { %5371 = vmatpush.msrb.mxu1 %v6154_v52  ;;  %5395 = vmatpush.msra.mxu2 %v6175_v10 }
0x104c   :  { %6129 = vmatmul.msk.f32.gmra.mxu3 %vm75_vm0, %v4799_v18  ;;  %6133 = vmatmul.msk.f32.gmra.mxu0 %vm75_vm0, %v4799_v18 }
0x104d   :  { %5372 = vmatpush.msrb.mxu1 %v6153_v27  ;;  %5396 = vmatpush.msra.mxu2 %v6174_v33 }
0x104f   :  { %5373 = vmatpush.msrb.mxu1 %v6152_v36  ;;  %5397 = vmatpush.msra.mxu2 %v6173_v59  ;;  %v6166_v59 = vld [vmem:[%s10181_s11 + $0x1a8] sm:$0xff] }
0x1051   :  { %5374 = vmatpush.msrb.mxu1 %v6151_v15 }
0x1053   :  { %5375 = vmatpush.msrb.mxu1 %v6150_v53 }
0x1054   :  { %6130 = vmatmul.msk.f32.gmra.mxu3 %vm75_vm0, %v4800_v4  ;;  %6134 = vmatmul.msk.f32.gmra.mxu0 %vm75_vm0, %v4800_v4  ;;  %v6172_v4 = vld [vmem:[%s10181_s11 + $0x1d8] sm:$0xff] }
0x1055   :  { %5376 = vmatpush.msrb.mxu1 %v6149_v63  ;;  %5398 = vmatpush.msra.mxu2 %v6172_v4 }
0x1057   :  { %5377 = vmatpush.msrb.mxu1 %v6148_v55  ;;  %5399 = vmatpush.msra.mxu2 %v6171_v9 }
0x1059   :  { %5378 = vmatpush.msrb.mxu1 %v6147_v0  ;;  %5400 = vmatpush.msra.mxu2 %v6170_v21 }
0x1088   :  { %v9701_v56 = vpop.f32.mrf.mxu0 }
0x1089   :  { %v6136_v48 = vmul.f32 -1.442695, %v9701_v56  ;;  %v9707_v41 = vpop.f32.mrf.mxu1 }
0x108a   :  { %v6137_v50 = vmul.f32 -1.442695, %v9707_v41 }
0x108b   :  { %6617 = vpow2.f32 %v6136_v48 }
0x108c   :  { %6619 = vpow2.f32 %v6137_v50 }
0x108e   :  { %v9716_v16 = vpop.f32.mrf.mxu3 }
0x108f   :  { %v6135_v31 = vmul.f32 -1.442695, %v9716_v16 }
0x1091   :  { %v6618_v49 = vpop.eup %6617  ;;  %6621 = vpow2.f32 %v6135_v31 }
0x1092   :  { %v6620_v60 = vpop.eup %6619  ;;  %v9725_v11 = vadd.f32 1.0, %v6618_v49 }
0x1093   :  { %v9730_v44 = vadd.f32 1.0, %v6620_v60 }
0x1094   :  { %6623 = vrcp.f32 %v9725_v11  ;;  %v5135_v50 = vand.u32 2147483648, %v9725_v11  ;;  %vm5129_vm1 = vweird.f32 %v9725_v11 }
0x1095   :  { %6625 = vrcp.f32 %v9730_v44  ;;  %v5150_v43 = vand.u32 2147483648, %v9730_v44  ;;  %vm5144_vm2 = vweird.f32 %v9730_v44 }
0x1096   :  { %v5136_v10 = vor.u32 1.1754944e-38, %v5135_v50  ;;  %v6165_v50 = vld [vmem:[%s10181_s11 + $0x1a0] sm:$0xff] }
0x1097   :  { %v6622_v28 = vpop.eup %6621 }
0x1098   :  { %v9740_v5 = vadd.f32 1.0, %v6622_v28  ;;  %v9742_v57 = vpop.f32.mrf.mxu0 }
0x1099   :  { %v6139_v19 = vmul.f32 -1.442695, %v9742_v57  ;;  %v9748_v24 = vpop.f32.mrf.mxu1 }
0x109a   :  { %v9753_v34 = vpop.eup %6623  ;;  %6627 = vrcp.f32 %v9740_v5  ;;  %v6140_v37 = vmul.f32 -1.442695, %v9748_v24  ;;  %v5118_v2 = vand.u32 2147483647, %v9740_v5  ;;  %v5120_v39 = vand.u32 2147483648, %v9740_v5 }
0x109b   :  { %v9759_v32 = vpop.eup %6625  ;;  %6629 = vpow2.f32 %v6139_v19  ;;  %v5125_v46 = vmul.f32 %v9753_v34, %v9725_v11  ;;  %vm5114_vm8 = vweird.f32 %v9740_v5  ;;  %vm5130_vm12 = vweird.f32 %v9753_v34 }
0x109c   :  { %6631 = vpow2.f32 %v6140_v37  ;;  %v5140_v61 = vmul.f32 %v9759_v32, %v9730_v44  ;;  %vm5119_vm13 = vcmp.eq.f32.partialorder %v5118_v2, 8.507059e+37  ;;  %v5121_v31 = vor.u32 1.1754944e-38, %v5120_v39  ;;  %v6169_v37 = vld [vmem:[%s10181_s11 + $0x1c0] sm:$0xff]  ;;  %vm9848_vm15 = vmor %vm5129_vm1, %vm5130_vm12  ;;  %v6179_v2 = vld [vmem:[%s10181_s11 + $0x210] sm:$0xff] }
0x109d   :  { %v5126_v18 = vsub.f32 1.0, %v5125_v46  ;;  %vm5145_vm14 = vweird.f32 %v9759_v32  ;;  %v5133_v19 = vand.u32 2147483647, %v9725_v11  ;;  %v5148_v46 = vand.u32 2147483647, %v9730_v44  ;;  %v4991_v11 = vpop.f32.mrf.mxu2  ;;  %5401 = vmatpush.msra.mxu2 %v6169_v37  ;;  %v6168_v44 = vld [vmem:[%s10181_s11 + $0x1b8] sm:$0xff] }
0x109e   :  { %v9775_v45 = vpop.f32.mrf.mxu3  ;;  %v5141_v23 = vsub.f32 1.0, %v5140_v61  ;;  %vm9860_vm3 = vmor %vm5144_vm2, %vm5145_vm14  ;;  %v6163_v37 = vld [vmem:[%s10181_s11 + $0x190] sm:$0xff] }
0x109f   :  { %v6138_v25 = vmul.f32 -1.442695, %v9775_v45  ;;  %v5127_v13 = vmul.f32 %v9753_v34, %v5126_v18  ;;  %5402 = vmatpush.msra.mxu2 %v6168_v44  ;;  %vm5134_vm5 = vcmp.eq.f32.partialorder %v5133_v19, 8.507059e+37  ;;  %vm5149_vm9 = vcmp.eq.f32.partialorder %v5148_v46, 8.507059e+37 }
0x10a0   :  { %v6628_v6 = vpop.eup %6627  ;;  %v5142_v1 = vmul.f32 %v9759_v32, %v5141_v23 }
0x10a1   :  { %v6630_v58 = vpop.eup %6629  ;;  %v5110_v29 = vmul.f32 %v6628_v6, %v9740_v5  ;;  %6633 = vpow2.f32 %v6138_v25  ;;  %vm5115_vm7 = vweird.f32 %v6628_v6  ;;  %v5128_v49 = vadd.f32 %v9753_v34, %v5127_v13 }
0x10a2   :  { %v9791_v47 = vadd.f32 1.0, %v6630_v58  ;;  %v9793_v3 = vpop.f32.mrf.mxu0  ;;  %v6632_v20 = vpop.eup %6631  ;;  %vm5116_vm11 = vmor %vm5114_vm8, %vm5115_vm7  ;;  %v5143_v52 = vadd.f32 %v9759_v32, %v5142_v1  ;;  %v5151_v58 = vor.u32 1.1754944e-38, %v5150_v43 }
0x10a3   :  { %v5111_v62 = vsub.f32 1.0, %v5110_v29  ;;  %v6142_v54 = vmul.f32 -1.442695, %v9793_v3  ;;  %v9804_v40 = vpop.f32.mrf.mxu1  ;;  %v9815_v42 = vadd.f32 1.0, %v6632_v20  ;;  %v6167_v29 = vld [vmem:[%s10181_s11 + $0x1b0] sm:$0xff] }
0x10a4   :  { %6635 = vrcp.f32 %v9791_v47  ;;  %v6143_v14 = vmul.f32 -1.442695, %v9804_v40  ;;  %5403 = vmatpush.msra.mxu2 %v6167_v29  ;;  %v5180_v20 = vand.u32 2147483648, %v9791_v47  ;;  %v5178_v4 = vand.u32 2147483647, %v9791_v47 }
0x10a5   :  { %v5112_v22 = vmul.f32 %v6628_v6, %v5111_v62  ;;  %6637 = vpow2.f32 %v6142_v54  ;;  %vm5174_vm6 = vweird.f32 %v9791_v47  ;;  %v5195_v9 = vand.u32 2147483648, %v9815_v42 }
0x10a6   :  { %6639 = vrcp.f32 %v9815_v42  ;;  %5404 = vmatpush.msra.mxu2 %v6166_v59  ;;  %vm5189_vm8 = vweird.f32 %v9815_v42 }
0x10a7   :  { %v6634_v48 = vpop.eup %6633  ;;  %v5113_v8 = vadd.f32 %v6628_v6, %v5112_v22  ;;  %6641 = vpow2.f32 %v6143_v14  ;;  %v5193_v14 = vand.u32 2147483647, %v9815_v42  ;;  %v5196_v46 = vor.u32 1.1754944e-38, %v5195_v9 }
0x10a8   :  { %v9826_v17 = vpop.f32.mrf.mxu3  ;;  %v9829_v7 = vadd.f32 1.0, %v6634_v48  ;;  %5405 = vmatpush.msra.mxu2 %v6165_v50 }
0x10a9   :  { %v5117_v60 = vsel %vm5116_vm11, %v6628_v6, %v5113_v8  ;;  %v6141_v5 = vmul.f32 -1.442695, %v9826_v17  ;;  %vm9940_vm14 = vcmp.eq.f32.partialorder %v5193_v14, 8.507059e+37 }
0x10aa   :  { %v5122_v28 = vsel %vm5119_vm13, %v5121_v31, %v5117_v60  ;;  %v9837_v27 = vpop.eup %6635  ;;  %6643 = vrcp.f32 %v9829_v7  ;;  %v5163_v21 = vand.u32 2147483647, %v9829_v7  ;;  %vm9936_vm13 = vcmp.eq.f32.partialorder %v5178_v4, 8.507059e+37 }
0x10ab   :  { %v5289_v36 = vmul.f32 %v5122_v28, %v9716_v16  ;;  %v6638_v30 = vpop.eup %6637  ;;  %v5132_v16 = vsel %vm9848_vm15, %v9753_v34, %v5128_v49  ;;  %6645 = vpow2.f32 %v6141_v5  ;;  %v5147_v34 = vsel %vm9860_vm3, %v9759_v32, %v5143_v52  ;;  %v6180_v32 = vld [vmem:[%s10181_s11 + $0x218] sm:$0x3f] }
0x10ac   :  { %v9864_v53 = vadd.f32 1.0, %v6638_v30  ;;  %v9869_v25 = vpop.eup %6639  ;;  %v5170_v6 = vmul.f32 %v9837_v27, %v9791_v47  ;;  %v5137_v33 = vsel %vm5134_vm5, %v5136_v10, %v5132_v16  ;;  %6181 = vmatpush.msk.msra.mxu3 %vm10238_vm4, %v6180_v32  ;;  %v5152_v55 = vsel %vm5149_vm9, %v5151_v58, %v5147_v34 }
0x10ad   :  { %v5301_v61 = vmul.f32 %v5289_v36, %v4991_v11  ;;  %v6642_v63 = vpop.eup %6641  ;;  %v5185_v18 = vmul.f32 %v9869_v25, %v9815_v42  ;;  %v9899_v22 = vmul.f32 %v5137_v33, %v9701_v56  ;;  %v5291_v8 = vmul.f32 %v5152_v55, %v9707_v41  ;;  %v6164_v41 = vld [vmem:[%s10181_s11 + $0x198] sm:$0xff] }
0x10ae   :  { %6647 = vrcp.f32 %v9864_v53  ;;  %v9885_v23 = vadd.f32 1.0, %v6642_v63  ;;  %v5171_v0 = vsub.f32 1.0, %v5170_v6  ;;  %5436 = vmatpush.msra.mxu3 %v6179_v2  ;;  %v9915_v49 = vor.u32 1.1754944e-38, %v5180_v20  ;;  %5406 = vmatpush.msra.mxu2 %v6164_v41 }
0x10af   :  { %5379 = vmatmul.f32.vlgmr.msrb.gmra.mxu1 %v5301_v61  ;;  %v5186_v62 = vsub.f32 1.0, %v5185_v18  ;;  %v5165_v52 = vand.u32 2147483648, %v9829_v7  ;;  %vm5190_vm7 = vweird.f32 %v9869_v25  ;;  %vm5175_vm11 = vweird.f32 %v9837_v27 }
0x10b0   :  { %v6644_v39 = vpop.eup %6643  ;;  %6649 = vrcp.f32 %v9885_v23  ;;  %v5172_v28 = vmul.f32 %v9837_v27, %v5171_v0  ;;  %5407 = vmatpush.msra.mxu2 %v6163_v37  ;;  %vm9950_vm1 = vmor %vm5189_vm8, %vm5190_vm7  ;;  %vm5159_vm15 = vweird.f32 %v9829_v7  ;;  %vm5164_vm2 = vcmp.eq.f32.partialorder %v5163_v21, 8.507059e+37 }
0x10b1   :  { %v9889_v54 = vpop.f32.mrf.mxu0  ;;  %v6646_v13 = vpop.eup %6645  ;;  %v5187_v1 = vmul.f32 %v9869_v25, %v5186_v62  ;;  %v5155_v48 = vmul.f32 %v6644_v39, %v9829_v7  ;;  %vm5160_vm12 = vweird.f32 %v6644_v39  ;;  %v5166_v63 = vor.u32 1.1754944e-38, %v5165_v52  ;;  %vm9969_vm5 = vmor %vm5174_vm6, %vm5175_vm11 }
0x10b2   :  { %v9911_v56 = vadd.f32 1.0, %v6646_v13  ;;  %v6145_v19 = vmul.f32 -1.442695, %v9889_v54  ;;  %v9946_v16 = vpop.f32.mrf.mxu1  ;;  %v5173_v34 = vadd.f32 %v9837_v27, %v5172_v28  ;;  %vm5161_vm3 = vmor %vm5159_vm15, %vm5160_vm12  ;;  %v5223_v55 = vand.u32 2147483647, %v9864_v53  ;;  %v4994_v13 = vpop.f32.mrf.mxu2 }
0x10b3   :  { %v5156_v60 = vsub.f32 1.0, %v5155_v48  ;;  %v5188_v5 = vadd.f32 %v9869_v25, %v5187_v1  ;;  %v6146_v29 = vmul.f32 -1.442695, %v9946_v16  ;;  %vm5219_vm9 = vweird.f32 %v9864_v53 }
0x10b4   :  { %v9913_v31 = vpop.eup %6647  ;;  %6651 = vrcp.f32 %v9911_v56  ;;  %v5177_v0 = vsel %vm9969_vm5, %v9837_v27, %v5173_v34  ;;  %vm5234_vm4 = vweird.f32 %v9885_v23  ;;  %vm10247_vm6 = vcmask 113664  }
0x10b5   :  { %v5157_v43 = vmul.f32 %v6644_v39, %v5156_v60  ;;  %v5215_v11 = vmul.f32 %v9913_v31, %v9864_v53  ;;  %v5192_v6 = vsel %vm9950_vm1, %v9869_v25, %v5188_v5  ;;  %6653 = vpow2.f32 %v6145_v19 }
0x10b6   :  { %v9933_v30 = vpop.eup %6649  ;;  %v5197_v59 = vsel %vm9940_vm14, %v5196_v46, %v5192_v6  ;;  %6655 = vpow2.f32 %v6146_v29  ;;  %v5240_v1 = vand.u32 2147483648, %v9885_v23  ;;  %v5182_v60 = vsel %vm9936_vm13, %v9915_v49, %v5177_v0 }
0x10b7   :  { %v9928_v36 = vpop.f32.mrf.mxu3  ;;  %v5158_v61 = vadd.f32 %v6644_v39, %v5157_v43  ;;  %v5230_v44 = vmul.f32 %v9933_v30, %v9885_v23  ;;  %v5216_v33 = vsub.f32 1.0, %v5215_v11  ;;  %vm5235_vm7 = vweird.f32 %v9933_v30 }
0x10b8   :  { %v6144_v7 = vmul.f32 -1.442695, %v9928_v36  ;;  %v5294_v27 = vmul.f32 %v5197_v59, %v9748_v24  ;;  %v5238_v21 = vand.u32 2147483647, %v9885_v23  ;;  %v5210_v52 = vand.u32 2147483648, %v9911_v56  ;;  %vm9999_vm8 = vmor %vm5234_vm4, %vm5235_vm7 }
0x10b9   :  { %v5049_v10 = vpop.f32.mrf.mxu0  ;;  %v5162_v58 = vsel %vm5161_vm3, %v6644_v39, %v5158_v61  ;;  %v5231_v18 = vsub.f32 1.0, %v5230_v44  ;;  %vm5220_vm11 = vweird.f32 %v9913_v31  ;;  %v5241_v37 = vor.u32 1.1754944e-38, %v5240_v1 }
0x10ba   :  { %v5167_v32 = vsel %vm5164_vm2, %v5166_v63, %v5162_v58  ;;  %v5303_v20 = vmul.f32 %v5291_v8, %v5049_v10  ;;  %v6652_v62 = vpop.eup %6651  ;;  %6657 = vpow2.f32 %v6144_v7  ;;  %v5217_v8 = vmul.f32 %v9913_v31, %v5216_v33  ;;  %vm10250_vm2 = vmmov %vm10247_vm6  ;;  %v4997_v7 = vpop.f32.mrf.mxu2 }
0x10bb   :  { %v5292_v2 = vmul.f32 %v5167_v32, %v9775_v45  ;;  %v5232_v39 = vmul.f32 %v9933_v30, %v5231_v18  ;;  %v5200_v47 = vmul.f32 %v6652_v62, %v9911_v56  ;;  %v6654_v50 = vpop.eup %6653  ;;  %vm5205_vm12 = vweird.f32 %v6652_v62  ;;  %vm10024_vm3 = vmor %vm5219_vm9, %vm5220_vm11 }
0x10bc   :  { %6182 = vmatmul.msk.f32.vlgmr.msra.gmra.mxu3 %vm10247_vm6, %v5303_v20  ;;  %v9995_v41 = vadd.f32 1.0, %v6654_v50  ;;  %v6656_v49 = vpop.eup %6655  ;;  %v5218_v15 = vadd.f32 %v9913_v31, %v5217_v8  ;;  %vm5204_vm13 = vweird.f32 %v9911_v56  ;;  %v5225_v11 = vand.u32 2147483648, %v9864_v53  ;;  %vm10253_vm4 = vmmov %vm10250_vm2 }
0x10bd   :  { %v5304_v4 = vmul.f32 %v5292_v2, %v4994_v13  ;;  %v5233_v45 = vadd.f32 %v9933_v30, %v5232_v39  ;;  %v5201_v14 = vsub.f32 1.0, %v5200_v47  ;;  %v10011_v46 = vadd.f32 1.0, %v6656_v49  ;;  %vm5206_vm1 = vmor %vm5204_vm13, %vm5205_vm12 }
0x10be   :  { %6659 = vrcp.f32 %v9995_v41  ;;  %vm5239_vm14 = vcmp.eq.f32.partialorder %v5238_v21, 8.507059e+37  ;;  %v5211_v35 = vor.u32 1.1754944e-38, %v5210_v52  ;;  %v5293_v10 = vmul.f32 %v5182_v60, %v9742_v57 }
0x10bf   :  { %v5020_v48 = vpop.f32.mrf.mxu3  ;;  %5382 = vmatmul.f32.gmra.mxu1 %v5304_v4  ;;  %v5202_v5 = vmul.f32 %v6652_v62, %v5201_v14  ;;  %v5237_v43 = vsel %vm9999_vm8, %v9933_v30, %v5233_v45  ;;  %6661 = vrcp.f32 %v10011_v46  ;;  %v5222_v63 = vsel %vm10024_vm3, %v9913_v31, %v5218_v15 }
0x10c0   :  { %v5302_v9 = vmul.f32 %v9899_v22, %v5020_v48  ;;  %v5208_v22 = vand.u32 2147483647, %v9911_v56  ;;  %v6658_v23 = vpop.eup %6657  ;;  %v5242_v30 = vsel %vm5239_vm14, %v5241_v37, %v5237_v43  ;;  %v5226_v57 = vor.u32 1.1754944e-38, %v5225_v11 }
0x10c1   :  { %v5052_v28 = vpop.f32.mrf.mxu0  ;;  %v5203_v42 = vadd.f32 %v6652_v62, %v5202_v5  ;;  %v10015_v61 = vadd.f32 1.0, %v6658_v23  ;;  %v5297_v29 = vmul.f32 %v5242_v30, %v9804_v40  ;;  %vm5224_vm5 = vcmp.eq.f32.partialorder %v5223_v55, 8.507059e+37 }
0x10c2   :  { %v5306_v19 = vmul.f32 %v5294_v27, %v5052_v28  ;;  %5408 = vmatmul.f32.vlgmr.msra.gmra.mxu2 %v5302_v9  ;;  %vm5209_vm15 = vcmp.eq.f32.partialorder %v5208_v22, 8.507059e+37  ;;  %v5227_v25 = vsel %vm5224_vm5, %v5226_v57, %v5222_v63  ;;  %v5268_v59 = vand.u32 2147483647, %v9995_v41  ;;  %v5000_v30 = vpop.f32.mrf.mxu2  ;;  %vm10256_vm5 = vmmov %vm10253_vm4 }
0x10c3   :  { %v5207_v44 = vsel %vm5206_vm1, %v6652_v62, %v5203_v42  ;;  %6663 = vrcp.f32 %v10015_v61  ;;  %v5270_v31 = vand.u32 2147483648, %v9995_v41  ;;  %v5296_v13 = vmul.f32 %v5227_v25, %v9793_v3 }
0x10c4   :  { %6183 = vmatmul.msk.f32.gmra.mxu3 %vm10250_vm2, %v5306_v19  ;;  %v5212_v34 = vsel %vm5209_vm15, %v5211_v35, %v5207_v44  ;;  %v6660_v18 = vpop.eup %6659  ;;  %vm5264_vm6 = vweird.f32 %v9995_v41  ;;  %vm10044_vm7 = vcmp.eq.f32.partialorder %v5268_v59, 8.507059e+37  ;;  %v5285_v50 = vand.u32 2147483648, %v10011_v46 }
0x10c5   :  { %v5295_v58 = vmul.f32 %v5212_v34, %v9826_v17  ;;  %v5260_v62 = vmul.f32 %v6660_v18, %v9995_v41  ;;  %v6662_v17 = vpop.eup %6661  ;;  %vm5265_vm9 = vweird.f32 %v6660_v18  ;;  %v5271_v4 = vor.u32 1.1754944e-38, %v5270_v31 }
0x10c6   :  { %v5275_v0 = vmul.f32 %v6662_v17, %v10011_v46  ;;  %vm5266_vm8 = vmor %vm5264_vm6, %vm5265_vm9  ;;  %vm5280_vm12 = vweird.f32 %v6662_v17  ;;  %v5283_v14 = vand.u32 2147483647, %v10011_v46  ;;  %v5255_v9 = vand.u32 2147483648, %v10015_v61 }
0x10c7   :  { %v5023_v6 = vpop.f32.mrf.mxu3  ;;  %v5307_v20 = vmul.f32 %v5295_v58, %v4997_v7  ;;  %v5261_v39 = vsub.f32 1.0, %v5260_v62  ;;  %v5253_v52 = vand.u32 2147483647, %v10015_v61  ;;  %vm5279_vm13 = vweird.f32 %v10011_v46 }
0x10c8   :  { %v5305_v32 = vmul.f32 %v5293_v10, %v5023_v6  ;;  %v5276_v45 = vsub.f32 1.0, %v5275_v0  ;;  %vm5281_vm14 = vmor %vm5279_vm13, %vm5280_vm12  ;;  %v5286_v24 = vor.u32 1.1754944e-38, %v5285_v50  ;;  %vm5249_vm1 = vweird.f32 %v10015_v61  ;;  %v5462_v50 = vld [vmem:[%s10182_s13] sm:$0xff] }
0x10c9   :  { %v5055_v33 = vpop.f32.mrf.mxu0  ;;  %5385 = vmatmul.f32.gmra.mxu1 %v5307_v20  ;;  %v6664_v40 = vpop.eup %6663  ;;  %v5262_v53 = vmul.f32 %v6660_v18, %v5261_v39  ;;  %vm5284_vm15 = vcmp.eq.f32.partialorder %v5283_v14, 8.507059e+37  ;;  %v5256_v19 = vor.u32 1.1754944e-38, %v5255_v9  ;;  %vm5254_vm3 = vcmp.eq.f32.partialorder %v5253_v52, 8.507059e+37 }
0x10ca   :  { %v5309_v2 = vmul.f32 %v5297_v29, %v5055_v33  ;;  %5411 = vmatmul.f32.gmra.mxu2 %v5305_v32  ;;  %v5245_v55 = vmul.f32 %v6664_v40, %v10015_v61  ;;  %v5277_v8 = vmul.f32 %v6662_v17, %v5276_v45  ;;  %vm5250_vm11 = vweird.f32 %v6664_v40 }
0x10cb   :  { %v5263_v48 = vadd.f32 %v6660_v18, %v5262_v53  ;;  %vm5251_vm2 = vmor %vm5249_vm1, %vm5250_vm11  ;;  %v6687_v6 = vmov 16.0   ;;  %v6688_v53 = vmov 0  }
0x10cc   :  { %6184 = vmatmul.msk.f32.gmra.mxu3 %vm10253_vm4, %v5309_v2  ;;  %v5246_v27 = vsub.f32 1.0, %v5245_v55  ;;  %v5278_v28 = vadd.f32 %v6662_v17, %v5277_v8  ;;  %6665 = vrcp.f32 %v6687_v6  ;;  %6309 = vset.pattern.permute.xlu1 %v6688_v53 }
0x10cd   :  { %v5267_v60 = vsel %vm5266_vm8, %v6660_v18, %v5263_v48  ;;  %6310 = vset.pattern.permute.xlu0 %v6688_v53  ;;  %6308 = vset.pattern.permute.xlu2 %v6688_v53 }
0x10ce   :  { %v5247_v21 = vmul.f32 %v6664_v40, %v5246_v27  ;;  %v5272_v41 = vsel %vm10044_vm7, %v5271_v4, %v5267_v60  ;;  %v5282_v22 = vsel %vm5281_vm14, %v6662_v17, %v5278_v28 }
0x10cf   :  { %v5026_v1 = vpop.f32.mrf.mxu3  ;;  %v5299_v49 = vmul.f32 %v5272_v41, %v9889_v54  ;;  %v5287_v43 = vsel %vm5284_vm15, %v5286_v24, %v5282_v22 }
0x10d0   :  { %v5308_v3 = vmul.f32 %v5296_v13, %v5026_v1  ;;  %v5248_v5 = vadd.f32 %v6664_v40, %v5247_v21  ;;  %v5300_v15 = vmul.f32 %v5287_v43, %v9946_v16  ;;  %v5454_v43 = vld [vmem:[%s10183_s12] sm:$0xff] }
0x10d1   :  { %v5058_v23 = vpop.f32.mrf.mxu0 }
0x10d2   :  { %5414 = vmatmul.f32.gmra.mxu2 %v5308_v3  ;;  %v5252_v37 = vsel %vm5251_vm2, %v6664_v40, %v5248_v5  ;;  %v5312_v44 = vmul.f32 %v5300_v15, %v5058_v23  ;;  %v5465_v40 = vld [vmem:[%s10182_s13 + $0x18] sm:$0xff]  ;;  %vm5751_vm2 = vcmask 1041409  }
0x10d3   :  { %v5257_v42 = vsel %vm5254_vm3, %v5256_v19, %v5252_v37  ;;  %5487 = vperm.xlu1 %6309, %v5465_v40   ;;  %v5457_v40 = vld [vmem:[%s10183_s12 + $0x18] sm:$0xff] }
0x10d4   :  { %v5298_v11 = vmul.f32 %v5257_v42, %v9928_v36  ;;  %6185 = vmatmul.msk.f32.gmra.mxu3 %vm10256_vm5, %v5312_v44  ;;  %v6666_v36 = vpop.eup %6665  ;;  %v5668_v44 = vld [vmem:[%s10184_s14] sm:$0xff] }
0x10d5   :  { %v5594_v7 = vmul.f32 16.0, %v6666_v36  ;;  %vm5598_vm9 = vweird.f32 %v6666_v36 }
0x10d6   :  { %v5310_v61 = vmul.f32 %v5298_v11, %v5000_v30  ;;  %v5468_v11 = vld [vmem:[%s10182_s13 + $0x30] sm:$0xff] }
0x10d7   :  { %v5029_v46 = vpop.f32.mrf.mxu3  ;;  %v5595_v62 = vsub.f32 1.0, %v5594_v7  ;;  %5502 = vperm.xlu0 %6310, %v5468_v11  }
0x10d8   :  { %v5311_v35 = vmul.f32 %v5299_v49, %v5029_v46  ;;  %5388 = vmatmul.f32.gmra.mxu1 %v5310_v61 }
0x10d9   :  { %v5596_v13 = vmul.f32 %v6666_v36, %v5595_v62 }
0x10da   :  { %5417 = vmatmul.f32.gmra.mxu2 %v5311_v35 }
0x10db   :  { %v5597_v47 = vadd.f32 %v6666_v36, %v5596_v13  ;;  %5472 = vperm.xlu1 %6309, %v5462_v50  }
0x10dd   :  { %v10071_v9 = vsel %vm5598_vm9, %v6666_v36, %v5597_v47  ;;  %vm5754_vm9 = vcmask 779264  }
0x112c   :  { %v5380_v54 = vpop.f32.mrf.mxu1 }
0x113c   :  { %v5383_v16 = vpop.f32.mrf.mxu1 }
0x113f   :  { %v5438_v10 = vpop.f32.mrf.mxu3 }
0x1145   :  { %v5409_v56 = vpop.f32.mrf.mxu2 }
0x1146   :  { %v5410_v34 = vadd.f32 %v5409_v56, %v5380_v54  ;;  %v5386_v20 = vpop.f32.mrf.mxu1  ;;  %v5455_v54 = vld [vmem:[%s10183_s12 + $0x8] sm:$0xff] }
0x1147   :  { %v5441_v63 = vpop.f32.mrf.mxu3 }
0x1148   :  { %v5439_v58 = vadd.f32 %v5438_v10, %v5410_v34 }
0x114a   :  { %v5450_v32 = vadd.f32 %v5439_v58, %v9397_v12  ;;  %v5464_v58 = vld [vmem:[%s10182_s13 + $0x10] sm:$0xff] }
0x114b   :  { %5482 = vperm.xlu2 %6308, %v5464_v58  }
0x114c   :  { %v5575_v59 = vsel %vm75_vm0, %v5450_v32, 0.0 }
0x114d   :  { %v5412_v18 = vpop.f32.mrf.mxu2 }
0x114e   :  { %v5413_v57 = vadd.f32 %v5412_v18, %v5383_v16  ;;  %v5669_v16 = vld [vmem:[%s10184_s14 + $0x8] sm:$0xff] }
0x114f   :  { %v5444_v31 = vpop.f32.mrf.mxu3  ;;  %5677 = vperm.xlu0 %6310, %v5669_v16  }
0x1150   :  { %v5442_v29 = vadd.f32 %v5441_v63, %v5413_v57 }
0x1152   :  { %v5451_v33 = vadd.f32 %v5442_v29, %v9403_v51 }
0x1154   :  { %v5576_v25 = vsel %vm75_vm0, %v5451_v33, 0.0 }
0x1155   :  { %v5415_v2 = vpop.f32.mrf.mxu2  ;;  %v5577_v17 = vadd.f32 %v5576_v25, %v5575_v59  ;;  %v5389_v4 = vpop.f32.mrf.mxu1 }
0x1156   :  { %v5416_v0 = vadd.f32 %v5415_v2, %v5386_v20  ;;  %v5469_v2 = vld [vmem:[%s10182_s13 + $0x38] sm:$0xff] }
0x1157   :  { %v5578_v39 = vrot.slane %v5577_v17, 4  ;;  %v5447_v27 = vpop.f32.mrf.mxu3  ;;  %5507 = vperm.xlu2 %6308, %v5469_v2  }
0x1158   :  { %v5445_v55 = vadd.f32 %v5444_v31, %v5416_v0 }
0x1159   :  { %v5579_v12 = vadd.f32 %v5578_v39, %v5577_v17 }
0x115a   :  { %v5452_v14 = vadd.f32 %v5445_v55, %v9409_v38  ;;  %v5466_v38 = vld [vmem:[%s10182_s13 + $0x20] sm:$0xff] }
0x115b   :  { %v5580_v51 = vrot.slane %v5579_v12, 2  ;;  %5492 = vperm.xlu1 %6309, %v5466_v38  }
0x115c   :  { %v5584_v28 = vsel %vm75_vm0, %v5452_v14, 0.0 }
0x115d   :  { %v5418_v45 = vpop.f32.mrf.mxu2  ;;  %v5581_v1 = vadd.f32 %v5580_v51, %v5579_v12  ;;  %v5463_v12 = vld [vmem:[%s10182_s13 + $0x8] sm:$0xff]  ;;  %v21_v51 = vstv %s10185_s15 }
0x115e   :  { %v5419_v48 = vadd.f32 %v5418_v45, %v5389_v4  ;;  %22 = vst [vmem:[#allocation2] sm:$0x1] %v21_v51 }
0x115f   :  { %v5582_v3 = vrot.slane %v5581_v1, 1  ;;  %5477 = vperm.xlu2 %6308, %v5463_v12  }
0x1160   :  { %v5448_v8 = vadd.f32 %v5447_v27, %v5419_v48  ;;  %v5458_v48 = vld [vmem:[%s10183_s12 + $0x20] sm:$0xff]  ;;  %v5467_v27 = vld [vmem:[%s10182_s13 + $0x28] sm:$0xff] }
0x1161   :  { %v5583_v60 = vadd.f32 %v5582_v3, %v5581_v1 }
0x1162   :  { %v5453_v21 = vadd.f32 %v5448_v8, %v9415_v26 }
0x1163   :  { %v5600_v52 = vmul.f32 %v10071_v9, %v5583_v60  ;;  %5672 = vperm.xlu1 %6309, %v5668_v44  }
0x1164   :  { %v5585_v41 = vsel %vm75_vm0, %v5453_v21, 0.0  ;;  %5546 = vmatpush.msra.mxu0 %v5453_v21 }
0x1165   :  { %v5586_v24 = vadd.f32 %v5585_v41, %v5584_v28  ;;  %v10077_v5 = vsub.f32 %v5451_v33, %v5600_v52  ;;  %v10079_v22 = vsub.f32 %v5450_v32, %v5600_v52  ;;  %v6318_v41 = vld [vmem:[#allocation2] ss:$0 sm:$0xff] }
0x1166   :  { %5547 = vmatpush.msra.mxu0 %v5452_v14 }
0x1167   :  { %v5587_v19 = vrot.slane %v5586_v24, 4  ;;  %v5607_v26 = vmul.f32 %v10077_v5, %v10077_v5  ;;  %v5606_v49 = vmul.f32 %v10079_v22, %v10079_v22  ;;  %5497 = vperm.xlu2 %6308, %v5467_v27  }
0x1168   :  { %5548 = vmatpush.msra.mxu0 %v5451_v33  ;;  %v5456_v33 = vld [vmem:[%s10183_s12 + $0x10] sm:$0xff] }
0x1169   :  { %v5588_v37 = vadd.f32 %v5587_v19, %v5586_v24  ;;  %v5610_v23 = vsel %vm75_vm0, %v5606_v49, 0.0  ;;  %v5611_v15 = vsel %vm75_vm0, %v5607_v26, 0.0  ;;  %v5460_v26 = vld [vmem:[%s10183_s12 + $0x30] sm:$0xff] }
0x116a   :  { %5549 = vmatpush.msra.mxu0 %v5450_v32  ;;  %v5612_v42 = vadd.f32 %v5611_v15, %v5610_v23  ;;  %v5461_v23 = vld [vmem:[%s10183_s12 + $0x38] sm:$0xff]  ;;  %v5488_v15 = vpop.permute.xlu1 %5487 }
0x116b   :  { %v5589_v46 = vrot.slane %v5588_v37, 2  ;;  %6186 = vmatmul.msk.f32.vlgmr.msra.gmra.mxu0 %vm2076_vm10, %v5454_v43 }
0x116c   :  { %v5613_v35 = vrot.slane %v5612_v42, 4 }
0x116d   :  { %v5590_v30 = vadd.f32 %v5589_v46, %v5588_v37 }
0x116e   :  { %v5614_v61 = vadd.f32 %v5613_v35, %v5612_v42 }
0x116f   :  { %v5591_v10 = vrot.slane %v5590_v30, 1  ;;  %5706 = vperm.xlu2 %6308, %v6318_v41  }
0x1170   :  { %v5615_v56 = vrot.slane %v5614_v61, 2 }
0x1171   :  { %v5592_v34 = vadd.f32 %v5591_v10, %v5590_v30 }
0x1172   :  { %v5616_v6 = vadd.f32 %v5615_v56, %v5614_v61  ;;  %v5473_v35 = vpop.permute.xlu1 %5472  ;;  %v5503_v56 = vpop.permute.xlu0 %5502 }
0x1173   :  { %v5601_v63 = vmul.f32 %v10071_v9, %v5592_v34  ;;  %6187 = vmatmul.msk.f32.gmra.mxu0 %vm2076_vm10, %v5455_v54 }
0x1174   :  { %v5617_v18 = vrot.slane %v5616_v6, 1 }
0x1175   :  { %v10111_v57 = vsub.f32 %v5453_v21, %v5601_v63  ;;  %v10113_v36 = vsub.f32 %v5452_v14, %v5601_v63 }
0x1176   :  { %v5618_v29 = vadd.f32 %v5617_v18, %v5616_v6 }
0x1177   :  { %v5609_v7 = vmul.f32 %v10111_v57, %v10111_v57  ;;  %v5608_v32 = vmul.f32 %v10113_v36, %v10113_v36 }
0x1178   :  { %v5628_v20 = vmul.f32 %v5618_v29, %v10071_v9 }
0x1179   :  { %v5619_v62 = vsel %vm75_vm0, %v5608_v32, 0.0  ;;  %v5620_v25 = vsel %vm75_vm0, %v5609_v7, 0.0 }
0x117a   :  { %v5630_v59 = vadd.f32 1e-05, %v5628_v20  ;;  %v5621_v31 = vadd.f32 %v5620_v25, %v5619_v62 }
0x117b   :  { %6188 = vmatmul.msk.f32.gmra.mxu0 %vm2076_vm10, %v5456_v33 }
0x117c   :  { %6667 = vrsqrt.f32 %v5630_v59  ;;  %v5622_v17 = vrot.slane %v5621_v31, 4  ;;  %vm5638_vm6 = vweird.f32 %v5630_v59 }
0x117e   :  { %v5623_v39 = vadd.f32 %v5622_v17, %v5621_v31 }
0x1180   :  { %v5624_v0 = vrot.slane %v5623_v39, 2 }
0x1182   :  { %v6668_v13 = vpop.eup %6667  ;;  %v5625_v53 = vadd.f32 %v5624_v0, %v5623_v39 }
0x1183   :  { %6189 = vmatmul.msk.f32.gmra.mxu0 %vm2076_vm10, %v5457_v40  ;;  %v5633_v55 = vmul.f32 %v6668_v13, %v5630_v59  ;;  %vm5639_vm4 = vweird.f32 %v6668_v13 }
0x1184   :  { %v5626_v47 = vrot.slane %v5625_v53, 1  ;;  %vm5640_vm7 = vmor %vm5638_vm6, %vm5639_vm4  ;;  %vm5758_vm4 = vcmask 1024  }
0x1185   :  { %v5634_v4 = vmul.f32 %v6668_v13, %v5633_v55 }
0x1186   :  { %v5627_v45 = vadd.f32 %v5626_v47, %v5625_v53 }
0x1187   :  { %v5635_v1 = vmul.f32 0.5, %v5634_v4 }
0x1188   :  { %v5629_v50 = vmul.f32 %v5627_v45, %v10071_v9  ;;  %v5459_v9 = vld [vmem:[%s10183_s12 + $0x28] sm:$0xff] }
0x1189   :  { %v5636_v3 = vsub.f32 1.5, %v5635_v1 }
0x118a   :  { %v5631_v8 = vadd.f32 1e-05, %v5629_v50 }
0x118b   :  { %6190 = vmatmul.msk.f32.gmra.mxu0 %vm2076_vm10, %v5458_v48  ;;  %v5637_v14 = vmul.f32 %v6668_v13, %v5636_v3 }
0x118c   :  { %6669 = vrsqrt.f32 %v5631_v8  ;;  %vm5648_vm12 = vweird.f32 %v5631_v8 }
0x118d   :  { %v5641_v60 = vsel %vm5640_vm7, %v6668_v13, %v5637_v14 }
0x118e   :  { %v5652_v21 = vmul.f32 %v5641_v60, %v10079_v22  ;;  %v5653_v52 = vmul.f32 %v5641_v60, %v10077_v5 }
0x1192   :  { %v6670_v28 = vpop.eup %6669 }
0x1193   :  { %6191 = vmatmul.msk.f32.gmra.mxu0 %vm2076_vm10, %v5459_v9  ;;  %v5643_v24 = vmul.f32 %v6670_v28, %v5631_v8  ;;  %vm5649_vm8 = vweird.f32 %v6670_v28 }
0x1194   :  { %vm5650_vm11 = vmor %vm5648_vm12, %vm5649_vm8 }
0x1195   :  { %v5644_v38 = vmul.f32 %v6670_v28, %v5643_v24 }
0x1197   :  { %v5645_v19 = vmul.f32 0.5, %v5644_v38 }
0x1199   :  { %v5646_v49 = vsub.f32 1.5, %v5645_v19 }
0x119b   :  { %6192 = vmatmul.msk.f32.gmra.mxu0 %vm2076_vm10, %v5460_v26  ;;  %v5647_v5 = vmul.f32 %v6670_v28, %v5646_v49 }
0x119d   :  { %v5651_v22 = vsel %vm5650_vm11, %v6670_v28, %v5647_v5 }
0x119e   :  { %v5654_v43 = vmul.f32 %v5651_v22, %v10113_v36  ;;  %v5655_v37 = vmul.f32 %v5651_v22, %v10111_v57 }
0x11a3   :  { %6193 = vmatmul.msk.f32.gmra.mxu0 %vm2076_vm10, %v5461_v23 }
0x11a5   :  { %v5483_v46 = vpop.permute.xlu2 %5482 }
0x11b1   :  { %v5508_v44 = vpop.permute.xlu2 %5507 }
0x11b9   :  { %v5478_v58 = vpop.permute.xlu2 %5477 }
0x11c1   :  { %v5678_v32 = vpop.permute.xlu0 %5677  ;;  %v5498_v51 = vpop.permute.xlu2 %5497 }
0x11c9   :  { %v5707_v14 = vpop.permute.xlu2 %5706 }
0x11cd   :  { %v5493_v10 = vpop.permute.xlu1 %5492 }
0x11d5   :  { %v5673_v36 = vpop.permute.xlu1 %5672 }
0x11e8   :  { %v5551_v42 = vpop.f32.mrf.mxu0 }
0x11e9   :  { %v5552_v63 = vadd.f32 %v5551_v42, %v5473_v35 }
0x11f0   :  { %v5554_v11 = vpop.f32.mrf.mxu0 }
0x11f1   :  { %v5555_v7 = vadd.f32 %v5554_v11, %v5478_v58 }
0x11f8   :  { %v5557_v30 = vpop.f32.mrf.mxu0 }
0x11f9   :  { %v5558_v61 = vadd.f32 %v5557_v30, %v5483_v46 }
0x11fb   :  { %v5656_v54 = vadd.f32 1.0, %v5558_v61 }
0x11fd   :  { %v5660_v34 = vmul.f32 %v5656_v54, %v5652_v21 }
0x11ff   :  { %v5664_v18 = vadd.f32 %v5660_v34, %v5552_v63 }
0x1200   :  { %v5560_v6 = vpop.f32.mrf.mxu0 }
0x1201   :  { %v5561_v16 = vadd.f32 %v5560_v6, %v5488_v15  ;;  %v5680_v33 = vmul.f32 %v5673_v36, %v5664_v18 }
0x1203   :  { %v5657_v57 = vadd.f32 1.0, %v5561_v16  ;;  %v5684_v59 = vsel %vm75_vm0, %v5680_v33, 0.0 }
0x1205   :  { %v5661_v29 = vmul.f32 %v5657_v57, %v5653_v52 }
0x1207   :  { %v5665_v20 = vadd.f32 %v5661_v29, %v5555_v7 }
0x1208   :  { %v5563_v62 = vpop.f32.mrf.mxu0 }
0x1209   :  { %v5681_v25 = vmul.f32 %v5678_v32, %v5665_v20  ;;  %v5564_v1 = vadd.f32 %v5563_v62, %v5493_v10 }
0x120b   :  { %v5685_v31 = vsel %vm75_vm0, %v5681_v25, 0.0 }
0x120c   :  { %v5686_v2 = vadd.f32 %v5685_v31, %v5684_v59 }
0x120e   :  { %v5687_v17 = vrot.slane %v5686_v2, 4 }
0x1210   :  { %v5566_v39 = vpop.f32.mrf.mxu0  ;;  %v5688_v40 = vadd.f32 %v5687_v17, %v5686_v2 }
0x1211   :  { %v5567_v8 = vadd.f32 %v5566_v39, %v5498_v51 }
0x1212   :  { %v5689_v0 = vrot.slane %v5688_v40, 2 }
0x1214   :  { %v5690_v12 = vadd.f32 %v5689_v0, %v5688_v40 }
0x1216   :  { %v5691_v47 = vrot.slane %v5690_v12, 1 }
0x1218   :  { %v5569_v13 = vpop.f32.mrf.mxu0  ;;  %v5692_v50 = vadd.f32 %v5691_v47, %v5690_v12 }
0x1219   :  { %v5570_v53 = vadd.f32 %v5569_v13, %v5503_v56 }
0x121a   :  { %v5709_v21 = vadd.f32 %v5707_v14, %v5692_v50 }
0x121b   :  { %v5658_v55 = vadd.f32 1.0, %v5570_v53 }
0x121c   :  { %v6194_v28 = vmul.f32 -1.442695, %v5709_v21 }
0x121d   :  { %v5662_v4 = vmul.f32 %v5658_v55, %v5654_v43 }
0x121e   :  { %6671 = vpow2.f32 %v6194_v28 }
0x121f   :  { %v5666_v27 = vadd.f32 %v5662_v4, %v5564_v1 }
0x1220   :  { %v5572_v45 = vpop.f32.mrf.mxu0 }
0x1221   :  { %v5573_v48 = vadd.f32 %v5572_v45, %v5508_v44  ;;  %v5682_v52 = vmul.f32 %v5673_v36, %v5666_v27 }
0x1223   :  { %v5659_v3 = vadd.f32 1.0, %v5573_v48  ;;  %v5693_v24 = vsel %vm75_vm0, %v5682_v52, 0.0 }
0x1224   :  { %v6672_v22 = vpop.eup %6671 }
0x1225   :  { %v5663_v60 = vmul.f32 %v5659_v3, %v5655_v37  ;;  %v5717_v15 = vadd.f32 1.0, %v6672_v22 }
0x1227   :  { %v5667_v9 = vadd.f32 %v5663_v60, %v5567_v8  ;;  %6673 = vrcp.f32 %v5717_v15  ;;  %vm5724_vm10 = vweird.f32 %v5717_v15  ;;  %v5730_v63 = vand.u32 2147483648, %v5717_v15 }
0x1228   :  { %v5728_v58 = vand.u32 2147483647, %v5717_v15 }
0x1229   :  { %v5683_v41 = vmul.f32 %v5678_v32, %v5667_v9  ;;  %v5731_v7 = vor.u32 1.1754944e-38, %v5730_v63 }
0x122a   :  { %vm5729_vm3 = vcmp.eq.f32.partialorder %v5728_v58, 8.507059e+37 }
0x122b   :  { %v5694_v38 = vsel %vm75_vm0, %v5683_v41, 0.0 }
0x122c   :  { %v5695_v19 = vadd.f32 %v5694_v38, %v5693_v24 }
0x122d   :  { %v6674_v11 = vpop.eup %6673 }
0x122e   :  { %v5696_v26 = vrot.slane %v5695_v19, 4  ;;  %v5720_v30 = vmul.f32 %v6674_v11, %v5717_v15  ;;  %vm5725_vm0 = vweird.f32 %v6674_v11 }
0x122f   :  { %vm5726_vm14 = vmor %vm5724_vm10, %vm5725_vm0 }
0x1230   :  { %v5697_v49 = vadd.f32 %v5696_v26, %v5695_v19  ;;  %v5721_v61 = vsub.f32 1.0, %v5720_v30 }
0x1232   :  { %v5698_v5 = vrot.slane %v5697_v49, 2  ;;  %v5722_v10 = vmul.f32 %v6674_v11, %v5721_v61 }
0x1234   :  { %v5699_v43 = vadd.f32 %v5698_v5, %v5697_v49  ;;  %v5723_v34 = vadd.f32 %v6674_v11, %v5722_v10 }
0x1236   :  { %v5700_v23 = vrot.slane %v5699_v43, 1  ;;  %v5727_v36 = vsel %vm5726_vm14, %v6674_v11, %v5723_v34 }
0x1237   :  { %v5732_v20 = vsel %vm5729_vm3, %v5731_v7, %v5727_v36 }
0x1238   :  { %v5701_v42 = vadd.f32 %v5700_v23, %v5699_v43 }
0x123a   :  { %v5710_v37 = vadd.f32 %v5707_v14, %v5701_v42 }
0x123c   :  { %v6195_v46 = vmul.f32 -1.442695, %v5710_v37 }
0x123e   :  { %6675 = vpow2.f32 %v6195_v46 }
0x1244   :  { %v6676_v35 = vpop.eup %6675 }
0x1245   :  { %v5718_v44 = vadd.f32 1.0, %v6676_v35 }
0x1247   :  { %6677 = vrcp.f32 %v5718_v44  ;;  %v5745_v16 = vand.u32 2147483648, %v5718_v44  ;;  %v5743_v57 = vand.u32 2147483647, %v5718_v44  ;;  %vm5739_vm1 = vweird.f32 %v5718_v44 }
0x1249   :  { %v5746_v32 = vor.u32 1.1754944e-38, %v5745_v16  ;;  %vm5744_vm5 = vcmp.eq.f32.partialorder %v5743_v57, 8.507059e+37 }
0x124d   :  { %v6678_v54 = vpop.eup %6677 }
0x124e   :  { %v5735_v56 = vmul.f32 %v6678_v54, %v5718_v44  ;;  %vm5740_vm13 = vweird.f32 %v6678_v54 }
0x124f   :  { %vm5741_vm15 = vmor %vm5739_vm1, %vm5740_vm13 }
0x1250   :  { %v5736_v6 = vsub.f32 1.0, %v5735_v56 }
0x1252   :  { %v5737_v18 = vmul.f32 %v6678_v54, %v5736_v6 }
0x1254   :  { %v5738_v29 = vadd.f32 %v6678_v54, %v5737_v18 }
0x1256   :  { %v5742_v33 = vsel %vm5741_vm15, %v6678_v54, %v5738_v29 }
0x1257   :  { %v5747_v62 = vsel %vm5744_vm5, %v5746_v32, %v5742_v33 }
0x1258   :  { %v5752_v25 = vsel %vm5751_vm2, %v5747_v62, %v5732_v20 }
0x1259   :  { %v5755_v59 = vsel %vm5754_vm9, %v5752_v25, -inf }
0x125a   :  { %5756 = vmax.xlane.f32.xlu1 %v5755_v59 }
0x12cd   :  { %v5757_v31 = vpop.xlane.xlu1 %5756 }
0x12ce   :  { %5759 = vst.msk [vmem:[%s10186_s16] sm:$0x3] %vm5758_vm4, %v5757_v31 }

</bundles_post_ra>
